<compile_context>
chip_gen: v5e
topology: v5e:2x2
jax: 0.10.0
libtpu: 0.0.40
codegen_flags: <defaults>
</compile_context>

<pallas_src>
import functools

import jax
import jax.numpy as jnp
from jax import lax
from jax.experimental import pallas as pl
from jax.experimental.pallas import tpu as pltpu

EPS = 1e-5
LANE = 128                       # channel dims padded to the TPU lane width
MXU_DTYPE = jnp.bfloat16         # matmul-input dtype (f32 accumulation)
VMEM_BUDGET = 40 * 1024 * 1024   # per-tile working-set target (v7x-safe)
VMEM_LIMIT = 48 * 1024 * 1024
# TODO(synk): raise VMEM_BUDGET/VMEM_LIMIT toward ~100 MiB (bigger batch tiles)
# when targeting v5e/v6e only; keep <= ~48 MiB for v7x's 64 MiB VMEM.


def _round_up(n, m):
    return (n + m - 1) // m * m


# ----------------------------- in-kernel helpers -----------------------------
def _silu(y):
    return y * jax.nn.sigmoid(y)


def _conv3x3(y4, w_ref, b_row):
    """'Same' 3x3 conv as 3 dy-grouped MXU matmuls with K = 3*C contraction.

    y4:    (TB, H, W, C) float32 activation (BN + SiLU already applied).
    w_ref: (3, 3*C, Co) weight ref in the MXU dtype; row index = dx*C + cin.
    b_row: (1, Co) float32 bias.
    Returns (TB*H*W, Co) float32.
    """
    TB, H, W, C = y4.shape
    Co = w_ref.shape[-1]
    M = TB * H * W
    mdt = w_ref.dtype

    # dx-im2col slab built ONCE per conv (2 shifted copies + lane-aligned
    # channel concat) instead of 9 sublane-misaligned patch slices.
    zcol = jnp.zeros((TB, H, 1, C), jnp.float32)
    left = jnp.concatenate([zcol, y4[:, :, : W - 1, :]], axis=2)    # y[.., w-1, :]
    right = jnp.concatenate([y4[:, :, 1:, :], zcol], axis=2)        # y[.., w+1, :]
    slab = jnp.concatenate([left, y4, right], axis=3).astype(mdt)   # (TB,H,W,3C)

    # Zero rows for the dy = -1 / +1 taps.  H is an outer (non-vreg) dim, so
    # the three H-slices below are plane-aligned: no sublane retiling.
    zrow = jnp.zeros((TB, 1, W, 3 * C), mdt)
    slab = jnp.concatenate([zrow, slab, zrow], axis=1)               # (TB,H+2,W,3C)

    acc = jnp.zeros((M, Co), jnp.float32)
    for dy in range(3):                                              # K = 3*C per dot
        patch = slab[:, dy:dy + H].reshape(M, 3 * C)
        acc = acc + jnp.dot(patch, w_ref[dy], preferred_element_type=jnp.float32)
    return acc + b_row


def _colsums(h2d):
    """Per-channel (sum, sumsq) of an (M, C) f32 slab -> (2, C) f32."""
    s = jnp.sum(h2d, axis=0, keepdims=True)
    s2 = jnp.sum(h2d * h2d, axis=0, keepdims=True)
    return jnp.concatenate([s, s2], axis=0)


# --------------------------------- kernels -----------------------------------
def _stats_kernel(x_ref, p_ref):
    TB, H, W, C = x_ref.shape
    x2 = x_ref[...].reshape(TB * H * W, C)
    p_ref[...] = _colsums(x2).reshape(1, 2, C)


def _conv1_kernel(x_ref, s1_ref, t1_ref, w1_ref, b1_ref, h1_ref, p_ref):
    TB, H, W, Ci = x_ref.shape
    Co = h1_ref.shape[-1]
    M = TB * H * W
    # BN1 (precomputed full-batch scale/shift) + SiLU, all in f32.
    y1 = _silu(x_ref[...].reshape(M, Ci) * s1_ref[...] + t1_ref[...])
    h1 = _conv3x3(y1.reshape(TB, H, W, Ci), w1_ref, b1_ref[...])     # (M, Co) f32
    h1_ref[...] = h1.reshape(TB, H, W, Co)
    p_ref[...] = _colsums(h1).reshape(1, 2, Co)                      # BN2 partials


def _conv2_res_kernel(h1_ref, x_ref, s2_ref, t2_ref, w2_ref, b2_ref,
                      wr_ref, br_ref, o_ref):
    TB, H, W, Ci = x_ref.shape
    Co = o_ref.shape[-1]
    M = TB * H * W
    # 1x1 residual conv FIRST: ends x's live range before conv2's working set.
    r = jnp.dot(x_ref[...].reshape(M, Ci).astype(wr_ref.dtype), wr_ref[...],
                preferred_element_type=jnp.float32) + br_ref[...]
    y2 = _silu(h1_ref[...].reshape(M, Co) * s2_ref[...] + t2_ref[...])  # f32
    # zero_module(Conv3x3): weights/bias are zero at init; kept & executed.
    h2 = _conv3x3(y2.reshape(TB, H, W, Co), w2_ref, b2_ref[...])        # (M, Co)
    o_ref[...] = (h2 + r).reshape(TB, H, W, Co).astype(o_ref.dtype)


# --------------------------------- wrapper ------------------------------------
def _const_spec(shape):
    zeros = (0,) * len(shape)
    return pl.BlockSpec(shape, lambda i: zeros)


def _batch_tile_spec(tb, shape):
    trail = (0,) * (len(shape) - 1)
    return pl.BlockSpec((tb,) + tuple(shape[1:]), lambda i: (i,) + trail)


def _bn_scale_shift(totals, count, gamma, beta):
    # totals: (2, C) f32 [sum, sumsq] over the FULL batch (exact BN semantics
    # even though the apply passes are tiled).
    mean = totals[0] / count
    var = totals[1] / count - mean * mean        # biased var, single pass in f32
    # TODO(synk): use a shifted / two-pass variance if activation magnitudes
    # ever get large enough for E[x^2] - mean^2 cancellation to matter.
    scale = gamma * lax.rsqrt(var + EPS)
    shift = beta - mean * scale
    return scale.reshape(1, -1), shift.reshape(1, -1)


def resblock_forward(x_nchw, params, *, block_batch=None, matmul_dtype=MXU_DTYPE):
    """ResBlock forward: (N, C_in, H, W) f32 -> (N, C_out, H, W) f32."""
    N, Cin, H, W = x_nchw.shape
    Cout = params["w1"].shape[0]
    Cp, Co = _round_up(Cin, LANE), _round_up(Cout, LANE)
    M = N * H * W

    # TODO(synk): keep activations NHWC in the surrounding model to avoid the
    # boundary transposes on every call.
    x = jnp.transpose(x_nchw, (0, 2, 3, 1)).astype(jnp.float32)
    x = jnp.pad(x, ((0, 0), (0, 0), (0, 0), (0, Cp - Cin)))          # lane-dense C

    # ---- parameters: pad channels to lane multiples, reorder conv weights ----
    def pad_vec(v, c):
        return jnp.pad(v.astype(jnp.float32), (0, c - v.shape[0]))

    def pack3x3(w, ci, cp, co, cpo):
        wt = jnp.transpose(w, (2, 3, 1, 0))                           # (3,3,ci,co)
        wt = jnp.pad(wt, ((0, 0), (0, 0), (0, cp - ci), (0, cpo - co)))
        return wt.reshape(3, 3 * cp, cpo).astype(matmul_dtype)        # row = dx*cp+cin

    w1 = pack3x3(params["w1"], Cin, Cp, Cout, Co)
    w2 = pack3x3(params["w2"], Cout, Co, Cout, Co)
    wr = jnp.pad(jnp.transpose(params["wr"][:, :, 0, 0], (1, 0)),
                 ((0, Cp - Cin), (0, Co - Cout))).astype(matmul_dtype)
    b1 = pad_vec(params["b1"], Co).reshape(1, Co)
    b2 = pad_vec(params["b2"], Co).reshape(1, Co)
    br = pad_vec(params["br"], Co).reshape(1, Co)
    g1, be1 = pad_vec(params["bn1_g"], Cp), pad_vec(params["bn1_b"], Cp)
    g2, be2 = pad_vec(params["bn2_g"], Co), pad_vec(params["bn2_b"], Co)

    # ---- batch tiling (the flattened b*num_tok axis is the large one) ----
    if block_batch is None:
        per_image = H * W * (Cp + Co) * 4 * 8    # rough tile footprint incl. slabs
        block_batch = max(1, min(N, VMEM_BUDGET // max(per_image, 1)))
        while N % block_batch:
            block_batch -= 1
    assert N % block_batch == 0, "block_batch must divide N"
    # TODO(synk): support a ragged last batch tile (masked stats) if needed.
    TB = block_batch
    G = N // TB
    f32 = jnp.float32
    cparams = pltpu.CompilerParams(
        dimension_semantics=("parallel",),       # shard tiles across v7x's 2 TCs
        vmem_limit_bytes=VMEM_LIMIT,
    )

    # ---------------- pass 1: BN1 batch statistics over x ----------------
    p1 = pl.pallas_call(
        _stats_kernel,
        out_shape=jax.ShapeDtypeStruct((G, 2, Cp), f32),
        grid=(G,),
        in_specs=[_batch_tile_spec(TB, x.shape)],
        out_specs=_batch_tile_spec(1, (G, 2, Cp)),
        compiler_params=cparams,
        cost_estimate=pl.CostEstimate(
            flops=3 * M * Cp, transcendentals=0,
            bytes_accessed=4 * (M * Cp + G * 2 * Cp)),
    )(x)
    s1, t1 = _bn_scale_shift(p1.sum(axis=0), float(M), g1, be1)

    # ------ pass 2: BN1+SiLU -> conv1 (MXU) -> h1 + BN2 partial stats ------
    h1, p2 = pl.pallas_call(
        _conv1_kernel,
        out_shape=(jax.ShapeDtypeStruct((N, H, W, Co), f32),
                   jax.ShapeDtypeStruct((G, 2, Co), f32)),
        grid=(G,),
        in_specs=[_batch_tile_spec(TB, x.shape),
                  _const_spec(s1.shape), _const_spec(t1.shape),
                  _const_spec(w1.shape), _const_spec(b1.shape)],
        out_specs=(_batch_tile_spec(TB, (N, H, W, Co)),
                   _batch_tile_spec(1, (G, 2, Co))),
        compiler_params=cparams,
        cost_estimate=pl.CostEstimate(
            flops=2 * M * 9 * Cp * Co, transcendentals=M * Cp,
            bytes_accessed=4 * (M * Cp + M * Co) + 2 * 9 * Cp * Co),
    )(x, s1, t1, w1, b1)
    s2, t2 = _bn_scale_shift(p2.sum(axis=0), float(M), g2, be2)

    # ---- pass 3: BN2+SiLU -> conv2 (MXU, zero-init weights) + 1x1 residual ----
    out = pl.pallas_call(
        _conv2_res_kernel,
        out_shape=jax.ShapeDtypeStruct((N, H, W, Co), f32),
        grid=(G,),
        in_specs=[_batch_tile_spec(TB, (N, H, W, Co)),
                  _batch_tile_spec(TB, x.shape),
                  _const_spec(s2.shape), _const_spec(t2.shape),
                  _const_spec(w2.shape), _const_spec(b2.shape),
                  _const_spec(wr.shape), _const_spec(br.shape)],
        out_specs=_batch_tile_spec(TB, (N, H, W, Co)),
        compiler_params=cparams,
        cost_estimate=pl.CostEstimate(
            flops=2 * M * (9 * Co * Co + Cp * Co), transcendentals=M * Co,
            bytes_accessed=4 * (2 * M * Co + M * Cp) + 2 * (9 * Co * Co + Cp * Co)),
    )(h1, x, s2, t2, w2, b2, wr, br)

    out = out[..., :Cout]                         # drop lane padding
    return jnp.transpose(out, (0, 3, 1, 2))       # back to NCHW


# -------------------------- plain-JAX reference -------------------------------
def ref_forward(x, params, matmul_dtype=jnp.float32):
    """NCHW reference.  matmul_dtype mirrors the kernel's MXU-input precision
    (conv/residual inputs cast, f32 accumulation) so comparisons are exact."""
    def bn_silu(h, g, b):
        mean = jnp.mean(h, axis=(0, 2, 3), keepdims=True)
        var = jnp.mean(h * h, axis=(0, 2, 3), keepdims=True) - mean * mean
        scale = g.reshape(1, -1, 1, 1) * lax.rsqrt(var + EPS)
        shift = b.reshape(1, -1, 1, 1) - mean * scale
        y = h * scale + shift
        return y * jax.nn.sigmoid(y)

    def conv(h, w, b, pad):
        y = lax.conv_general_dilated(
            h.astype(matmul_dtype), w.astype(matmul_dtype), (1, 1),
            [(pad, pad), (pad, pad)],
            dimension_numbers=("NCHW", "OIHW", "NCHW"),
            preferred_element_type=jnp.float32)
        return y + b.reshape(1, -1, 1, 1)

    h = bn_silu(x, params["bn1_g"], params["bn1_b"])
    h = conv(h, params["w1"], params["b1"], 1)
    h = bn_silu(h, params["bn2_g"], params["bn2_b"])
    h = conv(h, params["w2"], params["b2"], 1)
    return h + conv(x, params["wr"], params["br"], 0)


if __name__ == "__main__":
    N, Cin, Cout, H, W = 2, 4, 8, 16, 16
    key = jax.random.PRNGKey(0)
    ks = jax.random.split(key, 11)

    x = jax.random.normal(ks[0], (N, Cin, H, W), jnp.float32)

    # Faithful init: zero_module zeroes the last conv's weight and bias.
    params = dict(
        bn1_g=1.0 + 0.1 * jax.random.normal(ks[1], (Cin,), jnp.float32),
        bn1_b=0.1 * jax.random.normal(ks[2], (Cin,), jnp.float32),
        w1=0.1 * jax.random.normal(ks[3], (Cout, Cin, 3, 3), jnp.float32),
        b1=0.1 * jax.random.normal(ks[4], (Cout,), jnp.float32),
        bn2_g=1.0 + 0.1 * jax.random.normal(ks[5], (Cout,), jnp.float32),
        bn2_b=0.1 * jax.random.normal(ks[6], (Cout,), jnp.float32),
        w2=jnp.zeros((Cout, Cout, 3, 3), jnp.float32),
        b2=jnp.zeros((Cout,), jnp.float32),
        wr=0.1 * jax.random.normal(ks[7], (Cout, Cin, 1, 1), jnp.float32),
        br=0.1 * jax.random.normal(ks[8], (Cout,), jnp.float32),
    )
    # Same block with a trained (non-zero) second conv, to exercise every path.
    params_t = dict(
        params,
        w2=0.1 * jax.random.normal(ks[9], (Cout, Cout, 3, 3), jnp.float32),
        b2=0.1 * jax.random.normal(ks[10], (Cout,), jnp.float32))

    fwd_bf16 = jax.jit(functools.partial(resblock_forward, block_batch=1,
                                         matmul_dtype=jnp.bfloat16))
    fwd_f32 = jax.jit(functools.partial(resblock_forward, block_batch=1,
                                        matmul_dtype=jnp.float32))

    checks = [
        (fwd_bf16(x, params),   ref_forward(x, params,   jnp.bfloat16), 5e-3),
        (fwd_bf16(x, params_t), ref_forward(x, params_t, jnp.bfloat16), 5e-3),
        (fwd_f32(x, params_t),  ref_forward(x, params_t, jnp.float32),  1e-4),
    ]
    for out, ref, tol in checks:
        out = jax.block_until_ready(out)
        assert out.shape == (N, Cout, H, W), out.shape
        err = float(jnp.max(jnp.abs(out - ref)))
        assert bool(jnp.allclose(out, ref, atol=tol, rtol=tol)), err
    print("KERNEL_OK")
</pallas_src>

<mosaic_0001>
module attributes {stable_mosaic.version = 11 : i64} {
  func.func @_stats_kernel(%arg0: i32, %arg1: memref<1x16x16x128xf32, #tpu.memory_space<vmem>>, %arg2: memref<1x2x128xf32, #tpu.memory_space<vmem>>) attributes {dimension_semantics = [#tpu.dimension_semantics<parallel>], iteration_bounds = array<i64: 2>, scalar_prefetch = 0 : i64, scratch_operands = 0 : i64, tpu.core_type = #tpu.core_type<tc>, window_params = [{transform_indices = @transform_0, window_bounds = array<i64: 1, 16, 16, 128>}, {transform_indices = @transform_1, window_bounds = array<i64: 1, 2, 128>}]} {
    %c0 = arith.constant 0 : index
    %c0_0 = arith.constant 0 : index
    %c0_1 = arith.constant 0 : index
    %c0_2 = arith.constant 0 : index
    %0 = vector.load %arg1[%c0, %c0_0, %c0_1, %c0_2] : memref<1x16x16x128xf32, #tpu.memory_space<vmem>>, vector<1x16x16x128xf32>
    %1 = vector.shape_cast %0 : vector<1x16x16x128xf32> to vector<256x128xf32>
    %cst = arith.constant dense<0.000000e+00> : vector<128xf32>
    %2 = vector.multi_reduction <add>, %1, %cst [0] : vector<256x128xf32> to vector<128xf32>
    %3 = vector.shape_cast %2 : vector<128xf32> to vector<1x128xf32>
    %4 = arith.mulf %1, %1 : vector<256x128xf32>
    %cst_3 = arith.constant dense<0.000000e+00> : vector<128xf32>
    %5 = vector.multi_reduction <add>, %4, %cst_3 [0] : vector<256x128xf32> to vector<128xf32>
    %6 = vector.shape_cast %5 : vector<128xf32> to vector<1x128xf32>
    %7 = tpu.concatenate %3, %6 in 0 : vector<1x128xf32>, vector<1x128xf32> -> vector<2x128xf32>
    %8 = vector.shape_cast %7 : vector<2x128xf32> to vector<1x2x128xf32>
    %c0_4 = arith.constant 0 : index
    %c0_5 = arith.constant 0 : index
    %c0_6 = arith.constant 0 : index
    %9 = vector.load %arg2[%c0_4, %c0_5, %c0_6] : memref<1x2x128xf32, #tpu.memory_space<vmem>>, vector<1x2x128xf32>
    tpu.vector_store %arg2[%c0_4, %c0_5, %c0_6], %8 {strides = array<i32>} : memref<1x2x128xf32, #tpu.memory_space<vmem>>, vector<1x2x128xf32>,
    return
  }
  func.func @transform_0(%arg0: i32) -> (i32, i32, i32, i32) {
    %c0_i32 = arith.constant 0 : i32
    %c0_i32_0 = arith.constant 0 : i32
    %c0_i32_1 = arith.constant 0 : i32
    %c0_i32_2 = arith.constant 0 : i32
    return %arg0, %c0_i32, %c0_i32_0, %c0_i32_1 : i32, i32, i32, i32
  }
  func.func @transform_1(%arg0: i32) -> (i32, i32, i32) {
    %c0_i32 = arith.constant 0 : i32
    %c0_i32_0 = arith.constant 0 : i32
    %c0_i32_1 = arith.constant 0 : i32
    return %arg0, %c0_i32, %c0_i32_0 : i32, i32, i32
  }
}

module attributes {stable_mosaic.version = 11 : i64} {
  func.func @_conv1_kernel(%arg0: i32, %arg1: memref<1x16x16x128xf32, #tpu.memory_space<vmem>>, %arg2: memref<1x128xf32, #tpu.memory_space<vmem>>, %arg3: memref<1x128xf32, #tpu.memory_space<vmem>>, %arg4: memref<3x384x128xbf16, #tpu.memory_space<vmem>>, %arg5: memref<1x128xf32, #tpu.memory_space<vmem>>, %arg6: memref<1x16x16x128xf32, #tpu.memory_space<vmem>>, %arg7: memref<1x2x128xf32, #tpu.memory_space<vmem>>) attributes {dimension_semantics = [#tpu.dimension_semantics<parallel>], iteration_bounds = array<i64: 2>, scalar_prefetch = 0 : i64, scratch_operands = 0 : i64, tpu.core_type = #tpu.core_type<tc>, window_params = [{transform_indices = @transform_0, window_bounds = array<i64: 1, 16, 16, 128>}, {pipeline_mode = #tpu.pipeline_mode<synchronous>, transform_indices = @transform_1, window_bounds = array<i64: 1, 128>}, {pipeline_mode = #tpu.pipeline_mode<synchronous>, transform_indices = @transform_2, window_bounds = array<i64: 1, 128>}, {pipeline_mode = #tpu.pipeline_mode<synchronous>, transform_indices = @transform_3, window_bounds = array<i64: 3, 384, 128>}, {pipeline_mode = #tpu.pipeline_mode<synchronous>, transform_indices = @transform_4, window_bounds = array<i64: 1, 128>}, {transform_indices = @transform_5, window_bounds = array<i64: 1, 16, 16, 128>}, {transform_indices = @transform_6, window_bounds = array<i64: 1, 2, 128>}]} {
    %c0 = arith.constant 0 : index
    %c0_0 = arith.constant 0 : index
    %c0_1 = arith.constant 0 : index
    %c0_2 = arith.constant 0 : index
    %0 = vector.load %arg1[%c0, %c0_0, %c0_1, %c0_2] : memref<1x16x16x128xf32, #tpu.memory_space<vmem>>, vector<1x16x16x128xf32>
    %1 = vector.shape_cast %0 : vector<1x16x16x128xf32> to vector<256x128xf32>
    %c0_3 = arith.constant 0 : index
    %c0_4 = arith.constant 0 : index
    %2 = vector.load %arg2[%c0_3, %c0_4] : memref<1x128xf32, #tpu.memory_space<vmem>>, vector<1x128xf32>
    %3 = vector.broadcast %2 : vector<1x128xf32> to vector<256x128xf32>
    %4 = arith.mulf %1, %3 : vector<256x128xf32>
    %c0_5 = arith.constant 0 : index
    %c0_6 = arith.constant 0 : index
    %5 = vector.load %arg3[%c0_5, %c0_6] : memref<1x128xf32, #tpu.memory_space<vmem>>, vector<1x128xf32>
    %6 = vector.broadcast %5 : vector<1x128xf32> to vector<256x128xf32>
    %7 = arith.addf %4, %6 : vector<256x128xf32>
    %8 = arith.negf %7 : vector<256x128xf32>
    %9 = math.exp %8 : vector<256x128xf32>
    %cst = arith.constant 1.000000e+00 : f32
    %10 = vector.broadcast %cst : f32 to vector<256x128xf32>
    %11 = arith.addf %10, %9 : vector<256x128xf32>
    %12 = arith.divf %10, %11 : vector<256x128xf32>
    %13 = arith.mulf %7, %12 : vector<256x128xf32>
    %14 = vector.shape_cast %13 : vector<256x128xf32> to vector<1x16x16x128xf32>
    %c0_7 = arith.constant 0 : index
    %c0_8 = arith.constant 0 : index
    %15 = vector.load %arg5[%c0_7, %c0_8] : memref<1x128xf32, #tpu.memory_space<vmem>>, vector<1x128xf32>
    %cst_9 = arith.constant 0.000000e+00 : f32
    %16 = vector.broadcast %cst_9 : f32 to vector<1x16x1x128xf32>
    %17 = vector.extract_strided_slice %14 {offsets = [0, 0, 0, 0], sizes = [1, 16, 15, 128], strides = [1, 1, 1, 1]} : vector<1x16x16x128xf32> to vector<1x16x15x128xf32>
    %18 = tpu.concatenate %16, %17 in 2 : vector<1x16x1x128xf32>, vector<1x16x15x128xf32> -> vector<1x16x16x128xf32>
    %19 = vector.extract_strided_slice %14 {offsets = [0, 0, 1, 0], sizes = [1, 16, 15, 128], strides = [1, 1, 1, 1]} : vector<1x16x16x128xf32> to vector<1x16x15x128xf32>
    %20 = tpu.concatenate %19, %16 in 2 : vector<1x16x15x128xf32>, vector<1x16x1x128xf32> -> vector<1x16x16x128xf32>
    %21 = tpu.concatenate %18, %14, %20 in 3 : vector<1x16x16x128xf32>, vector<1x16x16x128xf32>, vector<1x16x16x128xf32> -> vector<1x16x16x384xf32>
    %22 = arith.truncf %21 : vector<1x16x16x384xf32> to vector<1x16x16x384xbf16>
    %cst_10 = arith.constant 0.000000e+00 : bf16
    %23 = vector.broadcast %cst_10 : bf16 to vector<1x1x16x384xbf16>
    %24 = tpu.concatenate %23, %22, %23 in 1 : vector<1x1x16x384xbf16>, vector<1x16x16x384xbf16>, vector<1x1x16x384xbf16> -> vector<1x18x16x384xbf16>
    %cst_11 = arith.constant 0.000000e+00 : f32
    %25 = vector.broadcast %cst_11 : f32 to vector<256x128xf32>
    %26 = vector.extract_strided_slice %24 {offsets = [0, 0, 0, 0], sizes = [1, 16, 16, 384], strides = [1, 1, 1, 1]} : vector<1x18x16x384xbf16> to vector<1x16x16x384xbf16>
    %27 = vector.shape_cast %26 : vector<1x16x16x384xbf16> to vector<256x384xbf16>
    %c0_12 = arith.constant 0 : index
    %c0_13 = arith.constant 0 : index
    %c0_14 = arith.constant 0 : index
    %28 = vector.load %arg4[%c0_12, %c0_13, %c0_14] : memref<3x384x128xbf16, #tpu.memory_space<vmem>>, vector<1x384x128xbf16>
    %29 = vector.shape_cast %28 : vector<1x384x128xbf16> to vector<384x128xbf16>
    %cst_15 = arith.constant dense<0.000000e+00> : vector<256x128xf32>
    %30 = tpu.matmul %27, %29, %cst_15 {dimension_numbers = #tpu.dot_dimension_numbers<[1], [0], [0], [1], [0, 0, 1, 1], [], []>} : vector<256x384xbf16>, vector<384x128xbf16>, vector<256x128xf32> -> vector<256x128xf32>
    %31 = arith.addf %25, %30 : vector<256x128xf32>
    %32 = vector.extract_strided_slice %24 {offsets = [0, 1, 0, 0], sizes = [1, 16, 16, 384], strides = [1, 1, 1, 1]} : vector<1x18x16x384xbf16> to vector<1x16x16x384xbf16>
    %33 = vector.shape_cast %32 : vector<1x16x16x384xbf16> to vector<256x384xbf16>
    %c1 = arith.constant 1 : index
    %c0_16 = arith.constant 0 : index
    %c0_17 = arith.constant 0 : index
    %34 = vector.load %arg4[%c1, %c0_16, %c0_17] : memref<3x384x128xbf16, #tpu.memory_space<vmem>>, vector<1x384x128xbf16>
    %35 = vector.shape_cast %34 : vector<1x384x128xbf16> to vector<384x128xbf16>
    %cst_18 = arith.constant dense<0.000000e+00> : vector<256x128xf32>
    %36 = tpu.matmul %33, %35, %cst_18 {dimension_numbers = #tpu.dot_dimension_numbers<[1], [0], [0], [1], [0, 0, 1, 1], [], []>} : vector<256x384xbf16>, vector<384x128xbf16>, vector<256x128xf32> -> vector<256x128xf32>
    %37 = arith.addf %31, %36 : vector<256x128xf32>
    %38 = vector.extract_strided_slice %24 {offsets = [0, 2, 0, 0], sizes = [1, 16, 16, 384], strides = [1, 1, 1, 1]} : vector<1x18x16x384xbf16> to vector<1x16x16x384xbf16>
    %39 = vector.shape_cast %38 : vector<1x16x16x384xbf16> to vector<256x384xbf16>
    %c2 = arith.constant 2 : index
    %c0_19 = arith.constant 0 : index
    %c0_20 = arith.constant 0 : index
    %40 = vector.load %arg4[%c2, %c0_19, %c0_20] : memref<3x384x128xbf16, #tpu.memory_space<vmem>>, vector<1x384x128xbf16>
    %41 = vector.shape_cast %40 : vector<1x384x128xbf16> to vector<384x128xbf16>
    %cst_21 = arith.constant dense<0.000000e+00> : vector<256x128xf32>
    %42 = tpu.matmul %39, %41, %cst_21 {dimension_numbers = #tpu.dot_dimension_numbers<[1], [0], [0], [1], [0, 0, 1, 1], [], []>} : vector<256x384xbf16>, vector<384x128xbf16>, vector<256x128xf32> -> vector<256x128xf32>
    %43 = arith.addf %37, %42 : vector<256x128xf32>
    %44 = vector.broadcast %15 : vector<1x128xf32> to vector<256x128xf32>
    %45 = arith.addf %43, %44 : vector<256x128xf32>
    %46 = vector.shape_cast %45 : vector<256x128xf32> to vector<1x16x16x128xf32>
    %c0_22 = arith.constant 0 : index
    %c0_23 = arith.constant 0 : index
    %c0_24 = arith.constant 0 : index
    %c0_25 = arith.constant 0 : index
    %47 = vector.load %arg6[%c0_22, %c0_23, %c0_24, %c0_25] : memref<1x16x16x128xf32, #tpu.memory_space<vmem>>, vector<1x16x16x128xf32>
    tpu.vector_store %arg6[%c0_22, %c0_23, %c0_24, %c0_25], %46 {strides = array<i32>} : memref<1x16x16x128xf32, #tpu.memory_space<vmem>>, vector<1x16x16x128xf32>,
    %cst_26 = arith.constant dense<0.000000e+00> : vector<128xf32>
    %48 = vector.multi_reduction <add>, %45, %cst_26 [0] : vector<256x128xf32> to vector<128xf32>
    %49 = vector.shape_cast %48 : vector<128xf32> to vector<1x128xf32>
    %50 = arith.mulf %45, %45 : vector<256x128xf32>
    %cst_27 = arith.constant dense<0.000000e+00> : vector<128xf32>
    %51 = vector.multi_reduction <add>, %50, %cst_27 [0] : vector<256x128xf32> to vector<128xf32>
    %52 = vector.shape_cast %51 : vector<128xf32> to vector<1x128xf32>
    %53 = tpu.concatenate %49, %52 in 0 : vector<1x128xf32>, vector<1x128xf32> -> vector<2x128xf32>
    %54 = vector.shape_cast %53 : vector<2x128xf32> to vector<1x2x128xf32>
    %c0_28 = arith.constant 0 : index
    %c0_29 = arith.constant 0 : index
    %c0_30 = arith.constant 0 : index
    %55 = vector.load %arg7[%c0_28, %c0_29, %c0_30] : memref<1x2x128xf32, #tpu.memory_space<vmem>>, vector<1x2x128xf32>
    tpu.vector_store %arg7[%c0_28, %c0_29, %c0_30], %54 {strides = array<i32>} : memref<1x2x128xf32, #tpu.memory_space<vmem>>, vector<1x2x128xf32>,
    return
  }
  func.func @transform_0(%arg0: i32) -> (i32, i32, i32, i32) {
    %c0_i32 = arith.constant 0 : i32
    %c0_i32_0 = arith.constant 0 : i32
    %c0_i32_1 = arith.constant 0 : i32
    %c0_i32_2 = arith.constant 0 : i32
    return %arg0, %c0_i32, %c0_i32_0, %c0_i32_1 : i32, i32, i32, i32
  }
  func.func @transform_1(%arg0: i32) -> (i32, i32) {
    %c0_i32 = arith.constant 0 : i32
    %c0_i32_0 = arith.constant 0 : i32
    %c0_i32_1 = arith.constant 0 : i32
    return %c0_i32, %c0_i32_0 : i32, i32
  }
  func.func @transform_2(%arg0: i32) -> (i32, i32) {
    %c0_i32 = arith.constant 0 : i32
    %c0_i32_0 = arith.constant 0 : i32
    %c0_i32_1 = arith.constant 0 : i32
    return %c0_i32, %c0_i32_0 : i32, i32
  }
  func.func @transform_3(%arg0: i32) -> (i32, i32, i32) {
    %c0_i32 = arith.constant 0 : i32
    %c0_i32_0 = arith.constant 0 : i32
    %c0_i32_1 = arith.constant 0 : i32
    %c0_i32_2 = arith.constant 0 : i32
    return %c0_i32, %c0_i32_0, %c0_i32_1 : i32, i32, i32
  }
  func.func @transform_4(%arg0: i32) -> (i32, i32) {
    %c0_i32 = arith.constant 0 : i32
    %c0_i32_0 = arith.constant 0 : i32
    %c0_i32_1 = arith.constant 0 : i32
    return %c0_i32, %c0_i32_0 : i32, i32
  }
  func.func @transform_5(%arg0: i32) -> (i32, i32, i32, i32) {
    %c0_i32 = arith.constant 0 : i32
    %c0_i32_0 = arith.constant 0 : i32
    %c0_i32_1 = arith.constant 0 : i32
    %c0_i32_2 = arith.constant 0 : i32
    return %arg0, %c0_i32, %c0_i32_0, %c0_i32_1 : i32, i32, i32, i32
  }
  func.func @transform_6(%arg0: i32) -> (i32, i32, i32) {
    %c0_i32 = arith.constant 0 : i32
    %c0_i32_0 = arith.constant 0 : i32
    %c0_i32_1 = arith.constant 0 : i32
    return %arg0, %c0_i32, %c0_i32_0 : i32, i32, i32
  }
}

module attributes {stable_mosaic.version = 11 : i64} {
  func.func @_conv2_res_kernel(%arg0: i32, %arg1: memref<1x16x16x128xf32, #tpu.memory_space<vmem>>, %arg2: memref<1x16x16x128xf32, #tpu.memory_space<vmem>>, %arg3: memref<1x128xf32, #tpu.memory_space<vmem>>, %arg4: memref<1x128xf32, #tpu.memory_space<vmem>>, %arg5: memref<3x384x128xbf16, #tpu.memory_space<vmem>>, %arg6: memref<1x128xf32, #tpu.memory_space<vmem>>, %arg7: memref<128x128xbf16, #tpu.memory_space<vmem>>, %arg8: memref<1x128xf32, #tpu.memory_space<vmem>>, %arg9: memref<1x16x16x128xf32, #tpu.memory_space<vmem>>) attributes {dimension_semantics = [#tpu.dimension_semantics<parallel>], iteration_bounds = array<i64: 2>, scalar_prefetch = 0 : i64, scratch_operands = 0 : i64, tpu.core_type = #tpu.core_type<tc>, window_params = [{transform_indices = @transform_0, window_bounds = array<i64: 1, 16, 16, 128>}, {transform_indices = @transform_1, window_bounds = array<i64: 1, 16, 16, 128>}, {pipeline_mode = #tpu.pipeline_mode<synchronous>, transform_indices = @transform_2, window_bounds = array<i64: 1, 128>}, {pipeline_mode = #tpu.pipeline_mode<synchronous>, transform_indices = @transform_3, window_bounds = array<i64: 1, 128>}, {pipeline_mode = #tpu.pipeline_mode<synchronous>, transform_indices = @transform_4, window_bounds = array<i64: 3, 384, 128>}, {pipeline_mode = #tpu.pipeline_mode<synchronous>, transform_indices = @transform_5, window_bounds = array<i64: 1, 128>}, {pipeline_mode = #tpu.pipeline_mode<synchronous>, transform_indices = @transform_6, window_bounds = array<i64: 128, 128>}, {pipeline_mode = #tpu.pipeline_mode<synchronous>, transform_indices = @transform_7, window_bounds = array<i64: 1, 128>}, {transform_indices = @transform_8, window_bounds = array<i64: 1, 16, 16, 128>}]} {
    %c0 = arith.constant 0 : index
    %c0_0 = arith.constant 0 : index
    %c0_1 = arith.constant 0 : index
    %c0_2 = arith.constant 0 : index
    %0 = vector.load %arg2[%c0, %c0_0, %c0_1, %c0_2] : memref<1x16x16x128xf32, #tpu.memory_space<vmem>>, vector<1x16x16x128xf32>
    %1 = vector.shape_cast %0 : vector<1x16x16x128xf32> to vector<256x128xf32>
    %2 = arith.truncf %1 : vector<256x128xf32> to vector<256x128xbf16>
    %c0_3 = arith.constant 0 : index
    %c0_4 = arith.constant 0 : index
    %3 = vector.load %arg7[%c0_3, %c0_4] : memref<128x128xbf16, #tpu.memory_space<vmem>>, vector<128x128xbf16>
    %cst = arith.constant dense<0.000000e+00> : vector<256x128xf32>
    %4 = tpu.matmul %2, %3, %cst {dimension_numbers = #tpu.dot_dimension_numbers<[1], [0], [0], [1], [0, 0, 1, 1], [], []>} : vector<256x128xbf16>, vector<128x128xbf16>, vector<256x128xf32> -> vector<256x128xf32>
    %c0_5 = arith.constant 0 : index
    %c0_6 = arith.constant 0 : index
    %5 = vector.load %arg8[%c0_5, %c0_6] : memref<1x128xf32, #tpu.memory_space<vmem>>, vector<1x128xf32>
    %6 = vector.broadcast %5 : vector<1x128xf32> to vector<256x128xf32>
    %7 = arith.addf %4, %6 : vector<256x128xf32>
    %c0_7 = arith.constant 0 : index
    %c0_8 = arith.constant 0 : index
    %c0_9 = arith.constant 0 : index
    %c0_10 = arith.constant 0 : index
    %8 = vector.load %arg1[%c0_7, %c0_8, %c0_9, %c0_10] : memref<1x16x16x128xf32, #tpu.memory_space<vmem>>, vector<1x16x16x128xf32>
    %9 = vector.shape_cast %8 : vector<1x16x16x128xf32> to vector<256x128xf32>
    %c0_11 = arith.constant 0 : index
    %c0_12 = arith.constant 0 : index
    %10 = vector.load %arg3[%c0_11, %c0_12] : memref<1x128xf32, #tpu.memory_space<vmem>>, vector<1x128xf32>
    %11 = vector.broadcast %10 : vector<1x128xf32> to vector<256x128xf32>
    %12 = arith.mulf %9, %11 : vector<256x128xf32>
    %c0_13 = arith.constant 0 : index
    %c0_14 = arith.constant 0 : index
    %13 = vector.load %arg4[%c0_13, %c0_14] : memref<1x128xf32, #tpu.memory_space<vmem>>, vector<1x128xf32>
    %14 = vector.broadcast %13 : vector<1x128xf32> to vector<256x128xf32>
    %15 = arith.addf %12, %14 : vector<256x128xf32>
    %16 = arith.negf %15 : vector<256x128xf32>
    %17 = math.exp %16 : vector<256x128xf32>
    %cst_15 = arith.constant 1.000000e+00 : f32
    %18 = vector.broadcast %cst_15 : f32 to vector<256x128xf32>
    %19 = arith.addf %18, %17 : vector<256x128xf32>
    %20 = arith.divf %18, %19 : vector<256x128xf32>
    %21 = arith.mulf %15, %20 : vector<256x128xf32>
    %22 = vector.shape_cast %21 : vector<256x128xf32> to vector<1x16x16x128xf32>
    %c0_16 = arith.constant 0 : index
    %c0_17 = arith.constant 0 : index
    %23 = vector.load %arg6[%c0_16, %c0_17] : memref<1x128xf32, #tpu.memory_space<vmem>>, vector<1x128xf32>
    %cst_18 = arith.constant 0.000000e+00 : f32
    %24 = vector.broadcast %cst_18 : f32 to vector<1x16x1x128xf32>
    %25 = vector.extract_strided_slice %22 {offsets = [0, 0, 0, 0], sizes = [1, 16, 15, 128], strides = [1, 1, 1, 1]} : vector<1x16x16x128xf32> to vector<1x16x15x128xf32>
    %26 = tpu.concatenate %24, %25 in 2 : vector<1x16x1x128xf32>, vector<1x16x15x128xf32> -> vector<1x16x16x128xf32>
    %27 = vector.extract_strided_slice %22 {offsets = [0, 0, 1, 0], sizes = [1, 16, 15, 128], strides = [1, 1, 1, 1]} : vector<1x16x16x128xf32> to vector<1x16x15x128xf32>
    %28 = tpu.concatenate %27, %24 in 2 : vector<1x16x15x128xf32>, vector<1x16x1x128xf32> -> vector<1x16x16x128xf32>
    %29 = tpu.concatenate %26, %22, %28 in 3 : vector<1x16x16x128xf32>, vector<1x16x16x128xf32>, vector<1x16x16x128xf32> -> vector<1x16x16x384xf32>
    %30 = arith.truncf %29 : vector<1x16x16x384xf32> to vector<1x16x16x384xbf16>
    %cst_19 = arith.constant 0.000000e+00 : bf16
    %31 = vector.broadcast %cst_19 : bf16 to vector<1x1x16x384xbf16>
    %32 = tpu.concatenate %31, %30, %31 in 1 : vector<1x1x16x384xbf16>, vector<1x16x16x384xbf16>, vector<1x1x16x384xbf16> -> vector<1x18x16x384xbf16>
    %cst_20 = arith.constant 0.000000e+00 : f32
    %33 = vector.broadcast %cst_20 : f32 to vector<256x128xf32>
    %34 = vector.extract_strided_slice %32 {offsets = [0, 0, 0, 0], sizes = [1, 16, 16, 384], strides = [1, 1, 1, 1]} : vector<1x18x16x384xbf16> to vector<1x16x16x384xbf16>
    %35 = vector.shape_cast %34 : vector<1x16x16x384xbf16> to vector<256x384xbf16>
    %c0_21 = arith.constant 0 : index
    %c0_22 = arith.constant 0 : index
    %c0_23 = arith.constant 0 : index
    %36 = vector.load %arg5[%c0_21, %c0_22, %c0_23] : memref<3x384x128xbf16, #tpu.memory_space<vmem>>, vector<1x384x128xbf16>
    %37 = vector.shape_cast %36 : vector<1x384x128xbf16> to vector<384x128xbf16>
    %cst_24 = arith.constant dense<0.000000e+00> : vector<256x128xf32>
    %38 = tpu.matmul %35, %37, %cst_24 {dimension_numbers = #tpu.dot_dimension_numbers<[1], [0], [0], [1], [0, 0, 1, 1], [], []>} : vector<256x384xbf16>, vector<384x128xbf16>, vector<256x128xf32> -> vector<256x128xf32>
    %39 = arith.addf %33, %38 : vector<256x128xf32>
    %40 = vector.extract_strided_slice %32 {offsets = [0, 1, 0, 0], sizes = [1, 16, 16, 384], strides = [1, 1, 1, 1]} : vector<1x18x16x384xbf16> to vector<1x16x16x384xbf16>
    %41 = vector.shape_cast %40 : vector<1x16x16x384xbf16> to vector<256x384xbf16>
    %c1 = arith.constant 1 : index
    %c0_25 = arith.constant 0 : index
    %c0_26 = arith.constant 0 : index
    %42 = vector.load %arg5[%c1, %c0_25, %c0_26] : memref<3x384x128xbf16, #tpu.memory_space<vmem>>, vector<1x384x128xbf16>
    %43 = vector.shape_cast %42 : vector<1x384x128xbf16> to vector<384x128xbf16>
    %cst_27 = arith.constant dense<0.000000e+00> : vector<256x128xf32>
    %44 = tpu.matmul %41, %43, %cst_27 {dimension_numbers = #tpu.dot_dimension_numbers<[1], [0], [0], [1], [0, 0, 1, 1], [], []>} : vector<256x384xbf16>, vector<384x128xbf16>, vector<256x128xf32> -> vector<256x128xf32>
    %45 = arith.addf %39, %44 : vector<256x128xf32>
    %46 = vector.extract_strided_slice %32 {offsets = [0, 2, 0, 0], sizes = [1, 16, 16, 384], strides = [1, 1, 1, 1]} : vector<1x18x16x384xbf16> to vector<1x16x16x384xbf16>
    %47 = vector.shape_cast %46 : vector<1x16x16x384xbf16> to vector<256x384xbf16>
    %c2 = arith.constant 2 : index
    %c0_28 = arith.constant 0 : index
    %c0_29 = arith.constant 0 : index
    %48 = vector.load %arg5[%c2, %c0_28, %c0_29] : memref<3x384x128xbf16, #tpu.memory_space<vmem>>, vector<1x384x128xbf16>
    %49 = vector.shape_cast %48 : vector<1x384x128xbf16> to vector<384x128xbf16>
    %cst_30 = arith.constant dense<0.000000e+00> : vector<256x128xf32>
    %50 = tpu.matmul %47, %49, %cst_30 {dimension_numbers = #tpu.dot_dimension_numbers<[1], [0], [0], [1], [0, 0, 1, 1], [], []>} : vector<256x384xbf16>, vector<384x128xbf16>, vector<256x128xf32> -> vector<256x128xf32>
    %51 = arith.addf %45, %50 : vector<256x128xf32>
    %52 = vector.broadcast %23 : vector<1x128xf32> to vector<256x128xf32>
    %53 = arith.addf %51, %52 : vector<256x128xf32>
    %54 = arith.addf %53, %7 : vector<256x128xf32>
    %55 = vector.shape_cast %54 : vector<256x128xf32> to vector<1x16x16x128xf32>
    %c0_31 = arith.constant 0 : index
    %c0_32 = arith.constant 0 : index
    %c0_33 = arith.constant 0 : index
    %c0_34 = arith.constant 0 : index
    %56 = vector.load %arg9[%c0_31, %c0_32, %c0_33, %c0_34] : memref<1x16x16x128xf32, #tpu.memory_space<vmem>>, vector<1x16x16x128xf32>
    tpu.vector_store %arg9[%c0_31, %c0_32, %c0_33, %c0_34], %55 {strides = array<i32>} : memref<1x16x16x128xf32, #tpu.memory_space<vmem>>, vector<1x16x16x128xf32>,
    return
  }
  func.func @transform_0(%arg0: i32) -> (i32, i32, i32, i32) {
    %c0_i32 = arith.constant 0 : i32
    %c0_i32_0 = arith.constant 0 : i32
    %c0_i32_1 = arith.constant 0 : i32
    %c0_i32_2 = arith.constant 0 : i32
    return %arg0, %c0_i32, %c0_i32_0, %c0_i32_1 : i32, i32, i32, i32
  }
  func.func @transform_1(%arg0: i32) -> (i32, i32, i32, i32) {
    %c0_i32 = arith.constant 0 : i32
    %c0_i32_0 = arith.constant 0 : i32
    %c0_i32_1 = arith.constant 0 : i32
    %c0_i32_2 = arith.constant 0 : i32
    return %arg0, %c0_i32, %c0_i32_0, %c0_i32_1 : i32, i32, i32, i32
  }
  func.func @transform_2(%arg0: i32) -> (i32, i32) {
    %c0_i32 = arith.constant 0 : i32
    %c0_i32_0 = arith.constant 0 : i32
    %c0_i32_1 = arith.constant 0 : i32
    return %c0_i32, %c0_i32_0 : i32, i32
  }
  func.func @transform_3(%arg0: i32) -> (i32, i32) {
    %c0_i32 = arith.constant 0 : i32
    %c0_i32_0 = arith.constant 0 : i32
    %c0_i32_1 = arith.constant 0 : i32
    return %c0_i32, %c0_i32_0 : i32, i32
  }
  func.func @transform_4(%arg0: i32) -> (i32, i32, i32) {
    %c0_i32 = arith.constant 0 : i32
    %c0_i32_0 = arith.constant 0 : i32
    %c0_i32_1 = arith.constant 0 : i32
    %c0_i32_2 = arith.constant 0 : i32
    return %c0_i32, %c0_i32_0, %c0_i32_1 : i32, i32, i32
  }
  func.func @transform_5(%arg0: i32) -> (i32, i32) {
    %c0_i32 = arith.constant 0 : i32
    %c0_i32_0 = arith.constant 0 : i32
    %c0_i32_1 = arith.constant 0 : i32
    return %c0_i32, %c0_i32_0 : i32, i32
  }
  func.func @transform_6(%arg0: i32) -> (i32, i32) {
    %c0_i32 = arith.constant 0 : i32
    %c0_i32_0 = arith.constant 0 : i32
    %c0_i32_1 = arith.constant 0 : i32
    return %c0_i32, %c0_i32_0 : i32, i32
  }
  func.func @transform_7(%arg0: i32) -> (i32, i32) {
    %c0_i32 = arith.constant 0 : i32
    %c0_i32_0 = arith.constant 0 : i32
    %c0_i32_1 = arith.constant 0 : i32
    return %c0_i32, %c0_i32_0 : i32, i32
  }
  func.func @transform_8(%arg0: i32) -> (i32, i32, i32, i32) {
    %c0_i32 = arith.constant 0 : i32
    %c0_i32_0 = arith.constant 0 : i32
    %c0_i32_1 = arith.constant 0 : i32
    %c0_i32_2 = arith.constant 0 : i32
    return %arg0, %c0_i32, %c0_i32_0, %c0_i32_1 : i32, i32, i32, i32
  }
}

</mosaic_0001>

<bundles_post_ra>
// kernel: resblock_forward.3
= control target key start
LH: loop header
LB: loop body
LE: loop exit
PB: predicated region body
PF: predicated region fallthrough
CT: control target
= control target key end

     0   :  { %s346_s6 = smov 0   ;;  %s401_s0 = inlined_call_operand.vmem [shape: f32[2,16,16,128], index: 0, kind: input, shape index: {}]   ;;  %s402_s1 = inlined_call_operand.vmem [shape: f32[2,2,128], index: 1, kind: output, shape index: {}]  }
   0x1 LB: > { %s309_s7 = sadd.s32 4294967295, %s334_s6   ;;  %p313_p0 = scmp.ge.s32.totalorder %s334_s6, 1  ;;  %s334_s6 = sphi %s346_s6, %s11_s6  }
   0x2   : > { %p87_p1 = scmp.lt.s32.totalorder %s334_s6, 3 }
   0x4   : > { %p88_p2 = pnand %p313_p0, %p87_p1 }
   0x5   : > { %p106_p3 = scmp.lt.s32.totalorder (!%p88_p2), %s309_s7, 1 }
   0x6   : > { %91 = sbr.rel (%p88_p2) target bundleno = 93 (0x5d), region = 24 }
   0xb   : > { %s404_s7 = smov (!%p106_p3, %s309_s7), 1  ;;  %vm253_vm0 = vcmask 1040384  }
   0xc   : > { %s319_s8 = sshll.u32 %s404_s7, 8  ;;  %s316_s12 = sshll.u32 %s404_s7, 1 }
   0xd   : > { %s360_s11 = scalar_lea.vmem %s401_s0, %s319_s8  ;;  %s114_s15 = scalar_lea.vmem %s402_s1, %s316_s12 }
   0xe   : > { %v115_v0 = vld [vmem:[%s360_s11] sm:$0xff]  ;;  %v116_v1 = vld [vmem:[%s360_s11 + $0x8] sm:$0xff]  ;;  %v117_v2 = vld [vmem:[%s360_s11 + $0x10] sm:$0xff] }
   0xf   : > { %v118_v3 = vld [vmem:[%s360_s11 + $0x18] sm:$0xff]  ;;  %v147_v4 = vadd.f32 %v116_v1, %v115_v0  ;;  %v184_v5 = vmul.f32 %v115_v0, %v115_v0  ;;  %v185_v6 = vmul.f32 %v116_v1, %v116_v1  ;;  %v186_v7 = vmul.f32 %v117_v2, %v117_v2  ;;  %v119_v8 = vld [vmem:[%s360_s11 + $0x20] sm:$0xff]  ;;  %v120_v12 = vld [vmem:[%s360_s11 + $0x28] sm:$0xff] }
  0x10   : > { %v187_v10 = vmul.f32 %v118_v3, %v118_v3  ;;  %v188_v14 = vmul.f32 %v119_v8, %v119_v8  ;;  %v121_v16 = vld [vmem:[%s360_s11 + $0x30] sm:$0xff]  ;;  %v189_v18 = vmul.f32 %v120_v12, %v120_v12  ;;  %v122_v20 = vld [vmem:[%s360_s11 + $0x38] sm:$0xff]  ;;  %v123_v24 = vld [vmem:[%s360_s11 + $0x40] sm:$0xff] }
  0x11   : > { %v148_v9 = vadd.f32 %v147_v4, %v117_v2  ;;  %v216_v11 = vadd.f32 %v185_v6, %v184_v5  ;;  %v190_v22 = vmul.f32 %v121_v16, %v121_v16  ;;  %v191_v26 = vmul.f32 %v122_v20, %v122_v20  ;;  %v124_v28 = vld [vmem:[%s360_s11 + $0x48] sm:$0xff]  ;;  %v125_v32 = vld [vmem:[%s360_s11 + $0x50] sm:$0xff]  ;;  %v126_v36 = vld [vmem:[%s360_s11 + $0x58] sm:$0xff] }
  0x12   : > { %v192_v30 = vmul.f32 %v123_v24, %v123_v24  ;;  %v193_v34 = vmul.f32 %v124_v28, %v124_v28  ;;  %v194_v38 = vmul.f32 %v125_v32, %v125_v32  ;;  %v127_v40 = vld [vmem:[%s360_s11 + $0x60] sm:$0xff]  ;;  %v195_v42 = vmul.f32 %v126_v36, %v126_v36  ;;  %v128_v44 = vld [vmem:[%s360_s11 + $0x68] sm:$0xff]  ;;  %v129_v48 = vld [vmem:[%s360_s11 + $0x70] sm:$0xff] }
  0x13   : > { %v149_v13 = vadd.f32 %v148_v9, %v118_v3  ;;  %v217_v15 = vadd.f32 %v216_v11, %v186_v7  ;;  %v196_v46 = vmul.f32 %v127_v40, %v127_v40  ;;  %v197_v50 = vmul.f32 %v128_v44, %v128_v44  ;;  %v130_v52 = vld [vmem:[%s360_s11 + $0x78] sm:$0xff]  ;;  %v131_v56 = vld [vmem:[%s360_s11 + $0x80] sm:$0xff]  ;;  %v132_v60 = vld [vmem:[%s360_s11 + $0x88] sm:$0xff] }
  0x14   : > { %v198_v54 = vmul.f32 %v129_v48, %v129_v48  ;;  %v199_v58 = vmul.f32 %v130_v52, %v130_v52  ;;  %v200_v62 = vmul.f32 %v131_v56, %v131_v56  ;;  %v133_v0 = vld [vmem:[%s360_s11 + $0x90] sm:$0xff]  ;;  %v201_v2 = vmul.f32 %v132_v60, %v132_v60  ;;  %v134_v4 = vld [vmem:[%s360_s11 + $0x98] sm:$0xff] }
  0x15   : > { %v150_v17 = vadd.f32 %v149_v13, %v119_v8  ;;  %v218_v19 = vadd.f32 %v217_v15, %v187_v10  ;;  %v202_v6 = vmul.f32 %v133_v0, %v133_v0  ;;  %v135_v8 = vld [vmem:[%s360_s11 + $0xa0] sm:$0xff]  ;;  %v203_v10 = vmul.f32 %v134_v4, %v134_v4 }
  0x17   : > { %v151_v21 = vadd.f32 %v150_v17, %v120_v12  ;;  %v219_v23 = vadd.f32 %v218_v19, %v188_v14  ;;  %v136_v12 = vld [vmem:[%s360_s11 + $0xa8] sm:$0xff]  ;;  %v204_v14 = vmul.f32 %v135_v8, %v135_v8 }
  0x19   : > { %v152_v25 = vadd.f32 %v151_v21, %v121_v16  ;;  %v220_v27 = vadd.f32 %v219_v23, %v189_v18  ;;  %v137_v16 = vld [vmem:[%s360_s11 + $0xb0] sm:$0xff]  ;;  %v205_v18 = vmul.f32 %v136_v12, %v136_v12 }
  0x1b   : > { %v153_v29 = vadd.f32 %v152_v25, %v122_v20  ;;  %v221_v31 = vadd.f32 %v220_v27, %v190_v22  ;;  %v138_v20 = vld [vmem:[%s360_s11 + $0xb8] sm:$0xff]  ;;  %v206_v22 = vmul.f32 %v137_v16, %v137_v16 }
  0x1d   : > { %v154_v33 = vadd.f32 %v153_v29, %v123_v24  ;;  %v222_v35 = vadd.f32 %v221_v31, %v191_v26  ;;  %v139_v24 = vld [vmem:[%s360_s11 + $0xc0] sm:$0xff]  ;;  %v207_v26 = vmul.f32 %v138_v20, %v138_v20 }
  0x1f   : > { %v155_v37 = vadd.f32 %v154_v33, %v124_v28  ;;  %v223_v39 = vadd.f32 %v222_v35, %v192_v30  ;;  %v140_v28 = vld [vmem:[%s360_s11 + $0xc8] sm:$0xff]  ;;  %v208_v30 = vmul.f32 %v139_v24, %v139_v24 }
  0x21   : > { %v156_v41 = vadd.f32 %v155_v37, %v125_v32  ;;  %v224_v43 = vadd.f32 %v223_v39, %v193_v34  ;;  %v141_v32 = vld [vmem:[%s360_s11 + $0xd0] sm:$0xff]  ;;  %v209_v34 = vmul.f32 %v140_v28, %v140_v28 }
  0x23   : > { %v157_v45 = vadd.f32 %v156_v41, %v126_v36  ;;  %v225_v47 = vadd.f32 %v224_v43, %v194_v38  ;;  %v142_v36 = vld [vmem:[%s360_s11 + $0xd8] sm:$0xff]  ;;  %v210_v38 = vmul.f32 %v141_v32, %v141_v32 }
  0x25   : > { %v158_v49 = vadd.f32 %v157_v45, %v127_v40  ;;  %v226_v51 = vadd.f32 %v225_v47, %v195_v42  ;;  %v143_v40 = vld [vmem:[%s360_s11 + $0xe0] sm:$0xff]  ;;  %v211_v42 = vmul.f32 %v142_v36, %v142_v36 }
  0x27   : > { %v159_v53 = vadd.f32 %v158_v49, %v128_v44  ;;  %v227_v55 = vadd.f32 %v226_v51, %v196_v46  ;;  %v144_v44 = vld [vmem:[%s360_s11 + $0xe8] sm:$0xff]  ;;  %v212_v46 = vmul.f32 %v143_v40, %v143_v40 }
  0x29   : > { %v160_v57 = vadd.f32 %v159_v53, %v129_v48  ;;  %v228_v59 = vadd.f32 %v227_v55, %v197_v50  ;;  %v145_v48 = vld [vmem:[%s360_s11 + $0xf0] sm:$0xff]  ;;  %v213_v50 = vmul.f32 %v144_v44, %v144_v44 }
  0x2b   : > { %v161_v61 = vadd.f32 %v160_v57, %v130_v52  ;;  %v229_v63 = vadd.f32 %v228_v59, %v198_v54  ;;  %v146_v52 = vld [vmem:[%s360_s11 + $0xf8] sm:$0xff]  ;;  %v214_v54 = vmul.f32 %v145_v48, %v145_v48 }
  0x2c   : > { %v215_v57 = vmul.f32 %v146_v52, %v146_v52 }
  0x2d   : > { %v162_v1 = vadd.f32 %v161_v61, %v131_v56  ;;  %v230_v3 = vadd.f32 %v229_v63, %v199_v58 }
  0x2f   : > { %v163_v5 = vadd.f32 %v162_v1, %v132_v60  ;;  %v231_v7 = vadd.f32 %v230_v3, %v200_v62 }
  0x31   : > { %v164_v9 = vadd.f32 %v163_v5, %v133_v0  ;;  %v232_v11 = vadd.f32 %v231_v7, %v201_v2 }
  0x33   : > { %v165_v13 = vadd.f32 %v164_v9, %v134_v4  ;;  %v233_v15 = vadd.f32 %v232_v11, %v202_v6 }
  0x35   : > { %v166_v17 = vadd.f32 %v165_v13, %v135_v8  ;;  %v234_v19 = vadd.f32 %v233_v15, %v203_v10 }
  0x37   : > { %v167_v21 = vadd.f32 %v166_v17, %v136_v12  ;;  %v235_v23 = vadd.f32 %v234_v19, %v204_v14 }
  0x39   : > { %v168_v25 = vadd.f32 %v167_v21, %v137_v16  ;;  %v236_v27 = vadd.f32 %v235_v23, %v205_v18 }
  0x3b   : > { %v169_v29 = vadd.f32 %v168_v25, %v138_v20  ;;  %v237_v31 = vadd.f32 %v236_v27, %v206_v22 }
  0x3d   : > { %v170_v33 = vadd.f32 %v169_v29, %v139_v24  ;;  %v238_v35 = vadd.f32 %v237_v31, %v207_v26 }
  0x3f   : > { %v171_v37 = vadd.f32 %v170_v33, %v140_v28  ;;  %v239_v39 = vadd.f32 %v238_v35, %v208_v30 }
  0x41   : > { %v172_v41 = vadd.f32 %v171_v37, %v141_v32  ;;  %v240_v43 = vadd.f32 %v239_v39, %v209_v34 }
  0x43   : > { %v173_v45 = vadd.f32 %v172_v41, %v142_v36  ;;  %v241_v47 = vadd.f32 %v240_v43, %v210_v38 }
  0x45   : > { %v174_v49 = vadd.f32 %v173_v45, %v143_v40  ;;  %v242_v51 = vadd.f32 %v241_v47, %v211_v42 }
  0x47   : > { %v175_v53 = vadd.f32 %v174_v49, %v144_v44  ;;  %v243_v55 = vadd.f32 %v242_v51, %v212_v46 }
  0x49   : > { %v176_v56 = vadd.f32 %v175_v53, %v145_v48  ;;  %v244_v58 = vadd.f32 %v243_v55, %v213_v50 }
  0x4b   : > { %v177_v59 = vadd.f32 %v176_v56, %v146_v52  ;;  %v245_v60 = vadd.f32 %v244_v58, %v214_v54 }
  0x4d   : > { %v178_v61 = vrot.slane %v177_v59, 4  ;;  %v246_v62 = vadd.f32 %v245_v60, %v215_v57 }
  0x4f   : > { %v179_v63 = vadd.f32 %v178_v61, %v177_v59  ;;  %v247_v0 = vrot.slane %v246_v62, 4 }
  0x51   : > { %v180_v1 = vrot.slane %v179_v63, 2  ;;  %v248_v2 = vadd.f32 %v247_v0, %v246_v62 }
  0x53   : > { %v181_v3 = vadd.f32 %v180_v1, %v179_v63  ;;  %v249_v4 = vrot.slane %v248_v2, 2 }
  0x55   : > { %v182_v5 = vrot.slane %v181_v3, 1  ;;  %v250_v6 = vadd.f32 %v249_v4, %v248_v2 }
  0x57   : > { %v183_v7 = vadd.f32 %v182_v5, %v181_v3  ;;  %v251_v8 = vrot.slane %v250_v6, 1 }
  0x59   : > { %v252_v9 = vadd.f32 %v251_v8, %v250_v6 }
  0x5b   : > { %v254_v10 = vsel %vm253_vm0, %v183_v7, %v252_v9 }
  0x5c   : > { %255 = vst [vmem:[%s114_s15] sm:$0x3] %v254_v10 }
  0x5d PF: > { %s11_s6 = sadd.s32 1, %s334_s6  }
  0x5e   : > { %p8_p4 = scmp.ge.s32.totalorder %s11_s6, 4  }
  0x60   :  { %10 = sbr.rel (!%p8_p4) target bundleno = 1 (0x1), region = 54 }

// kernel: resblock_forward.4
= control target key start
LH: loop header
LB: loop body
LE: loop exit
PB: predicated region body
PF: predicated region fallthrough
CT: control target
= control target key end

     0   :  { %s3939_s21 = smov 0   ;;  %s6088_s0 = inlined_call_operand.vmem [shape: f32[2,16,16,128], index: 0, kind: input, shape index: {}]   ;;  %s6089_s1 = inlined_call_operand.vmem [shape: f32[1,128], index: 1, kind: input, shape index: {}]   ;;  %s6090_s2 = inlined_call_operand.vmem [shape: f32[1,128], index: 2, kind: input, shape index: {}]   ;;  %s6091_s3 = inlined_call_operand.vmem [shape: bf16[3,384,128], index: 3, kind: input, shape index: {}]   ;;  %s6092_s4 = inlined_call_operand.vmem [shape: f32[1,128], index: 4, kind: input, shape index: {}]   ;;  %s6093_s5 = inlined_call_operand.vmem [shape: f32[2,16,16,128], index: 5, kind: output, shape index: {0}]   ;;  %s6094_s6 = inlined_call_operand.vmem [shape: f32[2,2,128], index: 6, kind: output, shape index: {1}]  }
   0x1 LB: > { %s3227_s22 = sadd.s32 4294967295, %s3901_s21   ;;  %p3231_p0 = scmp.ge.s32.totalorder %s3901_s21, 1  ;;  %s3901_s21 = sphi %s3939_s21, %s17_s21  }
   0x2   : > { %p215_p1 = scmp.lt.s32.totalorder %s3901_s21, 3 }
   0x4   : > { %p216_p2 = pnand %p3231_p0, %p215_p1 }
   0x6   : > { %219 = sbr.rel (%p216_p2) target bundleno = 910 (0x38e), region = 40 }
   0xb   : > { %v3688_v0 = vld [vmem:[%s6091_s3 + $0xf8] sm:$0xff]  ;;  %p249_p3 = scmp.lt.s32.totalorder %s3227_s22, 1  ;;  %v3687_v1 = vld [vmem:[%s6091_s3 + $0xf0] sm:$0xff]  ;;  %v3958_v2 = vld [vmem:[%s6089_s1] ss:$0 sm:$0xff] }
   0xc   : > { %1796 = vmatpush.bf16.msra.mxu0 %v3688_v0  ;;  %3729 = vmatpush.bf16.msra.mxu1 %v3688_v0  ;;  %v3686_v3 = vld [vmem:[%s6091_s3 + $0xe8] sm:$0xff]  ;;  %v3974_v4 = vld [vmem:[%s6090_s2] ss:$0 sm:$0xff]  ;;  %v3684_v35 = vld [vmem:[%s6091_s3 + $0xd8] sm:$0xff] }
   0xd   : > { %s6466_s22 = smov (!%p249_p3, %s3227_s22), 1  ;;  %3730 = vmatpush.bf16.msra.mxu2 %v3688_v0  ;;  %3731 = vmatpush.bf16.msra.mxu3 %v3688_v0  ;;  %v3685_v23 = vld [vmem:[%s6091_s3 + $0xe0] sm:$0xff]  ;;  %v3683_v39 = vld [vmem:[%s6091_s3 + $0xd0] sm:$0xff]  ;;  %v3682_v47 = vld [vmem:[%s6091_s3 + $0xc8] sm:$0xff] }
   0xe   : > { %s3655_s29 = sshll.u32 %s6466_s22, 8  ;;  %v3681_v63 = vld [vmem:[%s6091_s3 + $0xc0] sm:$0xff] }
   0xf   : > { %s3969_s10 = scalar_lea.vmem %s6088_s0, %s3655_s29  ;;  %s5905_s14 = scalar_lea.vmem %s6093_s5, %s3655_s29 }
  0x10   : > { %1797 = vmatpush.bf16.msra.mxu0 %v3687_v1  ;;  %3732 = vmatpush.bf16.msra.mxu1 %v3687_v1  ;;  %v264_v5 = vld [vmem:[%s3969_s10] sm:$0xff]  ;;  %v265_v6 = vld [vmem:[%s3969_s10 + $0x8] sm:$0xff]  ;;  %v266_v43 = vld [vmem:[%s3969_s10 + $0x10] sm:$0xff]  ;;  %s3236_s29 = sshll.u32 %s6466_s22, 1 }
  0x11   : > { %v272_v7 = vld [vmem:[%s3969_s10 + $0x40] sm:$0xff]  ;;  %3733 = vmatpush.bf16.msra.mxu2 %v3687_v1  ;;  %3734 = vmatpush.bf16.msra.mxu3 %v3687_v1  ;;  %v300_v8 = vmul.f32 %v3958_v2, %v264_v5  ;;  %v301_v9 = vmul.f32 %v3958_v2, %v265_v6  ;;  %v273_v10 = vld [vmem:[%s3969_s10 + $0x48] sm:$0xff]  ;;  %v267_v49 = vld [vmem:[%s3969_s10 + $0x18] sm:$0xff]  ;;  %v4048_v53 = vmul.f32 %v3958_v2, %v266_v43  ;;  %s262_s17 = scalar_lea.vmem %s6094_s6, %s3236_s29 }
  0x12   : > { %v308_v11 = vmul.f32 %v3958_v2, %v272_v7  ;;  %v280_v12 = vld [vmem:[%s3969_s10 + $0x80] sm:$0xff]  ;;  %v281_v13 = vld [vmem:[%s3969_s10 + $0x88] sm:$0xff]  ;;  %v309_v14 = vmul.f32 %v3958_v2, %v273_v10  ;;  %v274_v50 = vld [vmem:[%s3969_s10 + $0x50] sm:$0xff]  ;;  %v4060_v60 = vmul.f32 %v3958_v2, %v267_v49 }
  0x13   : > { %v316_v15 = vmul.f32 %v3958_v2, %v280_v12  ;;  %v317_v16 = vmul.f32 %v3958_v2, %v281_v13  ;;  %v288_v17 = vld [vmem:[%s3969_s10 + $0xc0] sm:$0xff]  ;;  %v289_v18 = vld [vmem:[%s3969_s10 + $0xc8] sm:$0xff]  ;;  %v3991_v19 = vadd.f32 %v3974_v4, %v300_v8  ;;  %v3994_v20 = vadd.f32 %v3974_v4, %v301_v9 }
  0x14   : > { %v3997_v21 = vadd.f32 %v3974_v4, %v308_v11  ;;  %v324_v22 = vmul.f32 %v3958_v2, %v288_v17  ;;  %1798 = vmatpush.bf16.msra.mxu0 %v3686_v3  ;;  %3735 = vmatpush.bf16.msra.mxu1 %v3686_v3  ;;  %v4004_v24 = vadd.f32 %v3974_v4, %v309_v14 }
  0x15   : > { %v4007_v25 = vadd.f32 %v3974_v4, %v316_v15  ;;  %v4010_v26 = vadd.f32 %v3974_v4, %v317_v16  ;;  %3736 = vmatpush.bf16.msra.mxu2 %v3686_v3  ;;  %3737 = vmatpush.bf16.msra.mxu3 %v3686_v3  ;;  %v3237_v27 = vmul.f32 -1.442695, %v3991_v19  ;;  %v3238_v28 = vmul.f32 -1.442695, %v3994_v20 }
  0x16   : > { %v3245_v29 = vmul.f32 -1.442695, %v3997_v21  ;;  %v325_v30 = vmul.f32 %v3958_v2, %v289_v18  ;;  %v3246_v31 = vmul.f32 -1.442695, %v4004_v24  ;;  %v4018_v32 = vadd.f32 %v3974_v4, %v324_v22 }
  0x17   : > { %3765 = vpow2.f32 %v3237_v27  ;;  %v3253_v33 = vmul.f32 -1.442695, %v4007_v25  ;;  %v3254_v36 = vmul.f32 -1.442695, %v4010_v26  ;;  %v4063_v61 = vmul.f32 %v3958_v2, %v274_v50 }
  0x18   : > { %v4022_v34 = vadd.f32 %v3974_v4, %v325_v30  ;;  %1799 = vmatpush.bf16.msra.mxu0 %v3685_v23  ;;  %3738 = vmatpush.bf16.msra.mxu1 %v3685_v23  ;;  %3767 = vpow2.f32 %v3238_v28  ;;  %v3261_v37 = vmul.f32 -1.442695, %v4018_v32  ;;  %v4275_v5 = vadd.f32 %v3974_v4, %v4048_v53 }
  0x19   : > { %3739 = vmatpush.bf16.msra.mxu2 %v3685_v23  ;;  %3740 = vmatpush.bf16.msra.mxu3 %v3685_v23  ;;  %3769 = vpow2.f32 %v3245_v29 }
  0x1a   : > { %3771 = vpow2.f32 %v3246_v31  ;;  %v3262_v38 = vmul.f32 -1.442695, %v4022_v34 }
  0x1b   : > { %3773 = vpow2.f32 %v3253_v33 }
  0x1c   : > { %1800 = vmatpush.bf16.msra.mxu0 %v3684_v35  ;;  %3741 = vmatpush.bf16.msra.mxu1 %v3684_v35  ;;  %3775 = vpow2.f32 %v3254_v36 }
  0x1d   : > { %v3766_v40 = vpop.eup %3765  ;;  %3742 = vmatpush.bf16.msra.mxu2 %v3684_v35  ;;  %3743 = vmatpush.bf16.msra.mxu3 %v3684_v35  ;;  %3777 = vpow2.f32 %v3261_v37 }
  0x1e   : > { %v3768_v41 = vpop.eup %3767  ;;  %v4033_v42 = vadd.f32 1.0, %v3766_v40  ;;  %3779 = vpow2.f32 %v3262_v38 }
  0x1f   : > { %v3770_v44 = vpop.eup %3769  ;;  %v4036_v45 = vadd.f32 1.0, %v3768_v41 }
  0x20   : > { %v3772_v46 = vpop.eup %3771  ;;  %1801 = vmatpush.bf16.msra.mxu0 %v3683_v39  ;;  %3744 = vmatpush.bf16.msra.mxu1 %v3683_v39  ;;  %3781 = vrcp.f32 %v4033_v42  ;;  %v507_v48 = vand.u32 2147483648, %v4033_v42  ;;  %v505_v52 = vand.u32 2147483647, %v4033_v42  ;;  %v4052_v57 = vadd.f32 1.0, %v3770_v44 }
  0x21   : > { %v3774_v51 = vpop.eup %3773  ;;  %3745 = vmatpush.bf16.msra.mxu2 %v3683_v39  ;;  %3746 = vmatpush.bf16.msra.mxu3 %v3683_v39  ;;  %3783 = vrcp.f32 %v4036_v45  ;;  %v520_v55 = vand.u32 2147483647, %v4036_v45  ;;  %v522_v56 = vand.u32 2147483648, %v4036_v45  ;;  %v4054_v58 = vadd.f32 1.0, %v3772_v46 }
  0x22   : > { %v3776_v54 = vpop.eup %3775  ;;  %vm501_vm0 = vweird.f32 %v4033_v42  ;;  %v4057_v59 = vadd.f32 1.0, %v3774_v51  ;;  %v4070_v0 = vor.u32 1.1754944e-38, %v507_v48  ;;  %vm516_vm1 = vweird.f32 %v4036_v45 }
  0x23   : > { %v4065_v62 = vpop.eup %3777  ;;  %3785 = vrcp.f32 %v4052_v57  ;;  %v627_v1 = vand.u32 2147483648, %v4052_v57  ;;  %vm4077_vm2 = vcmp.eq.f32.partialorder %v505_v52, 8.507059e+37  ;;  %v625_v6 = vand.u32 2147483647, %v4052_v57 }
  0x24   : > { %1802 = vmatpush.bf16.msra.mxu0 %v3682_v47  ;;  %3747 = vmatpush.bf16.msra.mxu1 %v3682_v47  ;;  %v4075_v3 = vpop.eup %3779  ;;  %3787 = vrcp.f32 %v4054_v58  ;;  %v642_v7 = vand.u32 2147483648, %v4054_v58  ;;  %v4084_v8 = vadd.f32 1.0, %v3776_v54  ;;  %vm4086_vm3 = vcmp.eq.f32.partialorder %v520_v55, 8.507059e+37 }
  0x25   : > { %3748 = vmatpush.bf16.msra.mxu2 %v3682_v47  ;;  %3749 = vmatpush.bf16.msra.mxu3 %v3682_v47  ;;  %v523_v11 = vor.u32 1.1754944e-38, %v522_v56  ;;  %v640_v12 = vand.u32 2147483647, %v4054_v58  ;;  %3789 = vrcp.f32 %v4057_v59  ;;  %vm621_vm4 = vweird.f32 %v4052_v57 }
  0x26   : > { %v3782_v9 = vpop.eup %3781  ;;  %v4094_v15 = vor.u32 1.1754944e-38, %v627_v1  ;;  %vm636_vm5 = vweird.f32 %v4054_v58  ;;  %v745_v17 = vand.u32 2147483647, %v4057_v59  ;;  %v747_v18 = vand.u32 2147483648, %v4057_v59 }
  0x27   : > { %v3784_v13 = vpop.eup %3783  ;;  %v497_v14 = vmul.f32 %v3782_v9, %v4033_v42  ;;  %vm502_vm7 = vweird.f32 %v3782_v9  ;;  %vm4101_vm8 = vcmp.eq.f32.partialorder %v625_v6, 8.507059e+37  ;;  %v643_v27 = vor.u32 1.1754944e-38, %v642_v7 }
  0x28   : > { %1803 = vmatpush.bf16.msra.mxu0 %v3681_v63  ;;  %3750 = vmatpush.bf16.msra.mxu1 %v3681_v63  ;;  %v512_v16 = vmul.f32 %v3784_v13, %v4036_v45  ;;  %3791 = vrcp.f32 %v4084_v8  ;;  %vm517_vm9 = vweird.f32 %v3784_v13  ;;  %vm4106_vm11 = vcmp.eq.f32.partialorder %v640_v12, 8.507059e+37  ;;  %vm4121_vm14 = vmor %vm501_vm0, %vm502_vm7 }
  0x29   : > { %3751 = vmatpush.bf16.msra.mxu2 %v3681_v63  ;;  %3752 = vmatpush.bf16.msra.mxu3 %v3681_v63  ;;  %v498_v22 = vsub.f32 1.0, %v497_v14  ;;  %v3786_v28 = vpop.eup %3785  ;;  %v760_v31 = vand.u32 2147483647, %v4084_v8  ;;  %v762_v33 = vand.u32 2147483648, %v4084_v8  ;;  %vm4113_vm12 = vcmp.eq.f32.partialorder %v745_v17, 8.507059e+37  ;;  %vm4129_vm6 = vmor %vm516_vm1, %vm517_vm9  ;;  %v3672_v63 = vld [vmem:[%s6091_s3 + $0x78] sm:$0xff] }
  0x2a   : > { %v513_v29 = vsub.f32 1.0, %v512_v16  ;;  %v3788_v35 = vpop.eup %3787  ;;  %v617_v37 = vmul.f32 %v3786_v28, %v4052_v57  ;;  %v748_v39 = vor.u32 1.1754944e-38, %v747_v18  ;;  %vm756_vm13 = vweird.f32 %v4084_v8 }
  0x2b   : > { %v499_v36 = vmul.f32 %v3782_v9, %v498_v22  ;;  %v3790_v40 = vpop.eup %3789  ;;  %vm622_vm15 = vweird.f32 %v3786_v28  ;;  %v632_v44 = vmul.f32 %v3788_v35, %v4054_v58  ;;  %vm637_vm10 = vweird.f32 %v3788_v35 }
  0x2c   : > { %v514_v43 = vmul.f32 %v3784_v13, %v513_v29  ;;  %v618_v48 = vsub.f32 1.0, %v617_v37  ;;  %v737_v42 = vmul.f32 %v3790_v40, %v4057_v59  ;;  %v763_v49 = vor.u32 1.1754944e-38, %v762_v33  ;;  %vm4154_vm7 = vmor %vm621_vm4, %vm622_vm15  ;;  %2296 = vmatpush.bf16.msrb.mxu0 %v3672_v63 }
  0x2d   : > { %v500_v46 = vadd.f32 %v3782_v9, %v499_v36  ;;  %v633_v51 = vsub.f32 1.0, %v632_v44  ;;  %vm742_vm0 = vweird.f32 %v3790_v40  ;;  %v4135_v52 = vadd.f32 1.0, %v4065_v62 }
  0x2e   : > { %v515_v50 = vadd.f32 %v3784_v13, %v514_v43  ;;  %v3792_v54 = vpop.eup %3791  ;;  %v619_v56 = vmul.f32 %v3786_v28, %v618_v48  ;;  %v738_v45 = vsub.f32 1.0, %v737_v42  ;;  %vm4139_vm1 = vcmp.eq.f32.partialorder %v760_v31, 8.507059e+37 }
  0x2f   : > { %v504_v55 = vsel %vm4121_vm14, %v3782_v9, %v500_v46  ;;  %v4144_v1 = vadd.f32 1.0, %v4075_v3  ;;  %v634_v9 = vmul.f32 %v3788_v35, %v633_v51  ;;  %v752_v12 = vmul.f32 %v3792_v54, %v4084_v8  ;;  %v3664_v51 = vld [vmem:[%s6091_s3 + $0x38] sm:$0xff] }
  0x30   : > { %v509_v6 = vsel %vm4077_vm2, %v4070_v0, %v504_v55  ;;  %v519_v62 = vsel %vm4129_vm6, %v3784_v13, %v515_v50  ;;  %v620_v0 = vadd.f32 %v3786_v28, %v619_v56  ;;  %vm4167_vm2 = vmor %vm636_vm5, %vm637_vm10  ;;  %v739_v57 = vmul.f32 %v3790_v40, %v738_v45  ;;  %v3704_v50 = vld [vmem:[%s6091_s3 + $0x178] sm:$0xff]  ;;  %2207 = vmatpush.bf16.msrb.mxu3 %v3664_v51 }
  0x31   : > { %v524_v3 = vsel %vm4086_vm3, %v523_v11, %v519_v62  ;;  %v4162_v14 = vmul.f32 %v509_v6, %v3991_v19  ;;  %v635_v16 = vadd.f32 %v3788_v35, %v634_v9  ;;  %vm6180_vm4 = vweird.f32 %v4057_v59  ;;  %1974 = vmatpush.bf16.msrb.mxu2 %v3704_v50  ;;  %v3663_v9 = vld [vmem:[%s6091_s3 + $0x30] sm:$0xff] }
  0x32   : > { %v4172_v13 = vmul.f32 %v524_v3, %v3994_v20  ;;  %vm4177_vm3 = vmor %vm6180_vm4, %vm742_vm0  ;;  %v753_v19 = vsub.f32 1.0, %v752_v12  ;;  %vm757_vm6 = vweird.f32 %v3792_v54  ;;  %v624_v11 = vsel %vm4154_vm7, %v3786_v28, %v620_v0 }
  0x33   : > { %v1042_v58 = vrot.slane %v4162_v14, 7  ;;  %v740_v17 = vadd.f32 %v3790_v40, %v739_v57  ;;  %3793 = vrcp.f32 %v4135_v52  ;;  %v629_v59 = vsel %vm4101_vm8, %v4094_v15, %v624_v11  ;;  %vm4211_vm8 = vmor %vm756_vm13, %vm757_vm6 }
  0x34   : > { %v1043_v20 = vrot.slane %v4172_v13, 7  ;;  %v639_v18 = vsel %vm4167_vm2, %v3788_v35, %v635_v16  ;;  %v754_v22 = vmul.f32 %v3792_v54, %v753_v19  ;;  %vm6183_vm5 = vcmask 1040384   ;;  %v275_v16 = vld [vmem:[%s3969_s10 + $0x58] sm:$0xff]  ;;  %2208 = vmatpush.bf16.msrb.mxu3 %v3663_v9 }
  0x35   : > { %v1122_v29 = vsel %vm6183_vm5, 0.0, %v1042_v58  ;;  %v644_v31 = vsel %vm4106_vm11, %v643_v27, %v639_v18  ;;  %v4195_v28 = vmul.f32 %v629_v59, %v3997_v21  ;;  %v744_v33 = vsel %vm4177_vm3, %v3790_v40, %v740_v17  ;;  %vm6184_vm9 = vmmov %vm6183_vm5 }
  0x36   : > { %v1044_v36 = vsel %vm6184_vm9, %v1042_v58, %v1043_v20  ;;  %v4201_v23 = vpack.c.bf16 %v4162_v14, %v1122_v29  ;;  %v4204_v15 = vmul.f32 %v644_v31, %v4004_v24  ;;  %v749_v35 = vsel %vm4113_vm12, %v748_v39, %v744_v33  ;;  %vm6188_vm11 = vmmov %vm6183_vm5  ;;  %v282_v31 = vld [vmem:[%s3969_s10 + $0x90] sm:$0xff] }
  0x37   : > { %v4216_v27 = vpack.c.bf16 %v4172_v13, %v1044_v36  ;;  %v1054_v30 = vrot.slane %v4195_v28, 7  ;;  %v755_v37 = vadd.f32 %v3792_v54, %v754_v22  ;;  %v4220_v40 = vmul.f32 %v749_v35, %v4007_v25  ;;  %vm6189_vm12 = vmmov %vm6183_vm5 }
  0x38   : > { %v1363_v24 = vunpack.c.l.b16 %v4201_v23  ;;  %v1055_v38 = vrot.slane %v4204_v15, 7  ;;  %vm861_vm10 = vweird.f32 %v4135_v52  ;;  %v865_v8 = vand.u32 2147483647, %v4135_v52  ;;  %vm6191_vm13 = vmmov %vm6183_vm5 }
  0x39   : > { %6187 = vst [vmem:[#allocation2_spill] sm:$0xff] %v4220_v40  ;;  %v3794_v39 = vpop.eup %3793  ;;  %v1366_v41 = vunpack.c.l.b16 %v4216_v27  ;;  %v1126_v43 = vsel %vm6188_vm11, 0.0, %v1054_v30  ;;  %v759_v44 = vsel %vm4211_vm8, %v3792_v54, %v755_v37  ;;  %v1066_v46 = vrot.slane %v4220_v40, 7  ;;  %v3696_v54 = vld [vmem:[%s6091_s3 + $0x138] sm:$0xff]  ;;  %vm6194_vm15 = vmmov %vm6183_vm5 }
  0x3a   : > { %v1056_v25 = vsel %vm6189_vm12, %v1054_v30, %v1055_v38  ;;  %v4233_v47 = vpack.c.bf16 %v4195_v28, %v1126_v43  ;;  %v764_v48 = vsel %vm4139_vm1, %v763_v49, %v759_v44  ;;  %v857_v42 = vmul.f32 %v3794_v39, %v4135_v52  ;;  %1885 = vmatpush.bf16.msrb.mxu1 %v3696_v54  ;;  %v283_v37 = vld [vmem:[%s3969_s10 + $0x98] sm:$0xff]  ;;  %vm6202_vm4 = vmmov %vm6183_vm5 }
  0x3b   : > { %v4247_v55 = vpack.c.b16 %v1366_v41, %v1363_v24  ;;  %v4250_v56 = vpack.c.bf16 %v4204_v15, %v1056_v25  ;;  %v4253_v49 = vmul.f32 %v764_v48, %v4010_v26  ;;  %v1130_v45 = vsel %vm6191_vm13, 0.0, %v1066_v46  ;;  %v3703_v26 = vld [vmem:[%s6091_s3 + $0x170] sm:$0xff]  ;;  %v291_v25 = vld [vmem:[%s3969_s10 + $0xd8] sm:$0xff]  ;;  %vm6213_vm11 = vmmov %vm6202_vm4 }
  0x3c   : > { %v1387_v6 = vunpack.c.l.b16 %v4233_v47  ;;  %v4261_v62 = vpack.c.bf16 %v4220_v40, %v1130_v45  ;;  %v858_v7 = vsub.f32 1.0, %v857_v42  ;;  %vm862_vm14 = vweird.f32 %v3794_v39  ;;  %1975 = vmatpush.bf16.msrb.mxu2 %v3703_v26  ;;  %v290_v24 = vld [vmem:[%s3969_s10 + $0xd0] sm:$0xff] }
  0x3d   : > { %6190 = vst [vmem:[#allocation3_spill] sm:$0xff] %v4253_v49  ;;  %1804 = vmatmul.bf16.vlgmr.msra.gmra.mxu0 %v4247_v55  ;;  %v1390_v12 = vunpack.c.l.b16 %v4250_v56  ;;  %v1067_v3 = vrot.slane %v4253_v49, 7  ;;  %v867_v0 = vand.u32 2147483648, %v4135_v52  ;;  %3795 = vrcp.f32 %v4144_v1  ;;  %vm4285_vm0 = vmor %vm861_vm10, %vm862_vm14 }
  0x3e   : > { %6192 = vst [vmem:[#allocation4_spill] sm:$0xff] %v4261_v62  ;;  %v859_v57 = vmul.f32 %v3794_v39, %v858_v7  ;;  %vm4289_vm1 = vcmp.eq.f32.partialorder %v865_v8, 8.507059e+37  ;;  %v1411_v20 = vunpack.c.l.b16 %v4261_v62  ;;  %v4299_v52 = vadd.f32 %v3974_v4, %v4060_v60 }
  0x3f   : > { %v4279_v10 = vpack.c.b16 %v1390_v12, %v1387_v6  ;;  %v1068_v19 = vsel %vm6194_vm15, %v1066_v46, %v1067_v3  ;;  %v868_v11 = vor.u32 1.1754944e-38, %v867_v0  ;;  %v3239_v18 = vmul.f32 -1.442695, %v4275_v5 }
  0x40   : > { %v4294_v17 = vpack.c.bf16 %v4253_v49, %v1068_v19  ;;  %v860_v59 = vadd.f32 %v3794_v39, %v859_v57  ;;  %v311_v22 = vmul.f32 %v3958_v2, %v275_v16  ;;  %v4306_v29 = vadd.f32 %v3974_v4, %v4063_v61 }
  0x41   : > { %6193 = vst [vmem:[#allocation5_spill] sm:$0xff] %v4279_v10  ;;  %1824 = vmatmul.bf16.vlgmr.msra.gmra.mxu1 %v4279_v10  ;;  %v880_v35 = vand.u32 2147483647, %v4144_v1  ;;  %v3240_v60 = vmul.f32 -1.442695, %v4299_v52  ;;  %3797 = vpow2.f32 %v3239_v18  ;;  %v318_v41 = vmul.f32 %v3958_v2, %v282_v31 }
  0x42   : > { %6199 = vst [vmem:[#allocation6_spill] sm:$0xff] %v4294_v17  ;;  %v1414_v33 = vunpack.c.l.b16 %v4294_v17  ;;  %v864_v36 = vsel %vm4285_vm0, %v3794_v39, %v860_v59  ;;  %v4317_v30 = vadd.f32 %v3974_v4, %v311_v22  ;;  %v3247_v61 = vmul.f32 -1.442695, %v4306_v29 }
  0x43   : > { %v869_v21 = vsel %vm4289_vm1, %v868_v11, %v864_v36  ;;  %v3796_v38 = vpop.eup %3795  ;;  %3799 = vpow2.f32 %v3240_v60  ;;  %v882_v44 = vand.u32 2147483648, %v4144_v1  ;;  %v319_v42 = vmul.f32 %v3958_v2, %v283_v37 }
  0x44   : > { %v4322_v8 = vpack.c.b16 %v1414_v33, %v1411_v20  ;;  %v4325_v39 = vmul.f32 %v869_v21, %v4018_v32  ;;  %v872_v43 = vmul.f32 %v3796_v38, %v4144_v1  ;;  %3801 = vpow2.f32 %v3247_v61 }
  0x45   : > { %v3248_v46 = vmul.f32 -1.442695, %v4317_v30  ;;  %v4336_v32 = vadd.f32 %v3974_v4, %v318_v41  ;;  %v326_v50 = vmul.f32 %v3958_v2, %v290_v24  ;;  %vm876_vm7 = vweird.f32 %v4144_v1 }
  0x46   : > { %6200 = vst [vmem:[#allocation7_spill] sm:$0xff] %v4322_v8  ;;  %1844 = vmatmul.bf16.vlgmr.msra.gmra.mxu2 %v4322_v8  ;;  %v1078_v48 = vrot.slane %v4325_v39, 7  ;;  %v873_v51 = vsub.f32 1.0, %v872_v43  ;;  %vm877_vm2 = vweird.f32 %v3796_v38  ;;  %v4342_v45 = vadd.f32 %v3974_v4, %v319_v42  ;;  %v269_v43 = vld [vmem:[%s3969_s10 + $0x28] sm:$0xff]  ;;  %v270_v8 = vld [vmem:[%s3969_s10 + $0x30] sm:$0xff] }
  0x47   : > { %6201 = vst [vmem:[#allocation8_spill] sm:$0xff] %v4325_v39  ;;  %3803 = vpow2.f32 %v3248_v46  ;;  %v3255_v63 = vmul.f32 -1.442695, %v4336_v32  ;;  %v327_v6 = vmul.f32 %v3958_v2, %v291_v25  ;;  %v3798_v7 = vpop.eup %3797  ;;  %vm4346_vm3 = vmor %vm876_vm7, %vm877_vm2  ;;  %vm4350_vm6 = vcmp.eq.f32.partialorder %v880_v35, 8.507059e+37 }
  0x48   : > { %v1134_v54 = vsel %vm6202_vm4, 0.0, %v1078_v48  ;;  %v874_v26 = vmul.f32 %v3796_v38, %v873_v51  ;;  %v883_v3 = vor.u32 1.1754944e-38, %v882_v44  ;;  %v4354_v0 = vadd.f32 1.0, %v3798_v7 }
  0x49   : > { %v3800_v9 = vpop.eup %3799  ;;  %v4357_v57 = vadd.f32 %v3974_v4, %v326_v50  ;;  %v4360_v58 = vpack.c.bf16 %v4325_v39, %v1134_v54  ;;  %3805 = vpow2.f32 %v3255_v63  ;;  %v3256_v11 = vmul.f32 -1.442695, %v4342_v45 }
  0x4a   : > { %v3802_v16 = vpop.eup %3801  ;;  %v875_v19 = vadd.f32 %v3796_v38, %v874_v26  ;;  %v4362_v53 = vadd.f32 1.0, %v3800_v9  ;;  %3807 = vrcp.f32 %v4354_v0  ;;  %v4367_v20 = vadd.f32 %v3974_v4, %v327_v6 }
  0x4b   : > { %6207 = vst [vmem:[#allocation9_spill] sm:$0xff] %v4360_v58  ;;  %v535_v22 = vand.u32 2147483647, %v4354_v0  ;;  %v537_v31 = vand.u32 2147483648, %v4354_v0  ;;  %v3263_v60 = vmul.f32 -1.442695, %v4357_v57  ;;  %v1435_v61 = vunpack.c.l.b16 %v4360_v58 }
  0x4c   : > { %v879_v18 = vsel %vm4346_vm3, %v3796_v38, %v875_v19  ;;  %3809 = vrcp.f32 %v4362_v53  ;;  %v550_v36 = vand.u32 2147483647, %v4362_v53  ;;  %v552_v35 = vand.u32 2147483648, %v4362_v53  ;;  %v268_v38 = vld [vmem:[%s3969_s10 + $0x20] sm:$0xff] }
  0x4d   : > { %v3804_v59 = vpop.eup %3803  ;;  %v884_v33 = vsel %vm4350_vm6, %v883_v3, %v879_v18  ;;  %v4383_v37 = vadd.f32 1.0, %v3802_v16  ;;  %vm531_vm5 = vweird.f32 %v4354_v0  ;;  %vm546_vm9 = vweird.f32 %v4362_v53 }
  0x4e   : > { %v4380_v21 = vmul.f32 %v884_v33, %v4022_v34  ;;  %v4385_v24 = vadd.f32 1.0, %v3804_v59  ;;  %3811 = vpow2.f32 %v3256_v11  ;;  %v4391_v41 = vmul.f32 -1.442695, %v4367_v20 }
  0x4f   : > { %v3806_v44 = vpop.eup %3805  ;;  %vm4395_vm8 = vcmp.eq.f32.partialorder %v535_v22, 8.507059e+37  ;;  %v538_v25 = vor.u32 1.1754944e-38, %v537_v31  ;;  %v553_v42 = vor.u32 1.1754944e-38, %v552_v35  ;;  %3813 = vrcp.f32 %v4383_v37 }
  0x50   : > { %6208 = vst [vmem:[#allocation10_spill] sm:$0xff] %v4380_v21  ;;  %v1079_v34 = vrot.slane %v4380_v21, 7  ;;  %v3808_v50 = vpop.eup %3807  ;;  %vm4400_vm10 = vcmp.eq.f32.partialorder %v550_v36, 8.507059e+37  ;;  %v655_v54 = vand.u32 2147483647, %v4383_v37  ;;  %v657_v63 = vand.u32 2147483648, %v4383_v37 }
  0x51   : > { %3815 = vrcp.f32 %v4385_v24  ;;  %v304_v6 = vmul.f32 %v3958_v2, %v268_v38  ;;  %v527_v9 = vmul.f32 %v3808_v50, %v4354_v0  ;;  %v670_v12 = vand.u32 2147483647, %v4385_v24 }
  0x52   : > { %v3810_v7 = vpop.eup %3809  ;;  %v1080_v26 = vsel %vm6213_vm11, %v1078_v48, %v1079_v34  ;;  %v4412_v1 = vmul.f32 %v3958_v2, %v269_v43  ;;  %vm651_vm12 = vweird.f32 %v4383_v37  ;;  %vm666_vm13 = vweird.f32 %v4385_v24 }
  0x53   : > { %v4415_v3 = vpack.c.bf16 %v4380_v21, %v1080_v26  ;;  %v542_v16 = vmul.f32 %v3810_v7, %v4362_v53  ;;  %v528_v19 = vsub.f32 1.0, %v527_v9  ;;  %vm532_vm14 = vweird.f32 %v3808_v50 }
  0x54   : > { %v672_v48 = vand.u32 2147483648, %v4385_v24  ;;  %v4421_v11 = vadd.f32 1.0, %v3806_v44  ;;  %v3812_v59 = vpop.eup %3811  ;;  %vm547_vm15 = vweird.f32 %v3810_v7  ;;  %vm4424_vm0 = vcmp.eq.f32.partialorder %v655_v54, 8.507059e+37  ;;  %vm4440_vm7 = vmor %vm531_vm5, %vm532_vm14 }
  0x55   : > { %6214 = vst [vmem:[#allocation11_spill] sm:$0xff] %v4415_v3  ;;  %v1438_v18 = vunpack.c.l.b16 %v4415_v3  ;;  %v543_v22 = vsub.f32 1.0, %v542_v16  ;;  %v658_v33 = vor.u32 1.1754944e-38, %v657_v63  ;;  %v3814_v36 = vpop.eup %3813  ;;  %v529_v35 = vmul.f32 %v3808_v50, %v528_v19  ;;  %vm4448_vm2 = vmor %vm546_vm9, %vm547_vm15 }
  0x56   : > { %vm4428_vm1 = vcmp.eq.f32.partialorder %v670_v12, 8.507059e+37  ;;  %v4432_v43 = vadd.f32 1.0, %v3812_v59  ;;  %3817 = vrcp.f32 %v4421_v11  ;;  %v647_v26 = vmul.f32 %v3814_v36, %v4383_v37 }
  0x57   : > { %v3816_v44 = vpop.eup %3815  ;;  %v4435_v34 = vpack.c.b16 %v1438_v18, %v1435_v61  ;;  %v544_v63 = vmul.f32 %v3810_v7, %v543_v22  ;;  %3819 = vpow2.f32 %v3263_v60  ;;  %v530_v9 = vadd.f32 %v3808_v50, %v529_v35 }
  0x58   : > { %v662_v61 = vmul.f32 %v3816_v44, %v4385_v24  ;;  %v673_v16 = vor.u32 1.1754944e-38, %v672_v48  ;;  %v4454_v0 = vadd.f32 %v3974_v4, %v304_v6  ;;  %v648_v59 = vsub.f32 1.0, %v647_v26 }
  0x59   : > { %6219 = vst [vmem:[#allocation12_spill] sm:$0xff] %v4435_v34  ;;  %1864 = vmatmul.bf16.vlgmr.msra.gmra.mxu3 %v4435_v34  ;;  %v545_v19 = vadd.f32 %v3810_v7, %v544_v63  ;;  %vm652_vm4 = vweird.f32 %v3814_v36  ;;  %v775_v60 = vand.u32 2147483647, %v4421_v11  ;;  %v534_v53 = vsel %vm4440_vm7, %v3808_v50, %v530_v9 }
  0x5a   : > { %v663_v18 = vsub.f32 1.0, %v662_v61  ;;  %vm667_vm3 = vweird.f32 %v3816_v44  ;;  %3821 = vrcp.f32 %v4432_v43  ;;  %v539_v48 = vsel %vm4395_vm8, %v538_v25, %v534_v53  ;;  %vm4473_vm5 = vmor %vm651_vm12, %vm652_vm4 }
  0x5b   : > { %v549_v6 = vsel %vm4448_vm2, %v3810_v7, %v545_v19  ;;  %v649_v22 = vmul.f32 %v3814_v36, %v648_v59  ;;  %vm771_vm6 = vweird.f32 %v4421_v11  ;;  %v4469_v54 = vmul.f32 %v539_v48, %v4275_v5  ;;  %vm4484_vm9 = vmor %vm666_vm13, %vm667_vm3 }
  0x5c   : > { %v3818_v35 = vpop.eup %3817  ;;  %v554_v63 = vsel %vm4400_vm10, %v553_v42, %v549_v6  ;;  %v664_v46 = vmul.f32 %v3816_v44, %v663_v18  ;;  %v777_v25 = vand.u32 2147483648, %v4421_v11  ;;  %vm4489_vm8 = vcmp.eq.f32.partialorder %v775_v60, 8.507059e+37 }
  0x5d   : > { %v3820_v7 = vpop.eup %3819  ;;  %v4479_v26 = vmul.f32 %v554_v63, %v4299_v52  ;;  %v650_v9 = vadd.f32 %v3814_v36, %v649_v22  ;;  %v767_v37 = vmul.f32 %v3818_v35, %v4421_v11  ;;  %vm786_vm10 = vweird.f32 %v4432_v43 }
  0x5e   : > { %v1045_v51 = vrot.slane %v4469_v54, 7  ;;  %v665_v52 = vadd.f32 %v3816_v44, %v664_v46  ;;  %vm772_vm11 = vweird.f32 %v3818_v35  ;;  %v790_v12 = vand.u32 2147483647, %v4432_v43 }
  0x5f   : > { %v1046_v24 = vrot.slane %v4479_v26, 7  ;;  %v654_v61 = vsel %vm4473_vm5, %v3814_v36, %v650_v9  ;;  %v768_v19 = vsub.f32 1.0, %v767_v37  ;;  %3823 = vpow2.f32 %v4391_v41  ;;  %vm4530_vm14 = vmor %vm771_vm6, %vm772_vm11 }
  0x60   : > { %v4500_v59 = vpop.eup %3821  ;;  %vm6230_vm12 = vcmask 1040384   ;;  %v659_v53 = vsel %vm4424_vm0, %v658_v33, %v654_v61  ;;  %v669_v18 = vsel %vm4484_vm9, %v3816_v44, %v665_v52  ;;  %v792_v48 = vand.u32 2147483648, %v4432_v43 }
  0x61   : > { %v1123_v60 = vsel %vm6230_vm12, 0.0, %v1045_v51  ;;  %vm6231_vm13 = vmmov %vm6230_vm12  ;;  %v674_v41 = vsel %vm4428_vm1, %v673_v16, %v669_v18  ;;  %v4515_v36 = vmul.f32 %v659_v53, %v4306_v29  ;;  %v769_v33 = vmul.f32 %v3818_v35, %v768_v19  ;;  %v3702_v53 = vld [vmem:[%s6091_s3 + $0x168] sm:$0xff] }
  0x62   : > { %v1047_v6 = vsel %vm6231_vm13, %v1045_v51, %v1046_v24  ;;  %v4510_v22 = vpack.c.bf16 %v4469_v54, %v1123_v60  ;;  %v4521_v31 = vmul.f32 %v674_v41, %v4317_v30  ;;  %v782_v44 = vmul.f32 %v4500_v59, %v4432_v43  ;;  %vm6236_vm0 = vmmov %vm6230_vm12  ;;  %v3695_v60 = vld [vmem:[%s6091_s3 + $0x130] sm:$0xff]  ;;  %1976 = vmatpush.bf16.msrb.mxu2 %v3702_v53 }
  0x63   : > { %v4518_v63 = vpack.c.bf16 %v4479_v26, %v1047_v6  ;;  %v1057_v46 = vrot.slane %v4515_v36, 7  ;;  %v778_v38 = vor.u32 1.1754944e-38, %v777_v25  ;;  %vm4534_vm15 = vcmp.eq.f32.partialorder %v790_v12, 8.507059e+37  ;;  %vm6237_vm7 = vmmov %vm6236_vm0  ;;  %v3671_v41 = vld [vmem:[%s6091_s3 + $0x70] sm:$0xff]  ;;  %1886 = vmatpush.bf16.msrb.mxu1 %v3695_v60  ;;  %v284_v60 = vld [vmem:[%s3969_s10 + $0xa0] sm:$0xff] }
  0x64   : > { %v1369_v50 = vunpack.c.l.b16 %v4510_v22  ;;  %v1058_v9 = vrot.slane %v4521_v31, 7  ;;  %v770_v5 = vadd.f32 %v3818_v35, %v769_v33  ;;  %v783_v37 = vsub.f32 1.0, %v782_v44  ;;  %2297 = vmatpush.bf16.msrb.mxu0 %v3671_v41  ;;  %vm6242_vm3 = vmmov %vm6236_vm0 }
  0x65   : > { %v1372_v30 = vunpack.c.l.b16 %v4518_v63  ;;  %v3824_v51 = vpop.eup %3823  ;;  %v1127_v52 = vsel %vm6236_vm0, 0.0, %v1057_v46  ;;  %vm787_vm1 = vweird.f32 %v4500_v59  ;;  %v793_v11 = vor.u32 1.1754944e-38, %v792_v48  ;;  %vm6247_vm9 = vmmov %vm6236_vm0 }
  0x66   : > { %v4542_v24 = vadd.f32 1.0, %v3820_v7  ;;  %v1059_v25 = vsel %vm6237_vm7, %v1057_v46, %v1058_v9  ;;  %v4548_v12 = vpack.c.bf16 %v4515_v36, %v1127_v52  ;;  %v774_v19 = vsel %vm4530_vm14, %v3818_v35, %v770_v5  ;;  %v3662_v7 = vld [vmem:[%s6091_s3 + $0x28] sm:$0xff]  ;;  %vm4578_vm2 = vmor %vm786_vm10, %vm787_vm1  ;;  %v3661_v5 = vld [vmem:[%s6091_s3 + $0x20] sm:$0xff] }
  0x67   : > { %v4544_v61 = vpack.c.b16 %v1372_v30, %v1369_v50  ;;  %v4562_v18 = vpack.c.bf16 %v4521_v31, %v1059_v25  ;;  %v779_v48 = vsel %vm4489_vm8, %v778_v38, %v774_v19  ;;  %v784_v35 = vmul.f32 %v4500_v59, %v783_v37  ;;  %v3694_v50 = vld [vmem:[%s6091_s3 + $0x128] sm:$0xff]  ;;  %2209 = vmatpush.bf16.msrb.mxu3 %v3662_v7  ;;  %v3701_v38 = vld [vmem:[%s6091_s3 + $0x160] sm:$0xff] }
  0x68   : > { %v4567_v6 = vadd.f32 1.0, %v3824_v51  ;;  %v1393_v33 = vunpack.c.l.b16 %v4548_v12  ;;  %v4583_v42 = vmul.f32 %v779_v48, %v4336_v32  ;;  %3825 = vrcp.f32 %v4542_v24  ;;  %v3670_v37 = vld [vmem:[%s6091_s3 + $0x68] sm:$0xff]  ;;  %v276_v25 = vld [vmem:[%s3969_s10 + $0x60] sm:$0xff]  ;;  %1887 = vmatpush.bf16.msrb.mxu1 %v3694_v50  ;;  %1977 = vmatpush.bf16.msrb.mxu2 %v3701_v38 }
  0x69   : > { %1809 = vmatmul.bf16.gmra.mxu0 %v4544_v61  ;;  %v4591_v46 = vadd.f32 %v3974_v4, %v4412_v1  ;;  %v1396_v43 = vunpack.c.l.b16 %v4562_v18  ;;  %v785_v29 = vadd.f32 %v4500_v59, %v784_v35  ;;  %v895_v32 = vand.u32 2147483647, %v4542_v24  ;;  %v277_v19 = vld [vmem:[%s3969_s10 + $0x68] sm:$0xff] }
  0x6a   : > { %6240 = vst [vmem:[#allocation13_spill] sm:$0xff] %v4583_v42  ;;  %v3241_v30 = vmul.f32 -1.442695, %v4454_v0  ;;  %v1069_v1 = vrot.slane %v4583_v42, 7  ;;  %v897_v9 = vand.u32 2147483648, %v4542_v24  ;;  %3827 = vrcp.f32 %v4567_v6  ;;  %2298 = vmatpush.bf16.msrb.mxu0 %v3670_v37 }
  0x6b   : > { %v4609_v51 = vpack.c.b16 %v1396_v43, %v1393_v33  ;;  %v789_v52 = vsel %vm4578_vm2, %v4500_v59, %v785_v29  ;;  %vm891_vm4 = vweird.f32 %v4542_v24  ;;  %vm906_vm6 = vweird.f32 %v4567_v6  ;;  %2210 = vmatpush.bf16.msrb.mxu3 %v3661_v5 }
  0x6c   : > { %v794_v53 = vsel %vm4534_vm15, %v793_v11, %v789_v52  ;;  %v1131_v7 = vsel %vm6242_vm3, 0.0, %v1069_v1  ;;  %v910_v48 = vand.u32 2147483647, %v4567_v6  ;;  %vm4630_vm5 = vcmp.eq.f32.partialorder %v895_v32, 8.507059e+37  ;;  %v285_v11 = vld [vmem:[%s3969_s10 + $0xa8] sm:$0xff] }
  0x6d   : > { %6241 = vst [vmem:[#allocation14_spill] sm:$0xff] %v4609_v51  ;;  %1829 = vmatmul.bf16.gmra.mxu1 %v4609_v51  ;;  %v4625_v59 = vmul.f32 %v794_v53, %v4342_v45  ;;  %v4628_v35 = vpack.c.bf16 %v4583_v42, %v1131_v7  ;;  %3829 = vpow2.f32 %v3241_v30  ;;  %v3242_v16 = vmul.f32 -1.442695, %v4591_v46  ;;  %v279_v51 = vld [vmem:[%s3969_s10 + $0x78] sm:$0xff] }
  0x6e   : > { %v3826_v33 = vpop.eup %3825  ;;  %v898_v44 = vor.u32 1.1754944e-38, %v897_v9  ;;  %v312_v50 = vmul.f32 %v3958_v2, %v276_v25  ;;  %v313_v45 = vmul.f32 %v3958_v2, %v277_v19  ;;  %v320_v43 = vmul.f32 %v3958_v2, %v284_v60 }
  0x6f   : > { %6243 = vst [vmem:[#allocation15_spill] sm:$0xff] %v4625_v59  ;;  %v1070_v29 = vrot.slane %v4625_v59, 7  ;;  %v1417_v32 = vunpack.c.l.b16 %v4628_v35  ;;  %v887_v38 = vmul.f32 %v3826_v33, %v4542_v24  ;;  %v912_v30 = vand.u32 2147483648, %v4567_v6 }
  0x70   : > { %6244 = vst [vmem:[#allocation16_spill] sm:$0xff] %v4628_v35  ;;  %v3828_v52 = vpop.eup %3827  ;;  %3831 = vpow2.f32 %v3242_v16  ;;  %v4644_v9 = vadd.f32 %v3974_v4, %v312_v50  ;;  %v4647_v5 = vadd.f32 %v3974_v4, %v313_v45  ;;  %v321_v37 = vmul.f32 %v3958_v2, %v285_v11  ;;  %v4707_v11 = vld [vmem:[%s6089_s1] ss:$0 sm:$0xff] }
  0x71   : > { %v1071_v25 = vsel %vm6247_vm9, %v1069_v1, %v1070_v29  ;;  %v888_v19 = vsub.f32 1.0, %v887_v38  ;;  %vm892_vm8 = vweird.f32 %v3826_v33  ;;  %v902_v60 = vmul.f32 %v3828_v52, %v4567_v6 }
  0x72   : > { %v4653_v53 = vpack.c.bf16 %v4625_v59, %v1071_v25  ;;  %v3249_v7 = vmul.f32 -1.442695, %v4644_v9  ;;  %v3250_v16 = vmul.f32 -1.442695, %v4647_v5  ;;  %v4658_v50 = vadd.f32 %v3974_v4, %v320_v43  ;;  %vm4666_vm11 = vmor %vm891_vm4, %vm892_vm8 }
  0x73   : > { %v3830_v45 = vpop.eup %3829  ;;  %v889_v34 = vmul.f32 %v3826_v33, %v888_v19  ;;  %v903_v3 = vsub.f32 1.0, %v902_v60  ;;  %vm907_vm10 = vweird.f32 %v3828_v52  ;;  %v4661_v2 = vadd.f32 %v3974_v4, %v321_v37  ;;  %vm6263_vm4 = vmmov %vm6236_vm0 }
  0x74   : > { %6248 = vst [vmem:[#allocation17_spill] sm:$0xff] %v4653_v53  ;;  %v1420_v1 = vunpack.c.l.b16 %v4653_v53  ;;  %vm4670_vm12 = vcmp.eq.f32.partialorder %v910_v48, 8.507059e+37  ;;  %v4674_v43 = vadd.f32 1.0, %v3830_v45  ;;  %3833 = vpow2.f32 %v3249_v7  ;;  %vm4680_vm13 = vmor %vm906_vm6, %vm907_vm10 }
  0x75   : > { %v890_v38 = vadd.f32 %v3826_v33, %v889_v34  ;;  %v904_v25 = vmul.f32 %v3828_v52, %v903_v3  ;;  %v913_v4 = vor.u32 1.1754944e-38, %v912_v30  ;;  %3835 = vpow2.f32 %v3250_v16  ;;  %v292_v34 = vld [vmem:[%s3969_s10 + $0xe0] sm:$0xff] }
  0x76   : > { %v3832_v37 = vpop.eup %3831  ;;  %v4676_v19 = vpack.c.b16 %v1420_v1, %v1417_v32  ;;  %3837 = vrcp.f32 %v4674_v43  ;;  %v3257_v48 = vmul.f32 -1.442695, %v4658_v50  ;;  %v3258_v60 = vmul.f32 -1.442695, %v4661_v2 }
  0x77   : > { %v894_v3 = vsel %vm4666_vm11, %v3826_v33, %v890_v38  ;;  %v905_v30 = vadd.f32 %v3828_v52, %v904_v25  ;;  %v4690_v32 = vadd.f32 1.0, %v3832_v37  ;;  %v565_v6 = vand.u32 2147483647, %v4674_v43  ;;  %v293_v33 = vld [vmem:[%s3969_s10 + $0xe8] sm:$0xff] }
  0x78   : > { %6253 = vst [vmem:[#allocation18_spill] sm:$0xff] %v4676_v19  ;;  %1849 = vmatmul.bf16.gmra.mxu2 %v4676_v19  ;;  %v899_v7 = vsel %vm4630_vm5, %v898_v44, %v894_v3  ;;  %v567_v16 = vand.u32 2147483648, %v4674_v43  ;;  %v328_v38 = vmul.f32 %v4707_v11, %v292_v34  ;;  %vm561_vm14 = vweird.f32 %v4674_v43 }
  0x79   : > { %v909_v45 = vsel %vm4680_vm13, %v3828_v52, %v905_v30  ;;  %v4700_v1 = vmul.f32 %v899_v7, %v4357_v57  ;;  %3839 = vrcp.f32 %v4690_v32  ;;  %v580_v52 = vand.u32 2147483647, %v4690_v32 }
  0x7a   : > { %v3834_v41 = vpop.eup %3833  ;;  %v914_v44 = vsel %vm4670_vm12, %v913_v4, %v909_v45  ;;  %3841 = vpow2.f32 %v3257_v48  ;;  %vm4718_vm15 = vcmp.eq.f32.partialorder %v565_v6, 8.507059e+37  ;;  %v568_v4 = vor.u32 1.1754944e-38, %v567_v16 }
  0x7b   : > { %6256 = vst [vmem:[#allocation19_spill] sm:$0xff] %v4700_v1  ;;  %v3836_v57 = vpop.eup %3835  ;;  %v4715_v25 = vmul.f32 %v914_v44, %v4367_v20  ;;  %v1081_v37 = vrot.slane %v4700_v1, 7  ;;  %v4722_v34 = vadd.f32 1.0, %v3834_v41  ;;  %3843 = vpow2.f32 %v3258_v60 }
  0x7c   : > { %v3838_v29 = vpop.eup %3837  ;;  %v582_v3 = vand.u32 2147483648, %v4690_v32  ;;  %v4725_v30 = vadd.f32 1.0, %v3836_v57  ;;  %v329_v48 = vmul.f32 %v4707_v11, %v293_v33  ;;  %vm576_vm1 = vweird.f32 %v4690_v32 }
  0x7d   : > { %6257 = vst [vmem:[#allocation20_spill] sm:$0xff] %v4715_v25  ;;  %v1082_v20 = vrot.slane %v4715_v25, 7  ;;  %v1135_v7 = vsel %vm6236_vm0, 0.0, %v1081_v37  ;;  %v557_v6 = vmul.f32 %v3838_v29, %v4674_v43  ;;  %vm562_vm7 = vweird.f32 %v3838_v29 }
  0x7e   : > { %v4733_v45 = vpack.c.bf16 %v4700_v1, %v1135_v7  ;;  %vm4735_vm2 = vcmp.eq.f32.partialorder %v580_v52, 8.507059e+37  ;;  %3845 = vrcp.f32 %v4722_v34  ;;  %v685_v16 = vand.u32 2147483647, %v4722_v34  ;;  %vm4762_vm5 = vmor %vm561_vm14, %vm562_vm7 }
  0x7f   : > { %v3840_v33 = vpop.eup %3839  ;;  %v1083_v41 = vsel %vm6263_vm4, %v1081_v37, %v1082_v20  ;;  %v558_v44 = vsub.f32 1.0, %v557_v6  ;;  %v687_v57 = vand.u32 2147483648, %v4722_v34  ;;  %3847 = vrcp.f32 %v4725_v30  ;;  %v4753_v37 = vld [vmem:[%s6090_s2] ss:$0 sm:$0xff] }
  0x80   : > { %6260 = vst [vmem:[#allocation21_spill] sm:$0xff] %v4733_v45  ;;  %v3842_v19 = vpop.eup %3841  ;;  %v4745_v7 = vpack.c.bf16 %v4715_v25, %v1083_v41  ;;  %v1441_v52 = vunpack.c.l.b16 %v4733_v45  ;;  %v572_v1 = vmul.f32 %v3840_v33, %v4690_v32  ;;  %v583_v58 = vor.u32 1.1754944e-38, %v582_v3 }
  0x81   : > { %v3844_v21 = vpop.eup %3843  ;;  %v559_v39 = vmul.f32 %v3838_v29, %v558_v44  ;;  %vm577_vm3 = vweird.f32 %v3840_v33  ;;  %vm681_vm6 = vweird.f32 %v4722_v34  ;;  %v4756_v20 = vadd.f32 %v4753_v37, %v328_v38 }
  0x82   : > { %6264 = vst [vmem:[#allocation22_spill] sm:$0xff] %v4745_v7  ;;  %v1444_v6 = vunpack.c.l.b16 %v4745_v7  ;;  %v573_v41 = vsub.f32 1.0, %v572_v1  ;;  %v688_v44 = vor.u32 1.1754944e-38, %v687_v57  ;;  %v700_v45 = vand.u32 2147483647, %v4725_v30  ;;  %vm4787_vm10 = vmor %vm576_vm1, %vm577_vm3 }
  0x83   : > { %v560_v25 = vadd.f32 %v3838_v29, %v559_v39  ;;  %vm4767_vm9 = vcmp.eq.f32.partialorder %v685_v16, 8.507059e+37  ;;  %vm696_vm8 = vweird.f32 %v4725_v30  ;;  %v702_v38 = vand.u32 2147483648, %v4725_v30  ;;  %vm6280_vm3 = vmmov %vm6236_vm0 }
  0x84   : > { %v4773_v7 = vadd.f32 1.0, %v3842_v19  ;;  %v3846_v43 = vpop.eup %3845  ;;  %v4775_v53 = vpack.c.b16 %v1444_v6, %v1441_v52  ;;  %v574_v35 = vmul.f32 %v3840_v33, %v573_v41  ;;  %v4777_v59 = vadd.f32 1.0, %v3844_v21 }
  0x85   : > { %v4780_v1 = vadd.f32 %v4753_v37, %v329_v48  ;;  %v3848_v39 = vpop.eup %3847  ;;  %v564_v16 = vsel %vm4762_vm5, %v3838_v29, %v560_v25  ;;  %v677_v19 = vmul.f32 %v3846_v43, %v4722_v34  ;;  %vm4792_vm11 = vcmp.eq.f32.partialorder %v700_v45, 8.507059e+37 }
  0x86   : > { %6269 = vst [vmem:[#allocation23_spill] sm:$0xff] %v4775_v53  ;;  %3849 = vrcp.f32 %v4773_v7  ;;  %1869 = vmatmul.bf16.gmra.mxu3 %v4775_v53  ;;  %v569_v21 = vsel %vm4718_vm15, %v568_v4, %v564_v16  ;;  %v575_v25 = vadd.f32 %v3840_v33, %v574_v35  ;;  %vm682_vm12 = vweird.f32 %v3846_v43  ;;  %v3692_v53 = vld [vmem:[%s6091_s3 + $0x118] sm:$0xff] }
  0x87   : > { %v692_v32 = vmul.f32 %v3848_v39, %v4725_v30  ;;  %v4802_v29 = vmul.f32 %v569_v21, %v4454_v0  ;;  %v678_v48 = vsub.f32 1.0, %v677_v19  ;;  %vm697_vm13 = vweird.f32 %v3848_v39  ;;  %vm4818_vm14 = vmor %vm681_vm6, %vm682_vm12 }
  0x88   : > { %v805_v45 = vand.u32 2147483647, %v4773_v7  ;;  %v579_v6 = vsel %vm4787_vm10, %v3840_v33, %v575_v25  ;;  %v807_v41 = vand.u32 2147483648, %v4773_v7  ;;  %3851 = vrcp.f32 %v4777_v59  ;;  %vm4827_vm1 = vmor %vm696_vm8, %vm697_vm13 }
  0x89   : > { %v693_v3 = vsub.f32 1.0, %v692_v32  ;;  %v584_v35 = vsel %vm4735_vm2, %v583_v58, %v579_v6  ;;  %v1048_v24 = vrot.slane %v4802_v29, 7  ;;  %v679_v4 = vmul.f32 %v3846_v43, %v678_v48  ;;  %vm6287_vm8 = vmmov %vm6236_vm0 }
  0x8a   : > { %v703_v0 = vor.u32 1.1754944e-38, %v702_v38  ;;  %v4813_v16 = vmul.f32 %v584_v35, %v4591_v46  ;;  %vm801_vm15 = vweird.f32 %v4773_v7  ;;  %v808_v19 = vor.u32 1.1754944e-38, %v807_v41  ;;  %vm6288_vm10 = vmmov %vm6236_vm0 }
  0x8b   : > { %v694_v57 = vmul.f32 %v3848_v39, %v693_v3  ;;  %v1124_v58 = vsel %vm6236_vm0, 0.0, %v1048_v24  ;;  %v680_v21 = vadd.f32 %v3846_v43, %v679_v4  ;;  %vm4831_vm7 = vcmp.eq.f32.partialorder %v805_v45, 8.507059e+37  ;;  %vm6296_vm12 = vmmov %vm6236_vm0 }
  0x8c   : > { %v3850_v60 = vpop.eup %3849  ;;  %v820_v38 = vand.u32 2147483647, %v4777_v59  ;;  %v822_v25 = vand.u32 2147483648, %v4777_v59  ;;  %v1049_v32 = vrot.slane %v4813_v16, 7  ;;  %v4839_v48 = vpack.c.bf16 %v4802_v29, %v1124_v58  ;;  %vm6298_vm13 = vmmov %vm6236_vm0 }
  0x8d   : > { %v695_v6 = vadd.f32 %v3848_v39, %v694_v57  ;;  %v797_v30 = vmul.f32 %v3850_v60, %v4773_v7  ;;  %v684_v3 = vsel %vm4818_vm14, %v3846_v43, %v680_v21  ;;  %vm802_vm2 = vweird.f32 %v3850_v60 }
  0x8e   : > { %vm816_vm4 = vweird.f32 %v4777_v59  ;;  %v823_v45 = vor.u32 1.1754944e-38, %v822_v25  ;;  %v3852_v41 = vpop.eup %3851  ;;  %v1050_v35 = vsel %vm6280_vm3, %v1048_v24, %v1049_v32  ;;  %v1375_v4 = vunpack.c.l.b16 %v4839_v48 }
  0x8f   : > { %v689_v58 = vsel %vm4767_vm9, %v688_v44, %v684_v3  ;;  %v699_v57 = vsel %vm4827_vm1, %v3848_v39, %v695_v6  ;;  %vm4851_vm6 = vcmp.eq.f32.partialorder %v820_v38, 8.507059e+37  ;;  %v4856_v43 = vpack.c.bf16 %v4813_v16, %v1050_v35  ;;  %vm4877_vm9 = vmor %vm801_vm15, %vm802_vm2  ;;  %v278_v3 = vld [vmem:[%s3969_s10 + $0x70] sm:$0xff] }
  0x90   : > { %v704_v33 = vsel %vm4792_vm11, %v703_v0, %v699_v57  ;;  %v4861_v24 = vmul.f32 %v689_v58, %v4644_v9  ;;  %v798_v21 = vsub.f32 1.0, %v797_v30  ;;  %v812_v39 = vmul.f32 %v3852_v41, %v4777_v59  ;;  %v271_v9 = vld [vmem:[%s3969_s10 + $0x38] sm:$0xff] }
  0x91   : > { %v4865_v44 = vmul.f32 %v704_v33, %v4647_v5  ;;  %vm817_vm5 = vweird.f32 %v3852_v41  ;;  %v3265_v46 = vmul.f32 -1.442695, %v4756_v20  ;;  %v1378_v38 = vunpack.c.l.b16 %v4856_v43 }
  0x92   : > { %6283 = vst [vmem:[#allocation24_spill] sm:$0xff] %v4861_v24  ;;  %v1060_v25 = vrot.slane %v4861_v24, 7  ;;  %v799_v52 = vmul.f32 %v3850_v60, %v798_v21  ;;  %v3266_v0 = vmul.f32 -1.442695, %v4780_v1  ;;  %v813_v6 = vsub.f32 1.0, %v812_v39  ;;  %vm4901_vm11 = vmor %vm816_vm4, %vm817_vm5 }
  0x93   : > { %6284 = vst [vmem:[#allocation25_spill] sm:$0xff] %v4865_v44  ;;  %v1061_v32 = vrot.slane %v4865_v44, 7  ;;  %3853 = vpow2.f32 %v3265_v46  ;;  %v306_v30 = vmul.f32 %v4707_v11, %v270_v8  ;;  %v4883_v35 = vpack.c.b16 %v1378_v38, %v1375_v4 }
  0x94   : > { %v1128_v58 = vsel %vm6287_vm8, 0.0, %v1060_v25  ;;  %v800_v57 = vadd.f32 %v3850_v60, %v799_v52  ;;  %3855 = vpow2.f32 %v3266_v0  ;;  %v814_v7 = vmul.f32 %v3852_v41, %v813_v6 }
  0x95   : > { %v1062_v33 = vsel %vm6288_vm10, %v1060_v25, %v1061_v32  ;;  %v4888_v21 = vpack.c.bf16 %v4861_v24, %v1128_v58  ;;  %v307_v42 = vmul.f32 %v4707_v11, %v271_v9  ;;  %1814 = vmatmul.bf16.gmra.mxu0 %v4883_v35  ;;  %v4906_v46 = vadd.f32 %v4753_v37, %v306_v30 }
  0x96   : > { %v4894_v8 = vpack.c.bf16 %v4865_v44, %v1062_v33  ;;  %v804_v4 = vsel %vm4877_vm9, %v3850_v60, %v800_v57  ;;  %v314_v38 = vmul.f32 %v4707_v11, %v278_v3  ;;  %v815_v0 = vadd.f32 %v3852_v41, %v814_v7  ;;  %v3669_v33 = vld [vmem:[%s6091_s3 + $0x60] sm:$0xff] }
  0x97   : > { %6289 = vst [vmem:[#allocation26_spill] sm:$0xff] %v4888_v21  ;;  %v1399_v25 = vunpack.c.l.b16 %v4888_v21  ;;  %v809_v52 = vsel %vm4831_vm7, %v808_v19, %v804_v4  ;;  %v4913_v60 = vadd.f32 %v4753_v37, %v307_v42  ;;  %v3243_v32 = vmul.f32 -1.442695, %v4906_v46  ;;  %v3693_v19 = vld [vmem:[%s6091_s3 + $0x120] sm:$0xff]  ;;  %v3700_v42 = vld [vmem:[%s6091_s3 + $0x158] sm:$0xff]  ;;  %2299 = vmatpush.bf16.msrb.mxu0 %v3669_v33 }
  0x98   : > { %6290 = vst [vmem:[#allocation27_spill] sm:$0xff] %v4894_v8  ;;  %v1402_v59 = vunpack.c.l.b16 %v4894_v8  ;;  %v4917_v9 = vmul.f32 %v809_v52, %v4658_v50  ;;  %v315_v5 = vmul.f32 %v4707_v11, %v279_v51  ;;  %v819_v30 = vsel %vm4901_vm11, %v3852_v41, %v815_v0  ;;  %v3660_v50 = vld [vmem:[%s6091_s3 + $0x18] sm:$0xff]  ;;  %1888 = vmatpush.bf16.msrb.mxu1 %v3693_v19  ;;  %v3659_v0 = vld [vmem:[%s6091_s3 + $0x10] sm:$0xff] }
  0x99   : > { %v3854_v6 = vpop.eup %3853  ;;  %v3244_v34 = vmul.f32 -1.442695, %v4913_v60  ;;  %v824_v41 = vsel %vm4851_vm6, %v823_v45, %v819_v30  ;;  %1978 = vmatpush.bf16.msrb.mxu2 %v3700_v42  ;;  %v3699_v45 = vld [vmem:[%s6091_s3 + $0x150] sm:$0xff]  ;;  %3857 = vpow2.f32 %v3243_v32  ;;  %v4955_v39 = vadd.f32 %v4753_v37, %v314_v38  ;;  %2211 = vmatpush.bf16.msrb.mxu3 %v3660_v50  ;;  %v3668_v30 = vld [vmem:[%s6091_s3 + $0x58] sm:$0xff] }
  0x9a   : > { %6293 = vst [vmem:[#allocation28_spill] sm:$0xff] %v4917_v9  ;;  %v3856_v51 = vpop.eup %3855  ;;  %v4933_v3 = vpack.c.b16 %v1402_v59, %v1399_v25  ;;  %v1072_v58 = vrot.slane %v4917_v9, 7  ;;  %v4938_v57 = vadd.f32 1.0, %v3854_v6  ;;  %v4944_v7 = vmul.f32 %v824_v41, %v4661_v2  ;;  %v286_v25 = vld [vmem:[%s3969_s10 + $0xb0] sm:$0xff]  ;;  %v287_v19 = vld [vmem:[%s3969_s10 + $0xb8] sm:$0xff] }
  0x9b   : > { %v4946_v4 = vadd.f32 1.0, %v3856_v51  ;;  %v4966_v59 = vadd.f32 %v4753_v37, %v315_v5  ;;  %v322_v42 = vmul.f32 %v4707_v11, %v286_v25  ;;  %v3251_v33 = vmul.f32 -1.442695, %v4955_v39  ;;  %2300 = vmatpush.bf16.msrb.mxu0 %v3668_v30 }
  0x9c   : > { %6294 = vst [vmem:[#allocation29_spill] sm:$0xff] %v4933_v3  ;;  %1834 = vmatmul.bf16.gmra.mxu1 %v4933_v3  ;;  %v1132_v2 = vsel %vm6296_vm12, 0.0, %v1072_v58  ;;  %3859 = vrcp.f32 %v4938_v57  ;;  %v925_v52 = vand.u32 2147483647, %v4938_v57  ;;  %v1073_v38 = vrot.slane %v4944_v7, 7 }
  0x9d   : > { %6295 = vst [vmem:[#allocation30_spill] sm:$0xff] %v4944_v7  ;;  %v4970_v32 = vpack.c.bf16 %v4917_v9, %v1132_v2  ;;  %v927_v6 = vand.u32 2147483648, %v4938_v57  ;;  %3861 = vrcp.f32 %v4946_v4  ;;  %vm921_vm14 = vweird.f32 %v4938_v57  ;;  %1889 = vmatpush.bf16.msrb.mxu1 %v3692_v53  ;;  %1979 = vmatpush.bf16.msrb.mxu2 %v3699_v45 }
  0x9e   : > { %v1074_v5 = vsel %vm6298_vm13, %v1072_v58, %v1073_v38  ;;  %v940_v50 = vand.u32 2147483647, %v4946_v4  ;;  %3863 = vpow2.f32 %v3244_v34  ;;  %vm936_vm15 = vweird.f32 %v4946_v4  ;;  %2212 = vmatpush.bf16.msrb.mxu3 %v3659_v0  ;;  %v294_v38 = vld [vmem:[%s3969_s10 + $0xf0] sm:$0xff] }
  0x9f   : > { %6297 = vst [vmem:[#allocation31_spill] sm:$0xff] %v4970_v32  ;;  %v4983_v51 = vpack.c.bf16 %v4944_v7, %v1074_v5  ;;  %v1423_v41 = vunpack.c.l.b16 %v4970_v32  ;;  %v3858_v25 = vpop.eup %3857  ;;  %vm4988_vm0 = vcmp.eq.f32.partialorder %v925_v52, 8.507059e+37  ;;  %v928_v2 = vor.u32 1.1754944e-38, %v927_v6 }
  0xa0   : > { %v942_v53 = vand.u32 2147483648, %v4946_v4  ;;  %v3252_v34 = vmul.f32 -1.442695, %v4966_v59  ;;  %v323_v45 = vmul.f32 %v4707_v11, %v287_v19  ;;  %v4997_v32 = vadd.f32 1.0, %v3858_v25 }
  0xa1   : > { %6299 = vst [vmem:[#allocation32_spill] sm:$0xff] %v4983_v51  ;;  %v1426_v0 = vunpack.c.l.b16 %v4983_v51  ;;  %3865 = vpow2.f32 %v3251_v33  ;;  %v5000_v52 = vadd.f32 %v4753_v37, %v322_v42  ;;  %vm5003_vm1 = vcmp.eq.f32.partialorder %v940_v50, 8.507059e+37  ;;  %v295_v33 = vld [vmem:[%s3969_s10 + $0xf8] sm:$0xff] }
  0xa2   : > { %v3860_v5 = vpop.eup %3859  ;;  %3867 = vpow2.f32 %v3252_v34  ;;  %v5008_v19 = vadd.f32 %v4753_v37, %v323_v45  ;;  %v330_v42 = vmul.f32 %v4707_v11, %v294_v38  ;;  %v595_v50 = vand.u32 2147483647, %v4997_v32 }
  0xa3   : > { %v3862_v7 = vpop.eup %3861  ;;  %v917_v6 = vmul.f32 %v3860_v5, %v4938_v57  ;;  %v5010_v9 = vpack.c.b16 %v1426_v0, %v1423_v41  ;;  %3869 = vrcp.f32 %v4997_v32  ;;  %vm922_vm7 = vweird.f32 %v3860_v5 }
  0xa4   : > { %v932_v25 = vmul.f32 %v3862_v7, %v4946_v4  ;;  %v3864_v51 = vpop.eup %3863  ;;  %v597_v17 = vand.u32 2147483648, %v4997_v32  ;;  %vm937_vm2 = vweird.f32 %v3862_v7  ;;  %v3259_v45 = vmul.f32 -1.442695, %v5000_v52  ;;  %vm5028_vm4 = vmor %vm921_vm14, %vm922_vm7 }
  0xa5   : > { %6304 = vst [vmem:[#allocation33_spill] sm:$0xff] %v5010_v9  ;;  %v918_v3 = vsub.f32 1.0, %v917_v6  ;;  %1854 = vmatmul.bf16.gmra.mxu2 %v5010_v9  ;;  %v5019_v41 = vadd.f32 1.0, %v3864_v51  ;;  %v943_v62 = vor.u32 1.1754944e-38, %v942_v53  ;;  %v3260_v49 = vmul.f32 -1.442695, %v5008_v19  ;;  %vm5037_vm6 = vmor %vm936_vm15, %vm937_vm2 }
  0xa6   : > { %v933_v34 = vsub.f32 1.0, %v932_v25  ;;  %v5024_v38 = vmul.f32 %v4707_v11, %v295_v33  ;;  %vm591_vm3 = vweird.f32 %v4997_v32  ;;  %v598_v51 = vor.u32 1.1754944e-38, %v597_v17 }
  0xa7   : > { %v919_v0 = vmul.f32 %v3860_v5, %v918_v3  ;;  %v3866_v6 = vpop.eup %3865  ;;  %3871 = vrcp.f32 %v5019_v41  ;;  %vm5041_vm5 = vcmp.eq.f32.partialorder %v595_v50, 8.507059e+37  ;;  %v5048_v17 = vadd.f32 %v4753_v37, %v330_v42 }
  0xa8   : > { %v934_v25 = vmul.f32 %v3862_v7, %v933_v34  ;;  %v3868_v3 = vpop.eup %3867  ;;  %v5045_v33 = vadd.f32 1.0, %v3866_v6  ;;  %3873 = vpow2.f32 %v3259_v45  ;;  %vm606_vm9 = vweird.f32 %v5019_v41 }
  0xa9   : > { %v920_v53 = vadd.f32 %v3860_v5, %v919_v0  ;;  %v3870_v34 = vpop.eup %3869  ;;  %v610_v4 = vand.u32 2147483647, %v5019_v41  ;;  %v5052_v0 = vadd.f32 1.0, %v3868_v3  ;;  %v612_v6 = vand.u32 2147483648, %v5019_v41 }
  0xaa   : > { %v935_v9 = vadd.f32 %v3862_v7, %v934_v25  ;;  %v587_v10 = vmul.f32 %v3870_v34, %v4997_v32  ;;  %3875 = vpow2.f32 %v3260_v49  ;;  %vm592_vm8 = vweird.f32 %v3870_v34 }
  0xab   : > { %v924_v50 = vsel %vm5028_vm4, %v3860_v5, %v920_v53  ;;  %3877 = vrcp.f32 %v5045_v33  ;;  %v715_v3 = vand.u32 2147483647, %v5045_v33  ;;  %vm5072_vm10 = vcmp.eq.f32.partialorder %v610_v4, 8.507059e+37  ;;  %vm5084_vm11 = vmor %vm591_vm3, %vm592_vm8 }
  0xac   : > { %v929_v42 = vsel %vm4988_vm0, %v928_v2, %v924_v50  ;;  %v939_v45 = vsel %vm5037_vm6, %v3862_v7, %v935_v9  ;;  %v588_v5 = vsub.f32 1.0, %v587_v10  ;;  %v717_v9 = vand.u32 2147483648, %v5045_v33 }
  0xad   : > { %v944_v25 = vsel %vm5003_vm1, %v943_v62, %v939_v45  ;;  %v5066_v40 = vmul.f32 %v929_v42, %v4756_v20  ;;  %v3872_v53 = vpop.eup %3871  ;;  %3879 = vrcp.f32 %v5052_v0  ;;  %v613_v2 = vor.u32 1.1754944e-38, %v612_v6 }
  0xae   : > { %v5070_v49 = vmul.f32 %v944_v25, %v4780_v1  ;;  %v3874_v7 = vpop.eup %3873  ;;  %v589_v20 = vmul.f32 %v3870_v34, %v588_v5  ;;  %v602_v10 = vmul.f32 %v3872_v53, %v5019_v41  ;;  %vm607_vm12 = vweird.f32 %v3872_v53 }
  0xaf   : > { %v1084_v62 = vrot.slane %v5066_v40, 7  ;;  %vm711_vm13 = vweird.f32 %v5045_v33  ;;  %vm726_vm14 = vweird.f32 %v5052_v0  ;;  %vm6315_vm15 = vcmask 1040384   ;;  %vm5113_vm7 = vmor %vm606_vm9, %vm607_vm12 }
  0xb0   : > { %v1085_v30 = vrot.slane %v5070_v49, 7  ;;  %v3876_v11 = vpop.eup %3875  ;;  %v590_v50 = vadd.f32 %v3870_v34, %v589_v20  ;;  %v603_v42 = vsub.f32 1.0, %v602_v10  ;;  %vm5091_vm0 = vcmp.eq.f32.partialorder %v715_v3, 8.507059e+37  ;;  %vm6318_vm1 = vmmov %vm6315_vm15 }
  0xb1   : > { %v1136_v4 = vsel %vm6315_vm15, 0.0, %v1084_v62  ;;  %v3878_v45 = vpop.eup %3877  ;;  %v718_v5 = vor.u32 1.1754944e-38, %v717_v9  ;;  %v5099_v44 = vadd.f32 1.0, %v3874_v7  ;;  %v730_v7 = vand.u32 2147483647, %v5052_v0  ;;  %vm6323_vm6 = vmmov %vm6318_vm1 }
  0xb2   : > { %v1086_v32 = vsel %vm6318_vm1, %v1084_v62, %v1085_v30  ;;  %v5097_v25 = vpack.c.bf16 %v5066_v40, %v1136_v4  ;;  %v594_v20 = vsel %vm5084_vm11, %v3870_v34, %v590_v50  ;;  %v604_v10 = vmul.f32 %v3872_v53, %v603_v42  ;;  %vm6330_vm11 = vmmov %vm6318_vm1 }
  0xb3   : > { %v5102_v24 = vpack.c.bf16 %v5070_v49, %v1086_v32  ;;  %v707_v3 = vmul.f32 %v3878_v45, %v5045_v33  ;;  %v3880_v8 = vpop.eup %3879  ;;  %v599_v62 = vsel %vm5041_vm5, %v598_v51, %v594_v20  ;;  %vm712_vm2 = vweird.f32 %v3878_v45 }
  0xb4   : > { %v1447_v21 = vunpack.c.l.b16 %v5097_v25  ;;  %v605_v30 = vadd.f32 %v3872_v53, %v604_v10  ;;  %v5120_v1 = vmul.f32 %v599_v62, %v4906_v46  ;;  %v722_v57 = vmul.f32 %v3880_v8, %v5052_v0  ;;  %vm5137_vm4 = vmor %vm711_vm13, %vm712_vm2 }
  0xb5   : > { %v1450_v34 = vunpack.c.l.b16 %v5102_v24  ;;  %v708_v4 = vsub.f32 1.0, %v707_v3  ;;  %v732_v51 = vand.u32 2147483648, %v5052_v0  ;;  %v5124_v50 = vadd.f32 1.0, %v3876_v11 }
  0xb6   : > { %3881 = vrcp.f32 %v5099_v44  ;;  %v609_v42 = vsel %vm5113_vm7, %v3872_v53, %v605_v30  ;;  %v1051_v32 = vrot.slane %v5120_v1, 7  ;;  %v723_v11 = vsub.f32 1.0, %v722_v57 }
  0xb7   : > { %v5127_v41 = vpack.c.b16 %v1450_v34, %v1447_v21  ;;  %v709_v20 = vmul.f32 %v3878_v45, %v708_v4  ;;  %v614_v46 = vsel %vm5072_vm10, %v613_v2, %v609_v42  ;;  %vm727_vm3 = vweird.f32 %v3880_v8 }
  0xb8   : > { %v835_v21 = vand.u32 2147483647, %v5099_v44  ;;  %v5144_v53 = vmul.f32 %v614_v46, %v4913_v60  ;;  %v1125_v3 = vsel %vm6323_vm6, 0.0, %v1051_v32  ;;  %v837_v2 = vand.u32 2147483648, %v5099_v44  ;;  %vm5161_vm9 = vmor %vm726_vm14, %vm727_vm3 }
  0xb9   : > { %1874 = vmatmul.bf16.gmra.mxu3 %v5127_v41  ;;  %v710_v58 = vadd.f32 %v3878_v45, %v709_v20  ;;  %v5149_v33 = vpack.c.bf16 %v5120_v1, %v1125_v3  ;;  %v724_v62 = vmul.f32 %v3880_v8, %v723_v11  ;;  %vm5151_vm5 = vcmp.eq.f32.partialorder %v730_v7, 8.507059e+37  ;;  %vm6331_vm14 = vmmov %vm6318_vm1 }
  0xba   : > { %3883 = vrcp.f32 %v5124_v50  ;;  %v1052_v34 = vrot.slane %v5144_v53, 7  ;;  %v733_v4 = vor.u32 1.1754944e-38, %v732_v51  ;;  %vm831_vm8 = vweird.f32 %v5099_v44  ;;  %vm6334_vm3 = vmmov %vm6318_vm1 }
  0xbb   : > { %v714_v60 = vsel %vm5137_vm4, %v3878_v45, %v710_v58  ;;  %v725_v42 = vadd.f32 %v3880_v8, %v724_v62  ;;  %vm5168_vm10 = vcmp.eq.f32.partialorder %v835_v21, 8.507059e+37  ;;  %v838_v46 = vor.u32 1.1754944e-38, %v837_v2  ;;  %vm6333_vm4 = vmmov %vm6318_vm1 }
  0xbc   : > { %v3882_v7 = vpop.eup %3881  ;;  %v719_v57 = vsel %vm5091_vm0, %v718_v5, %v714_v60  ;;  %v1053_v45 = vsel %vm6330_vm11, %v1051_v32, %v1052_v34  ;;  %vm846_vm12 = vweird.f32 %v5124_v50  ;;  %v1381_v6 = vunpack.c.l.b16 %v5149_v33 }
  0xbd   : > { %v5174_v0 = vmul.f32 %v719_v57, %v4955_v39  ;;  %v827_v10 = vmul.f32 %v3882_v7, %v5099_v44  ;;  %v5179_v51 = vpack.c.bf16 %v5144_v53, %v1053_v45  ;;  %v729_v5 = vsel %vm5161_vm9, %v3880_v8, %v725_v42 }
  0xbe   : > { %vm832_vm13 = vweird.f32 %v3882_v7  ;;  %v734_v11 = vsel %vm5151_vm5, %v733_v4, %v729_v5  ;;  %v5189_v21 = vadd.f32 %v4753_v37, %v5024_v38  ;;  %v850_v62 = vand.u32 2147483647, %v5124_v50 }
  0xbf   : > { %v1063_v32 = vrot.slane %v5174_v0, 7  ;;  %v828_v39 = vsub.f32 1.0, %v827_v10  ;;  %v1384_v58 = vunpack.c.l.b16 %v5179_v51  ;;  %v5193_v2 = vmul.f32 %v734_v11, %v4966_v59  ;;  %vm833_vm15 = vmor %vm831_vm8, %vm832_vm13 }
  0xc0   : > { %v3884_v3 = vpop.eup %3883  ;;  %v3267_v8 = vmul.f32 -1.442695, %v5048_v17  ;;  %v852_v30 = vand.u32 2147483648, %v5124_v50  ;;  %v3268_v42 = vmul.f32 -1.442695, %v5189_v21  ;;  %vm851_vm2 = vcmp.eq.f32.partialorder %v850_v62, 8.507059e+37 }
  0xc1   : > { %v1129_v9 = vsel %vm6331_vm14, 0.0, %v1063_v32  ;;  %v829_v34 = vmul.f32 %v3882_v7, %v828_v39  ;;  %v842_v60 = vmul.f32 %v3884_v3, %v5124_v50  ;;  %v5200_v4 = vpack.c.b16 %v1384_v58, %v1381_v6  ;;  %v3691_v50 = vld [vmem:[%s6091_s3 + $0x110] sm:$0xff] }
  0xc2   : > { %v1064_v37 = vrot.slane %v5193_v2, 7  ;;  %v5204_v38 = vpack.c.bf16 %v5174_v0, %v1129_v9  ;;  %3885 = vpow2.f32 %v3267_v8  ;;  %vm847_vm0 = vweird.f32 %v3884_v3  ;;  %1890 = vmatpush.bf16.msrb.mxu1 %v3691_v50 }
  0xc3   : > { %6332 = vst [vmem:[#allocation34_spill] sm:$0xff] %v5200_v4  ;;  %v830_v59 = vadd.f32 %v3882_v7, %v829_v34  ;;  %v843_v57 = vsub.f32 1.0, %v842_v60  ;;  %1819 = vmatmul.bf16.gmra.mxu0 %v5200_v4  ;;  %3887 = vpow2.f32 %v3268_v42  ;;  %vm848_vm7 = vmor %vm846_vm12, %vm847_vm0  ;;  %v853_v39 = vor.u32 1.1754944e-38, %v852_v30 }
  0xc4   : > { %v1065_v45 = vsel %vm6318_vm1, %v1063_v32, %v1064_v37  ;;  %v1405_v10 = vunpack.c.l.b16 %v5204_v38  ;;  %v1367_v50 = vunpack.c.h.b16 %v4216_v27  ;;  %vm1138_vm5 = vcmask 1046528   ;;  %vm6340_vm0 = vmmov %vm6318_vm1 }
  0xc5   : > { %v5214_v6 = vpack.c.bf16 %v5193_v2, %v1065_v45  ;;  %v834_v5 = vsel %vm833_vm15, %v3882_v7, %v830_v59  ;;  %v844_v11 = vmul.f32 %v3884_v3, %v843_v57  ;;  %v3667_v59 = vld [vmem:[%s6091_s3 + $0x50] sm:$0xff]  ;;  %v3697_v45 = vld [vmem:[%s6091_s3 + $0x140] sm:$0xff]  ;;  %vm6339_vm15 = vmmov %vm6318_vm1 }
  0xc6   : > { %v839_v44 = vsel %vm5168_vm10, %v838_v46, %v834_v5  ;;  %v3698_v46 = vld [vmem:[%s6091_s3 + $0x148] sm:$0xff]  ;;  %2301 = vmatpush.bf16.msrb.mxu0 %v3667_v59  ;;  %v3657_v5 = vld [vmem:[%s6091_s3] sm:$0xff]  ;;  %vm6464_vm1 = vmmov %vm6340_vm0 }
  0xc7   : > { %v1408_v58 = vunpack.c.l.b16 %v5214_v6  ;;  %v845_v8 = vadd.f32 %v3884_v3, %v844_v11  ;;  %v5222_v32 = vmul.f32 %v839_v44, %v5000_v52  ;;  %v3658_v52 = vld [vmem:[%s6091_s3 + $0x8] sm:$0xff]  ;;  %1980 = vmatpush.bf16.msrb.mxu2 %v3698_v46 }
  0xc8   : > { %v3886_v9 = vpop.eup %3885  ;;  %2213 = vmatpush.bf16.msrb.mxu3 %v3658_v52  ;;  %v3666_v11 = vld [vmem:[%s6091_s3 + $0x48] sm:$0xff] }
  0xc9   : > { %v5224_v34 = vpack.c.b16 %v1408_v58, %v1405_v10  ;;  %v849_v7 = vsel %vm848_vm7, %v3884_v3, %v845_v8  ;;  %v1075_v60 = vrot.slane %v5222_v32, 7  ;;  %v5227_v37 = vadd.f32 1.0, %v3886_v9  ;;  %v3888_v62 = vpop.eup %3887  ;;  %v3689_v8 = vld [vmem:[%s6091_s3 + $0x100] sm:$0xff] }
  0xca   : > { %v854_v20 = vsel %vm851_vm2, %v853_v39, %v849_v7  ;;  %v5250_v42 = vadd.f32 1.0, %v3888_v62  ;;  %2302 = vmatpush.bf16.msrb.mxu0 %v3666_v11  ;;  %v1139_v62 = vrot.slane %v4162_v14, 1 }
  0xcb   : > { %1839 = vmatmul.bf16.gmra.mxu1 %v5224_v34  ;;  %v5240_v3 = vmul.f32 %v854_v20, %v5008_v19  ;;  %v1133_v30 = vsel %vm6333_vm4, 0.0, %v1075_v60  ;;  %3889 = vrcp.f32 %v5227_v37  ;;  %v3690_v19 = vld [vmem:[%s6091_s3 + $0x108] sm:$0xff]  ;;  %1981 = vmatpush.bf16.msrb.mxu2 %v3697_v45  ;;  %v957_v7 = vand.u32 2147483648, %v5227_v37 }
  0xcc   : > { %v5248_v57 = vpack.c.bf16 %v5222_v32, %v1133_v30  ;;  %3891 = vrcp.f32 %v5250_v42  ;;  %1891 = vmatpush.bf16.msrb.mxu1 %v3690_v19  ;;  %2214 = vmatpush.bf16.msrb.mxu3 %v3657_v5  ;;  %v1364_v20 = vunpack.c.h.b16 %v4201_v23  ;;  %vm951_vm6 = vweird.f32 %v5227_v37 }
  0xcd   : > { %v1076_v10 = vrot.slane %v5240_v3, 7  ;;  %v1140_v30 = vrot.slane %v4172_v13, 1  ;;  %v955_v23 = vand.u32 2147483647, %v5227_v37  ;;  %v958_v27 = vor.u32 1.1754944e-38, %v957_v7 }
  0xce   : > { %v1429_v58 = vunpack.c.l.b16 %v5248_v57  ;;  %v1460_v5 = vpack.c.b16 %v1367_v50, %v1364_v20  ;;  %vm966_vm8 = vweird.f32 %v5250_v42  ;;  %v972_v14 = vand.u32 2147483648, %v5250_v42 }
  0xcf   : > { %v1077_v44 = vsel %vm6334_vm3, %v1075_v60, %v1076_v10  ;;  %v3665_v60 = vld [vmem:[%s6091_s3 + $0x40] sm:$0xff]  ;;  %v1219_v7 = vsel %vm1138_vm5, %v1140_v30, 0.0  ;;  %vm956_vm12 = vcmp.eq.f32.partialorder %v955_v23, 8.507059e+37  ;;  %v6135_v20 = vmov 0   ;;  %v3680_v23 = vld [vmem:[%s6091_s3 + $0xb8] sm:$0xff] }
  0xd0   : > { %v5268_v39 = vpack.c.bf16 %v5240_v3, %v1077_v44  ;;  %1892 = vmatpush.bf16.msrb.mxu1 %v3689_v8  ;;  %2303 = vmatpush.bf16.msrb.mxu0 %v3665_v60  ;;  %v1141_v8 = vsel %vm1138_vm5, %v1139_v62, %v1140_v30  ;;  %v3712_v62 = vld [vmem:[%s6091_s3 + $0x1b8] sm:$0xff] }
  0xd1   : > { %v3890_v9 = vpop.eup %3889  ;;  %v3720_v30 = vld [vmem:[%s6091_s3 + $0x1f8] sm:$0xff]  ;;  %2667 = vmatpush.bf16.msra.mxu2 %v3712_v62 }
  0xd2   : > { %v1432_v46 = vunpack.c.l.b16 %v5268_v39  ;;  %v947_v52 = vmul.f32 %v3890_v9, %v5227_v37  ;;  %v3892_v59 = vpop.eup %3891  ;;  %vm952_vm9 = vweird.f32 %v3890_v9  ;;  %2756 = vmatpush.bf16.msra.mxu3 %v3720_v30 }
  0xd3   : > { %v962_v10 = vmul.f32 %v3892_v59, %v5250_v42  ;;  %vm967_vm10 = vweird.f32 %v3892_v59  ;;  %vm5294_vm11 = vmor %vm951_vm6, %vm952_vm9  ;;  %2304 = vmatmul.bf16.vlgmr.msrb.gmra.mxu0 %v6135_v20 }
  0xd4   : > { %v5285_v19 = vpack.c.b16 %v1432_v46, %v1429_v58  ;;  %v948_v45 = vsub.f32 1.0, %v947_v52  ;;  %v970_v58 = vand.u32 2147483647, %v5250_v42  ;;  %vm5302_vm13 = vmor %vm966_vm8, %vm967_vm10  ;;  %v973_v52 = vor.u32 1.1754944e-38, %v972_v14  ;;  %2385 = vmatpush.bf16.msra.mxu1 %v3680_v23 }
  0xd5   : > { %v963_v44 = vsub.f32 1.0, %v962_v10  ;;  %v1238_v42 = vpack.c.bf16 %v1219_v7, %v1219_v7 }
  0xd6   : > { %1859 = vmatmul.bf16.gmra.mxu2 %v5285_v19  ;;  %v949_v11 = vmul.f32 %v3890_v9, %v948_v45  ;;  %v1236_v45 = vpack.c.bf16 %v1141_v8, %v1141_v8  ;;  %vm971_vm14 = vcmp.eq.f32.partialorder %v970_v58, 8.507059e+37 }
  0xd7   : > { %v964_v50 = vmul.f32 %v3892_v59, %v963_v44  ;;  %v1368_v58 = vunpack.c.l.b16 %v1238_v42 }
  0xd8   : > { %v950_v60 = vadd.f32 %v3890_v9, %v949_v11  ;;  %v1365_v8 = vunpack.c.l.b16 %v1236_v45  ;;  %v1142_v45 = vrot.slane %v4469_v54, 1 }
  0xd9   : > { %v965_v11 = vadd.f32 %v3892_v59, %v964_v50 }
  0xda   : > { %v954_v37 = vsel %vm5294_vm11, %v3890_v9, %v950_v60  ;;  %v3728_v9 = vld [vmem:[%s6091_s3 + $0x238] sm:$0xff] }
  0xdb   : > { %v959_v10 = vsel %vm956_vm12, %v958_v27, %v954_v37  ;;  %1893 = vmatmul.bf16.vlgmr.msrb.gmra.mxu1 %v1460_v5  ;;  %v969_v13 = vsel %vm5302_vm13, %v3892_v59, %v965_v11  ;;  %2845 = vmatpush.bf16.msra.mxu0 %v3728_v9  ;;  %v5334_v37 = vpack.c.b16 %v1368_v58, %v1365_v8  ;;  %v1370_v59 = vunpack.c.h.b16 %v4510_v22 }
  0xdc   : > { %v5321_v14 = vmul.f32 %v959_v10, %v5048_v17  ;;  %v974_v44 = vsel %vm971_vm14, %v973_v52, %v969_v13  ;;  %v1373_v52 = vunpack.c.h.b16 %v4518_v63  ;;  %v1145_v8 = vrot.slane %v4802_v29, 1  ;;  %v3711_v29 = vld [vmem:[%s6091_s3 + $0x1b0] sm:$0xff] }
  0xdd   : > { %v5327_v7 = vmul.f32 %v974_v44, %v5189_v21  ;;  %v1143_v21 = vrot.slane %v4479_v26, 1  ;;  %v1376_v44 = vunpack.c.h.b16 %v4839_v48  ;;  %v1146_v58 = vrot.slane %v4813_v16, 1  ;;  %v3719_v16 = vld [vmem:[%s6091_s3 + $0x1f0] sm:$0xff]  ;;  %2668 = vmatpush.bf16.msra.mxu2 %v3711_v29 }
  0xde   : > { %v1087_v27 = vrot.slane %v5321_v14, 7  ;;  %v5347_v23 = vpack.c.b16 %v1373_v52, %v1370_v59  ;;  %v1385_v52 = vunpack.c.h.b16 %v5179_v51  ;;  %2757 = vmatpush.bf16.msra.mxu3 %v3719_v16  ;;  %v1149_v51 = vrot.slane %v5144_v53, 1 }
  0xdf   : > { %v1088_v17 = vrot.slane %v5327_v7, 7  ;;  %v1144_v22 = vsel %vm1138_vm5, %v1142_v45, %v1143_v21  ;;  %v1220_v10 = vsel %vm1138_vm5, %v1143_v21, 0.0  ;;  %v3727_v45 = vld [vmem:[%s6091_s3 + $0x230] sm:$0xff] }
  0xe0   : > { %v1137_v60 = vsel %vm6339_vm15, 0.0, %v1087_v27  ;;  %v1240_v54 = vpack.c.bf16 %v1144_v22, %v1144_v22  ;;  %v1242_v26 = vpack.c.bf16 %v1220_v10, %v1220_v10  ;;  %2846 = vmatpush.bf16.msra.mxu0 %v3727_v45 }
  0xe1   : > { %v5332_v50 = vpack.c.bf16 %v5321_v14, %v1137_v60  ;;  %v1089_v46 = vsel %vm6340_vm0, %v1087_v27, %v1088_v17  ;;  %v1379_v27 = vunpack.c.h.b16 %v4856_v43  ;;  %v1147_v60 = vsel %vm1138_vm5, %v1145_v8, %v1146_v58  ;;  %v3679_v43 = vld [vmem:[%s6091_s3 + $0xb0] sm:$0xff] }
  0xe2   : > { %v5342_v42 = vpack.c.bf16 %v5327_v7, %v1089_v46  ;;  %v1371_v11 = vunpack.c.l.b16 %v1240_v54  ;;  %v1374_v9 = vunpack.c.l.b16 %v1242_v26  ;;  %v1221_v17 = vsel %vm1138_vm5, %v1146_v58, 0.0  ;;  %2386 = vmatpush.bf16.msra.mxu1 %v3679_v43 }
  0xe3   : > { %v1453_v62 = vunpack.c.l.b16 %v5332_v50  ;;  %2309 = vmatmul.bf16.gmra.mxu0 %v1460_v5  ;;  %v5362_v5 = vpack.c.b16 %v1379_v27, %v1376_v44  ;;  %v1244_v59 = vpack.c.bf16 %v1147_v60, %v1147_v60  ;;  %v1246_v48 = vpack.c.bf16 %v1221_v17, %v1221_v17  ;;  %v5395_v27 = vpop.f32.mrf.mxu0 }
  0xe4   : > { %v1456_v30 = vunpack.c.l.b16 %v5342_v42  ;;  %v5355_v13 = vpack.c.b16 %v1374_v9, %v1371_v11  ;;  %v1382_v46 = vunpack.c.h.b16 %v5149_v33  ;;  %v1148_v33 = vrot.slane %v5120_v1, 1  ;;  %v5397_v1 = vpop.f32.mrf.mxu1 }
  0xe5   : > { %6342 = vst [vmem:[#allocation36_spill] sm:$0xff] %v5362_v5  ;;  %v1222_v54 = vsel %vm1138_vm5, %v1149_v51, 0.0  ;;  %v1388_v8 = vunpack.c.h.b16 %v4233_v47  ;;  %v1391_v58 = vunpack.c.h.b16 %v4250_v56  ;;  %v1151_v60 = vrot.slane %v4195_v28, 1  ;;  %v3710_v28 = vld [vmem:[%s6091_s3 + $0x1a8] sm:$0xff] }
  0xe6   : > { %1982 = vmatmul.bf16.vlgmr.msrb.gmra.mxu2 %v5334_v37  ;;  %v5351_v63 = vpack.c.b16 %v1456_v30, %v1453_v62  ;;  %v5383_v21 = vpack.c.b16 %v1385_v52, %v1382_v46  ;;  %v1377_v62 = vunpack.c.l.b16 %v1244_v59  ;;  %v1380_v30 = vunpack.c.l.b16 %v1246_v48  ;;  %v3678_v56 = vld [vmem:[%s6091_s3 + $0xa8] sm:$0xff]  ;;  %v5429_v52 = vpop.f32.mrf.mxu2 }
  0xe7   : > { %v1150_v10 = vsel %vm1138_vm5, %v1148_v33, %v1149_v51  ;;  %v1250_v11 = vpack.c.bf16 %v1222_v54, %v1222_v54  ;;  %v5406_v17 = vpack.c.b16 %v1391_v58, %v1388_v8  ;;  %v3726_v46 = vld [vmem:[%s6091_s3 + $0x228] sm:$0xff]  ;;  %2669 = vmatpush.bf16.msra.mxu2 %v3710_v28  ;;  %2387 = vmatpush.bf16.msra.mxu1 %v3678_v56  ;;  %v1397_v54 = vunpack.c.h.b16 %v4562_v18  ;;  %v6349_v28 = vld [vmem:[#allocation26_spill] sm:$0xff] }
  0xe8   : > { %6341 = vst [vmem:[#allocation35_spill] sm:$0xff] %v5351_v63  ;;  %1879 = vmatmul.bf16.gmra.mxu3 %v5351_v63  ;;  %v5385_v22 = vpack.c.b16 %v1380_v30, %v1377_v62  ;;  %v1248_v26 = vpack.c.bf16 %v1150_v10, %v1150_v10  ;;  %2847 = vmatpush.bf16.msra.mxu0 %v3726_v46  ;;  %v1394_v10 = vunpack.c.h.b16 %v4548_v12  ;;  %v6350_v56 = vld [vmem:[#allocation27_spill] sm:$0xff]  ;;  %v1409_v63 = vunpack.c.h.b16 %v5214_v6 }
  0xe9   : > { %6343 = vst [vmem:[#allocation37_spill] sm:$0xff] %v5383_v21  ;;  %v1386_v44 = vunpack.c.l.b16 %v1250_v11  ;;  %v1155_v11 = vrot.slane %v4521_v31, 1  ;;  %v1403_v46 = vunpack.c.h.b16 %v6350_v56 }
  0xea   : > { %v1383_v9 = vunpack.c.l.b16 %v1248_v26  ;;  %6344 = vst [vmem:[#allocation38_spill] sm:$0xff] %v5406_v17  ;;  %v1154_v26 = vrot.slane %v4515_v36, 1 }
  0xeb   : > { %1898 = vmatmul.bf16.gmra.mxu1 %v5347_v23  ;;  %v5422_v16 = vpop.f32.mrf.mxu0  ;;  %v1224_v58 = vsel %vm1138_vm5, %v1155_v11, 0.0 }
  0xec   : > { %v5399_v53 = vpack.c.b16 %v1386_v44, %v1383_v9  ;;  %v5424_v43 = vpop.f32.mrf.mxu1  ;;  %v5444_v44 = vpack.c.b16 %v1397_v54, %v1394_v10  ;;  %v1156_v8 = vsel %vm1138_vm5, %v1154_v26, %v1155_v11  ;;  %v1258_v18 = vpack.c.bf16 %v1224_v58, %v1224_v58  ;;  %v6352_v10 = vld [vmem:[#allocation25_spill] sm:$0xff] }
  0xed   : > { %v1256_v12 = vpack.c.bf16 %v1156_v8, %v1156_v8  ;;  %v1158_v54 = vrot.slane %v6352_v10, 1 }
  0xee   : > { %v5442_v9 = vpop.f32.mrf.mxu2  ;;  %6346 = vst [vmem:[#allocation40_spill] sm:$0xff] %v5444_v44 }
  0xef   : > { %v1225_v58 = vsel %vm1138_vm5, %v1158_v54, 0.0 }
  0xf3   : > { %2314 = vmatmul.bf16.gmra.mxu0 %v5347_v23  ;;  %v5433_v33 = vpop.f32.mrf.mxu0 }
  0xf4   : > { %v5435_v51 = vpop.f32.mrf.mxu1 }
  0xf6   : > { %1987 = vmatmul.bf16.gmra.mxu2 %v5355_v13 }
  0xf8   : > { %2215 = vmatmul.bf16.vlgmr.msrb.gmra.mxu3 %v6135_v20  ;;  %v1406_v20 = vunpack.c.h.b16 %v5204_v38  ;;  %v6360_v38 = vld [vmem:[#allocation5_spill] sm:$0xff] }
  0xfb   : > { %1903 = vmatmul.bf16.gmra.mxu1 %v5362_v5  ;;  %v5451_v36 = vpop.f32.mrf.mxu0 }
  0xfc   : > { %v5453_v31 = vpop.f32.mrf.mxu1 }
 0x103   : > { %2319 = vmatmul.bf16.gmra.mxu0 %v5362_v5 }
 0x106   : > { %1992 = vmatmul.bf16.gmra.mxu2 %v5385_v22 }
 0x108   : > { %2220 = vmatmul.bf16.gmra.mxu3 %v4247_v55  ;;  %v1152_v55 = vrot.slane %v4204_v15, 1  ;;  %v3718_v15 = vld [vmem:[%s6091_s3 + $0x1e8] sm:$0xff] }
 0x109   : > { %2758 = vmatpush.bf16.msra.mxu3 %v3718_v15  ;;  %v1400_v15 = vunpack.c.h.b16 %v6349_v28  ;;  %v3717_v28 = vld [vmem:[%s6091_s3 + $0x1e0] sm:$0xff] }
 0x10a   : > { %v1153_v59 = vsel %vm1138_vm5, %v1151_v60, %v1152_v55  ;;  %v1223_v48 = vsel %vm1138_vm5, %v1152_v55, 0.0  ;;  %v1395_v60 = vunpack.c.l.b16 %v1256_v12  ;;  %v1398_v55 = vunpack.c.l.b16 %v1258_v18 }
 0x10b   : > { %1908 = vmatmul.bf16.gmra.mxu1 %v5383_v21  ;;  %v1252_v29 = vpack.c.bf16 %v1153_v59, %v1153_v59  ;;  %v1254_v47 = vpack.c.bf16 %v1223_v48, %v1223_v48  ;;  %v5455_v59 = vpop.f32.mrf.mxu3  ;;  %v5457_v48 = vpop.f32.mrf.mxu2  ;;  %v5470_v11 = vpack.c.b16 %v1403_v46, %v1400_v15  ;;  %v3677_v15 = vld [vmem:[%s6091_s3 + $0xa0] sm:$0xff] }
 0x10c   : > { %6347 = vst [vmem:[#allocation41_spill] sm:$0xff] %v5455_v59  ;;  %2388 = vmatpush.bf16.msra.mxu1 %v3677_v15 }
 0x10d   : > { %v1389_v45 = vunpack.c.l.b16 %v1252_v29  ;;  %v1392_v62 = vunpack.c.l.b16 %v1254_v47  ;;  %v5459_v29 = vpack.c.b16 %v1398_v55, %v1395_v60  ;;  %6353 = vst [vmem:[#allocation26_spill] sm:$0xff] %v5470_v11  ;;  %v1262_v60 = vpack.c.bf16 %v1225_v58, %v1225_v58  ;;  %v3709_v55 = vld [vmem:[%s6091_s3 + $0x1a0] sm:$0xff]  ;;  %2759 = vmatpush.bf16.msra.mxu3 %v3717_v28 }
 0x10e   : > { %2670 = vmatpush.bf16.msra.mxu2 %v3709_v55 }
 0x10f   : > { %v5431_v30 = vpack.c.b16 %v1392_v62, %v1389_v45  ;;  %6348 = vst [vmem:[#allocation42_spill] sm:$0xff] %v5459_v29  ;;  %v6351_v45 = vld [vmem:[#allocation24_spill] sm:$0xff]  ;;  %v1404_v10 = vunpack.c.l.b16 %v1262_v60 }
 0x110   : > { %v1157_v62 = vrot.slane %v6351_v45, 1  ;;  %v3725_v45 = vld [vmem:[%s6091_s3 + $0x220] sm:$0xff] }
 0x111   : > { %6345 = vst [vmem:[#allocation39_spill] sm:$0xff] %v5431_v30  ;;  %2848 = vmatpush.bf16.msra.mxu0 %v3725_v45 }
 0x112   : > { %v5461_v47 = vpop.f32.mrf.mxu0  ;;  %v1159_v8 = vsel %vm1138_vm5, %v1157_v62, %v1158_v54 }
 0x113   : > { %2324 = vmatmul.bf16.gmra.mxu0 %v5383_v21  ;;  %v5476_v12 = vpop.f32.mrf.mxu3  ;;  %v1260_v18 = vpack.c.bf16 %v1159_v8, %v1159_v8  ;;  %v5487_v56 = vpop.f32.mrf.mxu2  ;;  %v6367_v21 = vld [vmem:[#allocation6_spill] sm:$0xff] }
 0x114   : > { %6354 = vst [vmem:[#allocation27_spill] sm:$0xff] %v5476_v12  ;;  %v1161_v12 = vrot.slane %v5193_v2, 1 }
 0x115   : > { %6355 = vst [vmem:[#allocation24_spill] sm:$0xff] %v5487_v56  ;;  %v1401_v62 = vunpack.c.l.b16 %v1260_v18  ;;  %v5510_v18 = vpack.c.b16 %v1409_v63, %v1406_v20 }
 0x116   : > { %1997 = vmatmul.bf16.gmra.mxu2 %v5399_v53  ;;  %v1226_v15 = vsel %vm1138_vm5, %v1161_v12, 0.0 }
 0x117   : > { %v5497_v8 = vpack.c.b16 %v1404_v10, %v1401_v62  ;;  %6359 = vst [vmem:[#allocation45_spill] sm:$0xff] %v5510_v18  ;;  %v1266_v2 = vpack.c.bf16 %v1226_v15, %v1226_v15  ;;  %v6366_v15 = vld [vmem:[#allocation4_spill] sm:$0xff] }
 0x118   : > { %2225 = vmatmul.bf16.gmra.mxu3 %v4544_v61  ;;  %v1412_v59 = vunpack.c.h.b16 %v6366_v15  ;;  %v6371_v15 = vld [vmem:[#allocation14_spill] sm:$0xff] }
 0x119   : > { %v5467_v26 = vpop.f32.mrf.mxu1  ;;  %6356 = vst [vmem:[#allocation25_spill] sm:$0xff] %v5497_v8  ;;  %v1410_v10 = vunpack.c.l.b16 %v1266_v2 }
 0x11a   : > { %v5490_v46 = vpop.f32.mrf.mxu0 }
 0x11b   : > { %1913 = vmatmul.bf16.gmra.mxu1 %v5406_v17  ;;  %v5505_v55 = vpop.f32.mrf.mxu3 }
 0x11c   : > { %6357 = vst [vmem:[#allocation43_spill] sm:$0xff] %v5505_v55  ;;  %v6364_v55 = vld [vmem:[#allocation2_spill] sm:$0xff] }
 0x121   : > { %v5495_v54 = vpop.f32.mrf.mxu1 }
 0x123   : > { %2329 = vmatmul.bf16.gmra.mxu0 %v5406_v17  ;;  %v5521_v20 = vpop.f32.mrf.mxu3  ;;  %v6365_v17 = vld [vmem:[#allocation3_spill] sm:$0xff] }
 0x124   : > { %6361 = vst [vmem:[#allocation46_spill] sm:$0xff] %v5521_v20 }
 0x126   : > { %2002 = vmatmul.bf16.gmra.mxu2 %v5431_v30 }
 0x128   : > { %2230 = vmatmul.bf16.gmra.mxu3 %v4883_v35  ;;  %v5507_v28 = vpop.f32.mrf.mxu2 }
 0x129   : > { %6358 = vst [vmem:[#allocation44_spill] sm:$0xff] %v5507_v28 }
 0x12b   : > { %1918 = vmatmul.bf16.gmra.mxu1 %v5444_v44 }
 0x130   : > { %v5523_v63 = vpop.f32.mrf.mxu2 }
 0x131   : > { %6362 = vst [vmem:[#allocation47_spill] sm:$0xff] %v5523_v63  ;;  %v6377_v63 = vld [vmem:[#allocation16_spill] sm:$0xff] }
 0x132   : > { %v1418_v5 = vunpack.c.h.b16 %v6377_v63 }
 0x133   : > { %2334 = vmatmul.bf16.gmra.mxu0 %v5444_v44  ;;  %v1160_v44 = vrot.slane %v5174_v0, 1 }
 0x135   : > { %v1162_v60 = vsel %vm1138_vm5, %v1160_v44, %v1161_v12 }
 0x136   : > { %2007 = vmatmul.bf16.gmra.mxu2 %v5459_v29  ;;  %v1264_v0 = vpack.c.bf16 %v1162_v60, %v1162_v60  ;;  %v1415_v29 = vunpack.c.h.b16 %v6367_v21 }
 0x138   : > { %2235 = vmatmul.bf16.gmra.mxu3 %v5200_v4  ;;  %v1407_v62 = vunpack.c.l.b16 %v1264_v0  ;;  %v5536_v0 = vpack.c.b16 %v1415_v29, %v1412_v59  ;;  %v3708_v59 = vld [vmem:[%s6091_s3 + $0x198] sm:$0xff] }
 0x139   : > { %v3716_v29 = vld [vmem:[%s6091_s3 + $0x1d8] sm:$0xff]  ;;  %2671 = vmatpush.bf16.msra.mxu2 %v3708_v59 }
 0x13a   : > { %v5527_v12 = vpack.c.b16 %v1410_v10, %v1407_v62  ;;  %6368 = vst [vmem:[#allocation2_spill] sm:$0xff] %v5536_v0  ;;  %2760 = vmatpush.bf16.msra.mxu3 %v3716_v29 }
 0x13b   : > { %1923 = vmatmul.bf16.gmra.mxu1 %v5470_v11 }
 0x13c   : > { %6363 = vst [vmem:[#allocation48_spill] sm:$0xff] %v5527_v12 }
 0x140   : > { %v5499_v58 = vpop.f32.mrf.mxu0 }
 0x143   : > { %2339 = vmatmul.bf16.gmra.mxu0 %v5470_v11  ;;  %v1163_v11 = vrot.slane %v6364_v55, 1  ;;  %v5541_v55 = vpop.f32.mrf.mxu3 }
 0x144   : > { %6369 = vst [vmem:[#allocation3_spill] sm:$0xff] %v5541_v55 }
 0x146   : > { %2012 = vmatmul.bf16.gmra.mxu2 %v5497_v8  ;;  %v1164_v8 = vrot.slane %v6365_v17, 1 }
 0x148   : > { %v5514_v45 = vpop.f32.mrf.mxu1  ;;  %2240 = vmatmul.bf16.gmra.mxu3 %v6360_v38  ;;  %v5519_v6 = vpop.f32.mrf.mxu0  ;;  %v1165_v2 = vsel %vm1138_vm5, %v1163_v11, %v1164_v8  ;;  %v1227_v20 = vsel %vm1138_vm5, %v1164_v8, 0.0 }
 0x149   : > { %v1268_v21 = vpack.c.bf16 %v1165_v2, %v1165_v2  ;;  %v1270_v38 = vpack.c.bf16 %v1227_v20, %v1227_v20  ;;  %v3724_v20 = vld [vmem:[%s6091_s3 + $0x218] sm:$0xff] }
 0x14a   : > { %2849 = vmatpush.bf16.msra.mxu0 %v3724_v20 }
 0x14b   : > { %1928 = vmatmul.bf16.gmra.mxu1 %v5510_v18  ;;  %v1413_v11 = vunpack.c.l.b16 %v1268_v21  ;;  %v1416_v8 = vunpack.c.l.b16 %v1270_v38  ;;  %v5567_v38 = vpop.f32.mrf.mxu3  ;;  %v6375_v21 = vld [vmem:[#allocation13_spill] sm:$0xff] }
 0x14c   : > { %6374 = vst [vmem:[#allocation50_spill] sm:$0xff] %v5567_v38  ;;  %v1166_v55 = vrot.slane %v6375_v21, 1  ;;  %v6380_v21 = vld [vmem:[#allocation29_spill] sm:$0xff] }
 0x14d   : > { %v5565_v29 = vpack.c.b16 %v1416_v8, %v1413_v11 }
 0x14f   : > { %6373 = vst [vmem:[#allocation49_spill] sm:$0xff] %v5565_v29 }
 0x150   : > { %v5525_v44 = vpop.f32.mrf.mxu1  ;;  %v5531_v60 = vpop.f32.mrf.mxu0 }
 0x153   : > { %2344 = vmatmul.bf16.gmra.mxu0 %v5510_v18 }
 0x156   : > { %2017 = vmatmul.bf16.gmra.mxu2 %v5527_v12  ;;  %v6376_v12 = vld [vmem:[#allocation15_spill] sm:$0xff] }
 0x158   : > { %v1894_v62 = vpop.f32.mrf.mxu1  ;;  %2245 = vmatmul.bf16.gmra.mxu3 %v6371_v15  ;;  %v5554_v18 = vpop.f32.mrf.mxu0  ;;  %v1167_v15 = vrot.slane %v6376_v12, 1 }
 0x159   : > { %v5543_v17 = vpop.f32.mrf.mxu2  ;;  %v1895_v10 = vadd.f32 %v1894_v62, %v5395_v27  ;;  %v3676_v27 = vld [vmem:[%s6091_s3 + $0x98] sm:$0xff] }
 0x15a   : > { %6370 = vst [vmem:[#allocation4_spill] sm:$0xff] %v5543_v17  ;;  %2389 = vmatpush.bf16.msra.mxu1 %v3676_v27  ;;  %v6378_v27 = vld [vmem:[#allocation17_spill] sm:$0xff] }
 0x15b   : > { %1933 = vmatmul.bf16.gmra.mxu1 %v5536_v0  ;;  %v1421_v20 = vunpack.c.h.b16 %v6378_v27 }
 0x15d   : > { %v5578_v8 = vpack.c.b16 %v1421_v20, %v1418_v5 }
 0x15f   : > { %6379 = vst [vmem:[#allocation13_spill] sm:$0xff] %v5578_v8 }
 0x160   : > { %v1896_v2 = vpop.f32.mrf.mxu1  ;;  %v5572_v17 = vpop.f32.mrf.mxu0 }
 0x161   : > { %v5562_v62 = vpop.f32.mrf.mxu2  ;;  %v1897_v59 = vadd.f32 %v1896_v2, %v5422_v16  ;;  %v1228_v16 = vsel %vm1138_vm5, %v1167_v15, 0.0 }
 0x162   : > { %6372 = vst [vmem:[#allocation6_spill] sm:$0xff] %v5562_v62  ;;  %v1168_v62 = vsel %vm1138_vm5, %v1166_v55, %v1167_v15  ;;  %v1274_v30 = vpack.c.bf16 %v1228_v16, %v1228_v16 }
 0x163   : > { %2349 = vmatmul.bf16.gmra.mxu0 %v5536_v0 }
 0x164   : > { %v1422_v27 = vunpack.c.l.b16 %v1274_v30  ;;  %v6385_v30 = vld [vmem:[#allocation31_spill] sm:$0xff] }
 0x166   : > { %2022 = vmatmul.bf16.gmra.mxu2 %v5565_v29  ;;  %v1272_v29 = vpack.c.bf16 %v1168_v62, %v1168_v62 }
 0x168   : > { %v1899_v11 = vpop.f32.mrf.mxu1  ;;  %2250 = vmatmul.bf16.gmra.mxu3 %v6380_v21  ;;  %v1419_v55 = vunpack.c.l.b16 %v1272_v29  ;;  %v5586_v15 = vpop.f32.mrf.mxu0  ;;  %v1424_v29 = vunpack.c.h.b16 %v6385_v30 }
 0x169   : > { %v1983_v2 = vpop.f32.mrf.mxu2  ;;  %v1900_v12 = vadd.f32 %v1899_v11, %v5433_v33  ;;  %v6382_v33 = vld [vmem:[#allocation28_spill] sm:$0xff] }
 0x16a   : > { %v1984_v38 = vadd.f32 %v1983_v2, %v1895_v10  ;;  %v5589_v4 = vpack.c.b16 %v1422_v27, %v1419_v55  ;;  %v1169_v11 = vrot.slane %v6382_v33, 1  ;;  %v6383_v10 = vld [vmem:[#allocation30_spill] sm:$0xff] }
 0x16b   : > { %1938 = vmatmul.bf16.gmra.mxu1 %v5578_v8  ;;  %v5584_v63 = vpop.f32.mrf.mxu3  ;;  %v1170_v62 = vrot.slane %v6383_v10, 1 }
 0x16c   : > { %6381 = vst [vmem:[#allocation15_spill] sm:$0xff] %v5584_v63  ;;  %v6386_v63 = vld [vmem:[#allocation32_spill] sm:$0xff] }
 0x16d   : > { %v1427_v21 = vunpack.c.h.b16 %v6386_v63  ;;  %v1171_v56 = vsel %vm1138_vm5, %v1169_v11, %v1170_v62  ;;  %v3707_v63 = vld [vmem:[%s6091_s3 + $0x190] sm:$0xff] }
 0x16e   : > { %v1276_v33 = vpack.c.bf16 %v1171_v56, %v1171_v56  ;;  %v3715_v11 = vld [vmem:[%s6091_s3 + $0x1d0] sm:$0xff]  ;;  %2672 = vmatpush.bf16.msra.mxu2 %v3707_v63  ;;  %v1172_v63 = vrot.slane %v5222_v32, 1 }
 0x16f   : > { %v5602_v55 = vpack.c.b16 %v1427_v21, %v1424_v29  ;;  %2761 = vmatpush.bf16.msra.mxu3 %v3715_v11  ;;  %v3675_v56 = vld [vmem:[%s6091_s3 + $0x90] sm:$0xff]  ;;  %v1173_v11 = vrot.slane %v5240_v3, 1 }
 0x170   : > { %v1901_v5 = vpop.f32.mrf.mxu1  ;;  %v5596_v2 = vpop.f32.mrf.mxu0  ;;  %2390 = vmatpush.bf16.msra.mxu1 %v3675_v56  ;;  %v1430_v56 = vunpack.c.h.b16 %v5248_v57 }
 0x171   : > { %v1985_v20 = vpop.f32.mrf.mxu2  ;;  %v1902_v0 = vadd.f32 %v1901_v5, %v5451_v36  ;;  %v1229_v36 = vsel %vm1138_vm5, %v1170_v62, 0.0  ;;  %6387 = vst [vmem:[#allocation17_spill] sm:$0xff] %v5602_v55 }
 0x172   : > { %v1986_v28 = vadd.f32 %v1985_v20, %v1897_v59  ;;  %v1278_v10 = vpack.c.bf16 %v1229_v36, %v1229_v36 }
 0x173   : > { %v5593_v16 = vpop.f32.mrf.mxu3  ;;  %2354 = vmatmul.bf16.gmra.mxu0 %v5578_v8 }
 0x174   : > { %6384 = vst [vmem:[#allocation16_spill] sm:$0xff] %v5593_v16  ;;  %v1428_v30 = vunpack.c.l.b16 %v1278_v10 }
 0x176   : > { %2027 = vmatmul.bf16.gmra.mxu2 %v5589_v4 }
 0x178   : > { %v1904_v59 = vpop.f32.mrf.mxu1  ;;  %2255 = vmatmul.bf16.gmra.mxu3 %v5224_v34  ;;  %v5614_v29 = vpop.f32.mrf.mxu0 }
 0x179   : > { %v1988_v27 = vpop.f32.mrf.mxu2  ;;  %v1905_v5 = vadd.f32 %v1904_v59, %v5461_v47  ;;  %v1425_v47 = vunpack.c.l.b16 %v1276_v33 }
 0x17a   : > { %v1989_v20 = vadd.f32 %v1988_v27, %v1900_v12  ;;  %v3723_v12 = vld [vmem:[%s6091_s3 + $0x210] sm:$0xff] }
 0x17b   : > { %1943 = vmatmul.bf16.gmra.mxu1 %v5602_v55  ;;  %v2216_v21 = vpop.f32.mrf.mxu3  ;;  %2850 = vmatpush.bf16.msra.mxu0 %v3723_v12  ;;  %v5626_v10 = vpack.c.b16 %v1428_v30, %v1425_v47  ;;  %v6391_v30 = vld [vmem:[#allocation7_spill] sm:$0xff] }
 0x17c   : > { %v2217_v62 = vadd.f32 %v2216_v21, %v1984_v38 }
 0x17e   : > { %v5623_v59 = vadd.f32 %v5531_v60, %v2217_v62  ;;  %v1433_v60 = vunpack.c.h.b16 %v5268_v39  ;;  %v1174_v62 = vsel %vm1138_vm5, %v1172_v63, %v1173_v11 }
 0x17f   : > { %v1280_v12 = vpack.c.bf16 %v1174_v62, %v1174_v62 }
 0x180   : > { %v1906_v36 = vpop.f32.mrf.mxu1  ;;  %6388 = vst [vmem:[#allocation28_spill] sm:$0xff] %v5623_v59  ;;  %v5631_v16 = vpop.f32.mrf.mxu0  ;;  %v5637_v47 = vpack.c.b16 %v1433_v60, %v1430_v56 }
 0x181   : > { %v1990_v27 = vpop.f32.mrf.mxu2  ;;  %v1907_v38 = vadd.f32 %v1906_v36, %v5490_v46  ;;  %v1230_v46 = vsel %vm1138_vm5, %v1173_v11, 0.0  ;;  %v1431_v63 = vunpack.c.l.b16 %v1280_v12 }
 0x182   : > { %v1991_v33 = vadd.f32 %v1990_v27, %v1902_v0  ;;  %6389 = vst [vmem:[#allocation30_spill] sm:$0xff] %v5637_v47  ;;  %v1282_v39 = vpack.c.bf16 %v1230_v46, %v1230_v46  ;;  %v6394_v46 = vld [vmem:[#allocation10_spill] sm:$0xff] }
 0x183   : > { %v2218_v21 = vpop.f32.mrf.mxu3  ;;  %2359 = vmatmul.bf16.gmra.mxu0 %v5602_v55 }
 0x184   : > { %v2219_v8 = vadd.f32 %v2218_v21, %v1986_v28  ;;  %v1434_v11 = vunpack.c.l.b16 %v1282_v39  ;;  %v6395_v39 = vld [vmem:[#allocation9_spill] sm:$0xff] }
 0x186   : > { %2032 = vmatmul.bf16.gmra.mxu2 %v5626_v10  ;;  %v5641_v32 = vadd.f32 %v5554_v18, %v2219_v8 }
 0x188   : > { %v1909_v0 = vpop.f32.mrf.mxu1  ;;  %6390 = vst [vmem:[#allocation31_spill] sm:$0xff] %v5641_v32  ;;  %2260 = vmatmul.bf16.gmra.mxu3 %v6391_v30  ;;  %v5646_v21 = vpop.f32.mrf.mxu0  ;;  %v6402_v32 = vld [vmem:[#allocation21_spill] sm:$0xff] }
 0x189   : > { %v1993_v3 = vpop.f32.mrf.mxu2  ;;  %v1910_v28 = vadd.f32 %v1909_v0, %v5499_v58  ;;  %v5652_v0 = vpack.c.b16 %v1434_v11, %v1431_v63 }
 0x18a   : > { %v1994_v57 = vadd.f32 %v1993_v3, %v1905_v5  ;;  %v6393_v5 = vld [vmem:[#allocation8_spill] sm:$0xff]  ;;  %v1176_v3 = vrot.slane %v6394_v46, 1  ;;  %v3714_v46 = vld [vmem:[%s6091_s3 + $0x1c8] sm:$0xff] }
 0x18b   : > { %1948 = vmatmul.bf16.gmra.mxu1 %v5637_v47  ;;  %v2221_v36 = vpop.f32.mrf.mxu3  ;;  %v1175_v62 = vrot.slane %v6393_v5, 1  ;;  %2762 = vmatpush.bf16.msra.mxu3 %v3714_v46 }
 0x18c   : > { %v2222_v27 = vadd.f32 %v2221_v36, %v1989_v20  ;;  %v1436_v36 = vunpack.c.h.b16 %v6395_v39 }
 0x18e   : > { %v5649_v18 = vadd.f32 %v5572_v17, %v2222_v27  ;;  %v6396_v17 = vld [vmem:[#allocation11_spill] sm:$0xff] }
 0x18f   : > { %v1439_v27 = vunpack.c.h.b16 %v6396_v17 }
 0x190   : > { %v1911_v56 = vpop.f32.mrf.mxu1  ;;  %6392 = vst [vmem:[#allocation32_spill] sm:$0xff] %v5649_v18  ;;  %v5657_v12 = vpop.f32.mrf.mxu0  ;;  %v1177_v18 = vsel %vm1138_vm5, %v1175_v62, %v1176_v3  ;;  %v3706_v62 = vld [vmem:[%s6091_s3 + $0x188] sm:$0xff] }
 0x191   : > { %v1995_v8 = vpop.f32.mrf.mxu2  ;;  %v1912_v58 = vadd.f32 %v1911_v56, %v5519_v6  ;;  %v1231_v6 = vsel %vm1138_vm5, %v1176_v3, 0.0  ;;  %v5663_v63 = vpack.c.b16 %v1439_v27, %v1436_v36  ;;  %2673 = vmatpush.bf16.msra.mxu2 %v3706_v62  ;;  %v6401_v62 = vld [vmem:[#allocation20_spill] sm:$0xff] }
 0x192   : > { %v1996_v60 = vadd.f32 %v1995_v8, %v1907_v38  ;;  %v1284_v8 = vpack.c.bf16 %v1177_v18, %v1177_v18  ;;  %v1286_v5 = vpack.c.bf16 %v1231_v6, %v1231_v6  ;;  %v3722_v18 = vld [vmem:[%s6091_s3 + $0x208] sm:$0xff]  ;;  %v1179_v46 = vrot.slane %v6401_v62, 1 }
 0x193   : > { %v2223_v55 = vpop.f32.mrf.mxu3  ;;  %6397 = vst [vmem:[#allocation7_spill] sm:$0xff] %v5663_v63  ;;  %2364 = vmatmul.bf16.gmra.mxu0 %v5637_v47 }
 0x194   : > { %v2224_v20 = vadd.f32 %v2223_v55, %v1991_v33  ;;  %v6399_v33 = vld [vmem:[#allocation18_spill] sm:$0xff]  ;;  %v1440_v39 = vunpack.c.l.b16 %v1286_v5  ;;  %2851 = vmatpush.bf16.msra.mxu0 %v3722_v18 }
 0x195   : > { %v6403_v18 = vld [vmem:[#allocation22_spill] sm:$0xff] }
 0x196   : > { %2037 = vmatmul.bf16.gmra.mxu2 %v5652_v0  ;;  %v5667_v11 = vadd.f32 %v5586_v15, %v2224_v20  ;;  %v1437_v20 = vunpack.c.l.b16 %v1284_v8  ;;  %v6400_v8 = vld [vmem:[#allocation19_spill] sm:$0xff]  ;;  %v1445_v59 = vunpack.c.h.b16 %v6403_v18 }
 0x197   : > { %v1178_v5 = vrot.slane %v6400_v8, 1  ;;  %v6405_v8 = vld [vmem:[#allocation33_spill] sm:$0xff] }
 0x198   : > { %v1914_v38 = vpop.f32.mrf.mxu1  ;;  %6398 = vst [vmem:[#allocation8_spill] sm:$0xff] %v5667_v11  ;;  %2265 = vmatmul.bf16.gmra.mxu3 %v6399_v33  ;;  %v5677_v36 = vpop.f32.mrf.mxu0 }
 0x199   : > { %v1998_v55 = vpop.f32.mrf.mxu2 }
 0x19a   : > { %v1999_v56 = vadd.f32 %v1998_v55, %v1910_v28  ;;  %v3674_v28 = vld [vmem:[%s6091_s3 + $0x88] sm:$0xff]  ;;  %v5688_v55 = vpack.c.b16 %v1440_v39, %v1437_v20 }
 0x19b   : > { %1953 = vmatmul.bf16.gmra.mxu1 %v5663_v63  ;;  %v2226_v15 = vpop.f32.mrf.mxu3 }
 0x19c   : > { %v2227_v3 = vadd.f32 %v2226_v15, %v1994_v57  ;;  %2391 = vmatpush.bf16.msra.mxu1 %v3674_v28  ;;  %v1442_v28 = vunpack.c.h.b16 %v6402_v32 }
 0x19e   : > { %v5686_v27 = vadd.f32 %v5596_v2, %v2227_v3  ;;  %v1180_v2 = vsel %vm1138_vm5, %v1178_v5, %v1179_v46  ;;  %v1915_v3 = vadd.f32 %v1914_v38, %v5397_v1  ;;  %v5700_v39 = vpack.c.b16 %v1445_v59, %v1442_v28 }
 0x19f   : > { %v1288_v62 = vpack.c.bf16 %v1180_v2, %v1180_v2  ;;  %v1181_v2 = vrot.slane %v5066_v40, 1 }
 0x1a0   : > { %v1916_v17 = vpop.f32.mrf.mxu1  ;;  %v5693_v11 = vpop.f32.mrf.mxu0 }
 0x1a1   : > { %v2000_v6 = vpop.f32.mrf.mxu2  ;;  %v1443_v18 = vunpack.c.l.b16 %v1288_v62  ;;  %v1917_v59 = vadd.f32 %v1916_v17, %v5424_v43  ;;  %v1448_v43 = vunpack.c.h.b16 %v5097_v25  ;;  %v1451_v17 = vunpack.c.h.b16 %v5102_v24 }
 0x1a2   : > { %v2001_v57 = vadd.f32 %v2000_v6, %v1912_v58  ;;  %v1232_v58 = vsel %vm1138_vm5, %v1179_v46, 0.0 }
 0x1a3   : > { %v2228_v15 = vpop.f32.mrf.mxu3  ;;  %2369 = vmatmul.bf16.gmra.mxu0 %v5663_v63  ;;  %v5726_v40 = vpack.c.b16 %v1451_v17, %v1448_v43 }
 0x1a4   : > { %v2229_v47 = vadd.f32 %v2228_v15, %v1996_v60  ;;  %v1290_v15 = vpack.c.bf16 %v1232_v58, %v1232_v58  ;;  %v1182_v58 = vrot.slane %v5070_v49, 1 }
 0x1a6   : > { %2042 = vmatmul.bf16.gmra.mxu2 %v5688_v55  ;;  %v5704_v60 = vadd.f32 %v5614_v29, %v2229_v47  ;;  %v1446_v1 = vunpack.c.l.b16 %v1290_v15  ;;  %v1233_v62 = vsel %vm1138_vm5, %v1182_v58, 0.0 }
 0x1a7   : > { %v1294_v24 = vpack.c.bf16 %v1233_v62, %v1233_v62  ;;  %v1184_v62 = vrot.slane %v5321_v14, 1 }
 0x1a8   : > { %v1919_v20 = vpop.f32.mrf.mxu1  ;;  %6404 = vst [vmem:[#allocation10_spill] sm:$0xff] %v5704_v60  ;;  %2270 = vmatmul.bf16.gmra.mxu3 %v6405_v8  ;;  %v5708_v38 = vpop.f32.mrf.mxu0  ;;  %v5714_v60 = vpack.c.b16 %v1446_v1, %v1443_v18  ;;  %v3705_v18 = vld [vmem:[%s6091_s3 + $0x180] sm:$0xff] }
 0x1a9   : > { %v2003_v6 = vpop.f32.mrf.mxu2  ;;  %v1920_v15 = vadd.f32 %v1919_v20, %v5435_v51  ;;  %v3713_v51 = vld [vmem:[%s6091_s3 + $0x1c0] sm:$0xff]  ;;  %2674 = vmatpush.bf16.msra.mxu2 %v3705_v18 }
 0x1aa   : > { %v2004_v32 = vadd.f32 %v2003_v6, %v1915_v3  ;;  %2763 = vmatpush.bf16.msra.mxu3 %v3713_v51 }
 0x1ab   : > { %1958 = vmatmul.bf16.gmra.mxu1 %v5700_v39  ;;  %v2231_v5 = vpop.f32.mrf.mxu3 }
 0x1ac   : > { %v2232_v46 = vadd.f32 %v2231_v5, %v1999_v56 }
 0x1ae   : > { %v5712_v29 = vadd.f32 %v5631_v16, %v2232_v46  ;;  %v1183_v16 = vsel %vm1138_vm5, %v1181_v2, %v1182_v58  ;;  %v3673_v2 = vld [vmem:[%s6091_s3 + $0x80] sm:$0xff] }
 0x1af   : > { %v1292_v46 = vpack.c.bf16 %v1183_v16, %v1183_v16  ;;  %v3721_v58 = vld [vmem:[%s6091_s3 + $0x200] sm:$0xff]  ;;  %2392 = vmatpush.bf16.msra.mxu1 %v3673_v2 }
 0x1b0   : > { %v1921_v28 = vpop.f32.mrf.mxu1  ;;  %v5719_v6 = vpop.f32.mrf.mxu0  ;;  %2852 = vmatpush.bf16.msra.mxu0 %v3721_v58 }
 0x1b1   : > { %v2005_v47 = vpop.f32.mrf.mxu2  ;;  %v1449_v1 = vunpack.c.l.b16 %v1292_v46 }
 0x1b2   : > { %v2006_v63 = vadd.f32 %v2005_v47, %v1917_v59  ;;  %v1452_v59 = vunpack.c.l.b16 %v1294_v24 }
 0x1b3   : > { %v2233_v3 = vpop.f32.mrf.mxu3  ;;  %2374 = vmatmul.bf16.gmra.mxu0 %v5700_v39 }
 0x1b4   : > { %v2234_v56 = vadd.f32 %v2233_v3, %v2001_v57  ;;  %v1922_v3 = vadd.f32 %v1921_v28, %v5453_v31  ;;  %v5752_v16 = vpack.c.b16 %v1452_v59, %v1449_v1  ;;  %v1454_v31 = vunpack.c.h.b16 %v5332_v50 }
 0x1b5   : > { %v1457_v28 = vunpack.c.h.b16 %v5342_v42 }
 0x1b6   : > { %2047 = vmatmul.bf16.gmra.mxu2 %v5714_v60  ;;  %v5730_v49 = vadd.f32 %v5646_v21, %v2234_v56 }
 0x1b7   : > { %v5764_v14 = vpack.c.b16 %v1457_v28, %v1454_v31 }
 0x1b8   : > { %v1924_v5 = vpop.f32.mrf.mxu1  ;;  %2275 = vmatmul.bf16.gmra.mxu3 %v5285_v19  ;;  %v5740_v47 = vpop.f32.mrf.mxu0 }
 0x1b9   : > { %v2008_v57 = vpop.f32.mrf.mxu2  ;;  %v1925_v51 = vadd.f32 %v1924_v5, %v5467_v26 }
 0x1ba   : > { %v2009_v25 = vadd.f32 %v2008_v57, %v1920_v15  ;;  %v1185_v15 = vrot.slane %v5327_v7, 1 }
 0x1bb   : > { %1963 = vmatmul.bf16.gmra.mxu1 %v5726_v40  ;;  %v2236_v21 = vpop.f32.mrf.mxu3 }
 0x1bc   : > { %v2237_v20 = vadd.f32 %v2236_v21, %v2004_v32  ;;  %v1234_v18 = vsel %vm1138_vm5, %v1185_v15, 0.0 }
 0x1bd   : > { %v1298_v42 = vpack.c.bf16 %v1234_v18, %v1234_v18 }
 0x1be   : > { %v5750_v43 = vadd.f32 %v5657_v12, %v2237_v20  ;;  %v1186_v12 = vsel %vm1138_vm5, %v1184_v62, %v1185_v15  ;;  %v6406_v20 = vld [vmem:[#allocation12_spill] sm:$0xff] }
 0x1bf   : > { %v1296_v1 = vpack.c.bf16 %v1186_v12, %v1186_v12  ;;  %v1458_v26 = vunpack.c.l.b16 %v1298_v42 }
 0x1c0   : > { %v1926_v56 = vpop.f32.mrf.mxu1  ;;  %v5757_v24 = vpop.f32.mrf.mxu0 }
 0x1c1   : > { %v2010_v32 = vpop.f32.mrf.mxu2  ;;  %v1455_v58 = vunpack.c.l.b16 %v1296_v1 }
 0x1c2   : > { %v2011_v17 = vadd.f32 %v2010_v32, %v1922_v3  ;;  %v1927_v3 = vadd.f32 %v1926_v56, %v5495_v54 }
 0x1c3   : > { %v2238_v57 = vpop.f32.mrf.mxu3  ;;  %2379 = vmatmul.bf16.gmra.mxu0 %v5726_v40 }
 0x1c4   : > { %v2239_v46 = vadd.f32 %v2238_v57, %v2006_v63  ;;  %v5776_v57 = vpack.c.b16 %v1458_v26, %v1455_v58 }
 0x1c6   : > { %2052 = vmatmul.bf16.gmra.mxu2 %v5752_v16  ;;  %v5768_v7 = vadd.f32 %v5677_v36, %v2239_v46 }
 0x1c8   : > { %v1929_v21 = vpop.f32.mrf.mxu1  ;;  %2280 = vmatmul.bf16.gmra.mxu3 %v6406_v20  ;;  %v2342_v5 = vpop.f32.mrf.mxu0 }
 0x1c9   : > { %v2013_v63 = vpop.f32.mrf.mxu2 }
 0x1ca   : > { %v2014_v50 = vadd.f32 %v2013_v63, %v1925_v51  ;;  %v6408_v51 = vmov 0  }
 0x1cb   : > { %1968 = vmatmul.bf16.gmra.mxu1 %v5764_v14  ;;  %v2241_v59 = vpop.f32.mrf.mxu3 }
 0x1cc   : > { %v2242_v2 = vadd.f32 %v2241_v59, %v2009_v25  ;;  %v1930_v25 = vadd.f32 %v1929_v21, %v5514_v45 }
 0x1ce   : > { %v5774_v62 = vadd.f32 %v5693_v11, %v2242_v2  ;;  %v6407_v11 = vld [vmem:[#allocation23_spill] sm:$0xff] }
 0x1d0   : > { %v1931_v32 = vpop.f32.mrf.mxu1  ;;  %v2345_v28 = vpop.f32.mrf.mxu0 }
 0x1d1   : > { %v2015_v36 = vpop.f32.mrf.mxu2  ;;  %v1932_v42 = vadd.f32 %v1931_v32, %v5525_v44 }
 0x1d2   : > { %v2016_v15 = vadd.f32 %v2015_v36, %v1927_v3 }
 0x1d3   : > { %v2243_v46 = vpop.f32.mrf.mxu3  ;;  %2853 = vmatmul.bf16.vlgmr.msra.gmra.mxu0 %v5355_v13 }
 0x1d4   : > { %v2244_v31 = vadd.f32 %v2243_v46, %v2011_v17 }
 0x1d6   : > { %2057 = vmatmul.bf16.gmra.mxu2 %v5776_v57  ;;  %v5782_v54 = vadd.f32 %v5708_v38, %v2244_v31 }
 0x1d8   : > { %v1934_v12 = vpop.f32.mrf.mxu1  ;;  %2285 = vmatmul.bf16.gmra.mxu3 %v6407_v11  ;;  %v2347_v17 = vpop.f32.mrf.mxu0 }
 0x1d9   : > { %v2018_v56 = vpop.f32.mrf.mxu2  ;;  %v1935_v3 = vadd.f32 %v1934_v12, %v5429_v52 }
 0x1da   : > { %v2019_v18 = vadd.f32 %v2018_v56, %v1930_v25 }
 0x1db   : > { %2393 = vmatmul.bf16.vlgmr.msra.gmra.mxu1 %v6408_v51  ;;  %v2246_v63 = vpop.f32.mrf.mxu3 }
 0x1dc   : > { %v2247_v1 = vadd.f32 %v2246_v63, %v2014_v50 }
 0x1de   : > { %v5788_v45 = vadd.f32 %v5719_v6, %v2247_v1 }
 0x1e0   : > { %v1936_v59 = vpop.f32.mrf.mxu1  ;;  %v2350_v26 = vpop.f32.mrf.mxu0 }
 0x1e1   : > { %v2020_v21 = vpop.f32.mrf.mxu2 }
 0x1e2   : > { %v2021_v2 = vadd.f32 %v2020_v21, %v1932_v42 }
 0x1e3   : > { %v2248_v58 = vpop.f32.mrf.mxu3  ;;  %2858 = vmatmul.bf16.gmra.mxu0 %v5385_v22 }
 0x1e4   : > { %v2249_v38 = vadd.f32 %v2248_v58, %v2016_v15 }
 0x1e6   : > { %2675 = vmatmul.bf16.vlgmr.msra.gmra.mxu2 %v4544_v61  ;;  %v5794_v50 = vadd.f32 %v5740_v47, %v2249_v38  ;;  %v1937_v61 = vadd.f32 %v1936_v59, %v5442_v9 }
 0x1e8   : > { %v1939_v36 = vpop.f32.mrf.mxu1  ;;  %2290 = vmatmul.bf16.gmra.mxu3 %v5127_v41  ;;  %v2352_v15 = vpop.f32.mrf.mxu0 }
 0x1e9   : > { %v2023_v44 = vpop.f32.mrf.mxu2  ;;  %v1940_v1 = vadd.f32 %v1939_v36, %v5457_v48 }
 0x1ea   : > { %v2024_v6 = vadd.f32 %v2023_v44, %v1935_v3 }
 0x1eb   : > { %2398 = vmatmul.bf16.gmra.mxu1 %v5334_v37  ;;  %v2251_v32 = vpop.f32.mrf.mxu3 }
 0x1ec   : > { %v2252_v46 = vadd.f32 %v2251_v32, %v2019_v18 }
 0x1ee   : > { %v5800_v52 = vadd.f32 %v5757_v24, %v2252_v46  ;;  %v6411_v46 = vld [vmem:[#allocation44_spill] sm:$0xff] }
 0x1f0   : > { %v1941_v31 = vpop.f32.mrf.mxu1  ;;  %v2355_v63 = vpop.f32.mrf.mxu0 }
 0x1f1   : > { %v2025_v25 = vpop.f32.mrf.mxu2 }
 0x1f2   : > { %v2026_v12 = vadd.f32 %v2025_v25, %v1937_v61  ;;  %v6412_v25 = vld [vmem:[#allocation39_spill] sm:$0xff] }
 0x1f3   : > { %v2253_v56 = vpop.f32.mrf.mxu3  ;;  %2863 = vmatmul.bf16.gmra.mxu0 %v5399_v53 }
 0x1f4   : > { %v2254_v47 = vadd.f32 %v2253_v56, %v2021_v2  ;;  %v6409_v2 = vld [vmem:[#allocation24_spill] sm:$0xff] }
 0x1f5   : > { %v1942_v58 = vadd.f32 %v1941_v31, %v6409_v2  ;;  %v6413_v56 = vld [vmem:[#allocation36_spill] sm:$0xff] }
 0x1f6   : > { %2680 = vmatmul.bf16.gmra.mxu2 %v4883_v35  ;;  %v5805_v37 = vadd.f32 %v2342_v5, %v2254_v47  ;;  %v6410_v5 = vld [vmem:[#allocation34_spill] sm:$0xff] }
 0x1f8   : > { %v1944_v42 = vpop.f32.mrf.mxu1  ;;  %2764 = vmatmul.bf16.vlgmr.msra.gmra.mxu3 %v5347_v23  ;;  %v2357_v21 = vpop.f32.mrf.mxu0 }
 0x1f9   : > { %v2028_v18 = vpop.f32.mrf.mxu2  ;;  %v1945_v23 = vadd.f32 %v1944_v42, %v6411_v46 }
 0x1fa   : > { %v2029_v9 = vadd.f32 %v2028_v18, %v1940_v1 }
 0x1fb   : > { %2403 = vmatmul.bf16.gmra.mxu1 %v5355_v13  ;;  %v2256_v24 = vpop.f32.mrf.mxu3 }
 0x1fc   : > { %v2257_v59 = vadd.f32 %v2256_v24, %v2024_v6 }
 0x1fe   : > { %v5810_v38 = vadd.f32 %v2345_v28, %v2257_v59 }
 0x200   : > { %v1946_v35 = vpop.f32.mrf.mxu1  ;;  %v2360_v32 = vpop.f32.mrf.mxu0 }
 0x201   : > { %v2030_v48 = vpop.f32.mrf.mxu2 }
 0x202   : > { %v2031_v3 = vadd.f32 %v2030_v48, %v1942_v58 }
 0x203   : > { %v2258_v36 = vpop.f32.mrf.mxu3  ;;  %2868 = vmatmul.bf16.gmra.mxu0 %v6412_v25 }
 0x204   : > { %v2259_v44 = vadd.f32 %v2258_v36, %v2026_v12  ;;  %v6414_v12 = vld [vmem:[#allocation47_spill] sm:$0xff] }
 0x205   : > { %v1947_v18 = vadd.f32 %v1946_v35, %v6414_v12 }
 0x206   : > { %2685 = vmatmul.bf16.gmra.mxu2 %v6410_v5  ;;  %v5815_v13 = vadd.f32 %v2347_v17, %v2259_v44  ;;  %v6415_v17 = vld [vmem:[#allocation5_spill] sm:$0xff]  ;;  %v6416_v44 = vld [vmem:[#allocation4_spill] sm:$0xff] }
 0x208   : > { %v1949_v61 = vpop.f32.mrf.mxu1  ;;  %2769 = vmatmul.bf16.gmra.mxu3 %v6413_v56  ;;  %v2362_v1 = vpop.f32.mrf.mxu0 }
 0x209   : > { %v2033_v6 = vpop.f32.mrf.mxu2  ;;  %v1950_v5 = vadd.f32 %v1949_v61, %v6416_v44  ;;  %v6422_v44 = vld [vmem:[#allocation41_spill] sm:$0xff] }
 0x20a   : > { %v2034_v31 = vadd.f32 %v2033_v6, %v1945_v23  ;;  %v6417_v23 = vld [vmem:[#allocation42_spill] sm:$0xff]  ;;  %v6418_v6 = vld [vmem:[#allocation37_spill] sm:$0xff] }
 0x20b   : > { %2408 = vmatmul.bf16.gmra.mxu1 %v5385_v22  ;;  %v2261_v28 = vpop.f32.mrf.mxu3 }
 0x20c   : > { %v2262_v47 = vadd.f32 %v2261_v28, %v2029_v9 }
 0x20e   : > { %v5820_v59 = vadd.f32 %v2350_v26, %v2262_v47 }
 0x210   : > { %v1951_v24 = vpop.f32.mrf.mxu1  ;;  %v2365_v36 = vpop.f32.mrf.mxu0 }
 0x211   : > { %v2035_v42 = vpop.f32.mrf.mxu2 }
 0x212   : > { %v2036_v2 = vadd.f32 %v2035_v42, %v1947_v18 }
 0x213   : > { %v2263_v58 = vpop.f32.mrf.mxu3  ;;  %2873 = vmatmul.bf16.gmra.mxu0 %v6417_v23 }
 0x214   : > { %v2264_v48 = vadd.f32 %v2263_v58, %v2031_v3  ;;  %v6419_v3 = vld [vmem:[#allocation6_spill] sm:$0xff] }
 0x215   : > { %v1952_v47 = vadd.f32 %v1951_v24, %v6419_v3 }
 0x216   : > { %2690 = vmatmul.bf16.gmra.mxu2 %v6415_v17  ;;  %v5825_v22 = vadd.f32 %v2352_v15, %v2264_v48  ;;  %v6421_v15 = vld [vmem:[#allocation14_spill] sm:$0xff] }
 0x218   : > { %v1954_v46 = vpop.f32.mrf.mxu1  ;;  %2774 = vmatmul.bf16.gmra.mxu3 %v6418_v6  ;;  %v2367_v28 = vpop.f32.mrf.mxu0 }
 0x219   : > { %v2038_v9 = vpop.f32.mrf.mxu2  ;;  %v1955_v6 = vadd.f32 %v1954_v46, %v6422_v44 }
 0x21a   : > { %v2039_v35 = vadd.f32 %v2038_v9, %v1950_v5  ;;  %v6423_v9 = vld [vmem:[#allocation25_spill] sm:$0xff] }
 0x21b   : > { %2413 = vmatmul.bf16.gmra.mxu1 %v5399_v53  ;;  %v2266_v26 = vpop.f32.mrf.mxu3 }
 0x21c   : > { %v2267_v56 = vadd.f32 %v2266_v26, %v2034_v31  ;;  %v6425_v26 = vld [vmem:[#allocation38_spill] sm:$0xff] }
 0x21e   : > { %v5830_v18 = vadd.f32 %v2355_v63, %v2267_v56 }
 0x220   : > { %v1956_v12 = vpop.f32.mrf.mxu1  ;;  %6420 = vst [vmem:[#allocation9_spill] sm:$0xff] %v5830_v18  ;;  %v2370_v48 = vpop.f32.mrf.mxu0 }
 0x221   : > { %v2040_v61 = vpop.f32.mrf.mxu2 }
 0x222   : > { %v2041_v42 = vadd.f32 %v2040_v61, %v1952_v47 }
 0x223   : > { %v2268_v58 = vpop.f32.mrf.mxu3  ;;  %2878 = vmatmul.bf16.gmra.mxu0 %v6423_v9 }
 0x224   : > { %v2269_v17 = vadd.f32 %v2268_v58, %v2036_v2  ;;  %v6426_v2 = vld [vmem:[#allocation27_spill] sm:$0xff] }
 0x225   : > { %v1957_v47 = vadd.f32 %v1956_v12, %v6426_v2 }
 0x226   : > { %2695 = vmatmul.bf16.gmra.mxu2 %v6421_v15  ;;  %v5835_v53 = vadd.f32 %v2357_v21, %v2269_v17  ;;  %v6428_v21 = vld [vmem:[#allocation29_spill] sm:$0xff] }
 0x228   : > { %v1959_v5 = vpop.f32.mrf.mxu1  ;;  %6424 = vst [vmem:[#allocation11_spill] sm:$0xff] %v5835_v53  ;;  %2779 = vmatmul.bf16.gmra.mxu3 %v6425_v26  ;;  %v2372_v3 = vpop.f32.mrf.mxu0  ;;  %v6429_v53 = vld [vmem:[#allocation43_spill] sm:$0xff] }
 0x229   : > { %v2043_v31 = vpop.f32.mrf.mxu2  ;;  %v1960_v26 = vadd.f32 %v1959_v5, %v6429_v53 }
 0x22a   : > { %v2044_v24 = vadd.f32 %v2043_v31, %v1955_v6  ;;  %v6430_v31 = vld [vmem:[#allocation48_spill] sm:$0xff] }
 0x22b   : > { %2418 = vmatmul.bf16.gmra.mxu1 %v6412_v25  ;;  %v2271_v63 = vpop.f32.mrf.mxu3 }
 0x22c   : > { %v2272_v56 = vadd.f32 %v2271_v63, %v2039_v35  ;;  %v6431_v63 = vld [vmem:[#allocation40_spill] sm:$0xff] }
 0x22e   : > { %v5840_v58 = vadd.f32 %v2360_v32, %v2272_v56 }
 0x230   : > { %v1961_v61 = vpop.f32.mrf.mxu1  ;;  %6427 = vst [vmem:[#allocation18_spill] sm:$0xff] %v5840_v58  ;;  %v2375_v17 = vpop.f32.mrf.mxu0 }
 0x231   : > { %v2045_v46 = vpop.f32.mrf.mxu2 }
 0x232   : > { %v2046_v15 = vadd.f32 %v2045_v46, %v1957_v47 }
 0x233   : > { %v2273_v44 = vpop.f32.mrf.mxu3  ;;  %2883 = vmatmul.bf16.gmra.mxu0 %v6430_v31 }
 0x234   : > { %v2274_v18 = vadd.f32 %v2273_v44, %v2041_v42  ;;  %v6432_v42 = vld [vmem:[#allocation46_spill] sm:$0xff] }
 0x235   : > { %v1962_v47 = vadd.f32 %v1961_v61, %v6432_v42 }
 0x236   : > { %2700 = vmatmul.bf16.gmra.mxu2 %v6428_v21  ;;  %v5845_v25 = vadd.f32 %v2362_v1, %v2274_v18  ;;  %v6434_v18 = vld [vmem:[#allocation3_spill] sm:$0xff] }
 0x238   : > { %v1964_v6 = vpop.f32.mrf.mxu1  ;;  %2784 = vmatmul.bf16.gmra.mxu3 %v6431_v63  ;;  %v2377_v2 = vpop.f32.mrf.mxu0 }
 0x239   : > { %v2048_v35 = vpop.f32.mrf.mxu2  ;;  %v1965_v63 = vadd.f32 %v1964_v6, %v6434_v18 }
 0x23a   : > { %v2049_v12 = vadd.f32 %v2048_v35, %v1960_v26  ;;  %v6435_v35 = vld [vmem:[#allocation49_spill] sm:$0xff] }
 0x23b   : > { %2423 = vmatmul.bf16.gmra.mxu1 %v6417_v23  ;;  %v2276_v32 = vpop.f32.mrf.mxu3 }
 0x23c   : > { %v2277_v56 = vadd.f32 %v2276_v32, %v2044_v24  ;;  %v6436_v32 = vld [vmem:[#allocation26_spill] sm:$0xff] }
 0x23e   : > { %v5850_v44 = vadd.f32 %v2365_v36, %v2277_v56 }
 0x240   : > { %v1966_v46 = vpop.f32.mrf.mxu1  ;;  %6433 = vst [vmem:[#allocation19_spill] sm:$0xff] %v5850_v44  ;;  %v2380_v1 = vpop.f32.mrf.mxu0 }
 0x241   : > { %v2050_v5 = vpop.f32.mrf.mxu2 }
 0x242   : > { %v2051_v53 = vadd.f32 %v2050_v5, %v1962_v47 }
 0x243   : > { %v2278_v21 = vpop.f32.mrf.mxu3  ;;  %2888 = vmatmul.bf16.gmra.mxu0 %v6435_v35 }
 0x244   : > { %v2279_v58 = vadd.f32 %v2278_v21, %v2046_v15  ;;  %v6437_v15 = vld [vmem:[#allocation50_spill] sm:$0xff] }
 0x245   : > { %v1967_v47 = vadd.f32 %v1966_v46, %v6437_v15 }
 0x246   : > { %2705 = vmatmul.bf16.gmra.mxu2 %v5224_v34  ;;  %v5855_v23 = vadd.f32 %v2367_v28, %v2279_v58  ;;  %v6438_v58 = vld [vmem:[#allocation15_spill] sm:$0xff] }
 0x248   : > { %v1969_v26 = vpop.f32.mrf.mxu1  ;;  %2789 = vmatmul.bf16.gmra.mxu3 %v6436_v32  ;;  %v2382_v42 = vpop.f32.mrf.mxu0 }
 0x249   : > { %v2053_v24 = vpop.f32.mrf.mxu2  ;;  %v1970_v32 = vadd.f32 %v1969_v26, %v6438_v58 }
 0x24a   : > { %v2054_v61 = vadd.f32 %v2053_v24, %v1965_v63  ;;  %v6439_v24 = vld [vmem:[#allocation45_spill] sm:$0xff] }
 0x24b   : > { %2428 = vmatmul.bf16.gmra.mxu1 %v6423_v9  ;;  %v2281_v36 = vpop.f32.mrf.mxu3 }
 0x24c   : > { %v2282_v56 = vadd.f32 %v2281_v36, %v2049_v12 }
 0x24e   : > { %v5860_v5 = vadd.f32 %v2370_v48, %v2282_v56 }
 0x250   : > { %v1971_v34 = vpop.f32.mrf.mxu1  ;;  %v2854_v28 = vpop.f32.mrf.mxu0 }
 0x251   : > { %v2055_v6 = vpop.f32.mrf.mxu2 }
 0x252   : > { %v2056_v21 = vadd.f32 %v2055_v6, %v1967_v47 }
 0x253   : > { %v2283_v18 = vpop.f32.mrf.mxu3  ;;  %2893 = vmatmul.bf16.gmra.mxu0 %v5589_v4 }
 0x254   : > { %v2284_v44 = vadd.f32 %v2283_v18, %v2051_v53  ;;  %v6440_v53 = vld [vmem:[#allocation16_spill] sm:$0xff] }
 0x255   : > { %v1972_v15 = vadd.f32 %v1971_v34, %v6440_v53 }
 0x256   : > { %2710 = vmatmul.bf16.gmra.mxu2 %v6391_v30  ;;  %v5865_v9 = vadd.f32 %v2372_v3, %v2284_v44 }
 0x258   : > { %v2394_v63 = vpop.f32.mrf.mxu1  ;;  %2794 = vmatmul.bf16.gmra.mxu3 %v6439_v24  ;;  %v2856_v56 = vpop.f32.mrf.mxu0 }
 0x259   : > { %v2058_v12 = vpop.f32.mrf.mxu2 }
 0x25a   : > { %v2059_v46 = vadd.f32 %v2058_v12, %v1970_v32 }
 0x25b   : > { %2433 = vmatmul.bf16.gmra.mxu1 %v6430_v31  ;;  %v2286_v48 = vpop.f32.mrf.mxu3 }
 0x25c   : > { %v2287_v36 = vadd.f32 %v2286_v48, %v2054_v61  ;;  %v6443_v61 = vld [vmem:[#allocation2_spill] sm:$0xff] }
 0x25e   : > { %v5870_v47 = vadd.f32 %v2375_v17, %v2287_v36 }
 0x260   : > { %v2396_v30 = vpop.f32.mrf.mxu1  ;;  %6441 = vst [vmem:[#allocation20_spill] sm:$0xff] %v5870_v47  ;;  %v2859_v3 = vpop.f32.mrf.mxu0 }
 0x261   : > { %v2060_v26 = vpop.f32.mrf.mxu2 }
 0x262   : > { %v2061_v6 = vadd.f32 %v2060_v26, %v1972_v15 }
 0x263   : > { %v2288_v18 = vpop.f32.mrf.mxu3  ;;  %2898 = vmatmul.bf16.gmra.mxu0 %v5626_v10 }
 0x264   : > { %v2289_v58 = vadd.f32 %v2288_v18, %v2056_v21 }
 0x266   : > { %2715 = vmatmul.bf16.gmra.mxu2 %v6399_v33  ;;  %v5874_v32 = vadd.f32 %v2377_v2, %v2289_v58 }
 0x268   : > { %v2399_v44 = vpop.f32.mrf.mxu1  ;;  %6442 = vst [vmem:[#allocation21_spill] sm:$0xff] %v5874_v32  ;;  %2799 = vmatmul.bf16.gmra.mxu3 %v6443_v61  ;;  %v2861_v12 = vpop.f32.mrf.mxu0  ;;  %v5896_v61 = vld [vmem:[%s6092_s4] ss:$0 sm:$0xff] }
 0x269   : > { %v2676_v31 = vpop.f32.mrf.mxu2 }
 0x26b   : > { %2438 = vmatmul.bf16.gmra.mxu1 %v6435_v35  ;;  %v2291_v34 = vpop.f32.mrf.mxu3 }
 0x26c   : > { %v2292_v17 = vadd.f32 %v2291_v34, %v2059_v46  ;;  %v6446_v46 = vld [vmem:[#allocation13_spill] sm:$0xff] }
 0x26e   : > { %v5878_v48 = vadd.f32 %v2380_v1, %v2292_v17 }
 0x270   : > { %v2401_v24 = vpop.f32.mrf.mxu1  ;;  %6444 = vst [vmem:[#allocation22_spill] sm:$0xff] %v5878_v48  ;;  %v5881_v53 = vpop.f32.mrf.mxu0 }
 0x271   : > { %v2678_v21 = vpop.f32.mrf.mxu2 }
 0x273   : > { %v2293_v36 = vpop.f32.mrf.mxu3  ;;  %2903 = vmatmul.bf16.gmra.mxu0 %v5652_v0 }
 0x274   : > { %v2294_v33 = vadd.f32 %v2293_v36, %v2061_v6  ;;  %v6447_v6 = vld [vmem:[#allocation28_spill] sm:$0xff]  ;;  %v6448_v36 = vld [vmem:[#allocation31_spill] sm:$0xff] }
 0x276   : > { %2720 = vmatmul.bf16.gmra.mxu2 %v6405_v8  ;;  %v5886_v15 = vadd.f32 %v2382_v42, %v2294_v33  ;;  %v2395_v8 = vadd.f32 %v2394_v63, %v6447_v6  ;;  %v2397_v33 = vadd.f32 %v2396_v30, %v6448_v36  ;;  %v6450_v36 = vld [vmem:[#allocation32_spill] sm:$0xff] }
 0x278   : > { %v5883_v2 = vpop.f32.mrf.mxu1  ;;  %6445 = vst [vmem:[#allocation33_spill] sm:$0xff] %v5886_v15  ;;  %2804 = vmatmul.bf16.gmra.mxu3 %v6446_v46  ;;  %v5890_v18 = vpop.f32.mrf.mxu0  ;;  %v2400_v15 = vadd.f32 %v2399_v44, %v6450_v36 }
 0x279   : > { %v2681_v35 = vpop.f32.mrf.mxu2 }
 0x27b   : > { %2443 = vmatmul.bf16.gmra.mxu1 %v5589_v4  ;;  %v2765_v1 = vpop.f32.mrf.mxu3 }
 0x27c   : > { %v2766_v26 = vadd.f32 %v2765_v1, %v2676_v31 }
 0x27e   : > { %v2855_v58 = vadd.f32 %v2854_v28, %v2766_v26 }
 0x280   : > { %v5898_v34 = vpop.f32.mrf.mxu1  ;;  %v2934_v17 = vadd.f32 %v2855_v58, %v2395_v8  ;;  %v5910_v31 = vpop.f32.mrf.mxu0  ;;  %v6449_v8 = vld [vmem:[#allocation17_spill] sm:$0xff] }
 0x281   : > { %v2683_v42 = vpop.f32.mrf.mxu2 }
 0x282   : > { %v2969_v4 = vadd.f32 %v5896_v61, %v2934_v17 }
 0x283   : > { %v2767_v63 = vpop.f32.mrf.mxu3  ;;  %2908 = vmatmul.bf16.gmra.mxu0 %v5688_v55 }
 0x284   : > { %3001 = vst [vmem:[%s5905_s14] sm:$0xff] %v2969_v4  ;;  %v2768_v28 = vadd.f32 %v2767_v63, %v2678_v21 }
 0x286   : > { %2725 = vmatmul.bf16.gmra.mxu2 %v5285_v19  ;;  %v2857_v46 = vadd.f32 %v2856_v56, %v2768_v28  ;;  %v3070_v19 = vmul.f32 %v2969_v4, %v2969_v4 }
 0x288   : > { %v5913_v1 = vpop.f32.mrf.mxu1  ;;  %v2935_v6 = vadd.f32 %v2857_v46, %v2397_v33  ;;  %2809 = vmatmul.bf16.gmra.mxu3 %v6449_v8  ;;  %v5920_v56 = vpop.f32.mrf.mxu0 }
 0x289   : > { %v2686_v26 = vpop.f32.mrf.mxu2 }
 0x28a   : > { %v2970_v58 = vadd.f32 %v5896_v61, %v2935_v6 }
 0x28b   : > { %2448 = vmatmul.bf16.gmra.mxu1 %v5626_v10  ;;  %v2770_v21 = vpop.f32.mrf.mxu3 }
 0x28c   : > { %3002 = vst [vmem:[%s5905_s14 + $0x8] sm:$0xff] %v2970_v58  ;;  %v3033_v17 = vadd.f32 %v2970_v58, %v2969_v4  ;;  %v3071_v63 = vmul.f32 %v2970_v58, %v2970_v58  ;;  %v2771_v30 = vadd.f32 %v2770_v21, %v2681_v35  ;;  %v6451_v21 = vld [vmem:[#allocation8_spill] sm:$0xff] }
 0x28d   : > { %v2402_v44 = vadd.f32 %v2401_v24, %v6451_v21 }
 0x28e   : > { %v3102_v28 = vadd.f32 %v3071_v63, %v3070_v19  ;;  %v2860_v48 = vadd.f32 %v2859_v3, %v2771_v30  ;;  %v6452_v63 = vld [vmem:[#allocation30_spill] sm:$0xff] }
 0x290   : > { %v5923_v33 = vpop.f32.mrf.mxu1  ;;  %v2936_v8 = vadd.f32 %v2860_v48, %v2400_v15  ;;  %v5928_v35 = vpop.f32.mrf.mxu0 }
 0x291   : > { %v2688_v46 = vpop.f32.mrf.mxu2 }
 0x292   : > { %v2971_v10 = vadd.f32 %v5896_v61, %v2936_v8 }
 0x293   : > { %v2772_v6 = vpop.f32.mrf.mxu3  ;;  %2913 = vmatmul.bf16.gmra.mxu0 %v5714_v60 }
 0x294   : > { %3003 = vst [vmem:[%s5905_s14 + $0x10] sm:$0xff] %v2971_v10  ;;  %v3034_v32 = vadd.f32 %v3033_v17, %v2971_v10  ;;  %v3072_v47 = vmul.f32 %v2971_v10, %v2971_v10  ;;  %v2773_v4 = vadd.f32 %v2772_v6, %v2683_v42 }
 0x296   : > { %2730 = vmatmul.bf16.gmra.mxu2 %v6406_v20  ;;  %v3103_v58 = vadd.f32 %v3102_v28, %v3072_v47  ;;  %v2862_v3 = vadd.f32 %v2861_v12, %v2773_v4  ;;  %v2405_v28 = vadd.f32 %v5883_v2, %v5686_v27  ;;  %v6453_v27 = vld [vmem:[#allocation10_spill] sm:$0xff] }
 0x298   : > { %v5931_v19 = vpop.f32.mrf.mxu1  ;;  %v2937_v15 = vadd.f32 %v2862_v3, %v2402_v44  ;;  %2814 = vmatmul.bf16.gmra.mxu3 %v6452_v63  ;;  %v5938_v24 = vpop.f32.mrf.mxu0 }
 0x299   : > { %v2691_v48 = vpop.f32.mrf.mxu2 }
 0x29a   : > { %v2972_v42 = vadd.f32 %v5896_v61, %v2937_v15 }
 0x29b   : > { %2453 = vmatmul.bf16.gmra.mxu1 %v5652_v0  ;;  %v2775_v20 = vpop.f32.mrf.mxu3 }
 0x29c   : > { %3004 = vst [vmem:[%s5905_s14 + $0x18] sm:$0xff] %v2972_v42  ;;  %v3035_v17 = vadd.f32 %v3034_v32, %v2972_v42  ;;  %v3073_v47 = vmul.f32 %v2972_v42, %v2972_v42  ;;  %v2776_v30 = vadd.f32 %v2775_v20, %v2686_v26  ;;  %v6454_v42 = vld [vmem:[#allocation7_spill] sm:$0xff] }
 0x29e   : > { %v3104_v12 = vadd.f32 %v3103_v58, %v3073_v47  ;;  %v2865_v36 = vadd.f32 %v5881_v53, %v2776_v30  ;;  %v2407_v53 = vadd.f32 %v5898_v34, %v6453_v27  ;;  %v2410_v30 = vadd.f32 %v5913_v1, %v5712_v29 }
 0x29f   : > { %v2412_v29 = vadd.f32 %v5923_v33, %v5730_v49 }
 0x2a0   : > { %v5943_v8 = vpop.f32.mrf.mxu1  ;;  %v2938_v0 = vadd.f32 %v2865_v36, %v2405_v28  ;;  %v5948_v58 = vpop.f32.mrf.mxu0 }
 0x2a1   : > { %v2693_v10 = vpop.f32.mrf.mxu2 }
 0x2a2   : > { %v2973_v6 = vadd.f32 %v5896_v61, %v2938_v0 }
 0x2a3   : > { %v2777_v4 = vpop.f32.mrf.mxu3  ;;  %2918 = vmatmul.bf16.gmra.mxu0 %v5752_v16 }
 0x2a4   : > { %3005 = vst [vmem:[%s5905_s14 + $0x20] sm:$0xff] %v2973_v6  ;;  %v3036_v21 = vadd.f32 %v3035_v17, %v2973_v6  ;;  %v3074_v32 = vmul.f32 %v2973_v6, %v2973_v6  ;;  %v2778_v26 = vadd.f32 %v2777_v4, %v2688_v46 }
 0x2a6   : > { %2735 = vmatmul.bf16.gmra.mxu2 %v6407_v11  ;;  %v3105_v44 = vadd.f32 %v3104_v12, %v3074_v32  ;;  %v2867_v2 = vadd.f32 %v5890_v18, %v2778_v26 }
 0x2a8   : > { %v5953_v3 = vpop.f32.mrf.mxu1  ;;  %v2939_v63 = vadd.f32 %v2867_v2, %v2407_v53  ;;  %2819 = vmatmul.bf16.gmra.mxu3 %v6454_v42  ;;  %v5960_v47 = vpop.f32.mrf.mxu0 }
 0x2a9   : > { %v2696_v15 = vpop.f32.mrf.mxu2 }
 0x2aa   : > { %v2974_v11 = vadd.f32 %v5896_v61, %v2939_v63 }
 0x2ab   : > { %2458 = vmatmul.bf16.gmra.mxu1 %v5688_v55  ;;  %v2780_v46 = vpop.f32.mrf.mxu3 }
 0x2ac   : > { %3006 = vst [vmem:[%s5905_s14 + $0x28] sm:$0xff] %v2974_v11  ;;  %v3037_v20 = vadd.f32 %v3036_v21, %v2974_v11  ;;  %v3075_v17 = vmul.f32 %v2974_v11, %v2974_v11  ;;  %v2781_v34 = vadd.f32 %v2780_v46, %v2691_v48 }
 0x2ae   : > { %v3106_v18 = vadd.f32 %v3105_v44, %v3075_v17  ;;  %v2870_v12 = vadd.f32 %v5910_v31, %v2781_v34  ;;  %v6455_v34 = vld [vmem:[#allocation35_spill] sm:$0xff] }
 0x2b0   : > { %v5965_v28 = vpop.f32.mrf.mxu1  ;;  %v2940_v55 = vadd.f32 %v2870_v12, %v2410_v30  ;;  %v5976_v44 = vpop.f32.mrf.mxu0 }
 0x2b1   : > { %v2698_v36 = vpop.f32.mrf.mxu2 }
 0x2b2   : > { %v2975_v0 = vadd.f32 %v5896_v61, %v2940_v55 }
 0x2b3   : > { %v2782_v6 = vpop.f32.mrf.mxu3  ;;  %2923 = vmatmul.bf16.gmra.mxu0 %v5776_v57  ;;  %v2415_v57 = vadd.f32 %v5931_v19, %v5750_v43  ;;  %v2417_v43 = vadd.f32 %v5943_v8, %v5768_v7 }
 0x2b4   : > { %3007 = vst [vmem:[%s5905_s14 + $0x30] sm:$0xff] %v2975_v0  ;;  %v3038_v4 = vadd.f32 %v3037_v20, %v2975_v0  ;;  %v3076_v21 = vmul.f32 %v2975_v0, %v2975_v0  ;;  %v2783_v48 = vadd.f32 %v2782_v6, %v2693_v10 }
 0x2b6   : > { %2740 = vmatmul.bf16.gmra.mxu2 %v5127_v41  ;;  %v3107_v32 = vadd.f32 %v3106_v18, %v3076_v21  ;;  %v2872_v31 = vadd.f32 %v5920_v56, %v2783_v48 }
 0x2b8   : > { %v5973_v1 = vpop.f32.mrf.mxu1  ;;  %v2941_v27 = vadd.f32 %v2872_v31, %v2412_v29  ;;  %2824 = vmatmul.bf16.gmra.mxu3 %v5700_v39  ;;  %v5987_v11 = vpop.f32.mrf.mxu0 }
 0x2b9   : > { %v2701_v26 = vpop.f32.mrf.mxu2 }
 0x2ba   : > { %v2976_v41 = vadd.f32 %v5896_v61, %v2941_v27 }
 0x2bb   : > { %2463 = vmatmul.bf16.gmra.mxu1 %v5714_v60  ;;  %v2785_v10 = vpop.f32.mrf.mxu3 }
 0x2bc   : > { %3008 = vst [vmem:[%s5905_s14 + $0x38] sm:$0xff] %v2976_v41  ;;  %v3039_v49 = vadd.f32 %v3038_v4, %v2976_v41  ;;  %v3077_v33 = vmul.f32 %v2976_v41, %v2976_v41  ;;  %v2786_v56 = vadd.f32 %v2785_v10, %v2696_v15  ;;  %v2420_v4 = vadd.f32 %v5953_v3, %v5774_v62 }
 0x2bd   : > { %v2422_v62 = vadd.f32 %v5965_v28, %v5782_v54 }
 0x2be   : > { %v3108_v53 = vadd.f32 %v3107_v32, %v3077_v33  ;;  %v2875_v2 = vadd.f32 %v5928_v35, %v2786_v56 }
 0x2c0   : > { %v5985_v42 = vpop.f32.mrf.mxu1  ;;  %v2942_v39 = vadd.f32 %v2875_v2, %v2415_v57  ;;  %v2889_v0 = vpop.f32.mrf.mxu0 }
 0x2c1   : > { %v2703_v63 = vpop.f32.mrf.mxu2 }
 0x2c2   : > { %v2977_v60 = vadd.f32 %v5896_v61, %v2942_v39 }
 0x2c3   : > { %v2787_v46 = vpop.f32.mrf.mxu3  ;;  %2928 = vmatmul.bf16.gmra.mxu0 %v6408_v51 }
 0x2c4   : > { %3009 = vst [vmem:[%s5905_s14 + $0x40] sm:$0xff] %v2977_v60  ;;  %v3040_v20 = vadd.f32 %v3039_v49, %v2977_v60  ;;  %v3078_v17 = vmul.f32 %v2977_v60, %v2977_v60  ;;  %v2788_v15 = vadd.f32 %v2787_v46, %v2698_v36  ;;  %v2425_v60 = vadd.f32 %v5973_v1, %v5788_v45 }
 0x2c6   : > { %2745 = vmatmul.bf16.gmra.mxu2 %v6455_v34  ;;  %v3109_v18 = vadd.f32 %v3108_v53, %v3078_v17  ;;  %v2877_v35 = vadd.f32 %v5938_v24, %v2788_v15 }
 0x2c8   : > { %v2943_v30 = vadd.f32 %v2877_v35, %v2417_v43  ;;  %2829 = vmatmul.bf16.gmra.mxu3 %v5726_v40  ;;  %v5997_v12 = vpop.f32.mrf.mxu1  ;;  %v2427_v43 = vadd.f32 %v5985_v42, %v5794_v50 }
 0x2c9   : > { %v2706_v19 = vpop.f32.mrf.mxu2  ;;  %v2430_v50 = vadd.f32 %v5997_v12, %v5800_v52 }
 0x2ca   : > { %v2978_v36 = vadd.f32 %v5896_v61, %v2943_v30 }
 0x2cb   : > { %2468 = vmatmul.bf16.gmra.mxu1 %v5752_v16  ;;  %v2790_v55 = vpop.f32.mrf.mxu3 }
 0x2cc   : > { %3010 = vst [vmem:[%s5905_s14 + $0x48] sm:$0xff] %v2978_v36  ;;  %v3041_v6 = vadd.f32 %v3040_v20, %v2978_v36  ;;  %v3079_v7 = vmul.f32 %v2978_v36, %v2978_v36  ;;  %v2791_v8 = vadd.f32 %v2790_v55, %v2701_v26  ;;  %v2891_v26 = vpop.f32.mrf.mxu0 }
 0x2ce   : > { %v3110_v24 = vadd.f32 %v3109_v18, %v3079_v7  ;;  %v2880_v21 = vadd.f32 %v5948_v58, %v2791_v8 }
 0x2d0   : > { %v2944_v48 = vadd.f32 %v2880_v21, %v2420_v4  ;;  %v2431_v29 = vpop.f32.mrf.mxu1 }
 0x2d1   : > { %v2708_v40 = vpop.f32.mrf.mxu2 }
 0x2d2   : > { %v2979_v32 = vadd.f32 %v5896_v61, %v2944_v48 }
 0x2d3   : > { %v2792_v16 = vpop.f32.mrf.mxu3 }
 0x2d4   : > { %3011 = vst [vmem:[%s5905_s14 + $0x50] sm:$0xff] %v2979_v32  ;;  %v3042_v31 = vadd.f32 %v3041_v6, %v2979_v32  ;;  %v3080_v27 = vmul.f32 %v2979_v32, %v2979_v32  ;;  %v2793_v41 = vadd.f32 %v2792_v16, %v2703_v63  ;;  %v2894_v28 = vpop.f32.mrf.mxu0 }
 0x2d6   : > { %2750 = vmatmul.bf16.gmra.mxu2 %v6408_v51  ;;  %v3111_v10 = vadd.f32 %v3110_v24, %v3080_v27  ;;  %v2882_v58 = vadd.f32 %v5960_v47, %v2793_v41  ;;  %v2432_v27 = vadd.f32 %v2431_v29, %v5805_v37 }
 0x2d8   : > { %v2945_v49 = vadd.f32 %v2882_v58, %v2422_v62  ;;  %2834 = vmatmul.bf16.gmra.mxu3 %v5764_v14  ;;  %v2434_v63 = vpop.f32.mrf.mxu1 }
 0x2d9   : > { %v2711_v3 = vpop.f32.mrf.mxu2 }
 0x2da   : > { %v2980_v33 = vadd.f32 %v5896_v61, %v2945_v49 }
 0x2db   : > { %v2795_v56 = vpop.f32.mrf.mxu3 }
 0x2dc   : > { %3012 = vst [vmem:[%s5905_s14 + $0x58] sm:$0xff] %v2980_v33  ;;  %v3043_v53 = vadd.f32 %v3042_v31, %v2980_v33  ;;  %v3081_v57 = vmul.f32 %v2980_v33, %v2980_v33  ;;  %v2796_v2 = vadd.f32 %v2795_v56, %v2706_v19  ;;  %v2896_v19 = vpop.f32.mrf.mxu0 }
 0x2de   : > { %v3112_v39 = vadd.f32 %v3111_v10, %v3081_v57  ;;  %v2885_v54 = vadd.f32 %v5976_v44, %v2796_v2 }
 0x2e0   : > { %v2946_v46 = vadd.f32 %v2885_v54, %v2425_v60  ;;  %v2436_v1 = vpop.f32.mrf.mxu1 }
 0x2e1   : > { %v2713_v47 = vpop.f32.mrf.mxu2 }
 0x2e2   : > { %v2981_v14 = vadd.f32 %v5896_v61, %v2946_v46 }
 0x2e3   : > { %v2797_v20 = vpop.f32.mrf.mxu3 }
 0x2e4   : > { %3013 = vst [vmem:[%s5905_s14 + $0x60] sm:$0xff] %v2981_v14  ;;  %v3044_v17 = vadd.f32 %v3043_v53, %v2981_v14  ;;  %v3082_v15 = vmul.f32 %v2981_v14, %v2981_v14  ;;  %v2798_v34 = vadd.f32 %v2797_v20, %v2708_v40  ;;  %v2899_v40 = vpop.f32.mrf.mxu0  ;;  %v2435_v53 = vadd.f32 %v2434_v63, %v5810_v38 }
 0x2e5   : > { %v2437_v14 = vadd.f32 %v2436_v1, %v5815_v13 }
 0x2e6   : > { %v3113_v18 = vadd.f32 %v3112_v39, %v3082_v15  ;;  %v2887_v35 = vadd.f32 %v5987_v11, %v2798_v34 }
 0x2e8   : > { %v2947_v44 = vadd.f32 %v2887_v35, %v2427_v43  ;;  %2839 = vmatmul.bf16.gmra.mxu3 %v6408_v51  ;;  %v2439_v4 = vpop.f32.mrf.mxu1 }
 0x2e9   : > { %v2716_v45 = vpop.f32.mrf.mxu2 }
 0x2ea   : > { %v2982_v30 = vadd.f32 %v5896_v61, %v2947_v44 }
 0x2eb   : > { %v2800_v36 = vpop.f32.mrf.mxu3 }
 0x2ec   : > { %3014 = vst [vmem:[%s5905_s14 + $0x68] sm:$0xff] %v2982_v30  ;;  %v3045_v55 = vadd.f32 %v3044_v17, %v2982_v30  ;;  %v3083_v6 = vmul.f32 %v2982_v30, %v2982_v30  ;;  %v2801_v7 = vadd.f32 %v2800_v36, %v2711_v3  ;;  %v2901_v33 = vpop.f32.mrf.mxu0 }
 0x2ee   : > { %v3114_v8 = vadd.f32 %v3113_v18, %v3083_v6  ;;  %v2890_v42 = vadd.f32 %v2889_v0, %v2801_v7 }
 0x2f0   : > { %v2948_v24 = vadd.f32 %v2890_v42, %v2430_v50  ;;  %v2441_v0 = vpop.f32.mrf.mxu1 }
 0x2f1   : > { %v2718_v11 = vpop.f32.mrf.mxu2  ;;  %v2442_v42 = vadd.f32 %v2441_v0, %v5825_v22 }
 0x2f2   : > { %v2983_v51 = vadd.f32 %v5896_v61, %v2948_v24 }
 0x2f3   : > { %v2802_v21 = vpop.f32.mrf.mxu3 }
 0x2f4   : > { %3015 = vst [vmem:[%s5905_s14 + $0x70] sm:$0xff] %v2983_v51  ;;  %v3046_v48 = vadd.f32 %v3045_v55, %v2983_v51  ;;  %v3084_v32 = vmul.f32 %v2983_v51, %v2983_v51  ;;  %v2803_v16 = vadd.f32 %v2802_v21, %v2713_v47  ;;  %v2904_v17 = vpop.f32.mrf.mxu0 }
 0x2f6   : > { %v3115_v31 = vadd.f32 %v3114_v8, %v3084_v32  ;;  %v2892_v41 = vadd.f32 %v2891_v26, %v2803_v16 }
 0x2f8   : > { %v2949_v62 = vadd.f32 %v2892_v41, %v2432_v27  ;;  %v2444_v47 = vpop.f32.mrf.mxu1  ;;  %v6456_v27 = vld [vmem:[#allocation9_spill] sm:$0xff] }
 0x2f9   : > { %v2721_v10 = vpop.f32.mrf.mxu2  ;;  %v2445_v41 = vadd.f32 %v2444_v47, %v6456_v27 }
 0x2fa   : > { %v2984_v52 = vadd.f32 %v5896_v61, %v2949_v62 }
 0x2fb   : > { %v2805_v12 = vpop.f32.mrf.mxu3 }
 0x2fc   : > { %3016 = vst [vmem:[%s5905_s14 + $0x78] sm:$0xff] %v2984_v52  ;;  %v3047_v58 = vadd.f32 %v3046_v48, %v2984_v52  ;;  %v3085_v3 = vmul.f32 %v2984_v52, %v2984_v52  ;;  %v2806_v49 = vadd.f32 %v2805_v12, %v2716_v45  ;;  %v2440_v45 = vadd.f32 %v2439_v4, %v5820_v59  ;;  %v2906_v13 = vpop.f32.mrf.mxu0 }
 0x2fe   : > { %v3116_v56 = vadd.f32 %v3115_v31, %v3085_v3  ;;  %v2895_v57 = vadd.f32 %v2894_v28, %v2806_v49 }
 0x300   : > { %v2950_v39 = vadd.f32 %v2895_v57, %v2435_v53  ;;  %v2446_v30 = vpop.f32.mrf.mxu1  ;;  %v6457_v53 = vld [vmem:[#allocation11_spill] sm:$0xff] }
 0x301   : > { %v2723_v2 = vpop.f32.mrf.mxu2  ;;  %v2447_v57 = vadd.f32 %v2446_v30, %v6457_v53 }
 0x302   : > { %v2985_v37 = vadd.f32 %v5896_v61, %v2950_v39 }
 0x303   : > { %v2807_v29 = vpop.f32.mrf.mxu3 }
 0x304   : > { %3017 = vst [vmem:[%s5905_s14 + $0x80] sm:$0xff] %v2985_v37  ;;  %v3048_v26 = vadd.f32 %v3047_v58, %v2985_v37  ;;  %v3086_v60 = vmul.f32 %v2985_v37, %v2985_v37  ;;  %v2808_v54 = vadd.f32 %v2807_v29, %v2718_v11 }
 0x306   : > { %v3117_v46 = vadd.f32 %v3116_v56, %v3086_v60  ;;  %v2897_v20 = vadd.f32 %v2896_v19, %v2808_v54 }
 0x308   : > { %v2951_v34 = vadd.f32 %v2897_v20, %v2437_v14  ;;  %v2449_v59 = vpop.f32.mrf.mxu1  ;;  %v6458_v20 = vld [vmem:[#allocation18_spill] sm:$0xff] }
 0x309   : > { %v2726_v15 = vpop.f32.mrf.mxu2 }
 0x30a   : > { %v2986_v38 = vadd.f32 %v5896_v61, %v2951_v34 }
 0x30b   : > { %v2810_v63 = vpop.f32.mrf.mxu3 }
 0x30c   : > { %3018 = vst [vmem:[%s5905_s14 + $0x88] sm:$0xff] %v2986_v38  ;;  %v3049_v28 = vadd.f32 %v3048_v26, %v2986_v38  ;;  %v3087_v18 = vmul.f32 %v2986_v38, %v2986_v38  ;;  %v2811_v43 = vadd.f32 %v2810_v63, %v2721_v10 }
 0x30e   : > { %v3118_v35 = vadd.f32 %v3117_v46, %v3087_v18  ;;  %v2900_v44 = vadd.f32 %v2899_v40, %v2811_v43  ;;  %v2909_v40 = vpop.f32.mrf.mxu0 }
 0x310   : > { %v2952_v55 = vadd.f32 %v2900_v44, %v2440_v45  ;;  %v2451_v0 = vpop.f32.mrf.mxu1 }
 0x311   : > { %v2728_v36 = vpop.f32.mrf.mxu2  ;;  %v2452_v30 = vadd.f32 %v2451_v0, %v5845_v25 }
 0x312   : > { %v2987_v1 = vadd.f32 %v5896_v61, %v2952_v55 }
 0x313   : > { %v2812_v19 = vpop.f32.mrf.mxu3 }
 0x314   : > { %3019 = vst [vmem:[%s5905_s14 + $0x90] sm:$0xff] %v2987_v1  ;;  %v3050_v6 = vadd.f32 %v3049_v28, %v2987_v1  ;;  %v3088_v7 = vmul.f32 %v2987_v1, %v2987_v1  ;;  %v2813_v8 = vadd.f32 %v2812_v19, %v2723_v2 }
 0x316   : > { %v3119_v50 = vadd.f32 %v3118_v35, %v3088_v7  ;;  %v2902_v11 = vadd.f32 %v2901_v33, %v2813_v8  ;;  %v2911_v33 = vpop.f32.mrf.mxu0 }
 0x318   : > { %v2953_v51 = vadd.f32 %v2902_v11, %v2442_v42  ;;  %v2454_v46 = vpop.f32.mrf.mxu1  ;;  %v6459_v11 = vld [vmem:[#allocation19_spill] sm:$0xff] }
 0x319   : > { %v2731_v24 = vpop.f32.mrf.mxu2 }
 0x31a   : > { %v2988_v4 = vadd.f32 %v5896_v61, %v2953_v51 }
 0x31b   : > { %v2815_v21 = vpop.f32.mrf.mxu3 }
 0x31c   : > { %3020 = vst [vmem:[%s5905_s14 + $0x98] sm:$0xff] %v2988_v4  ;;  %v3051_v48 = vadd.f32 %v3050_v6, %v2988_v4  ;;  %v3089_v32 = vmul.f32 %v2988_v4, %v2988_v4  ;;  %v2816_v16 = vadd.f32 %v2815_v21, %v2726_v15 }
 0x31e   : > { %v3120_v31 = vadd.f32 %v3119_v50, %v3089_v32  ;;  %v2905_v10 = vadd.f32 %v2904_v17, %v2816_v16  ;;  %v2450_v17 = vadd.f32 %v2449_v59, %v6458_v20  ;;  %v2914_v34 = vpop.f32.mrf.mxu0 }
 0x320   : > { %v2954_v62 = vadd.f32 %v2905_v10, %v2445_v41  ;;  %v2456_v55 = vpop.f32.mrf.mxu1 }
 0x321   : > { %v2733_v52 = vpop.f32.mrf.mxu2  ;;  %v2457_v41 = vadd.f32 %v2456_v55, %v5855_v23 }
 0x322   : > { %v2989_v22 = vadd.f32 %v5896_v61, %v2954_v62 }
 0x323   : > { %v2817_v12 = vpop.f32.mrf.mxu3 }
 0x324   : > { %3021 = vst [vmem:[%s5905_s14 + $0xa0] sm:$0xff] %v2989_v22  ;;  %v3052_v58 = vadd.f32 %v3051_v48, %v2989_v22  ;;  %v3090_v3 = vmul.f32 %v2989_v22, %v2989_v22  ;;  %v2818_v49 = vadd.f32 %v2817_v12, %v2728_v36 }
 0x326   : > { %v3121_v56 = vadd.f32 %v3120_v31, %v3090_v3  ;;  %v2907_v2 = vadd.f32 %v2906_v13, %v2818_v49  ;;  %v2916_v1 = vpop.f32.mrf.mxu0 }
 0x328   : > { %v2955_v39 = vadd.f32 %v2907_v2, %v2447_v57  ;;  %v2459_v21 = vpop.f32.mrf.mxu1 }
 0x329   : > { %v2736_v26 = vpop.f32.mrf.mxu2  ;;  %v2460_v53 = vadd.f32 %v2459_v21, %v5860_v5 }
 0x32a   : > { %v2990_v37 = vadd.f32 %v5896_v61, %v2955_v39 }
 0x32b   : > { %v2820_v29 = vpop.f32.mrf.mxu3 }
 0x32c   : > { %3022 = vst [vmem:[%s5905_s14 + $0xa8] sm:$0xff] %v2990_v37  ;;  %v3053_v60 = vadd.f32 %v3052_v58, %v2990_v37  ;;  %v3091_v54 = vmul.f32 %v2990_v37, %v2990_v37  ;;  %v2821_v47 = vadd.f32 %v2820_v29, %v2731_v24  ;;  %v2455_v24 = vadd.f32 %v2454_v46, %v6459_v11 }
 0x32e   : > { %v3122_v14 = vadd.f32 %v3121_v56, %v3091_v54  ;;  %v2910_v15 = vadd.f32 %v2909_v40, %v2821_v47  ;;  %v2919_v48 = vpop.f32.mrf.mxu0 }
 0x330   : > { %v2956_v38 = vadd.f32 %v2910_v15, %v2450_v17  ;;  %v2461_v0 = vpop.f32.mrf.mxu1 }
 0x331   : > { %v2738_v45 = vpop.f32.mrf.mxu2  ;;  %v2462_v46 = vadd.f32 %v2461_v0, %v5865_v9 }
 0x332   : > { %v2991_v63 = vadd.f32 %v5896_v61, %v2956_v38 }
 0x333   : > { %v2822_v28 = vpop.f32.mrf.mxu3 }
 0x334   : > { %3023 = vst [vmem:[%s5905_s14 + $0xb0] sm:$0xff] %v2991_v63  ;;  %v3054_v18 = vadd.f32 %v3053_v60, %v2991_v63  ;;  %v3092_v43 = vmul.f32 %v2991_v63, %v2991_v63  ;;  %v2823_v35 = vadd.f32 %v2822_v28, %v2733_v52 }
 0x336   : > { %v3123_v44 = vadd.f32 %v3122_v14, %v3092_v43  ;;  %v2912_v36 = vadd.f32 %v2911_v33, %v2823_v35  ;;  %v2921_v33 = vpop.f32.mrf.mxu0  ;;  %v6460_v43 = vld [vmem:[#allocation20_spill] sm:$0xff] }
 0x338   : > { %v2957_v13 = vadd.f32 %v2912_v36, %v2452_v30  ;;  %v2464_v54 = vpop.f32.mrf.mxu1 }
 0x339   : > { %v2741_v59 = vpop.f32.mrf.mxu2  ;;  %v2465_v35 = vadd.f32 %v2464_v54, %v6460_v43 }
 0x33a   : > { %v2992_v19 = vadd.f32 %v5896_v61, %v2957_v13 }
 0x33b   : > { %v2825_v6 = vpop.f32.mrf.mxu3 }
 0x33c   : > { %3024 = vst [vmem:[%s5905_s14 + $0xb8] sm:$0xff] %v2992_v19  ;;  %v3055_v7 = vadd.f32 %v3054_v18, %v2992_v19  ;;  %v3093_v8 = vmul.f32 %v2992_v19, %v2992_v19  ;;  %v2826_v50 = vadd.f32 %v2825_v6, %v2736_v26 }
 0x33e   : > { %v3124_v42 = vadd.f32 %v3123_v44, %v3093_v8  ;;  %v2915_v51 = vadd.f32 %v2914_v34, %v2826_v50  ;;  %v2924_v20 = vpop.f32.mrf.mxu0 }
 0x340   : > { %v2958_v4 = vadd.f32 %v2915_v51, %v2455_v24  ;;  %v2466_v44 = vpop.f32.mrf.mxu1 }
 0x341   : > { %v2743_v52 = vpop.f32.mrf.mxu2 }
 0x342   : > { %v2993_v25 = vadd.f32 %v5896_v61, %v2958_v4 }
 0x343   : > { %v2827_v40 = vpop.f32.mrf.mxu3 }
 0x344   : > { %3025 = vst [vmem:[%s5905_s14 + $0xc0] sm:$0xff] %v2993_v25  ;;  %v3056_v32 = vadd.f32 %v3055_v7, %v2993_v25  ;;  %v3094_v16 = vmul.f32 %v2993_v25, %v2993_v25  ;;  %v2828_v31 = vadd.f32 %v2827_v40, %v2738_v45  ;;  %v6461_v7 = vld [vmem:[#allocation21_spill] sm:$0xff] }
 0x345   : > { %v2467_v8 = vadd.f32 %v2466_v44, %v6461_v7 }
 0x346   : > { %v3125_v27 = vadd.f32 %v3124_v42, %v3094_v16  ;;  %v2917_v10 = vadd.f32 %v2916_v1, %v2828_v31  ;;  %v2926_v36 = vpop.f32.mrf.mxu0 }
 0x348   : > { %v2959_v62 = vadd.f32 %v2917_v10, %v2457_v41  ;;  %v2469_v24 = vpop.f32.mrf.mxu1 }
 0x349   : > { %v2746_v37 = vpop.f32.mrf.mxu2 }
 0x34a   : > { %v2994_v22 = vadd.f32 %v5896_v61, %v2959_v62 }
 0x34b   : > { %v2830_v12 = vpop.f32.mrf.mxu3 }
 0x34c   : > { %3026 = vst [vmem:[%s5905_s14 + $0xc8] sm:$0xff] %v2994_v22  ;;  %v3057_v58 = vadd.f32 %v3056_v32, %v2994_v22  ;;  %v3095_v3 = vmul.f32 %v2994_v22, %v2994_v22  ;;  %v2831_v49 = vadd.f32 %v2830_v12, %v2741_v59  ;;  %v6462_v32 = vld [vmem:[#allocation22_spill] sm:$0xff] }
 0x34d   : > { %v2470_v16 = vadd.f32 %v2469_v24, %v6462_v32 }
 0x34e   : > { %v3126_v56 = vadd.f32 %v3125_v27, %v3095_v3  ;;  %v2920_v57 = vadd.f32 %v2919_v48, %v2831_v49  ;;  %v2929_v59 = vpop.f32.mrf.mxu0  ;;  %v6463_v49 = vld [vmem:[#allocation33_spill] sm:$0xff] }
 0x350   : > { %v2960_v2 = vadd.f32 %v2920_v57, %v2460_v53  ;;  %v2471_v62 = vpop.f32.mrf.mxu1 }
 0x351   : > { %v2748_v28 = vpop.f32.mrf.mxu2 }
 0x352   : > { %v2995_v23 = vadd.f32 %v5896_v61, %v2960_v2 }
 0x353   : > { %v2832_v39 = vpop.f32.mrf.mxu3 }
 0x354   : > { %3027 = vst [vmem:[%s5905_s14 + $0xd0] sm:$0xff] %v2995_v23  ;;  %v3058_v29 = vadd.f32 %v3057_v58, %v2995_v23  ;;  %v3096_v26 = vmul.f32 %v2995_v23, %v2995_v23  ;;  %v2833_v60 = vadd.f32 %v2832_v39, %v2743_v52 }
 0x356   : > { %v3127_v47 = vadd.f32 %v3126_v56, %v3096_v26  ;;  %v2922_v14 = vadd.f32 %v2921_v33, %v2833_v60  ;;  %v2931_v58 = vpop.f32.mrf.mxu0  ;;  %v2472_v33 = vadd.f32 %v2471_v62, %v6463_v49 }
 0x358   : > { %v2961_v17 = vadd.f32 %v2922_v14, %v2462_v46 }
 0x359   : > { %v2751_v42 = vpop.f32.mrf.mxu2 }
 0x35a   : > { %v2996_v5 = vadd.f32 %v5896_v61, %v2961_v17 }
 0x35b   : > { %v2835_v15 = vpop.f32.mrf.mxu3 }
 0x35c   : > { %3028 = vst [vmem:[%s5905_s14 + $0xd8] sm:$0xff] %v2996_v5  ;;  %v3059_v34 = vadd.f32 %v3058_v29, %v2996_v5  ;;  %v3097_v38 = vmul.f32 %v2996_v5, %v2996_v5  ;;  %v2836_v63 = vadd.f32 %v2835_v15, %v2746_v37 }
 0x35e   : > { %v3128_v18 = vadd.f32 %v3127_v47, %v3097_v38  ;;  %v2925_v45 = vadd.f32 %v2924_v20, %v2836_v63 }
 0x360   : > { %v2962_v30 = vadd.f32 %v2925_v45, %v2465_v35 }
 0x361   : > { %v2753_v41 = vpop.f32.mrf.mxu2 }
 0x362   : > { %v2997_v9 = vadd.f32 %v5896_v61, %v2962_v30 }
 0x363   : > { %v2837_v55 = vpop.f32.mrf.mxu3 }
 0x364   : > { %3029 = vst [vmem:[%s5905_s14 + $0xe0] sm:$0xff] %v2997_v9  ;;  %v3060_v13 = vadd.f32 %v3059_v34, %v2997_v9  ;;  %v3098_v1 = vmul.f32 %v2997_v9, %v2997_v9  ;;  %v2838_v19 = vadd.f32 %v2837_v55, %v2748_v28 }
 0x366   : > { %v3129_v6 = vadd.f32 %v3128_v18, %v3098_v1  ;;  %v2927_v50 = vadd.f32 %v2926_v36, %v2838_v19 }
 0x368   : > { %v2963_v11 = vadd.f32 %v2927_v50, %v2467_v8 }
 0x36a   : > { %v2998_v51 = vadd.f32 %v5896_v61, %v2963_v11 }
 0x36b   : > { %v2840_v4 = vpop.f32.mrf.mxu3 }
 0x36c   : > { %3030 = vst [vmem:[%s5905_s14 + $0xe8] sm:$0xff] %v2998_v51  ;;  %v3061_v21 = vadd.f32 %v3060_v13, %v2998_v51  ;;  %v3099_v25 = vmul.f32 %v2998_v51, %v2998_v51  ;;  %v2841_v40 = vadd.f32 %v2840_v4, %v2751_v42 }
 0x36e   : > { %v3130_v48 = vadd.f32 %v3129_v6, %v3099_v25  ;;  %v2930_v31 = vadd.f32 %v2929_v59, %v2841_v40 }
 0x370   : > { %v2964_v27 = vadd.f32 %v2930_v31, %v2470_v16 }
 0x372   : > { %v2999_v10 = vadd.f32 %v5896_v61, %v2964_v27 }
 0x373   : > { %v2842_v52 = vpop.f32.mrf.mxu3 }
 0x374   : > { %3031 = vst [vmem:[%s5905_s14 + $0xf0] sm:$0xff] %v2999_v10  ;;  %v3062_v22 = vadd.f32 %v3061_v21, %v2999_v10  ;;  %v3100_v12 = vmul.f32 %v2999_v10, %v2999_v10  ;;  %v2843_v0 = vadd.f32 %v2842_v52, %v2753_v41 }
 0x376   : > { %v3131_v3 = vadd.f32 %v3130_v48, %v3100_v12  ;;  %v2932_v56 = vadd.f32 %v2931_v58, %v2843_v0 }
 0x378   : > { %v2965_v53 = vadd.f32 %v2932_v56, %v2472_v33 }
 0x37a   : > { %v3000_v57 = vadd.f32 %v5896_v61, %v2965_v53 }
 0x37c   : > { %3032 = vst [vmem:[%s5905_s14 + $0xf8] sm:$0xff] %v3000_v57  ;;  %v3063_v2 = vadd.f32 %v3062_v22, %v3000_v57  ;;  %v3101_v23 = vmul.f32 %v3000_v57, %v3000_v57 }
 0x37e   : > { %v3064_v39 = vrot.slane %v3063_v2, 4  ;;  %v3132_v37 = vadd.f32 %v3131_v3, %v3101_v23 }
 0x380   : > { %v3065_v29 = vadd.f32 %v3064_v39, %v3063_v2  ;;  %v3133_v26 = vrot.slane %v3132_v37, 4 }
 0x382   : > { %v3066_v60 = vrot.slane %v3065_v29, 2  ;;  %v3134_v54 = vadd.f32 %v3133_v26, %v3132_v37 }
 0x384   : > { %v3067_v47 = vadd.f32 %v3066_v60, %v3065_v29  ;;  %v3135_v46 = vrot.slane %v3134_v54, 2 }
 0x386   : > { %v3068_v14 = vrot.slane %v3067_v47, 1  ;;  %v3136_v20 = vadd.f32 %v3135_v46, %v3134_v54 }
 0x388   : > { %v3137_v17 = vrot.slane %v3136_v20, 1  ;;  %v3069_v61 = vadd.f32 %v3068_v14, %v3067_v47 }
 0x38a   : > { %v3138_v5 = vadd.f32 %v3137_v17, %v3136_v20 }
 0x38c   : > { %v3139_v15 = vsel %vm6464_vm1, %v3069_v61, %v3138_v5 }
 0x38d   : > { %3140 = vst [vmem:[%s262_s17] sm:$0x3] %v3139_v15 }
 0x38e PF: > { %s17_s21 = sadd.s32 1, %s3901_s21  }
 0x38f   : > { %p14_p4 = scmp.ge.s32.totalorder %s17_s21, 4  }
 0x391   :  { %16 = sbr.rel (!%p14_p4) target bundleno = 1 (0x1), region = 84 }

// kernel: resblock_forward.5
= control target key start
LH: loop header
LB: loop body
LE: loop exit
PB: predicated region body
PF: predicated region fallthrough
CT: control target
= control target key end

     0   :  { %s4157_s27 = smov 0   ;;  %s6669_s0 = inlined_call_operand.vmem [shape: f32[2,16,16,128], index: 0, kind: input, shape index: {}]   ;;  %s6670_s1 = inlined_call_operand.vmem [shape: f32[2,16,16,128], index: 1, kind: input, shape index: {}]   ;;  %s6671_s2 = inlined_call_operand.vmem [shape: f32[1,128], index: 2, kind: input, shape index: {}]   ;;  %s6672_s3 = inlined_call_operand.vmem [shape: f32[1,128], index: 3, kind: input, shape index: {}]   ;;  %s6673_s4 = inlined_call_operand.vmem [shape: bf16[3,384,128], index: 4, kind: input, shape index: {}]   ;;  %s6674_s5 = inlined_call_operand.vmem [shape: f32[1,128], index: 5, kind: input, shape index: {}]   ;;  %s6675_s6 = inlined_call_operand.vmem [shape: bf16[128,128], index: 6, kind: input, shape index: {}]   ;;  %s6676_s7 = inlined_call_operand.vmem [shape: f32[1,128], index: 7, kind: input, shape index: {}]   ;;  %s6677_s8 = inlined_call_operand.vmem [shape: f32[2,16,16,128], index: 8, kind: output, shape index: {}]  }
   0x1 LB: > { %s3400_s28 = sadd.s32 4294967295, %s4109_s27   ;;  %p3404_p0 = scmp.ge.s32.totalorder %s4109_s27, 1  ;;  %s4109_s27 = sphi %s4157_s27, %s18_s27  }
   0x2   : > { %p272_p1 = scmp.lt.s32.totalorder %s4109_s27, 3 }
   0x4   : > { %p273_p2 = pnand %p3404_p0, %p272_p1 }
   0x6   : > { %276 = sbr.rel (%p273_p2) target bundleno = 901 (0x385), region = 52 }
   0xb   : > { %v3871_v0 = vld [vmem:[%s6675_s6 + $0x38] sm:$0xff]  ;;  %p311_p3 = scmp.lt.s32.totalorder %s3400_s28, 1  ;;  %v3870_v2 = vld [vmem:[%s6675_s6 + $0x30] sm:$0xff]  ;;  %v4188_v4 = vld [vmem:[%s6671_s2] ss:$0 sm:$0xff] }
   0xc   : > { %v3903_v1 = vld [vmem:[%s6673_s4 + $0xf8] sm:$0xff]  ;;  %3944 = vmatpush.bf16.msra.mxu2 %v3871_v0  ;;  %443 = vmatpush.bf16.msra.mxu0 %v3871_v0  ;;  %v3902_v3 = vld [vmem:[%s6673_s4 + $0xf0] sm:$0xff]  ;;  %v3869_v5 = vld [vmem:[%s6675_s6 + $0x28] sm:$0xff] }
   0xd   : > { %s7139_s28 = smov (!%p311_p3, %s3400_s28), 1  ;;  %2064 = vmatpush.bf16.msra.mxu1 %v3903_v1  ;;  %3952 = vmatpush.bf16.msra.mxu3 %v3903_v1  ;;  %v3901_v6 = vld [vmem:[%s6673_s4 + $0xe8] sm:$0xff]  ;;  %v3868_v7 = vld [vmem:[%s6675_s6 + $0x20] sm:$0xff]  ;;  %v3867_v32 = vld [vmem:[%s6675_s6 + $0x18] sm:$0xff] }
   0xe   : > { %s4177_s15 = sshll.u32 %s7139_s28, 8  ;;  %v4206_v12 = vld [vmem:[%s6672_s3] ss:$0 sm:$0xff]  ;;  %v3899_v36 = vld [vmem:[%s6673_s4 + $0xd8] sm:$0xff]  ;;  %v3866_v40 = vld [vmem:[%s6675_s6 + $0x10] sm:$0xff] }
   0xf   : > { %s4183_s18 = scalar_lea.vmem %s6669_s0, %s4177_s15  ;;  %v3900_v20 = vld [vmem:[%s6673_s4 + $0xe0] sm:$0xff]  ;;  %s4259_s17 = scalar_lea.vmem %s6670_s1, %s4177_s15  ;;  %v3898_v42 = vld [vmem:[%s6673_s4 + $0xd0] sm:$0xff]  ;;  %v3865_v51 = vld [vmem:[%s6675_s6 + $0x8] sm:$0xff] }
  0x10   : > { %3945 = vmatpush.bf16.msra.mxu2 %v3870_v2  ;;  %444 = vmatpush.bf16.msra.mxu0 %v3870_v2  ;;  %v532_v8 = vld [vmem:[%s4183_s18] sm:$0xff]  ;;  %v533_v9 = vld [vmem:[%s4183_s18 + $0x8] sm:$0xff]  ;;  %v534_v17 = vld [vmem:[%s4183_s18 + $0x10] sm:$0xff]  ;;  %s6440_s13 = scalar_lea.vmem %s6677_s8, %s4177_s15 }
  0x11   : > { %2065 = vmatpush.bf16.msra.mxu1 %v3902_v3  ;;  %3953 = vmatpush.bf16.msra.mxu3 %v3902_v3  ;;  %v568_v10 = vmul.f32 %v4188_v4, %v532_v8  ;;  %v569_v11 = vmul.f32 %v4188_v4, %v533_v9  ;;  %v548_v13 = vld [vmem:[%s4183_s18 + $0x80] sm:$0xff]  ;;  %v549_v14 = vld [vmem:[%s4183_s18 + $0x88] sm:$0xff]  ;;  %v535_v18 = vld [vmem:[%s4183_s18 + $0x18] sm:$0xff]  ;;  %v570_v23 = vmul.f32 %v4188_v4, %v534_v17 }
  0x12   : > { %v584_v15 = vmul.f32 %v4188_v4, %v548_v13  ;;  %v585_v16 = vmul.f32 %v4188_v4, %v549_v14  ;;  %v550_v19 = vld [vmem:[%s4183_s18 + $0x90] sm:$0xff]  ;;  %v571_v26 = vmul.f32 %v4188_v4, %v535_v18  ;;  %v551_v27 = vld [vmem:[%s4183_s18 + $0x98] sm:$0xff]  ;;  %v4273_v45 = vld [vmem:[%s4259_s17 + $0x80] sm:$0xff] }
  0x13   : > { %v4219_v21 = vadd.f32 %v4206_v12, %v568_v10  ;;  %v4222_v22 = vadd.f32 %v4206_v12, %v569_v11  ;;  %v586_v28 = vmul.f32 %v4188_v4, %v550_v19  ;;  %v4237_v31 = vadd.f32 %v4206_v12, %v570_v23  ;;  %v4276_v47 = vld [vmem:[%s4259_s17 + $0x88] sm:$0xff]  ;;  %v4279_v48 = vld [vmem:[%s4259_s17] sm:$0xff]  ;;  %v4288_v52 = vld [vmem:[%s4259_s17 + $0x90] sm:$0xff] }
  0x14   : > { %3946 = vmatpush.bf16.msra.mxu2 %v3869_v5  ;;  %445 = vmatpush.bf16.msra.mxu0 %v3869_v5  ;;  %v4226_v24 = vadd.f32 %v4206_v12, %v584_v15  ;;  %v4229_v25 = vadd.f32 %v4206_v12, %v585_v16  ;;  %v4245_v35 = vadd.f32 %v4206_v12, %v571_v26  ;;  %v4282_v49 = vld [vmem:[%s4259_s17 + $0x8] sm:$0xff]  ;;  %v4291_v53 = vld [vmem:[%s4259_s17 + $0x98] sm:$0xff]  ;;  %v536_v62 = vld [vmem:[%s4183_s18 + $0x20] sm:$0xff] }
  0x15   : > { %2066 = vmatpush.bf16.msra.mxu1 %v3901_v6  ;;  %3954 = vmatpush.bf16.msra.mxu3 %v3901_v6  ;;  %v3443_v29 = vmul.f32 -1.442695, %v4219_v21  ;;  %v3444_v30 = vmul.f32 -1.442695, %v4222_v22  ;;  %v3445_v37 = vmul.f32 -1.442695, %v4237_v31  ;;  %v587_v38 = vmul.f32 %v4188_v4, %v551_v27 }
  0x16   : > { %v3459_v33 = vmul.f32 -1.442695, %v4226_v24  ;;  %v3460_v34 = vmul.f32 -1.442695, %v4229_v25  ;;  %v4253_v39 = vadd.f32 %v4206_v12, %v586_v28  ;;  %v3446_v41 = vmul.f32 -1.442695, %v4245_v35 }
  0x17   : > { %3973 = vpow2.f32 %v3443_v29  ;;  %v4269_v43 = vadd.f32 %v4206_v12, %v587_v38  ;;  %v3897_v56 = vld [vmem:[%s6673_s4 + $0xc8] sm:$0xff]  ;;  %v367_v60 = vpack.c.bf16 %v4276_v47, %v4273_v45  ;;  %v359_v61 = vpack.c.bf16 %v4282_v49, %v4279_v48  ;;  %v3864_v5 = vld [vmem:[%s6675_s6] sm:$0xff]  ;;  %v3919_v16 = vld [vmem:[%s6673_s4 + $0x178] sm:$0xff] }
  0x18   : > { %3947 = vmatpush.bf16.msra.mxu2 %v3868_v7  ;;  %446 = vmatpush.bf16.msra.mxu0 %v3868_v7  ;;  %3975 = vpow2.f32 %v3444_v30  ;;  %v3461_v44 = vmul.f32 -1.442695, %v4253_v39  ;;  %v537_v63 = vld [vmem:[%s4183_s18 + $0x28] sm:$0xff]  ;;  %v368_v1 = vpack.c.bf16 %v4291_v53, %v4288_v52  ;;  %v3896_v10 = vld [vmem:[%s6673_s4 + $0xc0] sm:$0xff]  ;;  %v4327_v11 = vmul.f32 %v4188_v4, %v536_v62  ;;  %v3911_v17 = vld [vmem:[%s6673_s4 + $0x138] sm:$0xff] }
  0x19   : > { %2067 = vmatpush.bf16.msra.mxu1 %v3900_v20  ;;  %3955 = vmatpush.bf16.msra.mxu3 %v3900_v20  ;;  %3977 = vpow2.f32 %v3459_v33  ;;  %v3462_v58 = vmul.f32 -1.442695, %v4269_v43  ;;  %v4330_v13 = vmul.f32 %v4188_v4, %v537_v63  ;;  %v3879_v18 = vld [vmem:[%s6673_s4 + $0x38] sm:$0xff]  ;;  %v4357_v28 = vld [vmem:[%s4259_s17 + $0x10] sm:$0xff] }
  0x1a   : > { %3979 = vpow2.f32 %v3460_v34  ;;  %v4360_v29 = vld [vmem:[%s4259_s17 + $0x18] sm:$0xff] }
  0x1b   : > { %3981 = vpow2.f32 %v3445_v37  ;;  %v3887_v37 = vld [vmem:[%s6673_s4 + $0x78] sm:$0xff] }
  0x1c   : > { %3948 = vmatpush.bf16.msra.mxu2 %v3867_v32  ;;  %447 = vmatpush.bf16.msra.mxu0 %v3867_v32  ;;  %3983 = vpow2.f32 %v3446_v41 }
  0x1d   : > { %2068 = vmatpush.bf16.msra.mxu1 %v3899_v36  ;;  %3956 = vmatpush.bf16.msra.mxu3 %v3899_v36  ;;  %v3974_v46 = vpop.eup %3973  ;;  %3985 = vpow2.f32 %v3461_v44  ;;  %v360_v44 = vpack.c.bf16 %v4360_v29, %v4357_v28  ;;  %v3918_v28 = vld [vmem:[%s6673_s4 + $0x170] sm:$0xff] }
  0x1e   : > { %v3976_v50 = vpop.eup %3975  ;;  %v4293_v54 = vadd.f32 1.0, %v3974_v46  ;;  %v3878_v29 = vld [vmem:[%s6673_s4 + $0x30] sm:$0xff] }
  0x1f   : > { %v3978_v55 = vpop.eup %3977  ;;  %v4298_v57 = vadd.f32 1.0, %v3976_v50 }
  0x20   : > { %3949 = vmatpush.bf16.msra.mxu2 %v3866_v40  ;;  %448 = vmatpush.bf16.msra.mxu0 %v3866_v40  ;;  %v3980_v59 = vpop.eup %3979  ;;  %3987 = vrcp.f32 %v4293_v54  ;;  %v773_v2 = vand.u32 2147483647, %v4293_v54  ;;  %v775_v3 = vand.u32 2147483648, %v4293_v54  ;;  %v4318_v8 = vadd.f32 1.0, %v3978_v55 }
  0x21   : > { %2069 = vmatpush.bf16.msra.mxu1 %v3898_v42  ;;  %3957 = vmatpush.bf16.msra.mxu3 %v3898_v42  ;;  %v3982_v0 = vpop.eup %3981  ;;  %3989 = vrcp.f32 %v4298_v57  ;;  %v788_v6 = vand.u32 2147483647, %v4298_v57  ;;  %v790_v7 = vand.u32 2147483648, %v4298_v57  ;;  %v4320_v9 = vadd.f32 1.0, %v3980_v59 }
  0x22   : > { %vm769_vm0 = vweird.f32 %v4293_v54  ;;  %3991 = vpow2.f32 %v3462_v58  ;;  %v3984_v14 = vpop.eup %3983  ;;  %vm784_vm1 = vweird.f32 %v4298_v57  ;;  %v1015_v15 = vand.u32 2147483648, %v4318_v8 }
  0x23   : > { %3993 = vrcp.f32 %v4318_v8  ;;  %v4344_v19 = vadd.f32 1.0, %v3982_v0  ;;  %v4346_v20 = vpop.eup %3985  ;;  %vm4348_vm2 = vcmp.eq.f32.partialorder %v773_v2, 8.507059e+37  ;;  %v4352_v26 = vor.u32 1.1754944e-38, %v775_v3 }
  0x24   : > { %3950 = vmatpush.bf16.msra.mxu2 %v3865_v51  ;;  %449 = vmatpush.bf16.msra.mxu0 %v3865_v51  ;;  %v1013_v27 = vand.u32 2147483647, %v4318_v8  ;;  %3995 = vrcp.f32 %v4320_v9  ;;  %vm4364_vm3 = vcmp.eq.f32.partialorder %v788_v6, 8.507059e+37  ;;  %v4368_v33 = vor.u32 1.1754944e-38, %v790_v7 }
  0x25   : > { %2070 = vmatpush.bf16.msra.mxu1 %v3897_v56  ;;  %3958 = vmatpush.bf16.msra.mxu3 %v3897_v56  ;;  %v1028_v34 = vand.u32 2147483647, %v4320_v9  ;;  %v1030_v36 = vand.u32 2147483648, %v4320_v9  ;;  %vm1009_vm4 = vweird.f32 %v4318_v8  ;;  %v4380_v41 = vor.u32 1.1754944e-38, %v1015_v15 }
  0x26   : > { %v4362_v30 = vpop.eup %3987  ;;  %vm1024_vm5 = vweird.f32 %v4320_v9  ;;  %v4387_v45 = vadd.f32 1.0, %v3984_v14  ;;  %3997 = vrcp.f32 %v4344_v19  ;;  %vm4391_vm7 = vcmp.eq.f32.partialorder %v1013_v27, 8.507059e+37 }
  0x27   : > { %v4375_v38 = vpop.eup %3989  ;;  %v765_v40 = vmul.f32 %v4362_v30, %v4293_v54  ;;  %vm770_vm6 = vweird.f32 %v4362_v30  ;;  %v803_v49 = vand.u32 2147483647, %v4344_v19  ;;  %v805_v50 = vand.u32 2147483648, %v4344_v19 }
  0x28   : > { %3951 = vmatpush.bf16.msra.mxu2 %v3864_v5  ;;  %450 = vmatpush.bf16.msra.mxu0 %v3864_v5  ;;  %v780_v42 = vmul.f32 %v4375_v38, %v4298_v57  ;;  %v3992_v46 = vpop.eup %3991  ;;  %vm785_vm8 = vweird.f32 %v4375_v38  ;;  %vm4398_vm10 = vcmp.eq.f32.partialorder %v1028_v34, 8.507059e+37  ;;  %v1031_v58 = vor.u32 1.1754944e-38, %v1030_v36  ;;  %vm4411_vm12 = vmor %vm769_vm0, %vm770_vm6 }
  0x29   : > { %2071 = vmatpush.bf16.msra.mxu1 %v3896_v10  ;;  %3959 = vmatpush.bf16.msra.mxu3 %v3896_v10  ;;  %v766_v47 = vsub.f32 1.0, %v765_v40  ;;  %v3994_v51 = vpop.eup %3993  ;;  %3999 = vrcp.f32 %v4387_v45  ;;  %vm799_vm11 = vweird.f32 %v4344_v19  ;;  %v818_v62 = vand.u32 2147483647, %v4387_v45  ;;  %vm4423_vm9 = vmor %vm784_vm1, %vm785_vm8  ;;  %v4568_v40 = vld [vmem:[%s4259_s17 + $0xa8] sm:$0xff] }
  0x2a   : > { %v781_v55 = vsub.f32 1.0, %v780_v42  ;;  %v3996_v59 = vpop.eup %3995  ;;  %vm1010_vm13 = vweird.f32 %v3994_v51  ;;  %vm814_vm15 = vweird.f32 %v4387_v45  ;;  %vm4427_vm0 = vcmp.eq.f32.partialorder %v803_v49, 8.507059e+37 }
  0x2b   : > { %491 = vmatmul.bf16.vlgmr.msra.gmra.mxu2 %v367_v60  ;;  %451 = vmatmul.bf16.vlgmr.msra.gmra.mxu0 %v359_v61  ;;  %v767_v60 = vmul.f32 %v4362_v30, %v766_v47  ;;  %v1005_v61 = vmul.f32 %v3994_v51, %v4318_v8  ;;  %v1020_v2 = vmul.f32 %v3996_v59, %v4320_v9  ;;  %vm1025_vm14 = vweird.f32 %v3996_v59  ;;  %vm4451_vm6 = vmor %vm1009_vm4, %vm1010_vm13 }
  0x2c   : > { %2153 = vmatpush.bf16.msrb.mxu2 %v3911_v17  ;;  %2475 = vmatpush.bf16.msrb.mxu0 %v3879_v18  ;;  %v782_v0 = vmul.f32 %v4375_v38, %v781_v55  ;;  %v806_v7 = vor.u32 1.1754944e-38, %v805_v50  ;;  %v820_v10 = vand.u32 2147483648, %v4387_v45  ;;  %v3998_v14 = vpop.eup %3997  ;;  %v4434_v17 = vadd.f32 1.0, %v4346_v20 }
  0x2d   : > { %2242 = vmatpush.bf16.msrb.mxu3 %v3919_v16  ;;  %2564 = vmatpush.bf16.msrb.mxu1 %v3887_v37  ;;  %v768_v3 = vadd.f32 %v4362_v30, %v767_v60  ;;  %v1006_v5 = vsub.f32 1.0, %v1005_v61  ;;  %v1021_v16 = vsub.f32 1.0, %v1020_v2  ;;  %v4436_v57 = vadd.f32 1.0, %v3992_v46 }
  0x2e   : > { %v783_v15 = vadd.f32 %v4375_v38, %v782_v0  ;;  %v795_v34 = vmul.f32 %v3998_v14, %v4344_v19  ;;  %vm800_vm1 = vweird.f32 %v3998_v14  ;;  %vm4455_vm8 = vcmp.eq.f32.partialorder %v818_v62, 8.507059e+37 }
  0x2f   : > { %v772_v18 = vsel %vm4411_vm12, %v4362_v30, %v768_v3  ;;  %v1007_v27 = vmul.f32 %v3994_v51, %v1006_v5  ;;  %v4000_v36 = vpop.eup %3999  ;;  %v1022_v30 = vmul.f32 %v3996_v59, %v1021_v16  ;;  %v821_v46 = vor.u32 1.1754944e-38, %v820_v10 }
  0x30   : > { %v777_v37 = vsel %vm4348_vm2, %v4352_v26, %v772_v18  ;;  %v787_v20 = vsel %vm4423_vm9, %v4375_v38, %v783_v15  ;;  %vm4468_vm2 = vmor %vm1024_vm5, %vm1025_vm14  ;;  %v796_v47 = vsub.f32 1.0, %v795_v34  ;;  %v810_v55 = vmul.f32 %v4000_v36, %v4387_v45  ;;  %2476 = vmatpush.bf16.msrb.mxu0 %v3878_v29 }
  0x31   : > { %v792_v23 = vsel %vm4364_vm3, %v4368_v33, %v787_v20  ;;  %v4463_v26 = vmul.f32 %v777_v37, %v4219_v21  ;;  %v1008_v38 = vadd.f32 %v3994_v51, %v1007_v27  ;;  %v1023_v50 = vadd.f32 %v3996_v59, %v1022_v30  ;;  %vm4489_vm3 = vmor %vm799_vm11, %vm800_vm1  ;;  %v4565_v20 = vld [vmem:[%s4259_s17 + $0xa0] sm:$0xff]  ;;  %2243 = vmatpush.bf16.msrb.mxu3 %v3918_v28 }
  0x32   : > { %v4473_v49 = vmul.f32 %v792_v23, %v4222_v22  ;;  %vm815_vm4 = vweird.f32 %v4000_v36  ;;  %v797_v33 = vmul.f32 %v3998_v14, %v796_v47  ;;  %4001 = vrcp.f32 %v4434_v17 }
  0x33   : > { %v1310_v32 = vrot.slane %v4463_v26, 7  ;;  %v1012_v21 = vsel %vm4451_vm6, %v3994_v51, %v1008_v38  ;;  %v1027_v22 = vsel %vm4468_vm2, %v3996_v59, %v1023_v50  ;;  %v811_v51 = vsub.f32 1.0, %v810_v55  ;;  %vm4515_vm9 = vmor %vm814_vm15, %vm815_vm4 }
  0x34   : > { %v1311_v9 = vrot.slane %v4473_v49, 7  ;;  %v1017_v60 = vsel %vm4391_vm7, %v4380_v41, %v1012_v21  ;;  %vm6772_vm5 = vcmask 1040384   ;;  %v1032_v63 = vsel %vm4398_vm10, %v1031_v58, %v1027_v22 }
  0x35   : > { %v1390_v62 = vsel %vm6772_vm5, 0.0, %v1310_v32  ;;  %v4497_v0 = vmul.f32 %v1017_v60, %v4226_v24  ;;  %v798_v41 = vadd.f32 %v3998_v14, %v797_v33  ;;  %vm6774_vm7 = vmmov %vm6772_vm5  ;;  %v4504_v19 = vmul.f32 %v1032_v63, %v4229_v25  ;;  %v331_v33 = vld [vmem:[%s4259_s17 + $0x20] sm:$0xff] }
  0x36   : > { %v1312_v48 = vsel %vm6774_vm7, %v1310_v32, %v1311_v9  ;;  %v4501_v59 = vpack.c.bf16 %v4463_v26, %v1390_v62  ;;  %v812_v2 = vmul.f32 %v4000_v36, %v811_v51  ;;  %vm1039_vm10 = vweird.f32 %v4434_v17  ;;  %vm6778_vm11 = vmmov %vm6772_vm5  ;;  %v332_v9 = vld [vmem:[%s4259_s17 + $0x28] sm:$0xff]  ;;  %v552_v51 = vld [vmem:[%s4183_s18 + $0xa0] sm:$0xff] }
  0x37   : > { %6773 = vst [vmem:[#allocation2_spill] sm:$0xff] %v4497_v0  ;;  %v4507_v3 = vpack.c.bf16 %v4473_v49, %v1312_v48  ;;  %v1334_v54 = vrot.slane %v4497_v0, 7  ;;  %v802_v56 = vsel %vm4489_vm3, %v3998_v14, %v798_v41  ;;  %v1335_v58 = vrot.slane %v4504_v19, 7  ;;  %vm6779_vm12 = vmmov %vm6772_vm5  ;;  %v553_v62 = vld [vmem:[%s4183_s18 + $0xa8] sm:$0xff]  ;;  %v538_v48 = vld [vmem:[%s4183_s18 + $0x30] sm:$0xff] }
  0x38   : > { %6775 = vst [vmem:[#allocation3_spill] sm:$0xff] %v4504_v19  ;;  %v1631_v25 = vunpack.c.l.b16 %v4501_v59  ;;  %v807_v5 = vsel %vm4427_vm0, %v806_v7, %v802_v56  ;;  %v813_v10 = vadd.f32 %v4000_v36, %v812_v2  ;;  %v4002_v15 = vpop.eup %4001  ;;  %v1043_v6 = vand.u32 2147483647, %v4434_v17  ;;  %vm6782_vm14 = vmmov %vm6772_vm5 }
  0x39   : > { %v1634_v45 = vunpack.c.l.b16 %v4507_v3  ;;  %v1398_v14 = vsel %vm6778_vm11, 0.0, %v1334_v54  ;;  %v4533_v16 = vmul.f32 %v807_v5, %v4237_v31  ;;  %v1336_v7 = vsel %vm6779_vm12, %v1334_v54, %v1335_v58  ;;  %v3910_v31 = vld [vmem:[%s6673_s4 + $0x130] sm:$0xff]  ;;  %vm6786_vm0 = vmmov %vm6772_vm5 }
  0x3a   : > { %v4538_v52 = vpack.c.bf16 %v4497_v0, %v1398_v14  ;;  %v817_v53 = vsel %vm4515_vm9, %v4000_v36, %v813_v10  ;;  %v4555_v18 = vpack.c.bf16 %v4504_v19, %v1336_v7  ;;  %v3886_v36 = vld [vmem:[%s6673_s4 + $0x70] sm:$0xff]  ;;  %vm1040_vm13 = vweird.f32 %v4002_v15  ;;  %2154 = vmatpush.bf16.msrb.mxu2 %v3910_v31  ;;  %v555_v31 = vld [vmem:[%s4183_s18 + $0xb8] sm:$0xff]  ;;  %vm6788_vm2 = vmmov %vm6786_vm0 }
  0x3b   : > { %496 = vmatmul.bf16.gmra.mxu2 %v368_v1  ;;  %456 = vmatmul.bf16.gmra.mxu0 %v360_v44  ;;  %v1035_v1 = vmul.f32 %v4002_v15, %v4434_v17  ;;  %v4552_v44 = vpack.c.b16 %v1634_v45, %v1631_v25  ;;  %v822_v27 = vsel %vm4455_vm8, %v821_v46, %v817_v53  ;;  %v1313_v34 = vrot.slane %v4533_v16, 7  ;;  %vm4593_vm15 = vmor %vm1039_vm10, %vm1040_vm13  ;;  %v539_v45 = vld [vmem:[%s4183_s18 + $0x38] sm:$0xff]  ;;  %v554_v7 = vld [vmem:[%s4183_s18 + $0xb0] sm:$0xff] }
  0x3c   : > { %6780 = vst [vmem:[#allocation4_spill] sm:$0xff] %v4538_v52  ;;  %v1679_v37 = vunpack.c.l.b16 %v4538_v52  ;;  %v4571_v30 = vmul.f32 %v822_v27, %v4245_v35  ;;  %v1682_v42 = vunpack.c.l.b16 %v4555_v18  ;;  %v1045_v38 = vand.u32 2147483648, %v4434_v17  ;;  %2565 = vmatpush.bf16.msrb.mxu1 %v3886_v36  ;;  %vm6796_vm10 = vmmov %vm6786_vm0 }
  0x3d   : > { %6781 = vst [vmem:[#allocation5_spill] sm:$0xff] %v4555_v18  ;;  %v1036_v23 = vsub.f32 1.0, %v1035_v1  ;;  %2072 = vmatmul.bf16.vlgmr.msra.gmra.mxu1 %v4552_v44  ;;  %v1391_v46 = vsel %vm6782_vm14, 0.0, %v1313_v34  ;;  %v4579_v8 = vadd.f32 %v4206_v12, %v4327_v11  ;;  %4003 = vrcp.f32 %v4436_v57  ;;  %v4657_v11 = vld [vmem:[%s4259_s17 + $0xb8] sm:$0xff] }
  0x3e   : > { %v1314_v35 = vrot.slane %v4571_v30, 7  ;;  %v4583_v47 = vpack.c.bf16 %v4533_v16, %v1391_v46  ;;  %v4586_v55 = vpack.c.b16 %v1682_v42, %v1679_v37  ;;  %v369_v32 = vpack.c.bf16 %v4568_v40, %v4565_v20 }
  0x3f   : > { %v1037_v50 = vmul.f32 %v4002_v15, %v1036_v23  ;;  %v1046_v21 = vor.u32 1.1754944e-38, %v1045_v38  ;;  %vm1044_vm1 = vcmp.eq.f32.partialorder %v1043_v6, 8.507059e+37  ;;  %v1060_v61 = vand.u32 2147483648, %v4436_v57 }
  0x40   : > { %6783 = vst [vmem:[#allocation6_spill] sm:$0xff] %v4586_v55  ;;  %v1315_v60 = vsel %vm6786_vm0, %v1313_v34, %v1314_v35  ;;  %2112 = vmatmul.bf16.vlgmr.msra.gmra.mxu3 %v4586_v55  ;;  %v1637_v63 = vunpack.c.l.b16 %v4583_v47  ;;  %vm1054_vm6 = vweird.f32 %v4436_v57  ;;  %v1058_v41 = vand.u32 2147483647, %v4436_v57 }
  0x41   : > { %v1038_v22 = vadd.f32 %v4002_v15, %v1037_v50  ;;  %v4605_v17 = vpack.c.bf16 %v4571_v30, %v1315_v60  ;;  %v361_v54 = vpack.c.bf16 %v332_v9, %v331_v33  ;;  %v4615_v56 = vadd.f32 %v4206_v12, %v4330_v13  ;;  %v4654_v50 = vld [vmem:[%s4259_s17 + $0xb0] sm:$0xff] }
  0x42   : > { %v3447_v24 = vmul.f32 -1.442695, %v4579_v8  ;;  %v1061_v58 = vor.u32 1.1754944e-38, %v1060_v61  ;;  %v588_v5 = vmul.f32 %v4188_v4, %v552_v51  ;;  %v589_v10 = vmul.f32 %v4188_v4, %v553_v62 }
  0x43   : > { %v1042_v2 = vsel %vm4593_vm15, %v4002_v15, %v1038_v22  ;;  %v4004_v14 = vpop.eup %4003  ;;  %v3448_v15 = vmul.f32 -1.442695, %v4615_v56  ;;  %v574_v13 = vmul.f32 %v4188_v4, %v538_v48  ;;  %v1640_v53 = vunpack.c.l.b16 %v4605_v17 }
  0x44   : > { %v1047_v25 = vsel %vm1044_vm1, %v1046_v21, %v1042_v2  ;;  %4005 = vpow2.f32 %v3447_v24  ;;  %v1050_v1 = vmul.f32 %v4004_v14, %v4436_v57  ;;  %vm1055_vm8 = vweird.f32 %v4004_v14  ;;  %v540_v2 = vld [vmem:[%s4183_s18 + $0x40] sm:$0xff] }
  0x45   : > { %v4622_v6 = vmul.f32 %v1047_v25, %v4253_v39  ;;  %v4630_v28 = vadd.f32 %v4206_v12, %v588_v5  ;;  %4007 = vpow2.f32 %v3448_v15  ;;  %v4635_v39 = vadd.f32 %v4206_v12, %v589_v10  ;;  %vm4663_vm4 = vmor %vm1054_vm6, %vm1055_vm8 }
  0x46   : > { %v575_v27 = vmul.f32 %v4188_v4, %v539_v45  ;;  %v1051_v34 = vsub.f32 1.0, %v1050_v1  ;;  %v4640_v37 = vadd.f32 %v4206_v12, %v574_v13  ;;  %v590_v20 = vmul.f32 %v4188_v4, %v554_v7  ;;  %v3877_v13 = vld [vmem:[%s6673_s4 + $0x28] sm:$0xff] }
  0x47   : > { %6787 = vst [vmem:[#allocation7_spill] sm:$0xff] %v4622_v6  ;;  %v1337_v29 = vrot.slane %v4622_v6, 7  ;;  %v3463_v36 = vmul.f32 -1.442695, %v4630_v28  ;;  %v3464_v23 = vmul.f32 -1.442695, %v4635_v39  ;;  %v591_v46 = vmul.f32 %v4188_v4, %v555_v31  ;;  %2477 = vmatpush.bf16.msrb.mxu0 %v3877_v13 }
  0x48   : > { %v4648_v42 = vadd.f32 %v4206_v12, %v575_v27  ;;  %v4651_v38 = vpack.c.b16 %v1640_v53, %v1637_v63  ;;  %v1052_v35 = vmul.f32 %v4004_v14, %v1051_v34  ;;  %v3449_v21 = vmul.f32 -1.442695, %v4640_v37  ;;  %v3885_v27 = vld [vmem:[%s6673_s4 + $0x68] sm:$0xff] }
  0x49   : > { %v1399_v40 = vsel %vm6788_vm2, 0.0, %v1337_v29  ;;  %4009 = vpow2.f32 %v3463_v36  ;;  %v4669_v60 = vadd.f32 %v4206_v12, %v590_v20  ;;  %v4672_v22 = vadd.f32 %v4206_v12, %v591_v46  ;;  %2566 = vmatpush.bf16.msrb.mxu1 %v3885_v27  ;;  %v334_v46 = vld [vmem:[%s4259_s17 + $0x38] sm:$0xff] }
  0x4a   : > { %6789 = vst [vmem:[#allocation8_spill] sm:$0xff] %v4651_v38  ;;  %v4006_v33 = vpop.eup %4005  ;;  %4011 = vpow2.f32 %v3464_v23  ;;  %v1053_v61 = vadd.f32 %v4004_v14, %v1052_v35  ;;  %vm1059_vm3 = vcmp.eq.f32.partialorder %v1058_v41, 8.507059e+37  ;;  %v4675_v51 = vpack.c.bf16 %v4622_v6, %v1399_v40  ;;  %v333_v23 = vld [vmem:[%s4259_s17 + $0x30] sm:$0xff] }
  0x4b   : > { %501 = vmatmul.bf16.gmra.mxu2 %v369_v32  ;;  %461 = vmatmul.bf16.gmra.mxu0 %v361_v54  ;;  %v3450_v32 = vmul.f32 -1.442695, %v4648_v42  ;;  %v4677_v62 = vadd.f32 1.0, %v4006_v33  ;;  %v4008_v57 = vpop.eup %4007  ;;  %4013 = vpow2.f32 %v3449_v21  ;;  %v3465_v48 = vmul.f32 -1.442695, %v4669_v60 }
  0x4c   : > { %6792 = vst [vmem:[#allocation9_spill] sm:$0xff] %v4675_v51  ;;  %v1057_v12 = vsel %vm4663_vm4, %v4004_v14, %v1053_v61  ;;  %v4686_v54 = vadd.f32 1.0, %v4008_v57  ;;  %v3466_v41 = vmul.f32 -1.442695, %v4672_v22  ;;  %v1685_v15 = vunpack.c.l.b16 %v4675_v51  ;;  %v3917_v14 = vld [vmem:[%s6673_s4 + $0x168] sm:$0xff] }
  0x4d   : > { %2077 = vmatmul.bf16.gmra.mxu1 %v4651_v38  ;;  %4015 = vrcp.f32 %v4677_v62  ;;  %v1062_v24 = vsel %vm1059_vm3, %v1061_v58, %v1057_v12  ;;  %v833_v25 = vand.u32 2147483647, %v4677_v62  ;;  %v835_v5 = vand.u32 2147483648, %v4677_v62  ;;  %v3909_v58 = vld [vmem:[%s6673_s4 + $0x128] sm:$0xff]  ;;  %2244 = vmatpush.bf16.msrb.mxu3 %v3917_v14 }
  0x4e   : > { %4017 = vpow2.f32 %v3450_v32  ;;  %v4693_v45 = vmul.f32 %v1062_v24, %v4269_v43  ;;  %v4707_v7 = vmul.f32 %v4188_v4, %v540_v2  ;;  %v848_v53 = vand.u32 2147483647, %v4686_v54  ;;  %2155 = vmatpush.bf16.msrb.mxu2 %v3909_v58 }
  0x4f   : > { %v4010_v10 = vpop.eup %4009  ;;  %4019 = vrcp.f32 %v4686_v54  ;;  %v850_v1 = vand.u32 2147483648, %v4686_v54  ;;  %vm829_vm5 = vweird.f32 %v4677_v62  ;;  %vm4720_vm7 = vcmp.eq.f32.partialorder %v833_v25, 8.507059e+37 }
  0x50   : > { %6793 = vst [vmem:[#allocation10_spill] sm:$0xff] %v4693_v45  ;;  %v4012_v43 = vpop.eup %4011  ;;  %v4711_v31 = vadd.f32 1.0, %v4010_v10  ;;  %4021 = vpow2.f32 %v3465_v48  ;;  %v1338_v34 = vrot.slane %v4693_v45, 7  ;;  %v4724_v40 = vor.u32 1.1754944e-38, %v835_v5 }
  0x51   : > { %v4718_v4 = vadd.f32 1.0, %v4012_v43  ;;  %4023 = vpow2.f32 %v3466_v41  ;;  %v4014_v36 = vpop.eup %4013  ;;  %vm844_vm9 = vweird.f32 %v4686_v54  ;;  %vm4740_vm11 = vcmp.eq.f32.partialorder %v848_v53, 8.507059e+37  ;;  %v4757_v53 = vld [vmem:[%s4259_s17 + $0xc0] sm:$0xff] }
  0x52   : > { %4025 = vrcp.f32 %v4711_v31  ;;  %v1339_v21 = vsel %vm6796_vm10, %v1337_v29, %v1338_v34  ;;  %v1073_v33 = vand.u32 2147483647, %v4711_v31  ;;  %v1075_v9 = vand.u32 2147483648, %v4711_v31 }
  0x53   : > { %v4016_v35 = vpop.eup %4015  ;;  %4027 = vrcp.f32 %v4718_v4  ;;  %v4737_v61 = vpack.c.bf16 %v4693_v45, %v1339_v21  ;;  %v851_v2 = vor.u32 1.1754944e-38, %v850_v1  ;;  %vm1069_vm12 = vweird.f32 %v4711_v31  ;;  %v4760_v1 = vld [vmem:[%s4259_s17 + $0xc8] sm:$0xff] }
  0x54   : > { %v4018_v32 = vpop.eup %4017  ;;  %v825_v57 = vmul.f32 %v4016_v35, %v4677_v62  ;;  %vm1084_vm13 = vweird.f32 %v4718_v4  ;;  %v1088_v12 = vand.u32 2147483647, %v4718_v4  ;;  %v1090_v41 = vand.u32 2147483648, %v4718_v4 }
  0x55   : > { %6797 = vst [vmem:[#allocation11_spill] sm:$0xff] %v4737_v61  ;;  %v4020_v29 = vpop.eup %4019  ;;  %v362_v24 = vpack.c.bf16 %v334_v46, %v333_v23  ;;  %v1688_v5 = vunpack.c.l.b16 %v4737_v61  ;;  %vm830_vm14 = vweird.f32 %v4016_v35  ;;  %vm4752_vm0 = vcmp.eq.f32.partialorder %v1073_v33, 8.507059e+37 }
  0x56   : > { %v4022_v25 = vpop.eup %4021  ;;  %v826_v10 = vsub.f32 1.0, %v825_v57  ;;  %v840_v14 = vmul.f32 %v4020_v29, %v4686_v54  ;;  %vm845_vm15 = vweird.f32 %v4020_v29  ;;  %v1076_v43 = vor.u32 1.1754944e-38, %v1075_v9  ;;  %vm4774_vm1 = vmor %vm829_vm5, %vm830_vm14 }
  0x57   : > { %v4750_v58 = vpop.eup %4023  ;;  %v4762_v27 = vadd.f32 1.0, %v4014_v36  ;;  %v4764_v23 = vpack.c.b16 %v1688_v5, %v1685_v15  ;;  %v4766_v57 = vadd.f32 1.0, %v4018_v32  ;;  %v6803_v33 = vpack.c.bf16 %v4657_v11, %v4654_v50  ;;  %vm4791_vm8 = vmor %vm844_vm9, %vm845_vm15 }
  0x58   : > { %v4026_v34 = vpop.eup %4025  ;;  %v827_v46 = vmul.f32 %v4016_v35, %v826_v10  ;;  %v841_v21 = vsub.f32 1.0, %v840_v14  ;;  %vm4779_vm6 = vcmp.eq.f32.partialorder %v1088_v12, 8.507059e+37  ;;  %v1091_v32 = vor.u32 1.1754944e-38, %v1090_v41 }
  0x59   : > { %6802 = vst [vmem:[#allocation12_spill] sm:$0xff] %v4764_v23  ;;  %v4028_v63 = vpop.eup %4027  ;;  %v1065_v36 = vmul.f32 %v4026_v34, %v4711_v31  ;;  %4029 = vrcp.f32 %v4762_v27  ;;  %2117 = vmatmul.bf16.gmra.mxu3 %v4764_v23  ;;  %vm1070_vm2 = vweird.f32 %v4026_v34  ;;  %vm859_vm3 = vweird.f32 %v4762_v27  ;;  %v335_v31 = vld [vmem:[%s4259_s17 + $0x40] sm:$0xff] }
  0x5a   : > { %v828_v50 = vadd.f32 %v4016_v35, %v827_v46  ;;  %v842_v11 = vmul.f32 %v4020_v29, %v841_v21  ;;  %v1080_v62 = vmul.f32 %v4028_v63, %v4718_v4  ;;  %4031 = vrcp.f32 %v4766_v57  ;;  %vm4811_vm5 = vmor %vm1069_vm12, %vm1070_vm2 }
  0x5b   : > { %506 = vmatmul.bf16.gmra.mxu2 %v6803_v33  ;;  %466 = vmatmul.bf16.gmra.mxu0 %v362_v24  ;;  %v1066_v41 = vsub.f32 1.0, %v1065_v36  ;;  %v863_v24 = vand.u32 2147483647, %v4762_v27  ;;  %vm1085_vm4 = vweird.f32 %v4028_v63  ;;  %v865_v33 = vand.u32 2147483648, %v4762_v27 }
  0x5c   : > { %v832_v10 = vsel %vm4774_vm1, %v4016_v35, %v828_v50  ;;  %v843_v14 = vadd.f32 %v4020_v29, %v842_v11  ;;  %v1081_v46 = vsub.f32 1.0, %v1080_v62  ;;  %v878_v20 = vand.u32 2147483647, %v4766_v57  ;;  %vm4821_vm9 = vmor %vm1084_vm13, %vm1085_vm4 }
  0x5d   : > { %v837_v54 = vsel %vm4720_vm7, %v4724_v40, %v832_v10  ;;  %v1067_v21 = vmul.f32 %v4026_v34, %v1066_v41  ;;  %vm874_vm7 = vweird.f32 %v4766_v57  ;;  %vm4825_vm10 = vcmp.eq.f32.partialorder %v863_v24, 8.507059e+37 }
  0x5e   : > { %v847_v36 = vsel %vm4791_vm8, %v4020_v29, %v843_v14  ;;  %v4807_v5 = vmul.f32 %v837_v54, %v4579_v8  ;;  %v1082_v9 = vmul.f32 %v4028_v63, %v1081_v46  ;;  %v880_v29 = vand.u32 2147483648, %v4766_v57 }
  0x5f   : > { %v4030_v40 = vpop.eup %4029  ;;  %v852_v50 = vsel %vm4740_vm11, %v851_v2, %v847_v36  ;;  %v1068_v11 = vadd.f32 %v4026_v34, %v1067_v21  ;;  %v866_v24 = vor.u32 1.1754944e-38, %v865_v33  ;;  %v4839_v10 = vadd.f32 1.0, %v4022_v25 }
  0x60   : > { %v4831_v62 = vmul.f32 %v852_v50, %v4615_v56  ;;  %v1316_v12 = vrot.slane %v4807_v5, 7  ;;  %v1083_v48 = vadd.f32 %v4028_v63, %v1082_v9  ;;  %v855_v2 = vmul.f32 %v4030_v40, %v4762_v27  ;;  %v4835_v41 = vpop.eup %4031  ;;  %v3916_v27 = vld [vmem:[%s6673_s4 + $0x160] sm:$0xff] }
  0x61   : > { %v1072_v4 = vsel %vm4811_vm5, %v4026_v34, %v1068_v11  ;;  %vm860_vm11 = vweird.f32 %v4030_v40  ;;  %vm6816_vm12 = vcmask 1040384   ;;  %vm4847_vm13 = vcmp.eq.f32.partialorder %v878_v20, 8.507059e+37  ;;  %2245 = vmatpush.bf16.msrb.mxu3 %v3916_v27 }
  0x62   : > { %v1317_v14 = vrot.slane %v4831_v62, 7  ;;  %v1392_v46 = vsel %vm6816_vm12, 0.0, %v1316_v12  ;;  %v1077_v56 = vsel %vm4752_vm0, %v1076_v43, %v1072_v4  ;;  %v1087_v54 = vsel %vm4821_vm9, %v4028_v63, %v1083_v48  ;;  %vm6820_vm14 = vmmov %vm6816_vm12  ;;  %v3908_v48 = vld [vmem:[%s6673_s4 + $0x120] sm:$0xff] }
  0x63   : > { %v4852_v34 = vpack.c.bf16 %v4807_v5, %v1392_v46  ;;  %v1092_v25 = vsel %vm4779_vm6, %v1091_v32, %v1087_v54  ;;  %v4857_v33 = vmul.f32 %v1077_v56, %v4630_v28  ;;  %v856_v36 = vsub.f32 1.0, %v855_v2  ;;  %vm4874_vm15 = vmor %vm859_vm3, %vm860_vm11  ;;  %v3876_v2 = vld [vmem:[%s6673_s4 + $0x20] sm:$0xff]  ;;  %2156 = vmatpush.bf16.msrb.mxu2 %v3908_v48 }
  0x64   : > { %v1318_v13 = vsel %vm6820_vm14, %v1316_v12, %v1317_v14  ;;  %v4861_v43 = vmul.f32 %v1092_v25, %v4635_v39  ;;  %v870_v63 = vmul.f32 %v4835_v41, %v4766_v57  ;;  %v881_v35 = vor.u32 1.1754944e-38, %v880_v29  ;;  %vm6824_vm1 = vmmov %vm6816_vm12  ;;  %v3884_v56 = vld [vmem:[%s6673_s4 + $0x60] sm:$0xff]  ;;  %2478 = vmatpush.bf16.msrb.mxu0 %v3876_v2 }
  0x65   : > { %6819 = vst [vmem:[#allocation13_spill] sm:$0xff] %v4857_v33  ;;  %v4866_v9 = vpack.c.bf16 %v4831_v62, %v1318_v13  ;;  %v1643_v20 = vunpack.c.l.b16 %v4852_v34  ;;  %v1340_v15 = vrot.slane %v4857_v33, 7  ;;  %v857_v32 = vmul.f32 %v4030_v40, %v856_v36  ;;  %vm6825_vm6 = vmmov %vm6824_vm1  ;;  %2567 = vmatpush.bf16.msrb.mxu1 %v3884_v56  ;;  %v556_v56 = vld [vmem:[%s4183_s18 + $0xc0] sm:$0xff] }
  0x66   : > { %6821 = vst [vmem:[#allocation14_spill] sm:$0xff] %v4861_v43  ;;  %v1341_v28 = vrot.slane %v4861_v43, 7  ;;  %v871_v50 = vsub.f32 1.0, %v870_v63  ;;  %vm875_vm0 = vweird.f32 %v4835_v41  ;;  %4033 = vrcp.f32 %v4839_v10  ;;  %vm6847_vm14 = vmmov %vm6824_vm1 }
  0x67   : > { %v1646_v11 = vunpack.c.l.b16 %v4866_v9  ;;  %v1400_v8 = vsel %vm6824_vm1, 0.0, %v1340_v15  ;;  %v858_v29 = vadd.f32 %v4030_v40, %v857_v32  ;;  %v4883_v12 = vadd.f32 1.0, %v4750_v58  ;;  %vm4917_vm8 = vmor %vm874_vm7, %vm875_vm0 }
  0x68   : > { %v1342_v4 = vsel %vm6825_vm6, %v1340_v15, %v1341_v28  ;;  %v4896_v14 = vpack.c.bf16 %v4857_v33, %v1400_v8  ;;  %v872_v58 = vmul.f32 %v4835_v41, %v871_v50  ;;  %v1103_v46 = vand.u32 2147483647, %v4839_v10  ;;  %v4945_v8 = vld [vmem:[%s4259_s17 + $0xd0] sm:$0xff]  ;;  %vm6837_vm7 = vmmov %vm6824_vm1 }
  0x69   : > { %v4903_v54 = vpack.c.b16 %v1646_v11, %v1643_v20  ;;  %v4906_v25 = vpack.c.bf16 %v4861_v43, %v1342_v4  ;;  %v6829_v36 = vpack.c.bf16 %v4760_v1, %v4757_v53  ;;  %v862_v13 = vsel %vm4874_vm15, %v4030_v40, %v858_v29  ;;  %v4948_v29 = vld [vmem:[%s4259_s17 + $0xd8] sm:$0xff]  ;;  %v541_v4 = vld [vmem:[%s4183_s18 + $0x48] sm:$0xff]  ;;  %vm6850_vm15 = vmmov %vm6824_vm1 }
  0x6a   : > { %6826 = vst [vmem:[#allocation15_spill] sm:$0xff] %v4896_v14  ;;  %v1105_v20 = vand.u32 2147483648, %v4839_v10  ;;  %v1691_v15 = vunpack.c.l.b16 %v4896_v14  ;;  %v867_v53 = vsel %vm4825_vm10, %v866_v24, %v862_v13  ;;  %v873_v1 = vadd.f32 %v4835_v41, %v872_v58  ;;  %v336_v24 = vld [vmem:[%s4259_s17 + $0x48] sm:$0xff]  ;;  %v542_v13 = vld [vmem:[%s4183_s18 + $0x50] sm:$0xff]  ;;  %vm6840_vm10 = vmmov %vm6824_vm1 }
  0x6b   : > { %6827 = vst [vmem:[#allocation16_spill] sm:$0xff] %v4903_v54  ;;  %511 = vmatmul.bf16.gmra.mxu2 %v6829_v36  ;;  %vm1099_vm2 = vweird.f32 %v4839_v10  ;;  %2082 = vmatmul.bf16.gmra.mxu1 %v4903_v54  ;;  %v1694_v57 = vunpack.c.l.b16 %v4906_v25  ;;  %v4930_v40 = vmul.f32 %v867_v53, %v4640_v37  ;;  %vm4932_vm4 = vcmp.eq.f32.partialorder %v1103_v46, 8.507059e+37  ;;  %v557_v36 = vld [vmem:[%s4183_s18 + $0xc8] sm:$0xff]  ;;  %v544_v53 = vld [vmem:[%s4183_s18 + $0x60] sm:$0xff] }
  0x6c   : > { %6828 = vst [vmem:[#allocation17_spill] sm:$0xff] %v4906_v25  ;;  %4035 = vrcp.f32 %v4883_v12  ;;  %v4034_v28 = vpop.eup %4033  ;;  %v877_v39 = vsel %vm4917_vm8, %v4835_v41, %v873_v1  ;;  %v1106_v50 = vor.u32 1.1754944e-38, %v1105_v20  ;;  %v1118_v37 = vand.u32 2147483647, %v4883_v12  ;;  %v4981_v1 = vld [vmem:[%s6671_s2] ss:$0 sm:$0xff] }
  0x6d   : > { %6832 = vst [vmem:[#allocation18_spill] sm:$0xff] %v4930_v40  ;;  %v1120_v11 = vand.u32 2147483648, %v4883_v12  ;;  %v4950_v27 = vpack.c.b16 %v1694_v57, %v1691_v15  ;;  %v882_v48 = vsel %vm4847_vm13, %v881_v35, %v877_v39  ;;  %v1319_v41 = vrot.slane %v4930_v40, 7 }
  0x6e   : > { %v1095_v2 = vmul.f32 %v4034_v28, %v4839_v10  ;;  %v4958_v58 = vmul.f32 %v882_v48, %v4648_v42  ;;  %vm1100_vm3 = vweird.f32 %v4034_v28  ;;  %vm1114_vm5 = vweird.f32 %v4883_v12 }
  0x6f   : > { %6835 = vst [vmem:[#allocation19_spill] sm:$0xff] %v4950_v27  ;;  %v4961_v46 = vor.u32 1.1754944e-38, %v1120_v11  ;;  %2122 = vmatmul.bf16.gmra.mxu3 %v4950_v27  ;;  %v1393_v21 = vsel %vm6837_vm7, 0.0, %v1319_v41  ;;  %v363_v63 = vpack.c.bf16 %v336_v24, %v335_v31  ;;  %v372_v20 = vpack.c.bf16 %v4948_v29, %v4945_v8  ;;  %v4987_v31 = vld [vmem:[%s6672_s3] ss:$0 sm:$0xff]  ;;  %v543_v29 = vld [vmem:[%s4183_s18 + $0x58] sm:$0xff]  ;;  %vm5002_vm11 = vmor %vm1099_vm2, %vm1100_vm3 }
  0x70   : > { %6836 = vst [vmem:[#allocation20_spill] sm:$0xff] %v4958_v58  ;;  %v1096_v35 = vsub.f32 1.0, %v1095_v2  ;;  %v1320_v42 = vrot.slane %v4958_v58, 7  ;;  %v4972_v15 = vpack.c.bf16 %v4930_v40, %v1393_v21  ;;  %vm4974_vm9 = vcmp.eq.f32.partialorder %v1118_v37, 8.507059e+37  ;;  %v559_v27 = vld [vmem:[%s4183_s18 + $0xd8] sm:$0xff] }
  0x71   : > { %v577_v57 = vmul.f32 %v4981_v1, %v541_v4  ;;  %v4991_v24 = vadd.f32 %v4987_v31, %v4707_v7  ;;  %471 = vmatmul.bf16.gmra.mxu0 %v363_v63  ;;  %v592_v11 = vmul.f32 %v4981_v1, %v556_v56  ;;  %v593_v8 = vmul.f32 %v4981_v1, %v557_v36 }
  0x72   : > { %v4036_v39 = vpop.eup %4035  ;;  %v1097_v37 = vmul.f32 %v4034_v28, %v1096_v35  ;;  %v578_v48 = vmul.f32 %v4981_v1, %v542_v13  ;;  %v1321_v2 = vsel %vm6840_vm10, %v1319_v41, %v1320_v42  ;;  %v1649_v4 = vunpack.c.l.b16 %v4972_v15 }
  0x73   : > { %v1110_v21 = vmul.f32 %v4036_v39, %v4883_v12  ;;  %vm1115_vm12 = vweird.f32 %v4036_v39  ;;  %v5008_v56 = vpack.c.bf16 %v4958_v58, %v1321_v2  ;;  %v5011_v41 = vadd.f32 %v4987_v31, %v577_v57  ;;  %v558_v2 = vld [vmem:[%s4183_s18 + $0xd0] sm:$0xff] }
  0x74   : > { %v1098_v36 = vadd.f32 %v4034_v28, %v1097_v37  ;;  %v3451_v13 = vmul.f32 -1.442695, %v4991_v24  ;;  %v5015_v10 = vadd.f32 %v4987_v31, %v592_v11  ;;  %v5018_v63 = vadd.f32 %v4987_v31, %v593_v8  ;;  %vm5036_vm13 = vmor %vm1114_vm5, %vm1115_vm12 }
  0x75   : > { %v1111_v35 = vsub.f32 1.0, %v1110_v21  ;;  %v579_v42 = vmul.f32 %v4981_v1, %v543_v29  ;;  %v1652_v43 = vunpack.c.l.b16 %v5008_v56  ;;  %v3452_v57 = vmul.f32 -1.442695, %v5011_v41 }
  0x76   : > { %v1102_v37 = vsel %vm5002_vm11, %v4034_v28, %v1098_v36  ;;  %4037 = vpow2.f32 %v3451_v13  ;;  %v3467_v11 = vmul.f32 -1.442695, %v5015_v10  ;;  %v3468_v8 = vmul.f32 -1.442695, %v5018_v63 }
  0x77   : > { %v1107_v21 = vsel %vm4932_vm4, %v1106_v50, %v1102_v37  ;;  %v1112_v33 = vmul.f32 %v4036_v39, %v1111_v35  ;;  %v5031_v45 = vpack.c.b16 %v1652_v43, %v1649_v4  ;;  %4039 = vpow2.f32 %v3452_v57 }
  0x78   : > { %v5041_v29 = vmul.f32 %v1107_v21, %v4669_v60  ;;  %v5044_v32 = vadd.f32 %v4987_v31, %v578_v48  ;;  %4041 = vpow2.f32 %v3467_v11  ;;  %v5047_v7 = vadd.f32 %v4987_v31, %v579_v42 }
  0x79   : > { %6843 = vst [vmem:[#allocation21_spill] sm:$0xff] %v5031_v45  ;;  %v1113_v50 = vadd.f32 %v4036_v39, %v1112_v33  ;;  %v594_v43 = vmul.f32 %v4981_v1, %v558_v2  ;;  %4043 = vpow2.f32 %v3468_v8  ;;  %v595_v60 = vmul.f32 %v4981_v1, %v559_v27 }
  0x7a   : > { %6846 = vst [vmem:[#allocation22_spill] sm:$0xff] %v5041_v29  ;;  %v1343_v12 = vrot.slane %v5041_v29, 7  ;;  %v3453_v4 = vmul.f32 -1.442695, %v5044_v32  ;;  %v3454_v35 = vmul.f32 -1.442695, %v5047_v7 }
  0x7b   : > { %516 = vmatmul.bf16.gmra.mxu2 %v372_v20  ;;  %v1117_v48 = vsel %vm5036_vm13, %v4036_v39, %v1113_v50  ;;  %v5056_v33 = vadd.f32 %v4987_v31, %v594_v43  ;;  %2087 = vmatmul.bf16.gmra.mxu1 %v5031_v45  ;;  %v5065_v42 = vadd.f32 %v4987_v31, %v595_v60  ;;  %v545_v43 = vld [vmem:[%s4183_s18 + $0x68] sm:$0xff] }
  0x7c   : > { %v4038_v36 = vpop.eup %4037  ;;  %v1122_v13 = vsel %vm4974_vm9, %v4961_v46, %v1117_v48  ;;  %v1401_v20 = vsel %vm6847_vm14, 0.0, %v1343_v12  ;;  %4045 = vpow2.f32 %v3453_v4  ;;  %v3915_v48 = vld [vmem:[%s6673_s4 + $0x158] sm:$0xff] }
  0x7d   : > { %v5068_v27 = vmul.f32 %v1122_v13, %v4672_v22  ;;  %v5070_v39 = vadd.f32 1.0, %v4038_v36  ;;  %v4040_v37 = vpop.eup %4039  ;;  %v5073_v57 = vpack.c.bf16 %v5041_v29, %v1401_v20  ;;  %v5081_v11 = vmul.f32 -1.442695, %v5056_v33  ;;  %v3907_v36 = vld [vmem:[%s6673_s4 + $0x118] sm:$0xff]  ;;  %2246 = vmatpush.bf16.msrb.mxu3 %v3915_v48  ;;  %v337_v48 = vld [vmem:[%s4259_s17 + $0x50] sm:$0xff] }
  0x7e   : > { %v4042_v46 = vpop.eup %4041  ;;  %v5077_v21 = vadd.f32 1.0, %v4040_v37  ;;  %v5087_v50 = vmul.f32 -1.442695, %v5065_v42  ;;  %v3875_v13 = vld [vmem:[%s6673_s4 + $0x18] sm:$0xff]  ;;  %v5103_v20 = vmul.f32 %v4981_v1, %v544_v53  ;;  %2157 = vmatpush.bf16.msrb.mxu2 %v3907_v36  ;;  %v5119_v53 = vmul.f32 %v4981_v1, %v545_v43 }
  0x7f   : > { %6848 = vst [vmem:[#allocation23_spill] sm:$0xff] %v5068_v27  ;;  %v1344_v2 = vrot.slane %v5068_v27, 7  ;;  %4047 = vrcp.f32 %v5070_v39  ;;  %v4044_v22 = vpop.eup %4043  ;;  %v893_v8 = vand.u32 2147483647, %v5070_v39  ;;  %v5084_v28 = vadd.f32 1.0, %v4042_v46  ;;  %2479 = vmatpush.bf16.msrb.mxu0 %v3875_v13  ;;  %v338_v36 = vld [vmem:[%s4259_s17 + $0x58] sm:$0xff] }
  0x80   : > { %6849 = vst [vmem:[#allocation24_spill] sm:$0xff] %v5073_v57  ;;  %4049 = vpow2.f32 %v3454_v35  ;;  %v895_v60 = vand.u32 2147483648, %v5070_v39  ;;  %v1697_v35 = vunpack.c.l.b16 %v5073_v57  ;;  %v908_v37 = vand.u32 2147483647, %v5077_v21 }
  0x81   : > { %v1345_v4 = vsel %vm6850_vm15, %v1343_v12, %v1344_v2  ;;  %4051 = vrcp.f32 %v5077_v21  ;;  %v910_v46 = vand.u32 2147483648, %v5077_v21  ;;  %v3883_v2 = vld [vmem:[%s6673_s4 + $0x58] sm:$0xff]  ;;  %vm889_vm0 = vweird.f32 %v5070_v39 }
  0x82   : > { %v5106_v12 = vpack.c.bf16 %v5068_v27, %v1345_v4  ;;  %v5115_v29 = vadd.f32 1.0, %v4044_v22  ;;  %4053 = vrcp.f32 %v5084_v28  ;;  %v4046_v4 = vpop.eup %4045  ;;  %vm5122_vm1 = vcmp.eq.f32.partialorder %v893_v8, 8.507059e+37  ;;  %2568 = vmatpush.bf16.msrb.mxu1 %v3883_v2  ;;  %v355_v8 = vld [vmem:[%s4259_s17 + $0xe0] sm:$0xff] }
  0x83   : > { %vm904_vm6 = vweird.f32 %v5077_v21  ;;  %v1133_v22 = vand.u32 2147483647, %v5084_v28  ;;  %v896_v23 = vor.u32 1.1754944e-38, %v895_v60  ;;  %vm1129_vm8 = vweird.f32 %v5084_v28 }
  0x84   : > { %6851 = vst [vmem:[#allocation25_spill] sm:$0xff] %v5106_v12  ;;  %v1700_v27 = vunpack.c.l.b16 %v5106_v12  ;;  %v1135_v43 = vand.u32 2147483648, %v5084_v28  ;;  %4055 = vrcp.f32 %v5115_v29  ;;  %v356_v12 = vld [vmem:[%s4259_s17 + $0xe8] sm:$0xff]  ;;  %vm5138_vm2 = vcmp.eq.f32.partialorder %v908_v37, 8.507059e+37 }
  0x85   : > { %v4048_v57 = vpop.eup %4047  ;;  %v911_v2 = vor.u32 1.1754944e-38, %v910_v46  ;;  %vm1144_vm4 = vweird.f32 %v5115_v29  ;;  %v1148_v14 = vand.u32 2147483647, %v5115_v29  ;;  %v1150_v55 = vand.u32 2147483648, %v5115_v29 }
  0x86   : > { %v4050_v19 = vpop.eup %4049  ;;  %v5135_v0 = vpack.c.b16 %v1700_v27, %v1697_v35  ;;  %v885_v25 = vmul.f32 %v4048_v57, %v5070_v39  ;;  %vm890_vm3 = vweird.f32 %v4048_v57  ;;  %v364_v61 = vpack.c.bf16 %v338_v36, %v337_v48 }
  0x87   : > { %v4052_v60 = vpop.eup %4051  ;;  %vm5147_vm5 = vcmp.eq.f32.partialorder %v1133_v22, 8.507059e+37  ;;  %v373_v51 = vpack.c.bf16 %v356_v12, %v355_v8  ;;  %v1136_v18 = vor.u32 1.1754944e-38, %v1135_v43  ;;  %v5151_v52 = vadd.f32 1.0, %v4046_v4  ;;  %vm5160_vm9 = vmor %vm889_vm0, %vm890_vm3 }
  0x88   : > { %6854 = vst [vmem:[#allocation26_spill] sm:$0xff] %v5135_v0  ;;  %2127 = vmatmul.bf16.gmra.mxu3 %v5135_v0  ;;  %v886_v27 = vsub.f32 1.0, %v885_v25  ;;  %v900_v35 = vmul.f32 %v4052_v60, %v5077_v21  ;;  %v4054_v46 = vpop.eup %4053  ;;  %vm905_vm7 = vweird.f32 %v4052_v60  ;;  %476 = vmatmul.bf16.gmra.mxu0 %v364_v61  ;;  %v5153_v58 = vadd.f32 1.0, %v4050_v19 }
  0x89   : > { %v1125_v36 = vmul.f32 %v4054_v46, %v5084_v28  ;;  %4057 = vpow2.f32 %v5081_v11  ;;  %vm1130_vm10 = vweird.f32 %v4054_v46  ;;  %vm5164_vm11 = vcmp.eq.f32.partialorder %v1148_v14, 8.507059e+37  ;;  %vm5174_vm12 = vmor %vm904_vm6, %vm905_vm7 }
  0x8a   : > { %v887_v40 = vmul.f32 %v4048_v57, %v886_v27  ;;  %v901_v48 = vsub.f32 1.0, %v900_v35  ;;  %v4056_v25 = vpop.eup %4055  ;;  %4059 = vrcp.f32 %v5151_v52  ;;  %v925_v19 = vand.u32 2147483648, %v5151_v52  ;;  %vm5187_vm14 = vmor %vm1129_vm8, %vm1130_vm10 }
  0x8b   : > { %521 = vmatmul.bf16.gmra.mxu2 %v373_v51  ;;  %v1126_v11 = vsub.f32 1.0, %v1125_v36  ;;  %v1140_v22 = vmul.f32 %v4056_v25, %v5115_v29  ;;  %vm1145_vm13 = vweird.f32 %v4056_v25  ;;  %v1151_v14 = vor.u32 1.1754944e-38, %v1150_v55 }
  0x8c   : > { %v888_v51 = vadd.f32 %v4048_v57, %v887_v40  ;;  %v902_v4 = vmul.f32 %v4052_v60, %v901_v48  ;;  %v923_v43 = vand.u32 2147483647, %v5151_v52  ;;  %4061 = vrcp.f32 %v5153_v58 }
  0x8d   : > { %v1127_v27 = vmul.f32 %v4054_v46, %v1126_v11  ;;  %v1141_v35 = vsub.f32 1.0, %v1140_v22  ;;  %vm919_vm15 = vweird.f32 %v5151_v52  ;;  %v5192_v55 = vor.u32 1.1754944e-38, %v925_v19 }
  0x8e   : > { %v892_v40 = vsel %vm5160_vm9, %v4048_v57, %v888_v51  ;;  %v903_v8 = vadd.f32 %v4052_v60, %v902_v4  ;;  %v5196_v57 = vadd.f32 %v4987_v31, %v5103_v20  ;;  %vm934_vm0 = vweird.f32 %v5153_v58 }
  0x8f   : > { %v897_v48 = vsel %vm5122_vm1, %v896_v23, %v892_v40  ;;  %v4058_v36 = vpop.eup %4057  ;;  %v1128_v28 = vadd.f32 %v4054_v46, %v1127_v27  ;;  %v1142_v12 = vmul.f32 %v4056_v25, %v1141_v35  ;;  %vm5209_vm1 = vmor %vm1144_vm4, %vm1145_vm13  ;;  %vm5213_vm6 = vcmp.eq.f32.partialorder %v923_v43, 8.507059e+37 }
  0x90   : > { %v907_v6 = vsel %vm5174_vm12, %v4052_v60, %v903_v8  ;;  %v5201_v23 = vmul.f32 %v897_v48, %v4991_v24  ;;  %v4060_v51 = vpop.eup %4059  ;;  %v938_v24 = vand.u32 2147483647, %v5153_v58  ;;  %v940_v4 = vand.u32 2147483648, %v5153_v58 }
  0x91   : > { %v912_v19 = vsel %vm5138_vm2, %v911_v2, %v907_v6  ;;  %4063 = vpow2.f32 %v5087_v50  ;;  %v1132_v29 = vsel %vm5187_vm14, %v4054_v46, %v1128_v28  ;;  %v1143_v11 = vadd.f32 %v4056_v25, %v1142_v12 }
  0x92   : > { %6867 = vst [vmem:[#allocation27_spill] sm:$0xff] %v5201_v23  ;;  %v5221_v13 = vmul.f32 %v912_v19, %v5011_v41  ;;  %v1322_v2 = vrot.slane %v5201_v23, 7  ;;  %v5226_v22 = vpop.eup %4061  ;;  %v1137_v39 = vsel %vm5147_vm5, %v1136_v18, %v1132_v29  ;;  %v915_v43 = vmul.f32 %v4060_v51, %v5151_v52  ;;  %v3914_v52 = vld [vmem:[%s6673_s4 + $0x150] sm:$0xff] }
  0x93   : > { %vm920_vm8 = vweird.f32 %v4060_v51  ;;  %v5231_v40 = vadd.f32 1.0, %v4058_v36  ;;  %vm6873_vm2 = vcmask 1040384   ;;  %v1147_v8 = vsel %vm5209_vm1, %v4056_v25, %v1143_v11  ;;  %2247 = vmatpush.bf16.msrb.mxu3 %v3914_v52 }
  0x94   : > { %6872 = vst [vmem:[#allocation28_spill] sm:$0xff] %v5221_v13  ;;  %v1323_v50 = vrot.slane %v5221_v13, 7  ;;  %v1394_v41 = vsel %vm6873_vm2, 0.0, %v1322_v2  ;;  %v5238_v46 = vmul.f32 %v1137_v39, %v5015_v10  ;;  %v1152_v18 = vsel %vm5164_vm11, %v1151_v14, %v1147_v8  ;;  %vm6875_vm4 = vmmov %vm6873_vm2  ;;  %v3906_v39 = vld [vmem:[%s6673_s4 + $0x110] sm:$0xff] }
  0x95   : > { %v5241_v27 = vpack.c.bf16 %v5201_v23, %v1394_v41  ;;  %v916_v37 = vsub.f32 1.0, %v915_v43  ;;  %v930_v35 = vmul.f32 %v5226_v22, %v5153_v58  ;;  %v5249_v21 = vmul.f32 %v1152_v18, %v5018_v63  ;;  %vm6877_vm5 = vmmov %vm6873_vm2  ;;  %v3874_v43 = vld [vmem:[%s6673_s4 + $0x10] sm:$0xff]  ;;  %2158 = vmatpush.bf16.msrb.mxu2 %v3906_v39 }
  0x96   : > { %6874 = vst [vmem:[#allocation29_spill] sm:$0xff] %v5238_v46  ;;  %v1324_v48 = vsel %vm6875_vm4, %v1322_v2, %v1323_v50  ;;  %v1346_v25 = vrot.slane %v5238_v46, 7  ;;  %vm935_vm3 = vweird.f32 %v5226_v22  ;;  %vm5262_vm7 = vmor %vm919_vm15, %vm920_vm8  ;;  %4065 = vrcp.f32 %v5231_v40  ;;  %2480 = vmatpush.bf16.msrb.mxu0 %v3874_v43 }
  0x97   : > { %6876 = vst [vmem:[#allocation30_spill] sm:$0xff] %v5249_v21  ;;  %v4064_v10 = vpop.eup %4063  ;;  %v5254_v36 = vpack.c.bf16 %v5221_v13, %v1324_v48  ;;  %v1655_v61 = vunpack.c.l.b16 %v5241_v27  ;;  %v917_v14 = vmul.f32 %v4060_v51, %v916_v37  ;;  %v931_v6 = vsub.f32 1.0, %v930_v35  ;;  %vm6881_vm9 = vmmov %vm6873_vm2  ;;  %v3882_v37 = vld [vmem:[%s6673_s4 + $0x50] sm:$0xff] }
  0x98   : > { %v1347_v28 = vrot.slane %v5249_v21, 7  ;;  %v1402_v12 = vsel %vm6877_vm5, 0.0, %v1346_v25  ;;  %v5266_v19 = vadd.f32 1.0, %v4064_v10  ;;  %v941_v41 = vor.u32 1.1754944e-38, %v940_v4  ;;  %vm5301_vm10 = vmor %vm934_vm0, %vm935_vm3  ;;  %2569 = vmatpush.bf16.msrb.mxu1 %v3882_v37 }
  0x99   : > { %v1658_v20 = vunpack.c.l.b16 %v5254_v36  ;;  %v5271_v2 = vpack.c.bf16 %v5238_v46, %v1402_v12  ;;  %v918_v29 = vadd.f32 %v4060_v51, %v917_v14  ;;  %v932_v11 = vmul.f32 %v5226_v22, %v931_v6  ;;  %vm6893_vm0 = vmmov %vm6873_vm2 }
  0x9a   : > { %v1348_v50 = vsel %vm6881_vm9, %v1346_v25, %v1347_v28  ;;  %v1163_v8 = vand.u32 2147483647, %v5231_v40  ;;  %v1165_v18 = vand.u32 2147483648, %v5231_v40  ;;  %v339_v25 = vld [vmem:[%s4259_s17 + $0x60] sm:$0xff]  ;;  %vm5311_vm11 = vcmp.eq.f32.partialorder %v938_v24, 8.507059e+37  ;;  %vm6894_vm1 = vmmov %vm6893_vm0 }
  0x9b   : > { %6880 = vst [vmem:[#allocation31_spill] sm:$0xff] %v5271_v2  ;;  %v5289_v35 = vpack.c.b16 %v1658_v20, %v1655_v61  ;;  %v5292_v48 = vpack.c.bf16 %v5249_v21, %v1348_v50  ;;  %v1703_v10 = vunpack.c.l.b16 %v5271_v2  ;;  %v922_v14 = vsel %vm5262_vm7, %v4060_v51, %v918_v29  ;;  %v340_v61 = vld [vmem:[%s4259_s17 + $0x68] sm:$0xff]  ;;  %v357_v29 = vld [vmem:[%s4259_s17 + $0xf0] sm:$0xff]  ;;  %vm6901_vm3 = vmmov %vm6893_vm0 }
  0x9c   : > { %v927_v6 = vsel %vm5213_vm6, %v5192_v55, %v922_v14  ;;  %v933_v28 = vadd.f32 %v5226_v22, %v932_v11  ;;  %vm1159_vm12 = vweird.f32 %v5231_v40  ;;  %vm5321_vm13 = vcmp.eq.f32.partialorder %v1163_v8, 8.507059e+37  ;;  %v4066_v12 = vpop.eup %4065  ;;  %v358_v11 = vld [vmem:[%s4259_s17 + $0xf8] sm:$0xff]  ;;  %v560_v8 = vld [vmem:[%s4183_s18 + $0xe0] sm:$0xff]  ;;  %v561_v14 = vld [vmem:[%s4183_s18 + $0xe8] sm:$0xff] }
  0x9d   : > { %6882 = vst [vmem:[#allocation32_spill] sm:$0xff] %v5289_v35  ;;  %2092 = vmatmul.bf16.gmra.mxu1 %v5289_v35  ;;  %v1706_v58 = vunpack.c.l.b16 %v5292_v48  ;;  %v5319_v60 = vmul.f32 %v927_v6, %v5044_v32  ;;  %v1166_v24 = vor.u32 1.1754944e-38, %v1165_v18  ;;  %4067 = vrcp.f32 %v5266_v19  ;;  %vm6904_vm5 = vmmov %vm6893_vm0 }
  0x9e   : > { %6883 = vst [vmem:[#allocation33_spill] sm:$0xff] %v5292_v48  ;;  %v937_v63 = vsel %vm5301_vm10, %v5226_v22, %v933_v28  ;;  %vm1174_vm14 = vweird.f32 %v5266_v19  ;;  %v1180_v20 = vand.u32 2147483648, %v5266_v19  ;;  %v365_v32 = vpack.c.bf16 %v340_v61, %v339_v25 }
  0x9f   : > { %6888 = vst [vmem:[#allocation34_spill] sm:$0xff] %v5319_v60  ;;  %v5333_v52 = vpack.c.b16 %v1706_v58, %v1703_v10  ;;  %v942_v39 = vsel %vm5311_vm11, %v941_v41, %v937_v63  ;;  %v1325_v43 = vrot.slane %v5319_v60, 7  ;;  %v1155_v50 = vmul.f32 %v4066_v12, %v5231_v40  ;;  %v546_v10 = vld [vmem:[%s4183_s18 + $0x70] sm:$0xff] }
  0xa0   : > { %v5341_v22 = vmul.f32 %v942_v39, %v5047_v7  ;;  %vm1160_vm15 = vweird.f32 %v4066_v12  ;;  %v1178_v18 = vand.u32 2147483647, %v5266_v19  ;;  %v1181_v37 = vor.u32 1.1754944e-38, %v1180_v20  ;;  %481 = vmatmul.bf16.gmra.mxu0 %v365_v32 }
  0xa1   : > { %6891 = vst [vmem:[#allocation35_spill] sm:$0xff] %v5333_v52  ;;  %2132 = vmatmul.bf16.gmra.mxu3 %v5333_v52  ;;  %v1395_v41 = vsel %vm6893_vm0, 0.0, %v1325_v43  ;;  %v1156_v4 = vsub.f32 1.0, %v1155_v50  ;;  %v374_v25 = vpack.c.bf16 %v358_v11, %v357_v29  ;;  %v5350_v61 = vadd.f32 %v4987_v31, %v5119_v53  ;;  %v547_v29 = vld [vmem:[%s4183_s18 + $0x78] sm:$0xff]  ;;  %vm5367_vm6 = vmor %vm1159_vm12, %vm1160_vm15 }
  0xa2   : > { %6892 = vst [vmem:[#allocation36_spill] sm:$0xff] %v5341_v22  ;;  %v1326_v7 = vrot.slane %v5341_v22, 7  ;;  %v5354_v6 = vpack.c.bf16 %v5319_v60, %v1395_v41  ;;  %v3455_v28 = vmul.f32 -1.442695, %v5196_v57  ;;  %v596_v51 = vmul.f32 %v4981_v1, %v560_v8  ;;  %v563_v50 = vld [vmem:[%s4183_s18 + $0xf8] sm:$0xff] }
  0xa3   : > { %v4068_v58 = vpop.eup %4067  ;;  %v1157_v63 = vmul.f32 %v4066_v12, %v1156_v4  ;;  %526 = vmatmul.bf16.gmra.mxu2 %v374_v25  ;;  %v3456_v20 = vmul.f32 -1.442695, %v5350_v61  ;;  %v597_v32 = vmul.f32 %v4981_v1, %v561_v14  ;;  %v582_v53 = vmul.f32 %v4981_v1, %v546_v10 }
  0xa4   : > { %v1327_v11 = vsel %vm6894_vm1, %v1325_v43, %v1326_v7  ;;  %v1661_v39 = vunpack.c.l.b16 %v5354_v6  ;;  %v1170_v8 = vmul.f32 %v4068_v58, %v5266_v19  ;;  %vm1175_vm8 = vweird.f32 %v4068_v58 }
  0xa5   : > { %v5373_v41 = vpack.c.bf16 %v5341_v22, %v1327_v11  ;;  %v1158_v14 = vadd.f32 %v4066_v12, %v1157_v63  ;;  %4069 = vpow2.f32 %v3455_v28  ;;  %v5376_v10 = vadd.f32 %v4987_v31, %v596_v51  ;;  %vm5400_vm2 = vmor %vm1174_vm14, %vm1175_vm8 }
  0xa6   : > { %v1171_v43 = vsub.f32 1.0, %v1170_v8  ;;  %4071 = vpow2.f32 %v3456_v20  ;;  %v5379_v40 = vadd.f32 %v4987_v31, %v597_v32  ;;  %v583_v4 = vmul.f32 %v4981_v1, %v547_v29 }
  0xa7   : > { %v1664_v25 = vunpack.c.l.b16 %v5373_v41  ;;  %v1162_v7 = vsel %vm5367_vm6, %v4066_v12, %v1158_v14  ;;  %v3471_v63 = vmul.f32 -1.442695, %v5376_v10  ;;  %v5387_v28 = vadd.f32 %v4987_v31, %v582_v53 }
  0xa8   : > { %v1167_v51 = vsel %vm5321_vm13, %v1166_v24, %v1162_v7  ;;  %v1172_v20 = vmul.f32 %v4068_v58, %v1171_v43  ;;  %v3472_v32 = vmul.f32 -1.442695, %v5379_v40  ;;  %v5393_v11 = vadd.f32 %v4987_v31, %v583_v4  ;;  %v562_v24 = vld [vmem:[%s4183_s18 + $0xf0] sm:$0xff] }
  0xa9   : > { %v5395_v29 = vpack.c.b16 %v1664_v25, %v1661_v39  ;;  %v5405_v53 = vmul.f32 %v1167_v51, %v5056_v33  ;;  %4073 = vpow2.f32 %v3471_v63  ;;  %v3457_v55 = vmul.f32 -1.442695, %v5387_v28 }
  0xaa   : > { %v1173_v8 = vadd.f32 %v4068_v58, %v1172_v20  ;;  %vm1179_vm4 = vcmp.eq.f32.partialorder %v1178_v18, 8.507059e+37  ;;  %4075 = vpow2.f32 %v3472_v32  ;;  %v3458_v39 = vmul.f32 -1.442695, %v5393_v11 }
  0xab   : > { %6897 = vst [vmem:[#allocation37_spill] sm:$0xff] %v5395_v29  ;;  %v4070_v14 = vpop.eup %4069  ;;  %v1349_v19 = vrot.slane %v5405_v53, 7  ;;  %4077 = vpow2.f32 %v3457_v55  ;;  %v598_v25 = vmul.f32 %v4981_v1, %v562_v24  ;;  %v599_v7 = vmul.f32 %v4981_v1, %v563_v50  ;;  %v3913_v50 = vld [vmem:[%s6673_s4 + $0x148] sm:$0xff] }
  0xac   : > { %6900 = vst [vmem:[#allocation38_spill] sm:$0xff] %v5405_v53  ;;  %v4072_v43 = vpop.eup %4071  ;;  %v1177_v4 = vsel %vm5400_vm2, %v4068_v58, %v1173_v8  ;;  %v5414_v33 = vadd.f32 1.0, %v4070_v14  ;;  %4079 = vpow2.f32 %v3458_v39  ;;  %v3905_v8 = vld [vmem:[%s6673_s4 + $0x108] sm:$0xff]  ;;  %2248 = vmatpush.bf16.msrb.mxu3 %v3913_v50 }
  0xad   : > { %2097 = vmatmul.bf16.gmra.mxu1 %v5395_v29  ;;  %v1182_v18 = vsel %vm1179_vm4, %v1181_v37, %v1177_v4  ;;  %v1403_v63 = vsel %vm6901_vm3, 0.0, %v1349_v19  ;;  %v5420_v51 = vadd.f32 1.0, %v4072_v43  ;;  %v3873_v4 = vld [vmem:[%s6673_s4 + $0x8] sm:$0xff]  ;;  %2159 = vmatpush.bf16.msrb.mxu2 %v3905_v8 }
  0xae   : > { %v5423_v20 = vmul.f32 %v1182_v18, %v5065_v42  ;;  %v5426_v32 = vpack.c.bf16 %v5405_v53, %v1403_v63  ;;  %4081 = vrcp.f32 %v5414_v33  ;;  %v953_v12 = vand.u32 2147483647, %v5414_v33  ;;  %v3881_v18 = vld [vmem:[%s6673_s4 + $0x48] sm:$0xff]  ;;  %2481 = vmatpush.bf16.msrb.mxu0 %v3873_v4 }
  0xaf   : > { %v4074_v58 = vpop.eup %4073  ;;  %v955_v1 = vand.u32 2147483648, %v5414_v33  ;;  %4083 = vrcp.f32 %v5420_v51  ;;  %v968_v24 = vand.u32 2147483647, %v5420_v51  ;;  %v970_v42 = vand.u32 2147483648, %v5420_v51  ;;  %2570 = vmatpush.bf16.msrb.mxu1 %v3881_v18 }
  0xb0   : > { %6902 = vst [vmem:[#allocation39_spill] sm:$0xff] %v5423_v20  ;;  %v4076_v37 = vpop.eup %4075  ;;  %v1350_v55 = vrot.slane %v5423_v20, 7  ;;  %v5441_v14 = vadd.f32 1.0, %v4074_v58  ;;  %v5452_v63 = vadd.f32 %v4987_v31, %v598_v25  ;;  %v5455_v53 = vadd.f32 %v4987_v31, %v599_v7  ;;  %v3904_v25 = vld [vmem:[%s6673_s4 + $0x100] sm:$0xff] }
  0xb1   : > { %6903 = vst [vmem:[#allocation40_spill] sm:$0xff] %v5426_v32  ;;  %v4078_v39 = vpop.eup %4077  ;;  %v5443_v43 = vadd.f32 1.0, %v4076_v37  ;;  %v1709_v58 = vunpack.c.l.b16 %v5426_v32  ;;  %vm949_vm7 = vweird.f32 %v5414_v33  ;;  %vm964_vm9 = vweird.f32 %v5420_v51  ;;  %2160 = vmatpush.bf16.msrb.mxu2 %v3904_v25 }
  0xb2   : > { %v1351_v21 = vsel %vm6904_vm5, %v1349_v19, %v1350_v55  ;;  %v4080_v37 = vpop.eup %4079  ;;  %vm5467_vm10 = vcmp.eq.f32.partialorder %v953_v12, 8.507059e+37  ;;  %v956_v7 = vor.u32 1.1754944e-38, %v955_v1  ;;  %v5471_v55 = vor.u32 1.1754944e-38, %v970_v42  ;;  %v341_v12 = vld [vmem:[%s4259_s17 + $0x70] sm:$0xff] }
  0xb3   : > { %v5465_v31 = vpack.c.bf16 %v5423_v20, %v1351_v21  ;;  %4085 = vrcp.f32 %v5441_v14  ;;  %vm5474_vm11 = vcmp.eq.f32.partialorder %v968_v24, 8.507059e+37  ;;  %v1193_v46 = vand.u32 2147483647, %v5441_v14  ;;  %v342_v20 = vld [vmem:[%s4259_s17 + $0x78] sm:$0xff] }
  0xb4   : > { %v4082_v50 = vpop.eup %4081  ;;  %v1195_v21 = vand.u32 2147483648, %v5441_v14  ;;  %4087 = vrcp.f32 %v5443_v43  ;;  %v5483_v1 = vadd.f32 1.0, %v4078_v39  ;;  %vm1189_vm12 = vweird.f32 %v5441_v14 }
  0xb5   : > { %6905 = vst [vmem:[#allocation41_spill] sm:$0xff] %v5465_v31  ;;  %v4084_v42 = vpop.eup %4083  ;;  %v1712_v52 = vunpack.c.l.b16 %v5465_v31  ;;  %v945_v4 = vmul.f32 %v4082_v50, %v5414_v33  ;;  %v1208_v24 = vand.u32 2147483647, %v5443_v43  ;;  %vm950_vm13 = vweird.f32 %v4082_v50 }
  0xb6   : > { %v960_v18 = vmul.f32 %v4084_v42, %v5420_v51  ;;  %vm965_vm14 = vweird.f32 %v4084_v42  ;;  %vm1204_vm15 = vweird.f32 %v5443_v43  ;;  %v1210_v0 = vand.u32 2147483648, %v5443_v43  ;;  %vm5511_vm6 = vmor %vm949_vm7, %vm950_vm13 }
  0xb7   : > { %v5491_v32 = vpack.c.b16 %v1712_v52, %v1709_v58  ;;  %v946_v39 = vsub.f32 1.0, %v945_v4  ;;  %v366_v48 = vpack.c.bf16 %v342_v20, %v341_v12  ;;  %vm5494_vm0 = vcmp.eq.f32.partialorder %v1193_v46, 8.507059e+37  ;;  %vm5521_vm2 = vmor %vm964_vm9, %vm965_vm14 }
  0xb8   : > { %v961_v31 = vsub.f32 1.0, %v960_v18  ;;  %v1196_v22 = vor.u32 1.1754944e-38, %v1195_v21  ;;  %v5498_v60 = vadd.f32 1.0, %v4080_v37  ;;  %4089 = vrcp.f32 %v5483_v1 }
  0xb9   : > { %6910 = vst [vmem:[#allocation42_spill] sm:$0xff] %v5491_v32  ;;  %v4086_v29 = vpop.eup %4085  ;;  %2137 = vmatmul.bf16.gmra.mxu3 %v5491_v32  ;;  %v947_v25 = vmul.f32 %v4082_v50, %v946_v39  ;;  %vm5502_vm1 = vcmp.eq.f32.partialorder %v1208_v24, 8.507059e+37  ;;  %486 = vmatmul.bf16.gmra.mxu0 %v366_v48  ;;  %v983_v20 = vand.u32 2147483647, %v5483_v1  ;;  %v985_v46 = vand.u32 2147483648, %v5483_v1 }
  0xba   : > { %v4088_v58 = vpop.eup %4087  ;;  %v962_v21 = vmul.f32 %v4084_v42, %v961_v31  ;;  %v1185_v12 = vmul.f32 %v4086_v29, %v5441_v14  ;;  %vm979_vm8 = vweird.f32 %v5483_v1  ;;  %4091 = vrcp.f32 %v5498_v60 }
  0xbb   : > { %v948_v48 = vadd.f32 %v4082_v50, %v947_v25  ;;  %vm1190_vm4 = vweird.f32 %v4086_v29  ;;  %v1200_v33 = vmul.f32 %v4088_v58, %v5443_v43  ;;  %v1211_v24 = vor.u32 1.1754944e-38, %v1210_v0 }
  0xbc   : > { %v963_v18 = vadd.f32 %v4084_v42, %v962_v21  ;;  %v1186_v31 = vsub.f32 1.0, %v1185_v12  ;;  %vm1205_vm3 = vweird.f32 %v4088_v58  ;;  %v986_v39 = vor.u32 1.1754944e-38, %v985_v46  ;;  %vm5548_vm9 = vmor %vm1189_vm12, %vm1190_vm4 }
  0xbd   : > { %v952_v32 = vsel %vm5511_vm6, %v4082_v50, %v948_v48  ;;  %v1201_v13 = vsub.f32 1.0, %v1200_v33  ;;  %vm5528_vm5 = vcmp.eq.f32.partialorder %v983_v20, 8.507059e+37  ;;  %vm994_vm7 = vweird.f32 %v5498_v60 }
  0xbe   : > { %v998_v51 = vand.u32 2147483647, %v5498_v60  ;;  %v4090_v23 = vpop.eup %4089  ;;  %v957_v0 = vsel %vm5467_vm10, %v956_v7, %v952_v32  ;;  %v967_v21 = vsel %vm5521_vm2, %v4084_v42, %v963_v18  ;;  %v1187_v46 = vmul.f32 %v4086_v29, %v1186_v31  ;;  %vm5559_vm10 = vmor %vm1204_vm15, %vm1205_vm3 }
  0xbf   : > { %v1000_v37 = vand.u32 2147483648, %v5498_v60  ;;  %v972_v50 = vsel %vm5474_vm11, %v5471_v55, %v967_v21  ;;  %v5543_v20 = vmul.f32 %v957_v0, %v5196_v57  ;;  %v1202_v32 = vmul.f32 %v4088_v58, %v1201_v13 }
  0xc0   : > { %v975_v19 = vmul.f32 %v4090_v23, %v5483_v1  ;;  %v4092_v7 = vpop.eup %4091  ;;  %v5554_v42 = vmul.f32 %v972_v50, %v5350_v61  ;;  %v1188_v48 = vadd.f32 %v4086_v29, %v1187_v46  ;;  %vm980_vm11 = vweird.f32 %v4090_v23 }
  0xc1   : > { %v3473_v14 = vmul.f32 -1.442695, %v5452_v63  ;;  %v1328_v55 = vrot.slane %v5543_v20, 7  ;;  %v1203_v13 = vadd.f32 %v4088_v58, %v1202_v32  ;;  %v990_v4 = vmul.f32 %v4092_v7, %v5498_v60  ;;  %vm981_vm6 = vmor %vm979_vm8, %vm980_vm11 }
  0xc2   : > { %v976_v8 = vsub.f32 1.0, %v975_v19  ;;  %vm5566_vm12 = vcmp.eq.f32.partialorder %v998_v51, 8.507059e+37  ;;  %v1329_v33 = vrot.slane %v5554_v42, 7  ;;  %v1192_v43 = vsel %vm5548_vm9, %v4086_v29, %v1188_v48 }
  0xc3   : > { %vm995_vm13 = vweird.f32 %v4092_v7  ;;  %v1001_v18 = vor.u32 1.1754944e-38, %v1000_v37  ;;  %vm6927_vm14 = vcmask 1040384   ;;  %v1197_v0 = vsel %vm5494_vm0, %v1196_v22, %v1192_v43 }
  0xc4   : > { %v1396_v31 = vsel %vm6927_vm14, 0.0, %v1328_v55  ;;  %v1207_v21 = vsel %vm5559_vm10, %v4088_v58, %v1203_v13  ;;  %v977_v46 = vmul.f32 %v4090_v23, %v976_v8  ;;  %vm6928_vm15 = vmmov %vm6927_vm14  ;;  %v5585_v29 = vmul.f32 %v1197_v0, %v5376_v10 }
  0xc5   : > { %v1330_v51 = vsel %vm6928_vm15, %v1328_v55, %v1329_v33  ;;  %v5580_v50 = vpack.c.bf16 %v5543_v20, %v1396_v31  ;;  %v1212_v12 = vsel %vm5502_vm1, %v1211_v24, %v1207_v21  ;;  %v991_v37 = vsub.f32 1.0, %v990_v4  ;;  %vm6929_vm0 = vmmov %vm6927_vm14 }
  0xc6   : > { %v5591_v2 = vpack.c.bf16 %v5554_v42, %v1330_v51  ;;  %v5594_v22 = vmul.f32 %v1212_v12, %v5379_v40  ;;  %v978_v58 = vadd.f32 %v4090_v23, %v977_v46  ;;  %v1352_v52 = vrot.slane %v5585_v29, 7  ;;  %vm5607_vm1 = vmor %vm994_vm7, %vm995_vm13  ;;  %v3912_v51 = vld [vmem:[%s6673_s4 + $0x140] sm:$0xff]  ;;  %v5641_v12 = vpop.f32.mrf.mxu2 }
  0xc7   : > { %v1667_v32 = vunpack.c.l.b16 %v5580_v50  ;;  %4093 = vpow2.f32 %v3473_v14  ;;  %v3474_v10 = vmul.f32 -1.442695, %v5455_v53  ;;  %v992_v48 = vmul.f32 %v4092_v7, %v991_v37  ;;  %vm6933_vm8 = vmmov %vm6929_vm0  ;;  %6934 = vst [vmem:[#allocation44_spill] sm:$0xff] %v5641_v12  ;;  %2249 = vmatpush.bf16.msrb.mxu3 %v3912_v51 }
  0xc8   : > { %v1670_v24 = vunpack.c.l.b16 %v5591_v2  ;;  %v1353_v1 = vrot.slane %v5594_v22, 7  ;;  %v982_v19 = vsel %vm981_vm6, %v4090_v23, %v978_v58  ;;  %v1404_v57 = vsel %vm6929_vm0, 0.0, %v1352_v52  ;;  %vm6935_vm2 = vmmov %vm6929_vm0 }
  0xc9   : > { %v987_v40 = vsel %vm5528_vm5, %v986_v39, %v982_v19  ;;  %4095 = vpow2.f32 %v3474_v10  ;;  %v1632_v14 = vunpack.c.h.b16 %v4501_v59  ;;  %v5616_v8 = vpack.c.bf16 %v5585_v29, %v1404_v57  ;;  %vm6936_vm4 = vmmov %vm6929_vm0 }
  0xca   : > { %v5612_v13 = vpack.c.b16 %v1670_v24, %v1667_v32  ;;  %v1354_v23 = vsel %vm6933_vm8, %v1352_v52, %v1353_v1  ;;  %v993_v4 = vadd.f32 %v4092_v7, %v992_v48  ;;  %v5622_v60 = vmul.f32 %v987_v40, %v5387_v28  ;;  %v5664_v48 = vpop.f32.mrf.mxu0  ;;  %v5667_v40 = vpop.f32.mrf.mxu1  ;;  %vm6946_vm14 = vmmov %vm6929_vm0 }
  0xcb   : > { %v5619_v39 = vpack.c.bf16 %v5594_v22, %v1354_v23  ;;  %v1635_v25 = vunpack.c.h.b16 %v4507_v3  ;;  %v1715_v59 = vunpack.c.l.b16 %v5616_v8  ;;  %v6722_v1 = vmov 0   ;;  %6937 = vst [vmem:[#allocation45_spill] sm:$0xff] %v5664_v48  ;;  %vm6950_vm15 = vmmov %vm6929_vm0  ;;  %v6992_v48 = vld [vmem:[#allocation36_spill] sm:$0xff] }
  0xcc   : > { %6932 = vst [vmem:[#allocation43_spill] sm:$0xff] %v5612_v13  ;;  %2102 = vmatmul.bf16.gmra.mxu1 %v5612_v13  ;;  %v997_v33 = vsel %vm5607_vm1, %v4092_v7, %v993_v4  ;;  %v1331_v21 = vrot.slane %v5622_v60, 7  ;;  %v3872_v7 = vld [vmem:[%s6673_s4] sm:$0xff]  ;;  %v1638_v4 = vunpack.c.h.b16 %v4583_v47  ;;  %vm1406_vm6 = vcmask 1046528  }
  0xcd   : > { %v4094_v43 = vpop.eup %4093  ;;  %v1718_v31 = vunpack.c.l.b16 %v5619_v39  ;;  %v1002_v0 = vsel %vm5566_vm12, %v1001_v18, %v997_v33  ;;  %v5633_v46 = vpack.c.b16 %v1635_v25, %v1632_v14  ;;  %2482 = vmatpush.bf16.msrb.mxu0 %v3872_v7  ;;  %v1641_v25 = vunpack.c.h.b16 %v4605_v17 }
  0xce   : > { %v5636_v28 = vmul.f32 %v1002_v0, %v5393_v11  ;;  %v762_v3 = vadd.f32 1.0, %v4094_v43  ;;  %v1397_v58 = vsel %vm6935_vm2, 0.0, %v1331_v21  ;;  %v3880_v11 = vld [vmem:[%s6673_s4 + $0x40] sm:$0xff]  ;;  %v5669_v14 = vpop.f32.mrf.mxu2 }
  0xcf   : > { %v4096_v61 = vpop.eup %4095  ;;  %v5646_v18 = vpack.c.b16 %v1718_v31, %v1715_v59  ;;  %2161 = vmatmul.bf16.vlgmr.msrb.gmra.mxu2 %v5633_v46  ;;  %v5655_v32 = vpack.c.bf16 %v5622_v60, %v1397_v58  ;;  %2571 = vmatpush.bf16.msrb.mxu1 %v3880_v11  ;;  %6938 = vst [vmem:[#allocation46_spill] sm:$0xff] %v5669_v14  ;;  %v1656_v14 = vunpack.c.h.b16 %v5241_v27 }
  0xd0   : > { %v1332_v37 = vrot.slane %v5636_v28, 7  ;;  %v763_v52 = vadd.f32 1.0, %v4096_v61  ;;  %4097 = vrcp.f32 %v762_v3  ;;  %2483 = vmatmul.bf16.vlgmr.msrb.gmra.mxu0 %v6722_v1  ;;  %vm1219_vm3 = vweird.f32 %v762_v3 }
  0xd1   : > { %2142 = vmatmul.bf16.gmra.mxu3 %v5646_v18  ;;  %v1673_v19 = vunpack.c.l.b16 %v5655_v32  ;;  %v1225_v43 = vand.u32 2147483648, %v762_v3  ;;  %v1223_v0 = vand.u32 2147483647, %v762_v3  ;;  %v5675_v11 = vpack.c.b16 %v1641_v25, %v1638_v4  ;;  %v3935_v25 = vld [vmem:[%s6673_s4 + $0x1f8] sm:$0xff] }
  0xd2   : > { %v1333_v10 = vsel %vm6936_vm4, %v1331_v21, %v1332_v37  ;;  %4099 = vrcp.f32 %v763_v52  ;;  %vm1234_vm7 = vweird.f32 %v763_v52  ;;  %v1240_v51 = vand.u32 2147483648, %v763_v52  ;;  %3024 = vmatpush.bf16.msra.mxu0 %v3935_v25 }
  0xd3   : > { %v5660_v24 = vpack.c.bf16 %v5636_v28, %v1333_v10  ;;  %v1238_v58 = vand.u32 2147483647, %v763_v52  ;;  %v1226_v17 = vor.u32 1.1754944e-38, %v1225_v43  ;;  %vm1224_vm11 = vcmp.eq.f32.partialorder %v1223_v0, 8.507059e+37  ;;  %v5702_v0 = vpop.f32.mrf.mxu1 }
  0xd5   : > { %v1676_v57 = vunpack.c.l.b16 %v5660_v24  ;;  %vm1239_vm13 = vcmp.eq.f32.partialorder %v1238_v58, 8.507059e+37 }
  0xd6   : > { %v4098_v55 = vpop.eup %4097  ;;  %v5694_v4 = vpop.f32.mrf.mxu2 }
  0xd7   : > { %v1215_v23 = vmul.f32 %v4098_v55, %v762_v3  ;;  %v5673_v33 = vpack.c.b16 %v1676_v57, %v1673_v19  ;;  %vm1220_vm5 = vweird.f32 %v4098_v55  ;;  %v1241_v19 = vor.u32 1.1754944e-38, %v1240_v51  ;;  %v3895_v57 = vld [vmem:[%s6673_s4 + $0xb8] sm:$0xff]  ;;  %6945 = vst [vmem:[#allocation49_spill] sm:$0xff] %v5694_v4 }
  0xd8   : > { %v4100_v59 = vpop.eup %4099  ;;  %vm5678_vm10 = vmor %vm1219_vm3, %vm1220_vm5  ;;  %2653 = vmatpush.bf16.msra.mxu2 %v3895_v57 }
  0xd9   : > { %6939 = vst [vmem:[#allocation47_spill] sm:$0xff] %v5673_v33  ;;  %v1216_v31 = vsub.f32 1.0, %v1215_v23  ;;  %v1230_v21 = vmul.f32 %v4100_v59, %v763_v52  ;;  %vm1235_vm9 = vweird.f32 %v4100_v59  ;;  %v3927_v52 = vld [vmem:[%s6673_s4 + $0x1b8] sm:$0xff]  ;;  %v5692_v23 = vpop.f32.mrf.mxu0 }
  0xda   : > { %vm5682_vm12 = vmor %vm1234_vm7, %vm1235_vm9  ;;  %6944 = vst [vmem:[#allocation48_spill] sm:$0xff] %v5692_v23  ;;  %2935 = vmatpush.bf16.msra.mxu3 %v3927_v52  ;;  %v1644_v52 = vunpack.c.h.b16 %v4852_v34 }
  0xdb   : > { %v1217_v7 = vmul.f32 %v4098_v55, %v1216_v31  ;;  %v1231_v61 = vsub.f32 1.0, %v1230_v21  ;;  %v3943_v21 = vld [vmem:[%s6673_s4 + $0x238] sm:$0xff] }
  0xdc   : > { %2107 = vmatmul.bf16.gmra.mxu1 %v5673_v33 }
  0xdd   : > { %v1218_v37 = vadd.f32 %v4098_v55, %v1217_v7  ;;  %v1232_v10 = vmul.f32 %v4100_v59, %v1231_v61  ;;  %3113 = vmatpush.bf16.msra.mxu1 %v3943_v21  ;;  %v1408_v21 = vrot.slane %v4473_v49, 1 }
  0xde   : > { %v5726_v3 = vpop.f32.mrf.mxu2 }
  0xdf   : > { %v1222_v43 = vsel %vm5678_vm10, %v4098_v55, %v1218_v37  ;;  %v1233_v31 = vadd.f32 %v4100_v59, %v1232_v10  ;;  %2166 = vmatmul.bf16.gmra.mxu2 %v5675_v11  ;;  %v5719_v10 = vpop.f32.mrf.mxu3  ;;  %6949 = vst [vmem:[#allocation52_spill] sm:$0xff] %v5726_v3 }
  0xe0   : > { %v1227_v51 = vsel %vm1224_vm11, %v1226_v17, %v1222_v43  ;;  %2488 = vmatmul.bf16.gmra.mxu0 %v4552_v44  ;;  %6947 = vst [vmem:[#allocation50_spill] sm:$0xff] %v5719_v10  ;;  %v1647_v44 = vunpack.c.h.b16 %v4866_v9 }
  0xe1   : > { %v1237_v7 = vsel %vm5682_vm12, %v4100_v59, %v1233_v31  ;;  %v5710_v61 = vmul.f32 %v1227_v51, %v5452_v63  ;;  %v5724_v63 = vpop.f32.mrf.mxu0  ;;  %v1407_v31 = vrot.slane %v4463_v26, 1 }
  0xe2   : > { %v1242_v55 = vsel %vm1239_vm13, %v1241_v19, %v1237_v7  ;;  %6948 = vst [vmem:[#allocation51_spill] sm:$0xff] %v5724_v63  ;;  %v5729_v19 = vpop.f32.mrf.mxu1  ;;  %v5740_v51 = vpack.c.b16 %v1647_v44, %v1644_v52 }
  0xe3   : > { %v5713_v58 = vmul.f32 %v1242_v55, %v5455_v53  ;;  %v1355_v47 = vrot.slane %v5710_v61, 7  ;;  %v1409_v55 = vsel %vm1406_vm6, %v1407_v31, %v1408_v21  ;;  %v1653_v31 = vunpack.c.h.b16 %v5008_v56  ;;  %v3894_v56 = vld [vmem:[%s6673_s4 + $0xb0] sm:$0xff] }
  0xe4   : > { %2654 = vmatpush.bf16.msra.mxu2 %v3894_v56 }
  0xe5   : > { %v1356_v17 = vrot.slane %v5713_v58, 7  ;;  %v1405_v37 = vsel %vm6946_vm14, 0.0, %v1355_v47 }
  0xe6   : > { %v5722_v59 = vpack.c.bf16 %v5710_v61, %v1405_v37  ;;  %v5748_v9 = vpop.f32.mrf.mxu2 }
  0xe7   : > { %v1357_v53 = vsel %vm6950_vm15, %v1355_v47, %v1356_v17  ;;  %6953 = vst [vmem:[#allocation55_spill] sm:$0xff] %v5748_v9  ;;  %v1487_v47 = vsel %vm1406_vm6, %v1408_v21, 0.0  ;;  %v5752_v26 = vpop.f32.mrf.mxu3  ;;  %v1504_v17 = vpack.c.bf16 %v1409_v55, %v1409_v55  ;;  %v1410_v55 = vrot.slane %v4533_v16, 1  ;;  %v3934_v16 = vld [vmem:[%s6673_s4 + $0x1f0] sm:$0xff] }
  0xe8   : > { %v5734_v57 = vpack.c.bf16 %v5713_v58, %v1357_v53  ;;  %v1721_v25 = vunpack.c.l.b16 %v5722_v59  ;;  %6954 = vst [vmem:[#allocation56_spill] sm:$0xff] %v5752_v26  ;;  %v1506_v37 = vpack.c.bf16 %v1487_v47, %v1487_v47  ;;  %v1411_v47 = vrot.slane %v4571_v30, 1  ;;  %3025 = vmatpush.bf16.msra.mxu0 %v3934_v16 }
  0xe9   : > { %v5746_v34 = vpop.f32.mrf.mxu0  ;;  %v1633_v53 = vunpack.c.l.b16 %v1504_v17  ;;  %v1413_v16 = vrot.slane %v4807_v5, 1 }
  0xea   : > { %v1724_v43 = vunpack.c.l.b16 %v5734_v57  ;;  %6952 = vst [vmem:[#allocation54_spill] sm:$0xff] %v5746_v34  ;;  %v5755_v49 = vpop.f32.mrf.mxu1  ;;  %v1636_v52 = vunpack.c.l.b16 %v1506_v37  ;;  %v1412_v30 = vsel %vm1406_vm6, %v1410_v55, %v1411_v47 }
  0xec   : > { %v5742_v7 = vpack.c.b16 %v1724_v43, %v1721_v25  ;;  %2572 = vmatmul.bf16.vlgmr.msrb.gmra.mxu1 %v6722_v1  ;;  %v1650_v43 = vunpack.c.h.b16 %v4972_v15  ;;  %v5768_v9 = vpack.c.b16 %v1636_v52, %v1633_v53  ;;  %v3926_v15 = vld [vmem:[%s6673_s4 + $0x1b0] sm:$0xff] }
  0xed   : > { %v3942_v52 = vld [vmem:[%s6673_s4 + $0x230] sm:$0xff]  ;;  %2936 = vmatpush.bf16.msra.mxu3 %v3926_v15  ;;  %v1659_v15 = vunpack.c.h.b16 %v5254_v36 }
  0xee   : > { %6951 = vst [vmem:[#allocation53_spill] sm:$0xff] %v5742_v7  ;;  %2147 = vmatmul.bf16.gmra.mxu3 %v5742_v7  ;;  %v5760_v25 = vpop.f32.mrf.mxu2  ;;  %v5772_v17 = vpack.c.b16 %v1653_v31, %v1650_v43  ;;  %3114 = vmatpush.bf16.msra.mxu1 %v3942_v52  ;;  %v1508_v43 = vpack.c.bf16 %v1412_v30, %v1412_v30  ;;  %v1414_v30 = vrot.slane %v4831_v62, 1 }
  0xef   : > { %2171 = vmatmul.bf16.gmra.mxu2 %v5740_v51  ;;  %6956 = vst [vmem:[#allocation58_spill] sm:$0xff] %v5760_v25  ;;  %v5764_v21 = vpop.f32.mrf.mxu3 }
  0xf0   : > { %2493 = vmatmul.bf16.gmra.mxu0 %v4651_v38  ;;  %6957 = vst [vmem:[#allocation59_spill] sm:$0xff] %v5764_v21  ;;  %v1639_v55 = vunpack.c.l.b16 %v1508_v43  ;;  %v1415_v36 = vsel %vm1406_vm6, %v1413_v16, %v1414_v30  ;;  %v1489_v5 = vsel %vm1406_vm6, %v1414_v30, 0.0  ;;  %v1662_v16 = vunpack.c.h.b16 %v5354_v6  ;;  %v3893_v6 = vld [vmem:[%s6673_s4 + $0xa8] sm:$0xff]  ;;  %v7022_v21 = vld [vmem:[#allocation25_spill] sm:$0xff] }
  0xf1   : > { %v5758_v44 = vpop.f32.mrf.mxu0  ;;  %v1512_v62 = vpack.c.bf16 %v1415_v36, %v1415_v36  ;;  %v1665_v30 = vunpack.c.h.b16 %v5373_v41  ;;  %v6971_v36 = vld [vmem:[#allocation18_spill] sm:$0xff]  ;;  %2655 = vmatpush.bf16.msra.mxu2 %v3893_v6 }
  0xf2   : > { %6955 = vst [vmem:[#allocation57_spill] sm:$0xff] %v5758_v44  ;;  %v5766_v1 = vpop.f32.mrf.mxu1  ;;  %v1668_v44 = vunpack.c.h.b16 %v5580_v50 }
  0xf6   : > { %v5784_v53 = vpop.f32.mrf.mxu2 }
  0xf7   : > { %6959 = vst [vmem:[#allocation61_spill] sm:$0xff] %v5784_v53  ;;  %v5795_v53 = vpop.f32.mrf.mxu3 }
  0xf8   : > { %6960 = vst [vmem:[#allocation62_spill] sm:$0xff] %v5795_v53 }
  0xf9   : > { %v5782_v37 = vpop.f32.mrf.mxu0 }
  0xfa   : > { %6958 = vst [vmem:[#allocation60_spill] sm:$0xff] %v5782_v37  ;;  %v5797_v25 = vpop.f32.mrf.mxu1 }
  0xfc   : > { %2577 = vmatmul.bf16.gmra.mxu1 %v5633_v46  ;;  %v1488_v46 = vsel %vm1406_vm6, %v1411_v47, 0.0 }
  0xfd   : > { %v1510_v31 = vpack.c.bf16 %v1488_v46, %v1488_v46  ;;  %v5810_v46 = vpack.c.b16 %v1659_v15, %v1656_v14  ;;  %v1514_v14 = vpack.c.bf16 %v1489_v5, %v1489_v5  ;;  %v1416_v5 = vrot.slane %v6971_v36, 1 }
  0xfe   : > { %2250 = vmatmul.bf16.vlgmr.msrb.gmra.mxu3 %v5768_v9  ;;  %v5802_v4 = vpop.f32.mrf.mxu2 }
  0xff   : > { %2176 = vmatmul.bf16.gmra.mxu2 %v5772_v17  ;;  %v1642_v47 = vunpack.c.l.b16 %v1510_v31  ;;  %6962 = vst [vmem:[#allocation64_spill] sm:$0xff] %v5802_v4  ;;  %v5813_v52 = vpop.f32.mrf.mxu3 }
 0x100   : > { %2498 = vmatmul.bf16.gmra.mxu0 %v4903_v54  ;;  %6963 = vst [vmem:[#allocation65_spill] sm:$0xff] %v5810_v46  ;;  %v1701_v54 = vunpack.c.h.b16 %v7022_v21  ;;  %v3922_v21 = vld [vmem:[%s6673_s4 + $0x190] sm:$0xff] }
 0x101   : > { %v5800_v3 = vpop.f32.mrf.mxu0  ;;  %v5806_v56 = vpack.c.b16 %v1642_v47, %v1639_v55  ;;  %6964 = vst [vmem:[#allocation66_spill] sm:$0xff] %v5813_v52  ;;  %v1645_v55 = vunpack.c.l.b16 %v1512_v62  ;;  %v1648_v47 = vunpack.c.l.b16 %v1514_v14  ;;  %v5840_v62 = vpack.c.b16 %v1665_v30, %v1662_v16  ;;  %v3925_v14 = vld [vmem:[%s6673_s4 + $0x1a8] sm:$0xff] }
 0x102   : > { %6961 = vst [vmem:[#allocation63_spill] sm:$0xff] %v5800_v3  ;;  %v5815_v43 = vpop.f32.mrf.mxu1  ;;  %v3941_v30 = vld [vmem:[%s6673_s4 + $0x228] sm:$0xff]  ;;  %2937 = vmatpush.bf16.msra.mxu3 %v3925_v14  ;;  %v1671_v14 = vunpack.c.h.b16 %v5591_v2 }
 0x103   : > { %6973 = vst [vmem:[#allocation18_spill] sm:$0xff] %v5840_v62  ;;  %3115 = vmatpush.bf16.msra.mxu1 %v3941_v30 }
 0x106   : > { %v5820_v27 = vpop.f32.mrf.mxu2 }
 0x107   : > { %6966 = vst [vmem:[#allocation68_spill] sm:$0xff] %v5820_v27  ;;  %v5830_v12 = vpop.f32.mrf.mxu3  ;;  %v5836_v27 = vpack.c.b16 %v1648_v47, %v1645_v55 }
 0x108   : > { %6969 = vst [vmem:[#allocation71_spill] sm:$0xff] %v5830_v12 }
 0x109   : > { %v5818_v31 = vpop.f32.mrf.mxu0  ;;  %6970 = vst [vmem:[#allocation72_spill] sm:$0xff] %v5836_v27 }
 0x10a   : > { %6965 = vst [vmem:[#allocation67_spill] sm:$0xff] %v5818_v31  ;;  %v5832_v7 = vpop.f32.mrf.mxu1  ;;  %v6972_v31 = vld [vmem:[#allocation20_spill] sm:$0xff] }
 0x10b   : > { %v1417_v3 = vrot.slane %v6972_v31, 1  ;;  %v3933_v31 = vld [vmem:[%s6673_s4 + $0x1e8] sm:$0xff] }
 0x10c   : > { %2582 = vmatmul.bf16.gmra.mxu1 %v5675_v11  ;;  %3026 = vmatpush.bf16.msra.mxu0 %v3933_v31  ;;  %v6981_v31 = vld [vmem:[#allocation27_spill] sm:$0xff] }
 0x10d   : > { %v1418_v47 = vsel %vm1406_vm6, %v1416_v5, %v1417_v3  ;;  %v1490_v16 = vsel %vm1406_vm6, %v1417_v3, 0.0  ;;  %v1419_v30 = vrot.slane %v6981_v31, 1 }
 0x10e   : > { %2255 = vmatmul.bf16.gmra.mxu3 %v5806_v56  ;;  %v5828_v4 = vpop.f32.mrf.mxu2 }
 0x10f   : > { %2181 = vmatmul.bf16.gmra.mxu2 %v5810_v46  ;;  %6968 = vst [vmem:[#allocation70_spill] sm:$0xff] %v5828_v4  ;;  %v5863_v36 = vpop.f32.mrf.mxu3 }
 0x110   : > { %2503 = vmatmul.bf16.gmra.mxu0 %v5031_v45  ;;  %6976 = vst [vmem:[#allocation74_spill] sm:$0xff] %v5863_v36 }
 0x111   : > { %v5826_v15 = vpop.f32.mrf.mxu0 }
 0x112   : > { %6967 = vst [vmem:[#allocation69_spill] sm:$0xff] %v5826_v15 }
 0x116   : > { %v5852_v55 = vpop.f32.mrf.mxu2 }
 0x117   : > { %6975 = vst [vmem:[#allocation73_spill] sm:$0xff] %v5852_v55  ;;  %v1516_v55 = vpack.c.bf16 %v1418_v47, %v1418_v47  ;;  %v5876_v34 = vpop.f32.mrf.mxu3  ;;  %v6982_v47 = vld [vmem:[#allocation28_spill] sm:$0xff] }
 0x118   : > { %6980 = vst [vmem:[#allocation78_spill] sm:$0xff] %v5876_v34 }
 0x119   : > { %v5850_v41 = vpop.f32.mrf.mxu0  ;;  %v1651_v5 = vunpack.c.l.b16 %v1516_v55  ;;  %v5882_v55 = vpack.c.b16 %v1671_v14, %v1668_v44 }
 0x11a   : > { %6974 = vst [vmem:[#allocation20_spill] sm:$0xff] %v5850_v41  ;;  %v5865_v4 = vpop.f32.mrf.mxu1  ;;  %v1518_v41 = vpack.c.bf16 %v1490_v16, %v1490_v16  ;;  %v1420_v16 = vrot.slane %v6982_v47, 1  ;;  %v6986_v47 = vld [vmem:[#allocation37_spill] sm:$0xff] }
 0x11b   : > { %6983 = vst [vmem:[#allocation27_spill] sm:$0xff] %v5882_v55 }
 0x11c   : > { %2587 = vmatmul.bf16.gmra.mxu1 %v5740_v51  ;;  %v1654_v3 = vunpack.c.l.b16 %v1518_v41  ;;  %v1421_v2 = vsel %vm1406_vm6, %v1419_v30, %v1420_v16  ;;  %v1674_v30 = vunpack.c.h.b16 %v5655_v32  ;;  %v3892_v32 = vld [vmem:[%s6673_s4 + $0xa0] sm:$0xff] }
 0x11d   : > { %2656 = vmatpush.bf16.msra.mxu2 %v3892_v32 }
 0x11e   : > { %2260 = vmatmul.bf16.gmra.mxu3 %v5836_v27  ;;  %v5870_v37 = vpop.f32.mrf.mxu2  ;;  %v5874_v6 = vpack.c.b16 %v1654_v3, %v1651_v5  ;;  %v1491_v5 = vsel %vm1406_vm6, %v1420_v16, 0.0  ;;  %v1520_v3 = vpack.c.bf16 %v1421_v2, %v1421_v2  ;;  %v1677_v16 = vunpack.c.h.b16 %v5660_v24  ;;  %v6991_v2 = vld [vmem:[#allocation34_spill] sm:$0xff] }
 0x11f   : > { %2186 = vmatmul.bf16.gmra.mxu2 %v5840_v62  ;;  %6978 = vst [vmem:[#allocation76_spill] sm:$0xff] %v5870_v37  ;;  %v1522_v31 = vpack.c.bf16 %v1491_v5, %v1491_v5  ;;  %v1422_v5 = vrot.slane %v6991_v2, 1  ;;  %v3940_v2 = vld [vmem:[%s6673_s4 + $0x220] sm:$0xff] }
 0x120   : > { %2508 = vmatmul.bf16.gmra.mxu0 %v5289_v35  ;;  %6979 = vst [vmem:[#allocation77_spill] sm:$0xff] %v5874_v6  ;;  %v1657_v37 = vunpack.c.l.b16 %v1520_v3  ;;  %v5908_v34 = vpack.c.b16 %v1677_v16, %v1674_v30  ;;  %v3924_v3 = vld [vmem:[%s6673_s4 + $0x1a0] sm:$0xff]  ;;  %3116 = vmatpush.bf16.msra.mxu1 %v3940_v2 }
 0x121   : > { %v5868_v15 = vpop.f32.mrf.mxu0  ;;  %2938 = vmatpush.bf16.msra.mxu3 %v3924_v3 }
 0x122   : > { %6977 = vst [vmem:[#allocation75_spill] sm:$0xff] %v5868_v15  ;;  %v5880_v63 = vpop.f32.mrf.mxu1  ;;  %v1660_v15 = vunpack.c.l.b16 %v1522_v31 }
 0x123   : > { %6993 = vst [vmem:[#allocation34_spill] sm:$0xff] %v5908_v34 }
 0x124   : > { %v5894_v44 = vpop.f32.mrf.mxu3 }
 0x125   : > { %6987 = vst [vmem:[#allocation80_spill] sm:$0xff] %v5894_v44  ;;  %v6999_v44 = vld [vmem:[#allocation5_spill] sm:$0xff] }
 0x126   : > { %v5888_v50 = vpop.f32.mrf.mxu2  ;;  %v1683_v36 = vunpack.c.h.b16 %v6999_v44 }
 0x127   : > { %6985 = vst [vmem:[#allocation79_spill] sm:$0xff] %v5888_v50  ;;  %v5904_v50 = vpack.c.b16 %v1660_v15, %v1657_v37 }
 0x129   : > { %v5886_v41 = vpop.f32.mrf.mxu0  ;;  %6990 = vst [vmem:[#allocation83_spill] sm:$0xff] %v5904_v50 }
 0x12a   : > { %6984 = vst [vmem:[#allocation28_spill] sm:$0xff] %v5886_v41  ;;  %v5896_v14 = vpop.f32.mrf.mxu1 }
 0x12c   : > { %2592 = vmatmul.bf16.gmra.mxu1 %v5772_v17  ;;  %v5925_v15 = vpop.f32.mrf.mxu3 }
 0x12d   : > { %6996 = vst [vmem:[#allocation85_spill] sm:$0xff] %v5925_v15 }
 0x12e   : > { %2265 = vmatmul.bf16.gmra.mxu3 %v5874_v6  ;;  %v5900_v41 = vpop.f32.mrf.mxu2  ;;  %v7024_v6 = vld [vmem:[#allocation7_spill] sm:$0xff] }
 0x12f   : > { %2191 = vmatmul.bf16.gmra.mxu2 %v5882_v55  ;;  %6989 = vst [vmem:[#allocation82_spill] sm:$0xff] %v5900_v41  ;;  %v1434_v26 = vrot.slane %v7024_v6, 1 }
 0x130   : > { %2513 = vmatmul.bf16.gmra.mxu0 %v6986_v47  ;;  %v1423_v47 = vrot.slane %v6992_v48, 1  ;;  %v3932_v48 = vld [vmem:[%s6673_s4 + $0x1e0] sm:$0xff] }
 0x131   : > { %v5898_v23 = vpop.f32.mrf.mxu0  ;;  %3027 = vmatpush.bf16.msra.mxu0 %v3932_v48  ;;  %v1425_v48 = vrot.slane %v5543_v20, 1 }
 0x132   : > { %6988 = vst [vmem:[#allocation81_spill] sm:$0xff] %v5898_v23  ;;  %v1424_v31 = vsel %vm1406_vm6, %v1422_v5, %v1423_v47  ;;  %v1492_v30 = vsel %vm1406_vm6, %v1423_v47, 0.0  ;;  %v5929_v16 = vpop.f32.mrf.mxu1  ;;  %v6998_v47 = vld [vmem:[#allocation4_spill] sm:$0xff] }
 0x133   : > { %v1526_v41 = vpack.c.bf16 %v1492_v30, %v1492_v30  ;;  %v1680_v15 = vunpack.c.h.b16 %v6998_v47 }
 0x135   : > { %v1666_v5 = vunpack.c.l.b16 %v1526_v41 }
 0x136   : > { %v5920_v37 = vpop.f32.mrf.mxu2 }
 0x137   : > { %6995 = vst [vmem:[#allocation84_spill] sm:$0xff] %v5920_v37  ;;  %v1524_v37 = vpack.c.bf16 %v1424_v31, %v1424_v31  ;;  %v1426_v31 = vrot.slane %v5554_v42, 1 }
 0x139   : > { %v5918_v24 = vpop.f32.mrf.mxu0  ;;  %v1427_v41 = vsel %vm1406_vm6, %v1425_v48, %v1426_v31  ;;  %v1493_v44 = vsel %vm1406_vm6, %v1426_v31, 0.0  ;;  %v7006_v31 = vld [vmem:[#allocation9_spill] sm:$0xff] }
 0x13a   : > { %6994 = vst [vmem:[#allocation36_spill] sm:$0xff] %v5918_v24  ;;  %v1663_v24 = vunpack.c.l.b16 %v1524_v37  ;;  %v5950_v37 = vpack.c.b16 %v1683_v36, %v1680_v15  ;;  %v1528_v2 = vpack.c.bf16 %v1427_v41, %v1427_v41  ;;  %v1530_v20 = vpack.c.bf16 %v1493_v44, %v1493_v44 }
 0x13b   : > { %v1428_v44 = vrot.slane %v5622_v60, 1 }
 0x13c   : > { %2597 = vmatmul.bf16.gmra.mxu1 %v5810_v46  ;;  %v5942_v12 = vpop.f32.mrf.mxu3  ;;  %v5946_v32 = vpack.c.b16 %v1666_v5, %v1663_v24  ;;  %7003 = vst [vmem:[#allocation88_spill] sm:$0xff] %v5950_v37  ;;  %v1669_v36 = vunpack.c.l.b16 %v1528_v2  ;;  %v1672_v15 = vunpack.c.l.b16 %v1530_v20  ;;  %v3891_v20 = vld [vmem:[%s6673_s4 + $0x98] sm:$0xff]  ;;  %v7025_v46 = vld [vmem:[#allocation10_spill] sm:$0xff] }
 0x13d   : > { %7001 = vst [vmem:[#allocation5_spill] sm:$0xff] %v5942_v12  ;;  %2657 = vmatpush.bf16.msra.mxu2 %v3891_v20 }
 0x13e   : > { %2270 = vmatmul.bf16.gmra.mxu3 %v5904_v50  ;;  %v5940_v35 = vpop.f32.mrf.mxu2  ;;  %7002 = vst [vmem:[#allocation87_spill] sm:$0xff] %v5946_v32  ;;  %v5972_v12 = vpack.c.b16 %v1672_v15, %v1669_v36  ;;  %v7016_v50 = vld [vmem:[#allocation2_spill] sm:$0xff] }
 0x13f   : > { %2196 = vmatmul.bf16.gmra.mxu2 %v5908_v34  ;;  %7000 = vst [vmem:[#allocation4_spill] sm:$0xff] %v5940_v35  ;;  %v1686_v35 = vunpack.c.h.b16 %v7006_v31  ;;  %v1431_v53 = vrot.slane %v7016_v50, 1 }
 0x140   : > { %2518 = vmatmul.bf16.gmra.mxu0 %v5612_v13  ;;  %7008 = vst [vmem:[#allocation9_spill] sm:$0xff] %v5972_v12 }
 0x141   : > { %v5936_v23 = vpop.f32.mrf.mxu0 }
 0x142   : > { %6997 = vst [vmem:[#allocation86_spill] sm:$0xff] %v5936_v23  ;;  %v7007_v23 = vld [vmem:[#allocation11_spill] sm:$0xff] }
 0x144   : > { %v5963_v42 = vpop.f32.mrf.mxu3 }
 0x145   : > { %7005 = vst [vmem:[#allocation90_spill] sm:$0xff] %v5963_v42  ;;  %v1429_v42 = vrot.slane %v5636_v28, 1 }
 0x147   : > { %v1430_v60 = vsel %vm1406_vm6, %v1428_v44, %v1429_v42  ;;  %v1494_v28 = vsel %vm1406_vm6, %v1429_v42, 0.0  ;;  %v3931_v44 = vld [vmem:[%s6673_s4 + $0x1d8] sm:$0xff] }
 0x148   : > { %v1532_v36 = vpack.c.bf16 %v1430_v60, %v1430_v60  ;;  %v1534_v15 = vpack.c.bf16 %v1494_v28, %v1494_v28  ;;  %v3939_v42 = vld [vmem:[%s6673_s4 + $0x218] sm:$0xff]  ;;  %3028 = vmatpush.bf16.msra.mxu0 %v3931_v44 }
 0x149   : > { %v5944_v3 = vpop.f32.mrf.mxu1  ;;  %v5957_v30 = vpop.f32.mrf.mxu0  ;;  %3117 = vmatpush.bf16.msra.mxu1 %v3939_v42 }
 0x14a   : > { %7004 = vst [vmem:[#allocation89_spill] sm:$0xff] %v5957_v30  ;;  %v1689_v30 = vunpack.c.h.b16 %v7007_v23  ;;  %v3923_v23 = vld [vmem:[%s6673_s4 + $0x198] sm:$0xff]  ;;  %v1678_v20 = vunpack.c.l.b16 %v1534_v15 }
 0x14b   : > { %2939 = vmatpush.bf16.msra.mxu3 %v3923_v23  ;;  %v1675_v23 = vunpack.c.l.b16 %v1532_v36 }
 0x14c   : > { %2602 = vmatmul.bf16.gmra.mxu1 %v5840_v62  ;;  %v5978_v13 = vpack.c.b16 %v1689_v30, %v1686_v35  ;;  %v7017_v62 = vld [vmem:[#allocation3_spill] sm:$0xff] }
 0x14d   : > { %v6012_v52 = vpack.c.b16 %v1678_v20, %v1675_v23  ;;  %v1432_v36 = vrot.slane %v7017_v62, 1 }
 0x14e   : > { %2275 = vmatmul.bf16.gmra.mxu3 %v5946_v32 }
 0x14f   : > { %2201 = vmatmul.bf16.gmra.mxu2 %v5950_v37  ;;  %v1433_v44 = vsel %vm1406_vm6, %v1431_v53, %v1432_v36  ;;  %2940 = vmatpush.bf16.msra.mxu3 %v3922_v21 }
 0x150   : > { %2523 = vmatmul.bf16.gmra.mxu0 %v5673_v33  ;;  %v1536_v23 = vpack.c.bf16 %v1433_v44, %v1433_v44 }
 0x151   : > { %v5959_v24 = vpop.f32.mrf.mxu1  ;;  %v5968_v48 = vpop.f32.mrf.mxu0 }
 0x152   : > { %v5961_v5 = vpop.f32.mrf.mxu2 }
 0x154   : > { %v5981_v2 = vpop.f32.mrf.mxu3 }
 0x155   : > { %7009 = vst [vmem:[#allocation11_spill] sm:$0xff] %v5981_v2  ;;  %v7011_v2 = vld [vmem:[#allocation6_spill] sm:$0xff] }
 0x159   : > { %v5966_v47 = vpop.f32.mrf.mxu1  ;;  %v5995_v30 = vpop.f32.mrf.mxu0 }
 0x15a   : > { %v5974_v41 = vpop.f32.mrf.mxu2 }
 0x15c   : > { %2607 = vmatmul.bf16.gmra.mxu1 %v5882_v55  ;;  %v6006_v33 = vpop.f32.mrf.mxu3 }
 0x15d   : > { %7012 = vst [vmem:[#allocation92_spill] sm:$0xff] %v6006_v33 }
 0x15e   : > { %2280 = vmatmul.bf16.gmra.mxu3 %v5972_v12  ;;  %v7013_v12 = vld [vmem:[#allocation15_spill] sm:$0xff] }
 0x15f   : > { %2206 = vmatmul.bf16.gmra.mxu2 %v5978_v13  ;;  %v1692_v32 = vunpack.c.h.b16 %v7013_v12  ;;  %7015 = vst [vmem:[#allocation15_spill] sm:$0xff] %v6012_v52  ;;  %v1495_v12 = vsel %vm1406_vm6, %v1432_v36, 0.0  ;;  %v7021_v36 = vld [vmem:[#allocation24_spill] sm:$0xff] }
 0x160   : > { %2528 = vmatmul.bf16.gmra.mxu0 %v7011_v2  ;;  %v7014_v2 = vld [vmem:[#allocation17_spill] sm:$0xff]  ;;  %v1538_v20 = vpack.c.bf16 %v1495_v12, %v1495_v12 }
 0x161   : > { %v5993_v35 = vpop.f32.mrf.mxu1  ;;  %v6008_v28 = vpop.f32.mrf.mxu0  ;;  %v1695_v55 = vunpack.c.h.b16 %v7014_v2 }
 0x162   : > { %7010 = vst [vmem:[#allocation91_spill] sm:$0xff] %v5993_v35  ;;  %v5997_v31 = vpop.f32.mrf.mxu2  ;;  %v1684_v33 = vunpack.c.l.b16 %v1538_v20 }
 0x163   : > { %v6018_v15 = vpack.c.b16 %v1695_v55, %v1692_v32  ;;  %v7019_v55 = vld [vmem:[#allocation12_spill] sm:$0xff]  ;;  %v1681_v32 = vunpack.c.l.b16 %v1536_v23 }
 0x169   : > { %v2573_v60 = vpop.f32.mrf.mxu1  ;;  %v6029_v62 = vpop.f32.mrf.mxu0 }
 0x16a   : > { %v6014_v45 = vpop.f32.mrf.mxu2 }
 0x16c   : > { %2612 = vmatmul.bf16.gmra.mxu1 %v5908_v34  ;;  %v1698_v34 = vunpack.c.h.b16 %v7021_v36 }
 0x16e   : > { %2285 = vmatmul.bf16.gmra.mxu3 %v6012_v52  ;;  %v6046_v23 = vpack.c.b16 %v1701_v54, %v1698_v34  ;;  %v2163_v54 = vadd.f32 %v5961_v5, %v5667_v40  ;;  %v3930_v40 = vld [vmem:[%s6673_s4 + $0x1d0] sm:$0xff] }
 0x16f   : > { %2211 = vmatmul.bf16.gmra.mxu2 %v6018_v15  ;;  %v3938_v5 = vld [vmem:[%s6673_s4 + $0x210] sm:$0xff]  ;;  %3029 = vmatpush.bf16.msra.mxu0 %v3930_v40 }
 0x170   : > { %2533 = vmatmul.bf16.gmra.mxu0 %v7019_v55  ;;  %v1435_v55 = vrot.slane %v7025_v46, 1  ;;  %3118 = vmatpush.bf16.msra.mxu1 %v3938_v5 }
 0x171   : > { %v6025_v2 = vpop.f32.mrf.mxu3  ;;  %v2575_v42 = vpop.f32.mrf.mxu1 }
 0x172   : > { %7018 = vst [vmem:[#allocation17_spill] sm:$0xff] %v6025_v2  ;;  %v6027_v50 = vpop.f32.mrf.mxu2  ;;  %v6038_v2 = vpack.c.b16 %v1684_v33, %v1681_v32  ;;  %v6042_v12 = vpop.f32.mrf.mxu0  ;;  %v3890_v33 = vld [vmem:[%s6673_s4 + $0x90] sm:$0xff]  ;;  %v1436_v20 = vsel %vm1406_vm6, %v1434_v26, %v1435_v55  ;;  %v1496_v6 = vsel %vm1406_vm6, %v1435_v55, 0.0  ;;  %v7026_v26 = vld [vmem:[#allocation19_spill] sm:$0xff] }
 0x173   : > { %2658 = vmatpush.bf16.msra.mxu2 %v3890_v33  ;;  %v1540_v36 = vpack.c.bf16 %v1436_v20, %v1436_v20 }
 0x174   : > { %7023 = vst [vmem:[#allocation3_spill] sm:$0xff] %v6038_v2 }
 0x175   : > { %v1687_v21 = vunpack.c.l.b16 %v1540_v36  ;;  %v7030_v36 = vld [vmem:[#allocation13_spill] sm:$0xff] }
 0x179   : > { %v6032_v52 = vpop.f32.mrf.mxu3  ;;  %v6034_v53 = vpop.f32.mrf.mxu1 }
 0x17a   : > { %7020 = vst [vmem:[#allocation2_spill] sm:$0xff] %v6032_v52  ;;  %v6040_v44 = vpop.f32.mrf.mxu2  ;;  %v1542_v52 = vpack.c.bf16 %v1496_v6, %v1496_v6  ;;  %v2165_v6 = vadd.f32 %v5974_v41, %v5702_v0 }
 0x17c   : > { %2617 = vmatmul.bf16.gmra.mxu1 %v5950_v37  ;;  %v6065_v37 = vpop.f32.mrf.mxu0  ;;  %v1690_v33 = vunpack.c.l.b16 %v1542_v52 }
 0x17e   : > { %2290 = vmatmul.bf16.gmra.mxu3 %v6038_v2  ;;  %v6083_v27 = vpack.c.b16 %v1690_v33, %v1687_v21  ;;  %v2168_v33 = vadd.f32 %v5997_v31, %v5729_v19  ;;  %v2170_v19 = vadd.f32 %v6014_v45, %v5755_v49  ;;  %v3921_v49 = vld [vmem:[%s6673_s4 + $0x188] sm:$0xff] }
 0x17f   : > { %2216 = vmatmul.bf16.gmra.mxu2 %v6046_v23  ;;  %2941 = vmatpush.bf16.msra.mxu3 %v3921_v49 }
 0x180   : > { %2538 = vmatmul.bf16.gmra.mxu0 %v7026_v26  ;;  %v7029_v26 = vld [vmem:[#allocation33_spill] sm:$0xff] }
 0x181   : > { %v2251_v34 = vpop.f32.mrf.mxu3  ;;  %v6061_v46 = vpop.f32.mrf.mxu1  ;;  %v1707_v10 = vunpack.c.h.b16 %v7029_v26 }
 0x182   : > { %v2252_v32 = vadd.f32 %v2251_v34, %v2163_v54  ;;  %v6063_v2 = vpop.f32.mrf.mxu2 }
 0x184   : > { %v2485_v55 = vadd.f32 %v5968_v48, %v2252_v32  ;;  %v7028_v48 = vld [vmem:[#allocation31_spill] sm:$0xff]  ;;  %v6087_v52 = vpop.f32.mrf.mxu0 }
 0x185   : > { %v1704_v32 = vunpack.c.h.b16 %v7028_v48 }
 0x186   : > { %v6075_v20 = vadd.f32 %v2573_v60, %v2485_v55  ;;  %v1437_v60 = vrot.slane %v7030_v36, 1  ;;  %v7031_v55 = vld [vmem:[#allocation14_spill] sm:$0xff] }
 0x187   : > { %v1438_v40 = vrot.slane %v7031_v55, 1  ;;  %v6091_v5 = vpack.c.b16 %v1707_v10, %v1704_v32 }
 0x188   : > { %7027 = vst [vmem:[#allocation24_spill] sm:$0xff] %v6075_v20 }
 0x189   : > { %v2253_v54 = vpop.f32.mrf.mxu3  ;;  %v6079_v34 = vpop.f32.mrf.mxu1  ;;  %v1439_v26 = vsel %vm1406_vm6, %v1437_v60, %v1438_v40  ;;  %v1497_v21 = vsel %vm1406_vm6, %v1438_v40, 0.0 }
 0x18a   : > { %v2254_v38 = vadd.f32 %v2253_v54, %v2165_v6  ;;  %v6085_v35 = vpop.f32.mrf.mxu2 }
 0x18c   : > { %v2487_v0 = vadd.f32 %v5995_v30, %v2254_v38  ;;  %2622 = vmatmul.bf16.gmra.mxu1 %v5978_v13  ;;  %v1544_v38 = vpack.c.bf16 %v1439_v26, %v1439_v26  ;;  %v1546_v30 = vpack.c.bf16 %v1497_v21, %v1497_v21  ;;  %v6107_v32 = vpop.f32.mrf.mxu0  ;;  %v7034_v26 = vld [vmem:[#allocation40_spill] sm:$0xff] }
 0x18d   : > { %v1710_v21 = vunpack.c.h.b16 %v7034_v26 }
 0x18e   : > { %2295 = vmatmul.bf16.gmra.mxu3 %v6083_v27  ;;  %v6096_v41 = vadd.f32 %v2575_v42, %v2487_v0  ;;  %v7033_v42 = vld [vmem:[#allocation26_spill] sm:$0xff]  ;;  %v1693_v60 = vunpack.c.l.b16 %v1544_v38  ;;  %v1696_v55 = vunpack.c.l.b16 %v1546_v30  ;;  %v7037_v38 = vld [vmem:[#allocation23_spill] sm:$0xff] }
 0x18f   : > { %2221 = vmatmul.bf16.gmra.mxu2 %v6091_v5  ;;  %v1441_v30 = vrot.slane %v7037_v38, 1 }
 0x190   : > { %7032 = vst [vmem:[#allocation25_spill] sm:$0xff] %v6096_v41  ;;  %2543 = vmatmul.bf16.gmra.mxu0 %v7033_v42  ;;  %v6120_v20 = vpack.c.b16 %v1696_v55, %v1693_v60  ;;  %v3889_v60 = vld [vmem:[%s6673_s4 + $0x88] sm:$0xff] }
 0x191   : > { %v2256_v6 = vpop.f32.mrf.mxu3  ;;  %v6103_v10 = vpop.f32.mrf.mxu1  ;;  %2659 = vmatpush.bf16.msra.mxu2 %v3889_v60  ;;  %v2175_v60 = vadd.f32 %v6040_v44, %v5797_v25 }
 0x192   : > { %v2257_v54 = vadd.f32 %v2256_v6, %v2168_v33  ;;  %v6105_v48 = vpop.f32.mrf.mxu2  ;;  %v7035_v33 = vld [vmem:[#allocation41_spill] sm:$0xff] }
 0x193   : > { %v1713_v6 = vunpack.c.h.b16 %v7035_v33 }
 0x194   : > { %v2490_v36 = vadd.f32 %v6008_v28, %v2257_v54  ;;  %v6124_v28 = vpop.f32.mrf.mxu0  ;;  %v7036_v54 = vld [vmem:[#allocation22_spill] sm:$0xff] }
 0x196   : > { %v6112_v40 = vadd.f32 %v6034_v53, %v2490_v36  ;;  %v1440_v53 = vrot.slane %v7036_v54, 1  ;;  %v6128_v36 = vpack.c.b16 %v1713_v6, %v1710_v21 }
 0x199   : > { %v2258_v31 = vpop.f32.mrf.mxu3  ;;  %v6116_v0 = vpop.f32.mrf.mxu1 }
 0x19a   : > { %v2259_v41 = vadd.f32 %v2258_v31, %v2170_v19  ;;  %v6122_v42 = vpop.f32.mrf.mxu2  ;;  %v1442_v19 = vsel %vm1406_vm6, %v1440_v53, %v1441_v30  ;;  %v1498_v31 = vsel %vm1406_vm6, %v1441_v30, 0.0  ;;  %v7038_v53 = vld [vmem:[#allocation35_spill] sm:$0xff] }
 0x19b   : > { %v1548_v33 = vpack.c.bf16 %v1442_v19, %v1442_v19  ;;  %v1550_v6 = vpack.c.bf16 %v1498_v31, %v1498_v31  ;;  %v1716_v31 = vunpack.c.h.b16 %v5616_v8 }
 0x19c   : > { %v2492_v45 = vadd.f32 %v6029_v62, %v2259_v41  ;;  %2627 = vmatmul.bf16.gmra.mxu1 %v6018_v15  ;;  %v2173_v62 = vadd.f32 %v6027_v50, %v5766_v1  ;;  %v3929_v1 = vld [vmem:[%s6673_s4 + $0x1c8] sm:$0xff] }
 0x19d   : > { %v3937_v50 = vld [vmem:[%s6673_s4 + $0x208] sm:$0xff]  ;;  %v1699_v30 = vunpack.c.l.b16 %v1548_v33  ;;  %3030 = vmatpush.bf16.msra.mxu0 %v3929_v1  ;;  %v7039_v1 = vld [vmem:[#allocation29_spill] sm:$0xff] }
 0x19e   : > { %2300 = vmatmul.bf16.gmra.mxu3 %v6120_v20  ;;  %v6140_v55 = vadd.f32 %v6061_v46, %v2492_v45  ;;  %v6151_v46 = vpop.f32.mrf.mxu0  ;;  %v1702_v45 = vunpack.c.l.b16 %v1550_v6  ;;  %3119 = vmatpush.bf16.msra.mxu1 %v3937_v50 }
 0x19f   : > { %2226 = vmatmul.bf16.gmra.mxu2 %v6128_v36 }
 0x1a0   : > { %2548 = vmatmul.bf16.gmra.mxu0 %v7038_v53 }
 0x1a1   : > { %v2261_v41 = vpop.f32.mrf.mxu3  ;;  %v6147_v26 = vpop.f32.mrf.mxu1 }
 0x1a2   : > { %v2262_v21 = vadd.f32 %v2261_v41, %v2173_v62  ;;  %v6149_v54 = vpop.f32.mrf.mxu2  ;;  %v1719_v62 = vunpack.c.h.b16 %v5619_v39 }
 0x1a4   : > { %v2495_v38 = vadd.f32 %v6042_v12, %v2262_v21  ;;  %v6170_v21 = vpack.c.b16 %v1702_v45, %v1699_v30  ;;  %v6178_v53 = vpack.c.b16 %v1719_v62, %v1716_v31  ;;  %v2178_v30 = vadd.f32 %v6063_v2, %v5815_v43 }
 0x1a5   : > { %v2180_v43 = vadd.f32 %v6085_v35, %v5832_v7 }
 0x1a6   : > { %v6162_v49 = vadd.f32 %v6079_v34, %v2495_v38  ;;  %v6174_v6 = vpop.f32.mrf.mxu0  ;;  %v1443_v34 = vrot.slane %v7039_v1, 1  ;;  %v7040_v38 = vld [vmem:[#allocation30_spill] sm:$0xff] }
 0x1a7   : > { %v1444_v50 = vrot.slane %v7040_v38, 1 }
 0x1a9   : > { %v2263_v19 = vpop.f32.mrf.mxu3  ;;  %v6166_v12 = vpop.f32.mrf.mxu1  ;;  %v1445_v39 = vsel %vm1406_vm6, %v1443_v34, %v1444_v50  ;;  %v1499_v44 = vsel %vm1406_vm6, %v1444_v50, 0.0 }
 0x1aa   : > { %v2264_v41 = vadd.f32 %v2263_v19, %v2175_v60  ;;  %v6172_v33 = vpop.f32.mrf.mxu2  ;;  %v1552_v19 = vpack.c.bf16 %v1445_v39, %v1445_v39  ;;  %v1554_v31 = vpack.c.bf16 %v1499_v44, %v1499_v44  ;;  %v1722_v39 = vunpack.c.h.b16 %v5722_v59  ;;  %v3920_v59 = vld [vmem:[%s6673_s4 + $0x180] sm:$0xff] }
 0x1ab   : > { %v1725_v44 = vunpack.c.h.b16 %v5734_v57  ;;  %v3888_v57 = vld [vmem:[%s6673_s4 + $0x80] sm:$0xff]  ;;  %2942 = vmatpush.bf16.msra.mxu3 %v3920_v59  ;;  %v2185_v59 = vadd.f32 %v6122_v42, %v5880_v63 }
 0x1ac   : > { %v2497_v25 = vadd.f32 %v6065_v37, %v2264_v41  ;;  %2632 = vmatmul.bf16.gmra.mxu1 %v6046_v23  ;;  %v1705_v34 = vunpack.c.l.b16 %v1552_v19  ;;  %v1708_v38 = vunpack.c.l.b16 %v1554_v31  ;;  %v7043_v19 = vld [vmem:[#allocation39_spill] sm:$0xff]  ;;  %2660 = vmatpush.bf16.msra.mxu2 %v3888_v57 }
 0x1ad   : > { %v1447_v31 = vrot.slane %v7043_v19, 1  ;;  %v3928_v19 = vld [vmem:[%s6673_s4 + $0x1c0] sm:$0xff] }
 0x1ae   : > { %2305 = vmatmul.bf16.gmra.mxu3 %v6170_v21  ;;  %v6184_v8 = vadd.f32 %v6103_v10, %v2497_v25  ;;  %v6195_v41 = vpop.f32.mrf.mxu0  ;;  %v7041_v10 = vld [vmem:[#allocation42_spill] sm:$0xff]  ;;  %3031 = vmatpush.bf16.msra.mxu0 %v3928_v19 }
 0x1af   : > { %2231 = vmatmul.bf16.gmra.mxu2 %v6178_v53 }
 0x1b0   : > { %2553 = vmatmul.bf16.gmra.mxu0 %v7041_v10 }
 0x1b1   : > { %v2266_v45 = vpop.f32.mrf.mxu3  ;;  %v6191_v60 = vpop.f32.mrf.mxu1 }
 0x1b2   : > { %v2267_v37 = vadd.f32 %v2266_v45, %v2178_v30  ;;  %v6193_v62 = vpop.f32.mrf.mxu2  ;;  %v6208_v45 = vpack.c.b16 %v1708_v38, %v1705_v34  ;;  %v1500_v38 = vsel %vm1406_vm6, %v1447_v31, 0.0 }
 0x1b4   : > { %v2500_v1 = vadd.f32 %v6087_v52, %v2267_v37  ;;  %v7042_v37 = vld [vmem:[#allocation38_spill] sm:$0xff] }
 0x1b6   : > { %v6200_v50 = vadd.f32 %v6116_v0, %v2500_v1  ;;  %v6212_v52 = vpop.f32.mrf.mxu0  ;;  %v1446_v0 = vrot.slane %v7042_v37, 1  ;;  %v6216_v1 = vpack.c.b16 %v1725_v44, %v1722_v39 }
 0x1b8   : > { %v1448_v34 = vsel %vm1406_vm6, %v1446_v0, %v1447_v31 }
 0x1b9   : > { %v2268_v2 = vpop.f32.mrf.mxu3  ;;  %v6204_v25 = vpop.f32.mrf.mxu1  ;;  %v1556_v44 = vpack.c.bf16 %v1448_v34, %v1448_v34 }
 0x1ba   : > { %v2269_v30 = vadd.f32 %v2268_v2, %v2180_v43  ;;  %v6210_v10 = vpop.f32.mrf.mxu2 }
 0x1bc   : > { %v2502_v7 = vadd.f32 %v6107_v32, %v2269_v30  ;;  %2637 = vmatmul.bf16.gmra.mxu1 %v6091_v5  ;;  %v2183_v32 = vadd.f32 %v6105_v48, %v5865_v4  ;;  %v1558_v30 = vpack.c.bf16 %v1500_v38, %v1500_v38  ;;  %v3936_v4 = vld [vmem:[%s6673_s4 + $0x200] sm:$0xff]  ;;  %v1711_v48 = vunpack.c.l.b16 %v1556_v44 }
 0x1bd   : > { %3120 = vmatpush.bf16.msra.mxu1 %v3936_v4  ;;  %v1450_v44 = vrot.slane %v5594_v22, 1 }
 0x1be   : > { %2310 = vmatmul.bf16.gmra.mxu3 %v6208_v45  ;;  %v6228_v35 = vadd.f32 %v6147_v26, %v2502_v7  ;;  %v6237_v26 = vpop.f32.mrf.mxu0  ;;  %v1714_v31 = vunpack.c.l.b16 %v1558_v30 }
 0x1bf   : > { %2236 = vmatmul.bf16.gmra.mxu2 %v6216_v1 }
 0x1c0   : > { %2558 = vmatmul.bf16.gmra.mxu0 %v5646_v18  ;;  %v6252_v38 = vpack.c.b16 %v1714_v31, %v1711_v48 }
 0x1c1   : > { %v2271_v43 = vpop.f32.mrf.mxu3  ;;  %v2600_v2 = vpop.f32.mrf.mxu1 }
 0x1c2   : > { %v2272_v39 = vadd.f32 %v2271_v43, %v2183_v32  ;;  %v6235_v37 = vpop.f32.mrf.mxu2 }
 0x1c4   : > { %v2505_v0 = vadd.f32 %v6124_v28, %v2272_v39  ;;  %v1449_v39 = vrot.slane %v5585_v29, 1  ;;  %v2188_v29 = vadd.f32 %v6149_v54, %v5896_v14  ;;  %v2190_v14 = vadd.f32 %v6172_v33, %v5929_v16 }
 0x1c6   : > { %v6248_v7 = vadd.f32 %v6166_v12, %v2505_v0  ;;  %v6256_v43 = vpop.f32.mrf.mxu0  ;;  %v1451_v42 = vsel %vm1406_vm6, %v1449_v39, %v1450_v44  ;;  %v1501_v12 = vsel %vm1406_vm6, %v1450_v44, 0.0  ;;  %v7044_v0 = vmov 0  }
 0x1c7   : > { %v1562_v48 = vpack.c.bf16 %v1501_v12, %v1501_v12 }
 0x1c9   : > { %v2273_v57 = vpop.f32.mrf.mxu3  ;;  %v2603_v28 = vpop.f32.mrf.mxu1 }
 0x1ca   : > { %v2274_v34 = vadd.f32 %v2273_v57, %v2185_v59  ;;  %v6254_v32 = vpop.f32.mrf.mxu2 }
 0x1cc   : > { %v2507_v30 = vadd.f32 %v6151_v46, %v2274_v34  ;;  %2642 = vmatmul.bf16.gmra.mxu1 %v6128_v36  ;;  %v1560_v46 = vpack.c.bf16 %v1451_v42, %v1451_v42  ;;  %v1720_v34 = vunpack.c.l.b16 %v1562_v48 }
 0x1ce   : > { %2315 = vmatmul.bf16.gmra.mxu3 %v6252_v38  ;;  %v6264_v63 = vadd.f32 %v6191_v60, %v2507_v30  ;;  %v2521_v59 = vpop.f32.mrf.mxu0  ;;  %v1717_v57 = vunpack.c.l.b16 %v1560_v46 }
 0x1cf   : > { %2661 = vmatmul.bf16.vlgmr.msra.gmra.mxu2 %v7044_v0 }
 0x1d0   : > { %3032 = vmatmul.bf16.vlgmr.msra.gmra.mxu0 %v5675_v11  ;;  %v6280_v42 = vpack.c.b16 %v1720_v34, %v1717_v57  ;;  %v1452_v11 = vrot.slane %v5710_v61, 1 }
 0x1d1   : > { %v2276_v19 = vpop.f32.mrf.mxu3  ;;  %v2605_v22 = vpop.f32.mrf.mxu1 }
 0x1d2   : > { %v2277_v4 = vadd.f32 %v2276_v19, %v2188_v29  ;;  %v6271_v31 = vpop.f32.mrf.mxu2 }
 0x1d4   : > { %v2510_v60 = vadd.f32 %v6174_v6, %v2277_v4  ;;  %v1453_v6 = vrot.slane %v5713_v58, 1  ;;  %v2193_v4 = vadd.f32 %v6193_v62, %v5944_v3 }
 0x1d6   : > { %v6276_v39 = vadd.f32 %v6204_v25, %v2510_v60  ;;  %v2524_v29 = vpop.f32.mrf.mxu0  ;;  %v1454_v16 = vsel %vm1406_vm6, %v1452_v11, %v1453_v6  ;;  %v1502_v33 = vsel %vm1406_vm6, %v1453_v6, 0.0 }
 0x1d7   : > { %v1564_v48 = vpack.c.bf16 %v1454_v16, %v1454_v16 }
 0x1d9   : > { %v2278_v54 = vpop.f32.mrf.mxu3  ;;  %v2608_v44 = vpop.f32.mrf.mxu1  ;;  %v1723_v34 = vunpack.c.l.b16 %v1564_v48 }
 0x1da   : > { %v2279_v30 = vadd.f32 %v2278_v54, %v2190_v14  ;;  %v6282_v12 = vpop.f32.mrf.mxu2 }
 0x1dc   : > { %v2512_v19 = vadd.f32 %v6195_v41, %v2279_v30  ;;  %2647 = vmatmul.bf16.gmra.mxu1 %v6178_v53  ;;  %v1566_v41 = vpack.c.bf16 %v1502_v33, %v1502_v33 }
 0x1de   : > { %2320 = vmatmul.bf16.gmra.mxu3 %v6280_v42  ;;  %v6289_v25 = vadd.f32 %v2600_v2, %v2512_v19  ;;  %v2526_v57 = vpop.f32.mrf.mxu0  ;;  %v1726_v14 = vunpack.c.l.b16 %v1566_v41 }
 0x1df   : > { %2666 = vmatmul.bf16.gmra.mxu2 %v5768_v9  ;;  %v2195_v9 = vadd.f32 %v6210_v10, %v5959_v24  ;;  %v2198_v24 = vadd.f32 %v6235_v37, %v5966_v47  ;;  %v7046_v37 = vld [vmem:[#allocation72_spill] sm:$0xff] }
 0x1e0   : > { %3037 = vmatmul.bf16.gmra.mxu0 %v5740_v51  ;;  %v6302_v11 = vpack.c.b16 %v1726_v14, %v1723_v34  ;;  %v7047_v14 = vld [vmem:[#allocation8_spill] sm:$0xff] }
 0x1e1   : > { %v2281_v61 = vpop.f32.mrf.mxu3  ;;  %v2610_v46 = vpop.f32.mrf.mxu1 }
 0x1e2   : > { %v2282_v58 = vadd.f32 %v2281_v61, %v2193_v4  ;;  %v2207_v60 = vpop.f32.mrf.mxu2 }
 0x1e4   : > { %v2515_v2 = vadd.f32 %v6212_v52, %v2282_v58  ;;  %v7045_v58 = vld [vmem:[#allocation91_spill] sm:$0xff] }
 0x1e6   : > { %v6298_v54 = vadd.f32 %v2603_v28, %v2515_v2  ;;  %v2529_v19 = vpop.f32.mrf.mxu0 }
 0x1e9   : > { %v2283_v30 = vpop.f32.mrf.mxu3  ;;  %v2613_v3 = vpop.f32.mrf.mxu1 }
 0x1ea   : > { %v2284_v62 = vadd.f32 %v2283_v30, %v2195_v9  ;;  %v2209_v6 = vpop.f32.mrf.mxu2 }
 0x1ec   : > { %v2517_v16 = vadd.f32 %v6237_v26, %v2284_v62  ;;  %3121 = vmatmul.bf16.vlgmr.msra.gmra.mxu1 %v5806_v56 }
 0x1ee   : > { %2325 = vmatmul.bf16.gmra.mxu3 %v6302_v11  ;;  %v6307_v51 = vadd.f32 %v2605_v22, %v2517_v16  ;;  %v2531_v4 = vpop.f32.mrf.mxu0  ;;  %v2200_v22 = vadd.f32 %v6254_v32, %v7045_v58 }
 0x1ef   : > { %2671 = vmatmul.bf16.gmra.mxu2 %v5806_v56 }
 0x1f0   : > { %3042 = vmatmul.bf16.gmra.mxu0 %v5772_v17  ;;  %v7048_v17 = vld [vmem:[#allocation50_spill] sm:$0xff] }
 0x1f1   : > { %v2286_v10 = vpop.f32.mrf.mxu3  ;;  %v2615_v52 = vpop.f32.mrf.mxu1 }
 0x1f2   : > { %v2287_v28 = vadd.f32 %v2286_v10, %v2198_v24  ;;  %v2212_v33 = vpop.f32.mrf.mxu2  ;;  %v7049_v24 = vld [vmem:[#allocation65_spill] sm:$0xff] }
 0x1f4   : > { %v2520_v26 = vadd.f32 %v6256_v43, %v2287_v28  ;;  %v2203_v43 = vadd.f32 %v6271_v31, %v7048_v17  ;;  %v7050_v28 = vld [vmem:[#allocation56_spill] sm:$0xff]  ;;  %v7051_v31 = vld [vmem:[#allocation77_spill] sm:$0xff] }
 0x1f6   : > { %v6314_v61 = vadd.f32 %v2608_v44, %v2520_v26  ;;  %v2534_v34 = vpop.f32.mrf.mxu0  ;;  %v2205_v26 = vadd.f32 %v6282_v12, %v7050_v28 }
 0x1f9   : > { %v2288_v48 = vpop.f32.mrf.mxu3  ;;  %v2618_v41 = vpop.f32.mrf.mxu1 }
 0x1fa   : > { %v2289_v56 = vadd.f32 %v2288_v48, %v2200_v22  ;;  %v2214_v2 = vpop.f32.mrf.mxu2 }
 0x1fc   : > { %v2522_v47 = vadd.f32 %v2521_v59, %v2289_v56  ;;  %3126 = vmatmul.bf16.gmra.mxu1 %v7046_v37 }
 0x1fe   : > { %2943 = vmatmul.bf16.vlgmr.msra.gmra.mxu3 %v7047_v14  ;;  %v6320_v9 = vadd.f32 %v2610_v46, %v2522_v47  ;;  %v2536_v16 = vpop.f32.mrf.mxu0 }
 0x1ff   : > { %2676 = vmatmul.bf16.gmra.mxu2 %v7046_v37  ;;  %v7052_v37 = vld [vmem:[#allocation16_spill] sm:$0xff] }
 0x200   : > { %3047 = vmatmul.bf16.gmra.mxu0 %v7049_v24  ;;  %v7055_v24 = vld [vmem:[#allocation18_spill] sm:$0xff] }
 0x201   : > { %v2291_v44 = vpop.f32.mrf.mxu3  ;;  %v2620_v30 = vpop.f32.mrf.mxu1 }
 0x202   : > { %v2292_v32 = vadd.f32 %v2291_v44, %v2203_v43  ;;  %v2217_v62 = vpop.f32.mrf.mxu2 }
 0x204   : > { %v2525_v10 = vadd.f32 %v2524_v29, %v2292_v32  ;;  %v7054_v29 = vld [vmem:[#allocation59_spill] sm:$0xff] }
 0x206   : > { %v6326_v59 = vadd.f32 %v2613_v3, %v2525_v10  ;;  %v2539_v56 = vpop.f32.mrf.mxu0  ;;  %v2208_v3 = vadd.f32 %v2207_v60, %v7054_v29  ;;  %v7059_v60 = vld [vmem:[#allocation21_spill] sm:$0xff] }
 0x209   : > { %v2293_v46 = vpop.f32.mrf.mxu3  ;;  %v2623_v58 = vpop.f32.mrf.mxu1 }
 0x20a   : > { %v2294_v22 = vadd.f32 %v2293_v46, %v2205_v26  ;;  %v2219_v48 = vpop.f32.mrf.mxu2 }
 0x20c   : > { %v2527_v47 = vadd.f32 %v2526_v57, %v2294_v22  ;;  %3131 = vmatmul.bf16.gmra.mxu1 %v7051_v31  ;;  %v7057_v57 = vld [vmem:[#allocation62_spill] sm:$0xff] }
 0x20d   : > { %v2210_v26 = vadd.f32 %v2209_v6, %v7057_v57 }
 0x20e   : > { %2948 = vmatmul.bf16.gmra.mxu3 %v7052_v37  ;;  %v6332_v14 = vadd.f32 %v2615_v52, %v2527_v47  ;;  %v2541_v32 = vpop.f32.mrf.mxu0 }
 0x20f   : > { %2681 = vmatmul.bf16.gmra.mxu2 %v7051_v31 }
 0x210   : > { %7053 = vst [vmem:[#allocation7_spill] sm:$0xff] %v6332_v14  ;;  %3052 = vmatmul.bf16.gmra.mxu0 %v7055_v24  ;;  %v7058_v14 = vld [vmem:[#allocation83_spill] sm:$0xff] }
 0x211   : > { %v2296_v17 = vpop.f32.mrf.mxu3  ;;  %v2625_v43 = vpop.f32.mrf.mxu1 }
 0x212   : > { %v2297_v44 = vadd.f32 %v2296_v17, %v2208_v3  ;;  %v2222_v12 = vpop.f32.mrf.mxu2  ;;  %v7061_v3 = vld [vmem:[#allocation66_spill] sm:$0xff] }
 0x214   : > { %v2530_v10 = vadd.f32 %v2529_v19, %v2297_v44  ;;  %v2213_v19 = vadd.f32 %v2212_v33, %v7061_v3  ;;  %v7066_v33 = vld [vmem:[#allocation32_spill] sm:$0xff] }
 0x216   : > { %v6337_v28 = vadd.f32 %v2618_v41, %v2530_v10  ;;  %v2544_v37 = vpop.f32.mrf.mxu0  ;;  %v7062_v10 = vld [vmem:[#allocation27_spill] sm:$0xff] }
 0x218   : > { %7056 = vst [vmem:[#allocation10_spill] sm:$0xff] %v6337_v28  ;;  %v7065_v28 = vld [vmem:[#allocation87_spill] sm:$0xff] }
 0x219   : > { %v2298_v46 = vpop.f32.mrf.mxu3  ;;  %v2628_v22 = vpop.f32.mrf.mxu1 }
 0x21a   : > { %v2299_v52 = vadd.f32 %v2298_v46, %v2210_v26  ;;  %v2224_v47 = vpop.f32.mrf.mxu2 }
 0x21c   : > { %v2532_v31 = vadd.f32 %v2531_v4, %v2299_v52  ;;  %3136 = vmatmul.bf16.gmra.mxu1 %v7058_v14  ;;  %v7064_v4 = vld [vmem:[#allocation71_spill] sm:$0xff] }
 0x21d   : > { %v2215_v46 = vadd.f32 %v2214_v2, %v7064_v4 }
 0x21e   : > { %2953 = vmatmul.bf16.gmra.mxu3 %v7059_v60  ;;  %v6342_v29 = vadd.f32 %v2620_v30, %v2532_v31  ;;  %v2546_v24 = vpop.f32.mrf.mxu0 }
 0x21f   : > { %2686 = vmatmul.bf16.gmra.mxu2 %v7058_v14 }
 0x220   : > { %7060 = vst [vmem:[#allocation31_spill] sm:$0xff] %v6342_v29  ;;  %3057 = vmatmul.bf16.gmra.mxu0 %v7062_v10 }
 0x221   : > { %v2301_v41 = vpop.f32.mrf.mxu3  ;;  %v2630_v17 = vpop.f32.mrf.mxu1 }
 0x222   : > { %v2302_v44 = vadd.f32 %v2301_v41, %v2213_v19  ;;  %v2227_v6 = vpop.f32.mrf.mxu2  ;;  %v7068_v19 = vld [vmem:[#allocation74_spill] sm:$0xff] }
 0x224   : > { %v2535_v57 = vadd.f32 %v2534_v34, %v2302_v44  ;;  %v2218_v34 = vadd.f32 %v2217_v62, %v7068_v19  ;;  %v7073_v62 = vld [vmem:[#allocation37_spill] sm:$0xff] }
 0x226   : > { %v6347_v26 = vadd.f32 %v2623_v58, %v2535_v57  ;;  %v2549_v29 = vpop.f32.mrf.mxu0  ;;  %v7069_v57 = vld [vmem:[#allocation34_spill] sm:$0xff] }
 0x228   : > { %7063 = vst [vmem:[#allocation33_spill] sm:$0xff] %v6347_v26  ;;  %v7072_v26 = vld [vmem:[#allocation9_spill] sm:$0xff] }
 0x229   : > { %v2303_v52 = vpop.f32.mrf.mxu3  ;;  %v2633_v60 = vpop.f32.mrf.mxu1 }
 0x22a   : > { %v2304_v30 = vadd.f32 %v2303_v52, %v2215_v46  ;;  %v2229_v31 = vpop.f32.mrf.mxu2 }
 0x22c   : > { %v2537_v14 = vadd.f32 %v2536_v16, %v2304_v30  ;;  %3141 = vmatmul.bf16.gmra.mxu1 %v7065_v28  ;;  %v7071_v16 = vld [vmem:[#allocation78_spill] sm:$0xff] }
 0x22d   : > { %v2220_v52 = vadd.f32 %v2219_v48, %v7071_v16 }
 0x22e   : > { %2958 = vmatmul.bf16.gmra.mxu3 %v7066_v33  ;;  %v6352_v3 = vadd.f32 %v2625_v43, %v2537_v14  ;;  %v2551_v10 = vpop.f32.mrf.mxu0 }
 0x22f   : > { %2691 = vmatmul.bf16.gmra.mxu2 %v7065_v28 }
 0x230   : > { %7067 = vst [vmem:[#allocation13_spill] sm:$0xff] %v6352_v3  ;;  %3062 = vmatmul.bf16.gmra.mxu0 %v7069_v57 }
 0x231   : > { %v2306_v58 = vpop.f32.mrf.mxu3  ;;  %v2635_v41 = vpop.f32.mrf.mxu1 }
 0x232   : > { %v2307_v44 = vadd.f32 %v2306_v58, %v2218_v34  ;;  %v2232_v2 = vpop.f32.mrf.mxu2  ;;  %v7075_v34 = vld [vmem:[#allocation80_spill] sm:$0xff] }
 0x234   : > { %v2540_v4 = vadd.f32 %v2539_v56, %v2307_v44  ;;  %v2223_v56 = vadd.f32 %v2222_v12, %v7075_v34  ;;  %v7079_v12 = vld [vmem:[#allocation43_spill] sm:$0xff] }
 0x236   : > { %v6357_v46 = vadd.f32 %v2628_v22, %v2540_v4  ;;  %v2554_v3 = vpop.f32.mrf.mxu0  ;;  %v7076_v4 = vld [vmem:[#allocation88_spill] sm:$0xff] }
 0x238   : > { %7070 = vst [vmem:[#allocation14_spill] sm:$0xff] %v6357_v46  ;;  %v7078_v46 = vld [vmem:[#allocation15_spill] sm:$0xff] }
 0x239   : > { %v2308_v30 = vpop.f32.mrf.mxu3  ;;  %v2638_v33 = vpop.f32.mrf.mxu1 }
 0x23a   : > { %v2309_v43 = vadd.f32 %v2308_v30, %v2220_v52  ;;  %v2234_v14 = vpop.f32.mrf.mxu2 }
 0x23c   : > { %v2542_v28 = vadd.f32 %v2541_v32, %v2309_v43  ;;  %3146 = vmatmul.bf16.gmra.mxu1 %v7072_v26  ;;  %v7077_v32 = vld [vmem:[#allocation85_spill] sm:$0xff] }
 0x23d   : > { %v2225_v30 = vadd.f32 %v2224_v47, %v7077_v32 }
 0x23e   : > { %2963 = vmatmul.bf16.gmra.mxu3 %v7073_v62  ;;  %v6362_v19 = vadd.f32 %v2630_v17, %v2542_v28  ;;  %v2556_v57 = vpop.f32.mrf.mxu0 }
 0x23f   : > { %2696 = vmatmul.bf16.gmra.mxu2 %v7072_v26 }
 0x240   : > { %7074 = vst [vmem:[#allocation40_spill] sm:$0xff] %v6362_v19  ;;  %3067 = vmatmul.bf16.gmra.mxu0 %v7076_v4 }
 0x241   : > { %v2311_v22 = vpop.f32.mrf.mxu3  ;;  %v2640_v58 = vpop.f32.mrf.mxu1 }
 0x242   : > { %v2312_v44 = vadd.f32 %v2311_v22, %v2223_v56  ;;  %v2237_v48 = vpop.f32.mrf.mxu2  ;;  %v7080_v56 = vld [vmem:[#allocation5_spill] sm:$0xff] }
 0x244   : > { %v2545_v16 = vadd.f32 %v2544_v37, %v2312_v44  ;;  %v2228_v37 = vadd.f32 %v2227_v6, %v7080_v56  ;;  %v7082_v6 = vld [vmem:[#allocation3_spill] sm:$0xff] }
 0x245   : > { %v7083_v56 = vld [vmem:[#allocation47_spill] sm:$0xff] }
 0x246   : > { %v6367_v52 = vadd.f32 %v2633_v60, %v2545_v16  ;;  %v2559_v19 = vpop.f32.mrf.mxu0 }
 0x249   : > { %v2313_v43 = vpop.f32.mrf.mxu3  ;;  %v2643_v62 = vpop.f32.mrf.mxu1 }
 0x24a   : > { %v2314_v17 = vadd.f32 %v2313_v43, %v2225_v30  ;;  %v2239_v28 = vpop.f32.mrf.mxu2 }
 0x24c   : > { %v2547_v26 = vadd.f32 %v2546_v24, %v2314_v17  ;;  %3151 = vmatmul.bf16.gmra.mxu1 %v7078_v46  ;;  %v7081_v24 = vld [vmem:[#allocation90_spill] sm:$0xff] }
 0x24d   : > { %v2230_v30 = vadd.f32 %v2229_v31, %v7081_v24 }
 0x24e   : > { %2968 = vmatmul.bf16.gmra.mxu3 %v7079_v12  ;;  %v6372_v34 = vadd.f32 %v2635_v41, %v2547_v26  ;;  %v2561_v47 = vpop.f32.mrf.mxu0 }
 0x24f   : > { %2701 = vmatmul.bf16.gmra.mxu2 %v7078_v46 }
 0x250   : > { %3072 = vmatmul.bf16.gmra.mxu0 %v5978_v13  ;;  %v7084_v13 = vld [vmem:[#allocation11_spill] sm:$0xff] }
 0x251   : > { %v2316_v60 = vpop.f32.mrf.mxu3  ;;  %v2645_v22 = vpop.f32.mrf.mxu1 }
 0x252   : > { %v2317_v44 = vadd.f32 %v2316_v60, %v2228_v37  ;;  %v2662_v4 = vpop.f32.mrf.mxu2 }
 0x254   : > { %v2550_v16 = vadd.f32 %v2549_v29, %v2317_v44  ;;  %v2233_v29 = vadd.f32 %v2232_v2, %v7084_v13  ;;  %v7086_v13 = vld [vmem:[#allocation6_spill] sm:$0xff] }
 0x256   : > { %v6377_v32 = vadd.f32 %v2638_v33, %v2550_v16  ;;  %v3033_v46 = vpop.f32.mrf.mxu0 }
 0x259   : > { %v2318_v43 = vpop.f32.mrf.mxu3  ;;  %v2648_v17 = vpop.f32.mrf.mxu1 }
 0x25a   : > { %v2319_v41 = vadd.f32 %v2318_v43, %v2230_v30  ;;  %v6380_v26 = vpop.f32.mrf.mxu2  ;;  %v7085_v30 = vld [vmem:[#allocation92_spill] sm:$0xff] }
 0x25b   : > { %v2235_v43 = vadd.f32 %v2234_v14, %v7085_v30 }
 0x25c   : > { %v2552_v12 = vadd.f32 %v2551_v10, %v2319_v41  ;;  %3156 = vmatmul.bf16.gmra.mxu1 %v7082_v6 }
 0x25e   : > { %2973 = vmatmul.bf16.gmra.mxu3 %v7083_v56  ;;  %v6384_v37 = vadd.f32 %v2640_v58, %v2552_v12  ;;  %v3035_v16 = vpop.f32.mrf.mxu0 }
 0x25f   : > { %2706 = vmatmul.bf16.gmra.mxu2 %v7082_v6 }
 0x260   : > { %3077 = vmatmul.bf16.gmra.mxu0 %v6018_v15  ;;  %v7087_v15 = vld [vmem:[#allocation17_spill] sm:$0xff] }
 0x261   : > { %v2321_v33 = vpop.f32.mrf.mxu3  ;;  %v2650_v60 = vpop.f32.mrf.mxu1 }
 0x262   : > { %v2322_v31 = vadd.f32 %v2321_v33, %v2233_v29  ;;  %v6388_v44 = vpop.f32.mrf.mxu2 }
 0x264   : > { %v2555_v24 = vadd.f32 %v2554_v3, %v2322_v31  ;;  %v2238_v3 = vadd.f32 %v2237_v48, %v7087_v15  ;;  %v7089_v15 = vld [vmem:[#allocation12_spill] sm:$0xff] }
 0x266   : > { %v6391_v10 = vadd.f32 %v2643_v62, %v2555_v24  ;;  %v3038_v6 = vpop.f32.mrf.mxu0 }
 0x269   : > { %v2323_v41 = vpop.f32.mrf.mxu3  ;;  %v3122_v58 = vpop.f32.mrf.mxu1 }
 0x26a   : > { %v2324_v12 = vadd.f32 %v2323_v41, %v2235_v43  ;;  %v6394_v56 = vpop.f32.mrf.mxu2  ;;  %v7088_v43 = vld [vmem:[#allocation2_spill] sm:$0xff] }
 0x26b   : > { %v2240_v41 = vadd.f32 %v2239_v28, %v7088_v43  ;;  %v7092_v43 = vld [vmem:[#allocation45_spill] sm:$0xff] }
 0x26c   : > { %v2557_v2 = vadd.f32 %v2556_v57, %v2324_v12  ;;  %3161 = vmatmul.bf16.gmra.mxu1 %v6083_v27 }
 0x26e   : > { %2978 = vmatmul.bf16.gmra.mxu3 %v7086_v13  ;;  %v6398_v29 = vadd.f32 %v2645_v22, %v2557_v2  ;;  %v3040_v24 = vpop.f32.mrf.mxu0 }
 0x26f   : > { %2711 = vmatmul.bf16.gmra.mxu2 %v6083_v27 }
 0x270   : > { %3082 = vmatmul.bf16.gmra.mxu0 %v6046_v23 }
 0x271   : > { %v2326_v62 = vpop.f32.mrf.mxu3  ;;  %v3124_v33 = vpop.f32.mrf.mxu1 }
 0x272   : > { %v2327_v14 = vadd.f32 %v2326_v62, %v2238_v3  ;;  %v6402_v31 = vpop.f32.mrf.mxu2 }
 0x274   : > { %v2560_v30 = vadd.f32 %v2559_v19, %v2327_v14  ;;  %v7091_v14 = vld [vmem:[#allocation24_spill] sm:$0xff] }
 0x276   : > { %v6405_v57 = vadd.f32 %v2648_v17, %v2560_v30  ;;  %v6410_v27 = vpop.f32.mrf.mxu0  ;;  %v2663_v30 = vadd.f32 %v2662_v4, %v7091_v14 }
 0x279   : > { %v2328_v12 = vpop.f32.mrf.mxu3  ;;  %v3127_v22 = vpop.f32.mrf.mxu1 }
 0x27a   : > { %v2329_v2 = vadd.f32 %v2328_v12, %v2240_v41  ;;  %v6408_v13 = vpop.f32.mrf.mxu2 }
 0x27c   : > { %v2562_v48 = vadd.f32 %v2561_v47, %v2329_v2  ;;  %3166 = vmatmul.bf16.gmra.mxu1 %v6120_v20  ;;  %v6425_v47 = vld [vmem:[%s6676_s7] ss:$0 sm:$0xff] }
 0x27d   : > { %v453_v41 = vadd.f32 %v6425_v47, %v7092_v43 }
 0x27e   : > { %2983 = vmatmul.bf16.gmra.mxu3 %v7089_v15  ;;  %v6414_v3 = vadd.f32 %v2650_v60, %v2562_v48  ;;  %v6419_v62 = vpop.f32.mrf.mxu0 }
 0x27f   : > { %2716 = vmatmul.bf16.gmra.mxu2 %v6120_v20  ;;  %v6431_v20 = vld [vmem:[%s6674_s5] ss:$0 sm:$0xff] }
 0x280   : > { %7090 = vst [vmem:[#allocation41_spill] sm:$0xff] %v6414_v3  ;;  %3087 = vmatmul.bf16.gmra.mxu0 %v6091_v5 }
 0x281   : > { %v2944_v23 = vpop.f32.mrf.mxu3  ;;  %v3129_v19 = vpop.f32.mrf.mxu1 }
 0x282   : > { %v3034_v28 = vadd.f32 %v3033_v46, %v2944_v23  ;;  %v6417_v17 = vpop.f32.mrf.mxu2  ;;  %v7093_v23 = vld [vmem:[#allocation25_spill] sm:$0xff] }
 0x284   : > { %v3123_v60 = vadd.f32 %v3122_v58, %v3034_v28  ;;  %v2665_v28 = vadd.f32 %v6380_v26, %v7093_v23  ;;  %v7096_v23 = vld [vmem:[#allocation51_spill] sm:$0xff] }
 0x286   : > { %v3202_v46 = vadd.f32 %v3123_v60, %v2663_v30  ;;  %v6444_v15 = vpop.f32.mrf.mxu0  ;;  %v7094_v60 = vld [vmem:[#allocation19_spill] sm:$0xff] }
 0x288   : > { %v3237_v12 = vadd.f32 %v6431_v20, %v3202_v46  ;;  %v7095_v46 = vld [vmem:[#allocation48_spill] sm:$0xff] }
 0x289   : > { %v2946_v5 = vpop.f32.mrf.mxu3  ;;  %v3132_v4 = vpop.f32.mrf.mxu1 }
 0x28a   : > { %v3269_v58 = vadd.f32 %v3237_v12, %v453_v41  ;;  %v3036_v2 = vadd.f32 %v3035_v16, %v2946_v5  ;;  %v6442_v48 = vpop.f32.mrf.mxu2  ;;  %v455_v16 = vadd.f32 %v6425_v47, %v7095_v46 }
 0x28c   : > { %3301 = vst [vmem:[%s6440_s13] sm:$0xff] %v3269_v58  ;;  %v3125_v14 = vadd.f32 %v3124_v33, %v3036_v2  ;;  %3171 = vmatmul.bf16.gmra.mxu1 %v6170_v21  ;;  %v2668_v58 = vadd.f32 %v6388_v44, %v6112_v40 }
 0x28e   : > { %v3203_v30 = vadd.f32 %v3125_v14, %v2665_v28  ;;  %2988 = vmatmul.bf16.gmra.mxu3 %v7094_v60  ;;  %v6457_v33 = vpop.f32.mrf.mxu0  ;;  %v458_v28 = vadd.f32 %v6425_v47, %v7096_v23 }
 0x28f   : > { %2721 = vmatmul.bf16.gmra.mxu2 %v6170_v21 }
 0x290   : > { %v3238_v43 = vadd.f32 %v6431_v20, %v3203_v30  ;;  %3092 = vmatmul.bf16.gmra.mxu0 %v6128_v36  ;;  %v2670_v36 = vadd.f32 %v6394_v56, %v6140_v55 }
 0x291   : > { %v2949_v41 = vpop.f32.mrf.mxu3  ;;  %v3134_v12 = vpop.f32.mrf.mxu1 }
 0x292   : > { %v3270_v5 = vadd.f32 %v3238_v43, %v455_v16  ;;  %v3039_v3 = vadd.f32 %v3038_v6, %v2949_v41  ;;  %v6455_v26 = vpop.f32.mrf.mxu2  ;;  %v7098_v43 = vld [vmem:[#allocation54_spill] sm:$0xff] }
 0x294   : > { %3302 = vst [vmem:[%s6440_s13 + $0x8] sm:$0xff] %v3270_v5  ;;  %v3128_v21 = vadd.f32 %v3127_v22, %v3039_v3  ;;  %v7097_v3 = vld [vmem:[#allocation26_spill] sm:$0xff] }
 0x296   : > { %v3204_v2 = vadd.f32 %v3128_v21, %v2668_v58  ;;  %v6466_v16 = vpop.f32.mrf.mxu0  ;;  %v2673_v21 = vadd.f32 %v6402_v31, %v6162_v49 }
 0x298   : > { %v3239_v14 = vadd.f32 %v6431_v20, %v3204_v2 }
 0x299   : > { %v2951_v30 = vpop.f32.mrf.mxu3  ;;  %v3137_v6 = vpop.f32.mrf.mxu1 }
 0x29a   : > { %v3271_v60 = vadd.f32 %v3239_v14, %v458_v28  ;;  %v3041_v46 = vadd.f32 %v3040_v24, %v2951_v30  ;;  %v6472_v44 = vpop.f32.mrf.mxu2  ;;  %v460_v24 = vadd.f32 %v6425_v47, %v7098_v43  ;;  %v7099_v28 = vld [vmem:[#allocation57_spill] sm:$0xff] }
 0x29b   : > { %v463_v14 = vadd.f32 %v6425_v47, %v7099_v28 }
 0x29c   : > { %3303 = vst [vmem:[%s6440_s13 + $0x10] sm:$0xff] %v3271_v60  ;;  %v3130_v40 = vadd.f32 %v3129_v19, %v3041_v46  ;;  %3176 = vmatmul.bf16.gmra.mxu1 %v6208_v45 }
 0x29e   : > { %v3205_v22 = vadd.f32 %v3130_v40, %v2670_v36  ;;  %2993 = vmatmul.bf16.gmra.mxu3 %v7097_v3  ;;  %v6480_v19 = vpop.f32.mrf.mxu0 }
 0x29f   : > { %2726 = vmatmul.bf16.gmra.mxu2 %v6208_v45 }
 0x2a0   : > { %v3240_v41 = vadd.f32 %v6431_v20, %v3205_v22  ;;  %3097 = vmatmul.bf16.gmra.mxu0 %v6178_v53  ;;  %v2675_v53 = vadd.f32 %v6408_v13, %v6184_v8  ;;  %v7101_v22 = vld [vmem:[#allocation60_spill] sm:$0xff] }
 0x2a1   : > { %v2954_v5 = vpop.f32.mrf.mxu3  ;;  %v3139_v58 = vpop.f32.mrf.mxu1  ;;  %v465_v3 = vadd.f32 %v6425_v47, %v7101_v22 }
 0x2a2   : > { %v3272_v55 = vadd.f32 %v3240_v41, %v460_v24  ;;  %v3044_v56 = vadd.f32 %v6410_v27, %v2954_v5  ;;  %v6486_v23 = vpop.f32.mrf.mxu2 }
 0x2a4   : > { %3304 = vst [vmem:[%s6440_s13 + $0x18] sm:$0xff] %v3272_v55  ;;  %v3133_v45 = vadd.f32 %v3132_v4, %v3044_v56  ;;  %v7100_v4 = vld [vmem:[#allocation35_spill] sm:$0xff] }
 0x2a5   : > { %v7102_v56 = vld [vmem:[#allocation63_spill] sm:$0xff] }
 0x2a6   : > { %v3206_v2 = vadd.f32 %v3133_v45, %v2673_v21  ;;  %v6492_v40 = vpop.f32.mrf.mxu0  ;;  %v468_v21 = vadd.f32 %v6425_v47, %v7102_v56  ;;  %v7106_v56 = vld [vmem:[#allocation20_spill] sm:$0xff] }
 0x2a8   : > { %v3241_v30 = vadd.f32 %v6431_v20, %v3206_v2 }
 0x2a9   : > { %v2956_v60 = vpop.f32.mrf.mxu3  ;;  %v3142_v27 = vpop.f32.mrf.mxu1 }
 0x2aa   : > { %v3273_v46 = vadd.f32 %v3241_v30, %v463_v14  ;;  %v3046_v36 = vadd.f32 %v6419_v62, %v2956_v60  ;;  %v6503_v43 = vpop.f32.mrf.mxu2 }
 0x2ac   : > { %3305 = vst [vmem:[%s6440_s13 + $0x20] sm:$0xff] %v3273_v46  ;;  %v3135_v49 = vadd.f32 %v3134_v12, %v3046_v36  ;;  %3181 = vmatmul.bf16.gmra.mxu1 %v6252_v38  ;;  %v7104_v46 = vld [vmem:[#allocation67_spill] sm:$0xff] }
 0x2ae   : > { %v3207_v31 = vadd.f32 %v3135_v49, %v2675_v53  ;;  %2998 = vmatmul.bf16.gmra.mxu3 %v7100_v4  ;;  %v6506_v12 = vpop.f32.mrf.mxu0 }
 0x2af   : > { %2731 = vmatmul.bf16.gmra.mxu2 %v6252_v38  ;;  %v2678_v38 = vadd.f32 %v6417_v17, %v6200_v50  ;;  %v2680_v50 = vadd.f32 %v6442_v48, %v6228_v35  ;;  %v2683_v48 = vadd.f32 %v6455_v26, %v6248_v7 }
 0x2b0   : > { %v3242_v62 = vadd.f32 %v6431_v20, %v3207_v31  ;;  %3102 = vmatmul.bf16.gmra.mxu0 %v6216_v1 }
 0x2b1   : > { %v2959_v24 = vpop.f32.mrf.mxu3  ;;  %v3144_v41 = vpop.f32.mrf.mxu1 }
 0x2b2   : > { %v3274_v8 = vadd.f32 %v3242_v62, %v465_v3  ;;  %v3049_v13 = vadd.f32 %v6444_v15, %v2959_v24  ;;  %v6516_v30 = vpop.f32.mrf.mxu2  ;;  %v7105_v3 = vld [vmem:[#allocation69_spill] sm:$0xff] }
 0x2b3   : > { %v473_v62 = vadd.f32 %v6425_v47, %v7105_v3 }
 0x2b4   : > { %3306 = vst [vmem:[%s6440_s13 + $0x28] sm:$0xff] %v3274_v8  ;;  %v3138_v5 = vadd.f32 %v3137_v6, %v3049_v13  ;;  %v7103_v6 = vld [vmem:[#allocation42_spill] sm:$0xff] }
 0x2b6   : > { %v3208_v55 = vadd.f32 %v3138_v5, %v2678_v38  ;;  %v6518_v60 = vpop.f32.mrf.mxu0  ;;  %v2685_v5 = vadd.f32 %v6472_v44, %v6264_v63  ;;  %v2688_v44 = vadd.f32 %v6486_v23, %v6276_v39 }
 0x2b8   : > { %v3243_v45 = vadd.f32 %v6431_v20, %v3208_v55 }
 0x2b9   : > { %v2961_v2 = vpop.f32.mrf.mxu3  ;;  %v3147_v28 = vpop.f32.mrf.mxu1 }
 0x2ba   : > { %v3275_v14 = vadd.f32 %v3243_v45, %v468_v21  ;;  %v3051_v15 = vadd.f32 %v6457_v33, %v2961_v2  ;;  %v470_v33 = vadd.f32 %v6425_v47, %v7104_v46  ;;  %v2694_v4 = vpop.f32.mrf.mxu2  ;;  %v475_v21 = vadd.f32 %v6425_v47, %v7106_v56 }
 0x2bc   : > { %3307 = vst [vmem:[%s6440_s13 + $0x30] sm:$0xff] %v3275_v14  ;;  %v3140_v1 = vadd.f32 %v3139_v58, %v3051_v15  ;;  %3186 = vmatmul.bf16.gmra.mxu1 %v6280_v42 }
 0x2be   : > { %v3209_v17 = vadd.f32 %v3140_v1, %v2680_v50  ;;  %3003 = vmatmul.bf16.gmra.mxu3 %v7103_v6 }
 0x2bf   : > { %2736 = vmatmul.bf16.gmra.mxu2 %v6280_v42  ;;  %v3065_v42 = vpop.f32.mrf.mxu0 }
 0x2c0   : > { %v3244_v36 = vadd.f32 %v6431_v20, %v3209_v17  ;;  %3107 = vmatmul.bf16.gmra.mxu0 %v7044_v0 }
 0x2c1   : > { %v2964_v53 = vpop.f32.mrf.mxu3  ;;  %v3149_v49 = vpop.f32.mrf.mxu1 }
 0x2c2   : > { %v3276_v31 = vadd.f32 %v3244_v36, %v470_v33  ;;  %v3054_v35 = vadd.f32 %v6466_v16, %v2964_v53  ;;  %v7109_v53 = vld [vmem:[#allocation28_spill] sm:$0xff] }
 0x2c4   : > { %3308 = vst [vmem:[%s6440_s13 + $0x38] sm:$0xff] %v3276_v31  ;;  %v3143_v58 = vadd.f32 %v3142_v27, %v3054_v35  ;;  %v2697_v27 = vpop.f32.mrf.mxu2  ;;  %v480_v31 = vadd.f32 %v6425_v47, %v7109_v53 }
 0x2c6   : > { %v3210_v22 = vadd.f32 %v3143_v58, %v2683_v48 }
 0x2c7   : > { %v3068_v55 = vpop.f32.mrf.mxu0 }
 0x2c8   : > { %v3245_v24 = vadd.f32 %v6431_v20, %v3210_v22 }
 0x2c9   : > { %v2966_v8 = vpop.f32.mrf.mxu3  ;;  %v3152_v13 = vpop.f32.mrf.mxu1 }
 0x2ca   : > { %v3277_v38 = vadd.f32 %v3245_v24, %v473_v62  ;;  %v3056_v16 = vadd.f32 %v6480_v19, %v2966_v8  ;;  %v7110_v24 = vld [vmem:[#allocation81_spill] sm:$0xff] }
 0x2cb   : > { %v483_v8 = vadd.f32 %v6425_v47, %v7110_v24 }
 0x2cc   : > { %3309 = vst [vmem:[%s6440_s13 + $0x40] sm:$0xff] %v3277_v38  ;;  %v3145_v7 = vadd.f32 %v3144_v41, %v3056_v16  ;;  %3191 = vmatmul.bf16.gmra.mxu1 %v6302_v11  ;;  %v2699_v1 = vpop.f32.mrf.mxu2 }
 0x2ce   : > { %v3211_v26 = vadd.f32 %v3145_v7, %v2685_v5  ;;  %3008 = vmatmul.bf16.gmra.mxu3 %v5646_v18  ;;  %v7107_v18 = vld [vmem:[#allocation75_spill] sm:$0xff] }
 0x2cf   : > { %v478_v15 = vadd.f32 %v6425_v47, %v7107_v18  ;;  %v3070_v17 = vpop.f32.mrf.mxu0  ;;  %v7112_v18 = vld [vmem:[#allocation86_spill] sm:$0xff] }
 0x2d0   : > { %v3246_v45 = vadd.f32 %v6431_v20, %v3211_v26 }
 0x2d1   : > { %v2969_v2 = vpop.f32.mrf.mxu3  ;;  %v3154_v19 = vpop.f32.mrf.mxu1 }
 0x2d2   : > { %v3278_v14 = vadd.f32 %v3246_v45, %v475_v21  ;;  %v3059_v63 = vadd.f32 %v6492_v40, %v2969_v2  ;;  %v2690_v40 = vadd.f32 %v6503_v43, %v6289_v25  ;;  %v2693_v43 = vadd.f32 %v6516_v30, %v6298_v54  ;;  %v7111_v30 = vld [vmem:[#allocation36_spill] sm:$0xff] }
 0x2d4   : > { %3310 = vst [vmem:[%s6440_s13 + $0x48] sm:$0xff] %v3278_v14  ;;  %v3148_v11 = vadd.f32 %v3147_v28, %v3059_v63  ;;  %v7108_v28 = vld [vmem:[#allocation53_spill] sm:$0xff]  ;;  %v2702_v3 = vpop.f32.mrf.mxu2 }
 0x2d6   : > { %v3212_v41 = vadd.f32 %v3148_v11, %v2688_v44 }
 0x2d7   : > { %v3073_v25 = vpop.f32.mrf.mxu0 }
 0x2d8   : > { %v3247_v50 = vadd.f32 %v6431_v20, %v3212_v41 }
 0x2d9   : > { %v2971_v6 = vpop.f32.mrf.mxu3  ;;  %v3157_v46 = vpop.f32.mrf.mxu1 }
 0x2da   : > { %v3279_v33 = vadd.f32 %v3247_v50, %v478_v15  ;;  %v3061_v36 = vadd.f32 %v6506_v12, %v2971_v6 }
 0x2dc   : > { %3311 = vst [vmem:[%s6440_s13 + $0x50] sm:$0xff] %v3279_v33  ;;  %v3150_v39 = vadd.f32 %v3149_v49, %v3061_v36  ;;  %3196 = vmatmul.bf16.gmra.mxu1 %v7044_v0  ;;  %v2704_v21 = vpop.f32.mrf.mxu2 }
 0x2de   : > { %v3213_v23 = vadd.f32 %v3150_v39, %v2690_v40  ;;  %3013 = vmatmul.bf16.gmra.mxu3 %v7108_v28  ;;  %v2700_v40 = vadd.f32 %v2699_v1, %v6320_v9  ;;  %v7114_v1 = vld [vmem:[#allocation44_spill] sm:$0xff] }
 0x2df   : > { %v3075_v45 = vpop.f32.mrf.mxu0 }
 0x2e0   : > { %v3248_v35 = vadd.f32 %v6431_v20, %v3213_v23 }
 0x2e1   : > { %v2974_v48 = vpop.f32.mrf.mxu3  ;;  %v3159_v58 = vpop.f32.mrf.mxu1 }
 0x2e2   : > { %v3280_v12 = vadd.f32 %v3248_v35, %v480_v31  ;;  %v3064_v22 = vadd.f32 %v6518_v60, %v2974_v48  ;;  %v2695_v60 = vadd.f32 %v2694_v4, %v6307_v51 }
 0x2e4   : > { %3312 = vst [vmem:[%s6440_s13 + $0x58] sm:$0xff] %v3280_v12  ;;  %v3153_v49 = vadd.f32 %v3152_v13, %v3064_v22  ;;  %v485_v13 = vadd.f32 %v6425_v47, %v7111_v30  ;;  %v2703_v12 = vadd.f32 %v2702_v3, %v6326_v59  ;;  %v7116_v3 = vld [vmem:[#allocation46_spill] sm:$0xff] }
 0x2e5   : > { %v7117_v30 = vld [vmem:[#allocation10_spill] sm:$0xff] }
 0x2e6   : > { %v3214_v62 = vadd.f32 %v3153_v49, %v2693_v43 }
 0x2e7   : > { %v3078_v41 = vpop.f32.mrf.mxu0 }
 0x2e8   : > { %v3249_v38 = vadd.f32 %v6431_v20, %v3214_v62 }
 0x2e9   : > { %v2976_v16 = vpop.f32.mrf.mxu3  ;;  %v3162_v5 = vpop.f32.mrf.mxu1 }
 0x2ea   : > { %v3281_v7 = vadd.f32 %v3249_v38, %v483_v8  ;;  %v3066_v26 = vadd.f32 %v3065_v42, %v2976_v16  ;;  %v2698_v42 = vadd.f32 %v2697_v27, %v6314_v61  ;;  %v7113_v27 = vld [vmem:[#allocation89_spill] sm:$0xff]  ;;  %v7115_v38 = vld [vmem:[#allocation7_spill] sm:$0xff] }
 0x2eb   : > { %v2705_v16 = vadd.f32 %v2704_v21, %v7115_v38 }
 0x2ec   : > { %3313 = vst [vmem:[%s6440_s13 + $0x60] sm:$0xff] %v3281_v7  ;;  %v3155_v56 = vadd.f32 %v3154_v19, %v3066_v26  ;;  %v2707_v19 = vpop.f32.mrf.mxu2 }
 0x2ee   : > { %v3215_v54 = vadd.f32 %v3155_v56, %v2695_v60  ;;  %3018 = vmatmul.bf16.gmra.mxu3 %v7044_v0  ;;  %v488_v0 = vadd.f32 %v6425_v47, %v7112_v18 }
 0x2ef   : > { %v3080_v53 = vpop.f32.mrf.mxu0 }
 0x2f0   : > { %v3250_v2 = vadd.f32 %v6431_v20, %v3215_v54 }
 0x2f1   : > { %v2979_v14 = vpop.f32.mrf.mxu3  ;;  %v3164_v63 = vpop.f32.mrf.mxu1 }
 0x2f2   : > { %v3282_v44 = vadd.f32 %v3250_v2, %v485_v13  ;;  %v3069_v11 = vadd.f32 %v3068_v55, %v2979_v14  ;;  %v2708_v13 = vadd.f32 %v2707_v19, %v7117_v30 }
 0x2f4   : > { %3314 = vst [vmem:[%s6440_s13 + $0x68] sm:$0xff] %v3282_v44  ;;  %v3158_v51 = vadd.f32 %v3157_v46, %v3069_v11  ;;  %v490_v46 = vadd.f32 %v6425_v47, %v7113_v27  ;;  %v2709_v23 = vpop.f32.mrf.mxu2 }
 0x2f6   : > { %v3216_v4 = vadd.f32 %v3158_v51, %v2698_v42 }
 0x2f7   : > { %v3083_v8 = vpop.f32.mrf.mxu0 }
 0x2f8   : > { %v3251_v15 = vadd.f32 %v6431_v20, %v3216_v4 }
 0x2f9   : > { %v2981_v50 = vpop.f32.mrf.mxu3  ;;  %v3167_v6 = vpop.f32.mrf.mxu1 }
 0x2fa   : > { %v3283_v33 = vadd.f32 %v3251_v15, %v488_v0  ;;  %v3071_v36 = vadd.f32 %v3070_v17, %v2981_v50  ;;  %v7119_v0 = vld [vmem:[#allocation31_spill] sm:$0xff] }
 0x2fb   : > { %v2710_v15 = vadd.f32 %v2709_v23, %v7119_v0 }
 0x2fc   : > { %3315 = vst [vmem:[%s6440_s13 + $0x70] sm:$0xff] %v3283_v33  ;;  %v3160_v55 = vadd.f32 %v3159_v58, %v3071_v36  ;;  %v493_v58 = vadd.f32 %v6425_v47, %v7114_v1  ;;  %v2712_v24 = vpop.f32.mrf.mxu2  ;;  %v7120_v33 = vld [vmem:[#allocation52_spill] sm:$0xff] }
 0x2fd   : > { %v500_v36 = vadd.f32 %v6425_v47, %v7120_v33 }
 0x2fe   : > { %v3217_v61 = vadd.f32 %v3160_v55, %v2700_v40 }
 0x2ff   : > { %v3085_v14 = vpop.f32.mrf.mxu0 }
 0x300   : > { %v3252_v39 = vadd.f32 %v6431_v20, %v3217_v61 }
 0x301   : > { %v2984_v28 = vpop.f32.mrf.mxu3  ;;  %v3169_v48 = vpop.f32.mrf.mxu1 }
 0x302   : > { %v3284_v31 = vadd.f32 %v3252_v39, %v490_v46  ;;  %v3074_v35 = vadd.f32 %v3073_v25, %v2984_v28  ;;  %v7121_v39 = vld [vmem:[#allocation33_spill] sm:$0xff] }
 0x303   : > { %v2713_v28 = vadd.f32 %v2712_v24, %v7121_v39 }
 0x304   : > { %3316 = vst [vmem:[%s6440_s13 + $0x78] sm:$0xff] %v3284_v31  ;;  %v3163_v17 = vadd.f32 %v3162_v5, %v3074_v35  ;;  %v495_v5 = vadd.f32 %v6425_v47, %v7116_v3  ;;  %v2714_v2 = vpop.f32.mrf.mxu2  ;;  %v7122_v31 = vld [vmem:[#allocation55_spill] sm:$0xff] }
 0x305   : > { %v503_v35 = vadd.f32 %v6425_v47, %v7122_v31 }
 0x306   : > { %v3218_v9 = vadd.f32 %v3163_v17, %v2703_v12 }
 0x308   : > { %v3253_v22 = vadd.f32 %v6431_v20, %v3218_v9 }
 0x309   : > { %v2986_v43 = vpop.f32.mrf.mxu3  ;;  %v3172_v7 = vpop.f32.mrf.mxu1 }
 0x30a   : > { %v3285_v49 = vadd.f32 %v3253_v22, %v493_v58  ;;  %v3076_v62 = vadd.f32 %v3075_v45, %v2986_v43  ;;  %v7123_v43 = vld [vmem:[#allocation13_spill] sm:$0xff] }
 0x30c   : > { %3317 = vst [vmem:[%s6440_s13 + $0x80] sm:$0xff] %v3285_v49  ;;  %v3165_v25 = vadd.f32 %v3164_v63, %v3076_v62  ;;  %v7118_v63 = vld [vmem:[#allocation49_spill] sm:$0xff]  ;;  %v2717_v50 = vpop.f32.mrf.mxu2  ;;  %v2715_v49 = vadd.f32 %v2714_v2, %v7123_v43 }
 0x30d   : > { %v498_v11 = vadd.f32 %v6425_v47, %v7118_v63  ;;  %v7127_v63 = vld [vmem:[#allocation40_spill] sm:$0xff] }
 0x30e   : > { %v3219_v59 = vadd.f32 %v3165_v25, %v2705_v16 }
 0x310   : > { %v3254_v26 = vadd.f32 %v6431_v20, %v3219_v59 }
 0x311   : > { %v2989_v60 = vpop.f32.mrf.mxu3  ;;  %v3174_v44 = vpop.f32.mrf.mxu1 }
 0x312   : > { %v3286_v56 = vadd.f32 %v3254_v26, %v495_v5  ;;  %v3079_v54 = vadd.f32 %v3078_v41, %v2989_v60  ;;  %v7125_v26 = vld [vmem:[#allocation14_spill] sm:$0xff] }
 0x313   : > { %v2718_v60 = vadd.f32 %v2717_v50, %v7125_v26 }
 0x314   : > { %3318 = vst [vmem:[%s6440_s13 + $0x88] sm:$0xff] %v3286_v56  ;;  %v3168_v45 = vadd.f32 %v3167_v6, %v3079_v54  ;;  %v3088_v6 = vpop.f32.mrf.mxu0  ;;  %v2719_v12 = vpop.f32.mrf.mxu2 }
 0x316   : > { %v3220_v21 = vadd.f32 %v3168_v45, %v2708_v13  ;;  %v7126_v13 = vld [vmem:[#allocation61_spill] sm:$0xff] }
 0x317   : > { %v508_v45 = vadd.f32 %v6425_v47, %v7126_v13  ;;  %v7132_v13 = vld [vmem:[#allocation76_spill] sm:$0xff] }
 0x318   : > { %v3255_v42 = vadd.f32 %v6431_v20, %v3220_v21 }
 0x319   : > { %v2991_v51 = vpop.f32.mrf.mxu3  ;;  %v3177_v61 = vpop.f32.mrf.mxu1 }
 0x31a   : > { %v3287_v4 = vadd.f32 %v3255_v42, %v498_v11  ;;  %v3081_v18 = vadd.f32 %v3080_v53, %v2991_v51  ;;  %v2720_v11 = vadd.f32 %v2719_v12, %v7127_v63 }
 0x31c   : > { %3319 = vst [vmem:[%s6440_s13 + $0x90] sm:$0xff] %v3287_v4  ;;  %v3170_v41 = vadd.f32 %v3169_v48, %v3081_v18  ;;  %v3090_v9 = vpop.f32.mrf.mxu0  ;;  %v2722_v59 = vpop.f32.mrf.mxu2 }
 0x31e   : > { %v3221_v19 = vadd.f32 %v3170_v41, %v2710_v15  ;;  %v7128_v15 = vld [vmem:[#allocation64_spill] sm:$0xff] }
 0x31f   : > { %v510_v41 = vadd.f32 %v6425_v47, %v7128_v15 }
 0x320   : > { %v3256_v40 = vadd.f32 %v6431_v20, %v3221_v19 }
 0x321   : > { %v2994_v55 = vpop.f32.mrf.mxu3  ;;  %v3179_v22 = vpop.f32.mrf.mxu1 }
 0x322   : > { %v3288_v27 = vadd.f32 %v3256_v40, %v500_v36  ;;  %v3084_v46 = vadd.f32 %v3083_v8, %v2994_v55  ;;  %v7124_v8 = vld [vmem:[#allocation58_spill] sm:$0xff]  ;;  %v2723_v36 = vadd.f32 %v2722_v59, %v6367_v52 }
 0x323   : > { %v505_v38 = vadd.f32 %v6425_v47, %v7124_v8 }
 0x324   : > { %3320 = vst [vmem:[%s6440_s13 + $0x98] sm:$0xff] %v3288_v27  ;;  %v3173_v53 = vadd.f32 %v3172_v7, %v3084_v46  ;;  %v3093_v5 = vpop.f32.mrf.mxu0  ;;  %v2724_v42 = vpop.f32.mrf.mxu2  ;;  %v7129_v46 = vld [vmem:[#allocation68_spill] sm:$0xff] }
 0x325   : > { %v513_v39 = vadd.f32 %v6425_v47, %v7129_v46 }
 0x326   : > { %v3222_v23 = vadd.f32 %v3173_v53, %v2713_v28 }
 0x328   : > { %v3257_v48 = vadd.f32 %v6431_v20, %v3222_v23 }
 0x329   : > { %v2996_v17 = vpop.f32.mrf.mxu3  ;;  %v3182_v54 = vpop.f32.mrf.mxu1 }
 0x32a   : > { %v3289_v1 = vadd.f32 %v3257_v48, %v503_v35  ;;  %v3086_v58 = vadd.f32 %v3085_v14, %v2996_v17  ;;  %v2725_v48 = vadd.f32 %v2724_v42, %v6372_v34  ;;  %v7130_v17 = vld [vmem:[#allocation70_spill] sm:$0xff] }
 0x32c   : > { %3321 = vst [vmem:[%s6440_s13 + $0xa0] sm:$0xff] %v3289_v1  ;;  %v3175_v62 = vadd.f32 %v3174_v44, %v3086_v58  ;;  %v3095_v4 = vpop.f32.mrf.mxu0  ;;  %v2727_v55 = vpop.f32.mrf.mxu2 }
 0x32d   : > { %v2728_v8 = vadd.f32 %v2727_v55, %v6377_v32  ;;  %v7134_v55 = vld [vmem:[#allocation82_spill] sm:$0xff] }
 0x32e   : > { %v3223_v24 = vadd.f32 %v3175_v62, %v2715_v49 }
 0x330   : > { %v3258_v16 = vadd.f32 %v6431_v20, %v3223_v24 }
 0x331   : > { %v2999_v25 = vpop.f32.mrf.mxu3  ;;  %v3184_v0 = vpop.f32.mrf.mxu1 }
 0x332   : > { %v3290_v7 = vadd.f32 %v3258_v16, %v505_v38  ;;  %v3089_v3 = vadd.f32 %v3088_v6, %v2999_v25  ;;  %v7131_v16 = vld [vmem:[#allocation73_spill] sm:$0xff] }
 0x333   : > { %v518_v25 = vadd.f32 %v6425_v47, %v7131_v16 }
 0x334   : > { %3322 = vst [vmem:[%s6440_s13 + $0xa8] sm:$0xff] %v3290_v7  ;;  %v3178_v56 = vadd.f32 %v3177_v61, %v3089_v3  ;;  %v3098_v27 = vpop.f32.mrf.mxu0  ;;  %v2729_v1 = vpop.f32.mrf.mxu2 }
 0x336   : > { %v3224_v30 = vadd.f32 %v3178_v56, %v2718_v60  ;;  %v2730_v56 = vadd.f32 %v2729_v1, %v6384_v37 }
 0x338   : > { %v3259_v2 = vadd.f32 %v6431_v20, %v3224_v30 }
 0x339   : > { %v3001_v14 = vpop.f32.mrf.mxu3  ;;  %v3187_v23 = vpop.f32.mrf.mxu1 }
 0x33a   : > { %v3291_v21 = vadd.f32 %v3259_v2, %v508_v45  ;;  %v3091_v44 = vadd.f32 %v3090_v9, %v3001_v14  ;;  %v515_v9 = vadd.f32 %v6425_v47, %v7130_v17  ;;  %v520_v45 = vadd.f32 %v6425_v47, %v7132_v13 }
 0x33c   : > { %3323 = vst [vmem:[%s6440_s13 + $0xb0] sm:$0xff] %v3291_v21  ;;  %v3180_v51 = vadd.f32 %v3179_v22, %v3091_v44  ;;  %v3100_v43 = vpop.f32.mrf.mxu0  ;;  %v2732_v3 = vpop.f32.mrf.mxu2 }
 0x33d   : > { %v2733_v63 = vadd.f32 %v2732_v3, %v6391_v10 }
 0x33e   : > { %v3225_v18 = vadd.f32 %v3180_v51, %v2720_v11 }
 0x340   : > { %v3260_v19 = vadd.f32 %v6431_v20, %v3225_v18  ;;  %v7133_v18 = vld [vmem:[#allocation79_spill] sm:$0xff] }
 0x341   : > { %v3004_v50 = vpop.f32.mrf.mxu3  ;;  %v3189_v24 = vpop.f32.mrf.mxu1 }
 0x342   : > { %v3292_v6 = vadd.f32 %v3260_v19, %v510_v41  ;;  %v3094_v33 = vadd.f32 %v3093_v5, %v3004_v50 }
 0x344   : > { %3324 = vst [vmem:[%s6440_s13 + $0xb8] sm:$0xff] %v3292_v6  ;;  %v3183_v40 = vadd.f32 %v3182_v54, %v3094_v33  ;;  %v3103_v60 = vpop.f32.mrf.mxu0  ;;  %v2734_v11 = vpop.f32.mrf.mxu2 }
 0x345   : > { %v2735_v6 = vadd.f32 %v2734_v11, %v6398_v29 }
 0x346   : > { %v3226_v61 = vadd.f32 %v3183_v40, %v2723_v36 }
 0x348   : > { %v3261_v28 = vadd.f32 %v6431_v20, %v3226_v61  ;;  %v525_v61 = vadd.f32 %v6425_v47, %v7134_v55 }
 0x349   : > { %v3006_v53 = vpop.f32.mrf.mxu3  ;;  %v3192_v30 = vpop.f32.mrf.mxu1 }
 0x34a   : > { %v3293_v31 = vadd.f32 %v3261_v28, %v513_v39  ;;  %v3096_v35 = vadd.f32 %v3095_v4, %v3006_v53 }
 0x34c   : > { %3325 = vst [vmem:[%s6440_s13 + $0xc0] sm:$0xff] %v3293_v31  ;;  %v3185_v12 = vadd.f32 %v3184_v0, %v3096_v35  ;;  %v3105_v51 = vpop.f32.mrf.mxu0  ;;  %v523_v0 = vadd.f32 %v6425_v47, %v7133_v18  ;;  %v2737_v10 = vpop.f32.mrf.mxu2  ;;  %v7135_v35 = vld [vmem:[#allocation84_spill] sm:$0xff] }
 0x34e   : > { %v3227_v52 = vadd.f32 %v3185_v12, %v2725_v48  ;;  %v528_v48 = vadd.f32 %v6425_v47, %v7135_v35 }
 0x350   : > { %v3262_v58 = vadd.f32 %v6431_v20, %v3227_v52 }
 0x351   : > { %v3009_v22 = vpop.f32.mrf.mxu3  ;;  %v3194_v4 = vpop.f32.mrf.mxu1 }
 0x352   : > { %v3294_v49 = vadd.f32 %v3262_v58, %v515_v9  ;;  %v3099_v62 = vadd.f32 %v3098_v27, %v3009_v22 }
 0x354   : > { %3326 = vst [vmem:[%s6440_s13 + $0xc8] sm:$0xff] %v3294_v49  ;;  %v3188_v38 = vadd.f32 %v3187_v23, %v3099_v62  ;;  %v3108_v40 = vpop.f32.mrf.mxu0  ;;  %v2738_v23 = vadd.f32 %v2737_v10, %v6405_v57  ;;  %v2739_v12 = vpop.f32.mrf.mxu2 }
 0x356   : > { %v3228_v34 = vadd.f32 %v3188_v38, %v2728_v8 }
 0x358   : > { %v3263_v7 = vadd.f32 %v6431_v20, %v3228_v34 }
 0x359   : > { %v3011_v59 = vpop.f32.mrf.mxu3  ;;  %v3197_v46 = vpop.f32.mrf.mxu1 }
 0x35a   : > { %v3295_v5 = vadd.f32 %v3263_v7, %v518_v25  ;;  %v3101_v26 = vadd.f32 %v3100_v43, %v3011_v59  ;;  %v7136_v43 = vld [vmem:[#allocation41_spill] sm:$0xff] }
 0x35b   : > { %v2740_v49 = vadd.f32 %v2739_v12, %v7136_v43 }
 0x35c   : > { %3327 = vst [vmem:[%s6440_s13 + $0xd0] sm:$0xff] %v3295_v5  ;;  %v3190_v54 = vadd.f32 %v3189_v24, %v3101_v26  ;;  %v3110_v17 = vpop.f32.mrf.mxu0  ;;  %v7137_v24 = vld [vmem:[#allocation4_spill] sm:$0xff] }
 0x35d   : > { %v530_v8 = vadd.f32 %v6425_v47, %v7137_v24 }
 0x35e   : > { %v3229_v32 = vadd.f32 %v3190_v54, %v2730_v56 }
 0x360   : > { %v3264_v2 = vadd.f32 %v6431_v20, %v3229_v32 }
 0x361   : > { %v3014_v14 = vpop.f32.mrf.mxu3  ;;  %v3199_v22 = vpop.f32.mrf.mxu1 }
 0x362   : > { %v3296_v21 = vadd.f32 %v3264_v2, %v520_v45  ;;  %v3104_v44 = vadd.f32 %v3103_v60, %v3014_v14 }
 0x364   : > { %3328 = vst [vmem:[%s6440_s13 + $0xd8] sm:$0xff] %v3296_v21  ;;  %v3193_v42 = vadd.f32 %v3192_v30, %v3104_v44 }
 0x366   : > { %v3230_v37 = vadd.f32 %v3193_v42, %v2733_v63 }
 0x368   : > { %v3265_v15 = vadd.f32 %v6431_v20, %v3230_v37 }
 0x369   : > { %v3016_v41 = vpop.f32.mrf.mxu3 }
 0x36a   : > { %v3297_v19 = vadd.f32 %v3265_v15, %v523_v0  ;;  %v3106_v50 = vadd.f32 %v3105_v51, %v3016_v41 }
 0x36c   : > { %3329 = vst [vmem:[%s6440_s13 + $0xe0] sm:$0xff] %v3297_v19  ;;  %v3195_v33 = vadd.f32 %v3194_v4, %v3106_v50 }
 0x36e   : > { %v3231_v36 = vadd.f32 %v3195_v33, %v2735_v6 }
 0x370   : > { %v3266_v27 = vadd.f32 %v6431_v20, %v3231_v36 }
 0x371   : > { %v3019_v39 = vpop.f32.mrf.mxu3 }
 0x372   : > { %v3298_v28 = vadd.f32 %v3266_v27, %v525_v61  ;;  %v3109_v53 = vadd.f32 %v3108_v40, %v3019_v39 }
 0x374   : > { %3330 = vst [vmem:[%s6440_s13 + $0xe8] sm:$0xff] %v3298_v28  ;;  %v3198_v31 = vadd.f32 %v3197_v46, %v3109_v53 }
 0x376   : > { %v3232_v29 = vadd.f32 %v3198_v31, %v2738_v23 }
 0x378   : > { %v3267_v52 = vadd.f32 %v6431_v20, %v3232_v29 }
 0x379   : > { %v3021_v9 = vpop.f32.mrf.mxu3 }
 0x37a   : > { %v3299_v1 = vadd.f32 %v3267_v52, %v528_v48  ;;  %v3111_v58 = vadd.f32 %v3110_v17, %v3021_v9 }
 0x37c   : > { %3331 = vst [vmem:[%s6440_s13 + $0xf0] sm:$0xff] %v3299_v1  ;;  %v3200_v62 = vadd.f32 %v3199_v22, %v3111_v58 }
 0x37e   : > { %v3233_v57 = vadd.f32 %v3200_v62, %v2740_v49 }
 0x380   : > { %v3268_v38 = vadd.f32 %v6431_v20, %v3233_v57 }
 0x382   : > { %v3300_v34 = vadd.f32 %v3268_v38, %v530_v8 }
 0x384   : > { %3332 = vst [vmem:[%s6440_s13 + $0xf8] sm:$0xff] %v3300_v34 }
 0x385 PF: > { %s18_s27 = sadd.s32 1, %s4109_s27  }
 0x386   : > { %p15_p4 = scmp.ge.s32.totalorder %s18_s27, 4  }
 0x388   :  { %17 = sbr.rel (!%p15_p4) target bundleno = 1 (0x1), region = 87 }

</bundles_post_ra>
